<compile_context>
chip_gen: v7x
topology: tpu7x:2x2x1
jax: 0.10.0
libtpu: 0.0.40
codegen_flags: <defaults>
</compile_context>

<pallas_src>
import jax
import jax.numpy as jnp
from jax import lax
from jax.experimental import pallas as pl
from jax.experimental.pallas import tpu as pltpu

EPS = 1e-5  # nn.InstanceNorm2d default eps


def _shift_rows_up(x, k):
    """out[r] = x[(r + k) % n] along axis 0 (sublanes) — XLU rotation, no vst-slot copy."""
    if k == 0:
        return x
    n = x.shape[0]
    return pltpu.roll(x, n - k, axis=0)


def _fill_reflect_edges(xp_ref, H, W):
    """Fill the 1-pixel reflection border of the padded scratch (interior already stored).

    Rows first, then columns, so corners match nn.ReflectionPad2d(1).
    """
    xp_ref[0:1, :, :] = xp_ref[2:3, :, :]                # top pad row    <- image row 1
    xp_ref[H + 1:H + 2, :, :] = xp_ref[H - 1:H, :, :]    # bottom pad row <- image row H-2
    xp_ref[:, 0:1, :] = xp_ref[:, 2:3, :]                # left pad col   <- image col 1
    xp_ref[:, W + 1:W + 2, :] = xp_ref[:, W - 1:W, :]    # right pad col  <- image col W-2


def _conv3x3_instancenorm(xp_ref, w_ref, valid_mask, H, W, C, Pp, relu):
    """3x3 conv (nine MXU matmuls on aligned slabs) + one-pass InstanceNorm (+ optional ReLU).

    xp_ref: (H+2, Pp, C) f32 padded scratch (Pp = padded width rounded up to 8).
    w_ref:  (9, Cin, Cout) bf16 VMEM weights, tap order kh*3+kw.
    valid_mask: (H*Pp, 1) f32, 1.0 on rows whose W-position is a real output column.
    Returns (H*Pp, C) f32 in padded-row layout; rows h*Pp + w with w < W are valid.
    """
    HP = H * Pp
    total = (H + 2) * Pp

    xf = xp_ref[...].reshape(total, C)                   # free reshape: Pp % 8 == 0
    # Two XLU rotations give the kw = 1, 2 shifts of the whole slab; slabs below are then
    # static, 8-aligned row slices (views), not relayout copies.
    shifted = [_shift_rows_up(xf, kw) for kw in range(3)]

    acc = None
    for kh in range(3):
        base = kh * Pp                                   # multiple of 8 -> aligned slice
        for kw in range(3):
            slab = shifted[kw][base:base + HP, :]        # (HP, Cin) f32 view
            part = jnp.dot(slab.astype(jnp.bfloat16),    # bf16 MXU operands, f32 accumulate
                           w_ref[kh * 3 + kw],
                           preferred_element_type=jnp.float32)
            acc = part if acc is None else acc + part    # (HP, Cout) f32

    # One-pass InstanceNorm2d(affine=False) stats over the valid H*W positions only.
    masked = acc * valid_mask
    inv_n = 1.0 / (H * W)
    mean = jnp.sum(masked, axis=0, keepdims=True) * inv_n          # (1, Cout)
    ex2 = jnp.sum(masked * acc, axis=0, keepdims=True) * inv_n     # E[x^2], mask^2 == mask
    var = ex2 - mean * mean
    y = (acc - mean) * lax.rsqrt(var + EPS)                        # rsqrt -> EUP slot
    if relu:
        y = jnp.maximum(y, 0.0)
    return y


def resnet_block_kernel(x_ref, w1_ref, w2_ref, mask_ref, o_ref, xp_ref):
    # x_ref / o_ref: (1, H, W, C) f32 blocks (one batch element per grid step).
    # xp_ref: (H+2, Pp, C) f32 padded scratch reused by both conv stages.
    _, H, W, C = x_ref.shape
    Pp = xp_ref.shape[1]
    valid_mask = mask_ref[...]                           # (H*Pp, 1) f32

    # ---- stage 1: build padded input in the scratch -------------------------------------
    if Pp > W + 2:                                       # keep the alignment columns finite
        xp_ref[:, W + 2:Pp, :] = jnp.zeros((H + 2, Pp - W - 2, C), jnp.float32)
    xp_ref[1:H + 1, 1:W + 1, :] = x_ref[0]
    _fill_reflect_edges(xp_ref, H, W)

    h = _conv3x3_instancenorm(xp_ref, w1_ref, valid_mask, H, W, C, Pp, relu=True)

    # ---- stage 2: write h straight into the interior of the reused padded scratch -------
    # Rolling by +1 row makes the interior store a single tile-aligned full-width store
    # (rows 1..H); the pad columns it clobbers are rebuilt by the edge fix-up below.
    xp_ref[1:H + 1, :, :] = pltpu.roll(h, 1, axis=0).reshape(H, Pp, C)
    _fill_reflect_edges(xp_ref, H, W)

    y = _conv3x3_instancenorm(xp_ref, w2_ref, valid_mask, H, W, C, Pp, relu=False)

    # Residual add on the valid columns only (8-aligned slice when W % 8 == 0).
    o_ref[0] = x_ref[0] + y.reshape(H, Pp, C)[:, 0:W, :]


def resnet_block_forward(x, w1, b1, w2, b2):
    """x: (N, C, H, W) f32; w*: (C, C, 3, 3) OIHW; b*: (C,). Returns (N, C, H, W) f32.

    b1/b2 are accepted for parity with the PyTorch module but unused: under
    InstanceNorm2d(affine=False) a per-channel conv bias is exactly removed by the
    per-channel mean subtraction, so the kernel skips both bias passes.
    """
    del b1, b2
    N, C, H, W = x.shape
    Pp = ((W + 2 + 7) // 8) * 8          # padded width rounded up for aligned slab slices

    # Channels-last so the conv maps onto MXU matmuls (M = H*Pp rows, K = Cin, N = Cout).
    # TODO(synk): keep activations NHWC across the surrounding model to drop these transposes.
    x_nhwc = jnp.transpose(x, (0, 2, 3, 1)).astype(jnp.float32)       # (N, H, W, C)
    # Weights as (kh*3+kw, Cin, Cout) bf16 — precompute once outside if weights are static.
    w1r = jnp.transpose(w1, (2, 3, 1, 0)).reshape(9, C, C).astype(jnp.bfloat16)
    w2r = jnp.transpose(w2, (2, 3, 1, 0)).reshape(9, C, C).astype(jnp.bfloat16)
    # Valid-column mask for the padded-row layout used inside the kernel.
    maskf = ((jnp.arange(H * Pp) % Pp) < W).astype(jnp.float32).reshape(H * Pp, 1)

    act_spec = pl.BlockSpec((1, H, W, C), lambda n: (n, 0, 0, 0))
    w_spec = pl.BlockSpec((9, C, C), lambda n: (0, 0, 0))
    mask_spec = pl.BlockSpec((H * Pp, 1), lambda n: (0, 0))

    flops = 2 * (2 * N * H * W * C * C * 9)                            # two 3x3 convs
    bytes_accessed = 4 * 2 * x.size + 2 * (w1r.size + w2r.size) + 4 * maskf.size

    out_nhwc = pl.pallas_call(
        resnet_block_kernel,
        out_shape=jax.ShapeDtypeStruct((N, H, W, C), jnp.float32),
        grid=(N,),
        in_specs=[act_spec, w_spec, w_spec, mask_spec],
        out_specs=act_spec,
        scratch_shapes=[pltpu.VMEM((H + 2, Pp, C), jnp.float32)],
        compiler_params=pltpu.CompilerParams(
            dimension_semantics=("parallel",),
            # Above the 16/32 MiB scoped defaults, below v7x's 64 MiB physical VMEM.
            vmem_limit_bytes=48 * 1024 * 1024),
        cost_estimate=pl.CostEstimate(
            flops=flops,
            transcendentals=2 * N * C,
            bytes_accessed=bytes_accessed),
    )(x_nhwc, w1r, w2r, maskf)

    return jnp.transpose(out_nhwc, (0, 3, 1, 2))                       # back to NCHW


def resnet_block_reference(x, w1, b1, w2, b2):
    """Pure-JAX f32 reference mirroring the PyTorch module (bias applied; IN cancels it)."""
    def conv(z, w, b):
        zp = jnp.pad(z, ((0, 0), (0, 0), (1, 1), (1, 1)), mode="reflect")
        y = lax.conv_general_dilated(
            zp, w, window_strides=(1, 1), padding="VALID",
            dimension_numbers=("NCHW", "OIHW", "NCHW"))
        return y + b[None, :, None, None]

    def inorm(z):
        m = jnp.mean(z, axis=(2, 3), keepdims=True)
        v = jnp.mean((z - m) ** 2, axis=(2, 3), keepdims=True)
        return (z - m) / jnp.sqrt(v + EPS)

    h = jax.nn.relu(inorm(conv(x, w1, b1)))
    return x + inorm(conv(h, w2, b2))


if __name__ == "__main__":
    N, C, H, W = 2, 4, 16, 16  # dim = 4
    key = jax.random.PRNGKey(0)
    kx, kw1, kb1, kw2, kb2 = jax.random.split(key, 5)

    x = jax.random.normal(kx, (N, C, H, W), dtype=jnp.float32)
    # Deterministic synthetic parameters (CycleGAN-style N(0, 0.02) init).
    w1 = jax.random.normal(kw1, (C, C, 3, 3), dtype=jnp.float32) * 0.02
    b1 = jax.random.normal(kb1, (C,), dtype=jnp.float32) * 0.02
    w2 = jax.random.normal(kw2, (C, C, 3, 3), dtype=jnp.float32) * 0.02
    b2 = jax.random.normal(kb2, (C,), dtype=jnp.float32) * 0.02

    out = jax.block_until_ready(resnet_block_forward(x, w1, b1, w2, b2))
    ref = jax.block_until_ready(resnet_block_reference(x, w1, b1, w2, b2))

    assert out.shape == (N, C, H, W) and out.dtype == jnp.float32
    # Tolerance sized for bf16 MXU operands (~2^-9 relative rounding across two conv+IN
    # stages); structural bugs (padding / tap / norm / residual) are O(1) and still trip it.
    assert jnp.allclose(out, ref, atol=6e-2, rtol=6e-2), float(jnp.max(jnp.abs(out - ref)))

    print("KERNEL_OK")
</pallas_src>

<mosaic_0001>
module attributes {stable_mosaic.version = 11 : i64} {
  func.func @resnet_block_kernel(%arg0: i32, %arg1: memref<1x16x16x4xf32, #tpu.memory_space<vmem>>, %arg2: memref<9x4x4xbf16, #tpu.memory_space<vmem>>, %arg3: memref<9x4x4xbf16, #tpu.memory_space<vmem>>, %arg4: memref<384x1xf32, #tpu.memory_space<vmem>>, %arg5: memref<1x16x16x4xf32, #tpu.memory_space<vmem>>, %arg6: memref<18x24x4xf32, #tpu.memory_space<vmem>>) attributes {dimension_semantics = [#tpu.dimension_semantics<parallel>], iteration_bounds = array<i64: 2>, scalar_prefetch = 0 : i64, scratch_operands = 1 : i64, tpu.core_type = #tpu.core_type<tc>, window_params = [{transform_indices = @transform_0, window_bounds = array<i64: 1, 16, 16, 4>}, {pipeline_mode = #tpu.pipeline_mode<synchronous>, transform_indices = @transform_1, window_bounds = array<i64: 9, 4, 4>}, {pipeline_mode = #tpu.pipeline_mode<synchronous>, transform_indices = @transform_2, window_bounds = array<i64: 9, 4, 4>}, {pipeline_mode = #tpu.pipeline_mode<synchronous>, transform_indices = @transform_3, window_bounds = array<i64: 384, 1>}, {transform_indices = @transform_4, window_bounds = array<i64: 1, 16, 16, 4>}]} {
    %c0 = arith.constant 0 : index
    %c0_0 = arith.constant 0 : index
    %0 = vector.load %arg4[%c0, %c0_0] : memref<384x1xf32, #tpu.memory_space<vmem>>, vector<384x1xf32>
    %cst = arith.constant 0.000000e+00 : f32
    %1 = vector.broadcast %cst : f32 to vector<18x6x4xf32>
    %c0_1 = arith.constant 0 : index
    %c18 = arith.constant 18 : index
    %c0_2 = arith.constant 0 : index
    %2 = vector.load %arg6[%c0_1, %c18, %c0_2] : memref<18x24x4xf32, #tpu.memory_space<vmem>>, vector<18x6x4xf32>
    tpu.vector_store %arg6[%c0_1, %c18, %c0_2], %1 {strides = array<i32>} : memref<18x24x4xf32, #tpu.memory_space<vmem>>, vector<18x6x4xf32>,
    %c0_3 = arith.constant 0 : index
    %c0_4 = arith.constant 0 : index
    %c0_5 = arith.constant 0 : index
    %c0_6 = arith.constant 0 : index
    %3 = vector.load %arg1[%c0_3, %c0_4, %c0_5, %c0_6] : memref<1x16x16x4xf32, #tpu.memory_space<vmem>>, vector<1x16x16x4xf32>
    %4 = vector.shape_cast %3 : vector<1x16x16x4xf32> to vector<16x16x4xf32>
    %c1 = arith.constant 1 : index
    %c1_7 = arith.constant 1 : index
    %c0_8 = arith.constant 0 : index
    %5 = vector.load %arg6[%c1, %c1_7, %c0_8] : memref<18x24x4xf32, #tpu.memory_space<vmem>>, vector<16x16x4xf32>
    tpu.vector_store %arg6[%c1, %c1_7, %c0_8], %4 {strides = array<i32>} : memref<18x24x4xf32, #tpu.memory_space<vmem>>, vector<16x16x4xf32>,
    %c2 = arith.constant 2 : index
    %c0_9 = arith.constant 0 : index
    %c0_10 = arith.constant 0 : index
    %6 = vector.load %arg6[%c2, %c0_9, %c0_10] : memref<18x24x4xf32, #tpu.memory_space<vmem>>, vector<1x24x4xf32>
    %c0_11 = arith.constant 0 : index
    %c0_12 = arith.constant 0 : index
    %c0_13 = arith.constant 0 : index
    %7 = vector.load %arg6[%c0_11, %c0_12, %c0_13] : memref<18x24x4xf32, #tpu.memory_space<vmem>>, vector<1x24x4xf32>
    tpu.vector_store %arg6[%c0_11, %c0_12, %c0_13], %6 {strides = array<i32>} : memref<18x24x4xf32, #tpu.memory_space<vmem>>, vector<1x24x4xf32>,
    %c15 = arith.constant 15 : index
    %c0_14 = arith.constant 0 : index
    %c0_15 = arith.constant 0 : index
    %8 = vector.load %arg6[%c15, %c0_14, %c0_15] : memref<18x24x4xf32, #tpu.memory_space<vmem>>, vector<1x24x4xf32>
    %c17 = arith.constant 17 : index
    %c0_16 = arith.constant 0 : index
    %c0_17 = arith.constant 0 : index
    %9 = vector.load %arg6[%c17, %c0_16, %c0_17] : memref<18x24x4xf32, #tpu.memory_space<vmem>>, vector<1x24x4xf32>
    tpu.vector_store %arg6[%c17, %c0_16, %c0_17], %8 {strides = array<i32>} : memref<18x24x4xf32, #tpu.memory_space<vmem>>, vector<1x24x4xf32>,
    %c0_18 = arith.constant 0 : index
    %c2_19 = arith.constant 2 : index
    %c0_20 = arith.constant 0 : index
    %10 = vector.load %arg6[%c0_18, %c2_19, %c0_20] : memref<18x24x4xf32, #tpu.memory_space<vmem>>, vector<18x1x4xf32>
    %c0_21 = arith.constant 0 : index
    %c0_22 = arith.constant 0 : index
    %c0_23 = arith.constant 0 : index
    %11 = vector.load %arg6[%c0_21, %c0_22, %c0_23] : memref<18x24x4xf32, #tpu.memory_space<vmem>>, vector<18x1x4xf32>
    tpu.vector_store %arg6[%c0_21, %c0_22, %c0_23], %10 {strides = array<i32>} : memref<18x24x4xf32, #tpu.memory_space<vmem>>, vector<18x1x4xf32>,
    %c0_24 = arith.constant 0 : index
    %c15_25 = arith.constant 15 : index
    %c0_26 = arith.constant 0 : index
    %12 = vector.load %arg6[%c0_24, %c15_25, %c0_26] : memref<18x24x4xf32, #tpu.memory_space<vmem>>, vector<18x1x4xf32>
    %c0_27 = arith.constant 0 : index
    %c17_28 = arith.constant 17 : index
    %c0_29 = arith.constant 0 : index
    %13 = vector.load %arg6[%c0_27, %c17_28, %c0_29] : memref<18x24x4xf32, #tpu.memory_space<vmem>>, vector<18x1x4xf32>
    tpu.vector_store %arg6[%c0_27, %c17_28, %c0_29], %12 {strides = array<i32>} : memref<18x24x4xf32, #tpu.memory_space<vmem>>, vector<18x1x4xf32>,
    %c0_30 = arith.constant 0 : index
    %c0_31 = arith.constant 0 : index
    %c0_32 = arith.constant 0 : index
    %14 = vector.load %arg6[%c0_30, %c0_31, %c0_32] : memref<18x24x4xf32, #tpu.memory_space<vmem>>, vector<18x24x4xf32>
    %15 = vector.shape_cast %14 : vector<18x24x4xf32> to vector<432x4xf32>
    %c431_i32 = arith.constant 431 : i32
    %16 = tpu.dynamic_rotate %15 by %c431_i32 dim 0 : vector<432x4xf32>, i32 -> vector<432x4xf32>
    %c430_i32 = arith.constant 430 : i32
    %17 = tpu.dynamic_rotate %15 by %c430_i32 dim 0 : vector<432x4xf32>, i32 -> vector<432x4xf32>
    %18 = vector.extract_strided_slice %15 {offsets = [0, 0], sizes = [384, 4], strides = [1, 1]} : vector<432x4xf32> to vector<384x4xf32>
    %19 = arith.truncf %18 : vector<384x4xf32> to vector<384x4xbf16>
    %c0_33 = arith.constant 0 : index
    %c0_34 = arith.constant 0 : index
    %c0_35 = arith.constant 0 : index
    %20 = vector.load %arg2[%c0_33, %c0_34, %c0_35] : memref<9x4x4xbf16, #tpu.memory_space<vmem>>, vector<1x4x4xbf16>
    %21 = vector.shape_cast %20 : vector<1x4x4xbf16> to vector<4x4xbf16>
    %cst_36 = arith.constant dense<0.000000e+00> : vector<384x4xf32>
    %22 = tpu.matmul %19, %21, %cst_36 {dimension_numbers = #tpu.dot_dimension_numbers<[1], [0], [0], [1], [0, 0, 1, 1], [], []>} : vector<384x4xbf16>, vector<4x4xbf16>, vector<384x4xf32> -> vector<384x4xf32>
    %23 = vector.extract_strided_slice %16 {offsets = [0, 0], sizes = [384, 4], strides = [1, 1]} : vector<432x4xf32> to vector<384x4xf32>
    %24 = arith.truncf %23 : vector<384x4xf32> to vector<384x4xbf16>
    %c1_37 = arith.constant 1 : index
    %c0_38 = arith.constant 0 : index
    %c0_39 = arith.constant 0 : index
    %25 = vector.load %arg2[%c1_37, %c0_38, %c0_39] : memref<9x4x4xbf16, #tpu.memory_space<vmem>>, vector<1x4x4xbf16>
    %26 = vector.shape_cast %25 : vector<1x4x4xbf16> to vector<4x4xbf16>
    %cst_40 = arith.constant dense<0.000000e+00> : vector<384x4xf32>
    %27 = tpu.matmul %24, %26, %cst_40 {dimension_numbers = #tpu.dot_dimension_numbers<[1], [0], [0], [1], [0, 0, 1, 1], [], []>} : vector<384x4xbf16>, vector<4x4xbf16>, vector<384x4xf32> -> vector<384x4xf32>
    %28 = arith.addf %22, %27 : vector<384x4xf32>
    %29 = vector.extract_strided_slice %17 {offsets = [0, 0], sizes = [384, 4], strides = [1, 1]} : vector<432x4xf32> to vector<384x4xf32>
    %30 = arith.truncf %29 : vector<384x4xf32> to vector<384x4xbf16>
    %c2_41 = arith.constant 2 : index
    %c0_42 = arith.constant 0 : index
    %c0_43 = arith.constant 0 : index
    %31 = vector.load %arg2[%c2_41, %c0_42, %c0_43] : memref<9x4x4xbf16, #tpu.memory_space<vmem>>, vector<1x4x4xbf16>
    %32 = vector.shape_cast %31 : vector<1x4x4xbf16> to vector<4x4xbf16>
    %cst_44 = arith.constant dense<0.000000e+00> : vector<384x4xf32>
    %33 = tpu.matmul %30, %32, %cst_44 {dimension_numbers = #tpu.dot_dimension_numbers<[1], [0], [0], [1], [0, 0, 1, 1], [], []>} : vector<384x4xbf16>, vector<4x4xbf16>, vector<384x4xf32> -> vector<384x4xf32>
    %34 = arith.addf %28, %33 : vector<384x4xf32>
    %35 = vector.extract_strided_slice %15 {offsets = [24, 0], sizes = [384, 4], strides = [1, 1]} : vector<432x4xf32> to vector<384x4xf32>
    %36 = arith.truncf %35 : vector<384x4xf32> to vector<384x4xbf16>
    %c3 = arith.constant 3 : index
    %c0_45 = arith.constant 0 : index
    %c0_46 = arith.constant 0 : index
    %37 = vector.load %arg2[%c3, %c0_45, %c0_46] : memref<9x4x4xbf16, #tpu.memory_space<vmem>>, vector<1x4x4xbf16>
    %38 = vector.shape_cast %37 : vector<1x4x4xbf16> to vector<4x4xbf16>
    %cst_47 = arith.constant dense<0.000000e+00> : vector<384x4xf32>
    %39 = tpu.matmul %36, %38, %cst_47 {dimension_numbers = #tpu.dot_dimension_numbers<[1], [0], [0], [1], [0, 0, 1, 1], [], []>} : vector<384x4xbf16>, vector<4x4xbf16>, vector<384x4xf32> -> vector<384x4xf32>
    %40 = arith.addf %34, %39 : vector<384x4xf32>
    %41 = vector.extract_strided_slice %16 {offsets = [24, 0], sizes = [384, 4], strides = [1, 1]} : vector<432x4xf32> to vector<384x4xf32>
    %42 = arith.truncf %41 : vector<384x4xf32> to vector<384x4xbf16>
    %c4 = arith.constant 4 : index
    %c0_48 = arith.constant 0 : index
    %c0_49 = arith.constant 0 : index
    %43 = vector.load %arg2[%c4, %c0_48, %c0_49] : memref<9x4x4xbf16, #tpu.memory_space<vmem>>, vector<1x4x4xbf16>
    %44 = vector.shape_cast %43 : vector<1x4x4xbf16> to vector<4x4xbf16>
    %cst_50 = arith.constant dense<0.000000e+00> : vector<384x4xf32>
    %45 = tpu.matmul %42, %44, %cst_50 {dimension_numbers = #tpu.dot_dimension_numbers<[1], [0], [0], [1], [0, 0, 1, 1], [], []>} : vector<384x4xbf16>, vector<4x4xbf16>, vector<384x4xf32> -> vector<384x4xf32>
    %46 = arith.addf %40, %45 : vector<384x4xf32>
    %47 = vector.extract_strided_slice %17 {offsets = [24, 0], sizes = [384, 4], strides = [1, 1]} : vector<432x4xf32> to vector<384x4xf32>
    %48 = arith.truncf %47 : vector<384x4xf32> to vector<384x4xbf16>
    %c5 = arith.constant 5 : index
    %c0_51 = arith.constant 0 : index
    %c0_52 = arith.constant 0 : index
    %49 = vector.load %arg2[%c5, %c0_51, %c0_52] : memref<9x4x4xbf16, #tpu.memory_space<vmem>>, vector<1x4x4xbf16>
    %50 = vector.shape_cast %49 : vector<1x4x4xbf16> to vector<4x4xbf16>
    %cst_53 = arith.constant dense<0.000000e+00> : vector<384x4xf32>
    %51 = tpu.matmul %48, %50, %cst_53 {dimension_numbers = #tpu.dot_dimension_numbers<[1], [0], [0], [1], [0, 0, 1, 1], [], []>} : vector<384x4xbf16>, vector<4x4xbf16>, vector<384x4xf32> -> vector<384x4xf32>
    %52 = arith.addf %46, %51 : vector<384x4xf32>
    %53 = vector.extract_strided_slice %15 {offsets = [48, 0], sizes = [384, 4], strides = [1, 1]} : vector<432x4xf32> to vector<384x4xf32>
    %54 = arith.truncf %53 : vector<384x4xf32> to vector<384x4xbf16>
    %c6 = arith.constant 6 : index
    %c0_54 = arith.constant 0 : index
    %c0_55 = arith.constant 0 : index
    %55 = vector.load %arg2[%c6, %c0_54, %c0_55] : memref<9x4x4xbf16, #tpu.memory_space<vmem>>, vector<1x4x4xbf16>
    %56 = vector.shape_cast %55 : vector<1x4x4xbf16> to vector<4x4xbf16>
    %cst_56 = arith.constant dense<0.000000e+00> : vector<384x4xf32>
    %57 = tpu.matmul %54, %56, %cst_56 {dimension_numbers = #tpu.dot_dimension_numbers<[1], [0], [0], [1], [0, 0, 1, 1], [], []>} : vector<384x4xbf16>, vector<4x4xbf16>, vector<384x4xf32> -> vector<384x4xf32>
    %58 = arith.addf %52, %57 : vector<384x4xf32>
    %59 = vector.extract_strided_slice %16 {offsets = [48, 0], sizes = [384, 4], strides = [1, 1]} : vector<432x4xf32> to vector<384x4xf32>
    %60 = arith.truncf %59 : vector<384x4xf32> to vector<384x4xbf16>
    %c7 = arith.constant 7 : index
    %c0_57 = arith.constant 0 : index
    %c0_58 = arith.constant 0 : index
    %61 = vector.load %arg2[%c7, %c0_57, %c0_58] : memref<9x4x4xbf16, #tpu.memory_space<vmem>>, vector<1x4x4xbf16>
    %62 = vector.shape_cast %61 : vector<1x4x4xbf16> to vector<4x4xbf16>
    %cst_59 = arith.constant dense<0.000000e+00> : vector<384x4xf32>
    %63 = tpu.matmul %60, %62, %cst_59 {dimension_numbers = #tpu.dot_dimension_numbers<[1], [0], [0], [1], [0, 0, 1, 1], [], []>} : vector<384x4xbf16>, vector<4x4xbf16>, vector<384x4xf32> -> vector<384x4xf32>
    %64 = arith.addf %58, %63 : vector<384x4xf32>
    %65 = vector.extract_strided_slice %17 {offsets = [48, 0], sizes = [384, 4], strides = [1, 1]} : vector<432x4xf32> to vector<384x4xf32>
    %66 = arith.truncf %65 : vector<384x4xf32> to vector<384x4xbf16>
    %c8 = arith.constant 8 : index
    %c0_60 = arith.constant 0 : index
    %c0_61 = arith.constant 0 : index
    %67 = vector.load %arg2[%c8, %c0_60, %c0_61] : memref<9x4x4xbf16, #tpu.memory_space<vmem>>, vector<1x4x4xbf16>
    %68 = vector.shape_cast %67 : vector<1x4x4xbf16> to vector<4x4xbf16>
    %cst_62 = arith.constant dense<0.000000e+00> : vector<384x4xf32>
    %69 = tpu.matmul %66, %68, %cst_62 {dimension_numbers = #tpu.dot_dimension_numbers<[1], [0], [0], [1], [0, 0, 1, 1], [], []>} : vector<384x4xbf16>, vector<4x4xbf16>, vector<384x4xf32> -> vector<384x4xf32>
    %70 = arith.addf %64, %69 : vector<384x4xf32>
    %71 = vector.broadcast %0 : vector<384x1xf32> to vector<384x4xf32>
    %72 = arith.mulf %70, %71 : vector<384x4xf32>
    %cst_63 = arith.constant dense<0.000000e+00> : vector<4xf32>
    %73 = vector.multi_reduction <add>, %72, %cst_63 [0] : vector<384x4xf32> to vector<4xf32>
    %74 = vector.shape_cast %73 : vector<4xf32> to vector<1x4xf32>
    %cst_64 = arith.constant 3.906250e-03 : f32
    %75 = vector.broadcast %cst_64 : f32 to vector<1x4xf32>
    %76 = arith.mulf %74, %75 : vector<1x4xf32>
    %77 = arith.mulf %72, %70 : vector<384x4xf32>
    %cst_65 = arith.constant dense<0.000000e+00> : vector<4xf32>
    %78 = vector.multi_reduction <add>, %77, %cst_65 [0] : vector<384x4xf32> to vector<4xf32>
    %79 = vector.shape_cast %78 : vector<4xf32> to vector<1x4xf32>
    %cst_66 = arith.constant 3.906250e-03 : f32
    %80 = vector.broadcast %cst_66 : f32 to vector<1x4xf32>
    %81 = arith.mulf %79, %80 : vector<1x4xf32>
    %82 = arith.mulf %76, %76 : vector<1x4xf32>
    %83 = arith.subf %81, %82 : vector<1x4xf32>
    %84 = vector.broadcast %76 : vector<1x4xf32> to vector<384x4xf32>
    %85 = arith.subf %70, %84 : vector<384x4xf32>
    %cst_67 = arith.constant 9.99999974E-6 : f32
    %86 = vector.broadcast %cst_67 : f32 to vector<1x4xf32>
    %87 = arith.addf %83, %86 : vector<1x4xf32>
    %88 = math.rsqrt %87 : vector<1x4xf32>
    %89 = vector.broadcast %88 : vector<1x4xf32> to vector<384x4xf32>
    %90 = arith.mulf %85, %89 : vector<384x4xf32>
    %cst_68 = arith.constant 0.000000e+00 : f32
    %91 = vector.broadcast %cst_68 : f32 to vector<384x4xf32>
    %92 = arith.maximumf %90, %91 : vector<384x4xf32>
    %c1_i32 = arith.constant 1 : i32
    %93 = tpu.dynamic_rotate %92 by %c1_i32 dim 0 : vector<384x4xf32>, i32 -> vector<384x4xf32>
    %94 = vector.shape_cast %93 : vector<384x4xf32> to vector<16x24x4xf32>
    %c1_69 = arith.constant 1 : index
    %c0_70 = arith.constant 0 : index
    %c0_71 = arith.constant 0 : index
    %95 = vector.load %arg6[%c1_69, %c0_70, %c0_71] : memref<18x24x4xf32, #tpu.memory_space<vmem>>, vector<16x24x4xf32>
    tpu.vector_store %arg6[%c1_69, %c0_70, %c0_71], %94 {strides = array<i32>} : memref<18x24x4xf32, #tpu.memory_space<vmem>>, vector<16x24x4xf32>,
    %c2_72 = arith.constant 2 : index
    %c0_73 = arith.constant 0 : index
    %c0_74 = arith.constant 0 : index
    %96 = vector.load %arg6[%c2_72, %c0_73, %c0_74] : memref<18x24x4xf32, #tpu.memory_space<vmem>>, vector<1x24x4xf32>
    %c0_75 = arith.constant 0 : index
    %c0_76 = arith.constant 0 : index
    %c0_77 = arith.constant 0 : index
    %97 = vector.load %arg6[%c0_75, %c0_76, %c0_77] : memref<18x24x4xf32, #tpu.memory_space<vmem>>, vector<1x24x4xf32>
    tpu.vector_store %arg6[%c0_75, %c0_76, %c0_77], %96 {strides = array<i32>} : memref<18x24x4xf32, #tpu.memory_space<vmem>>, vector<1x24x4xf32>,
    %c15_78 = arith.constant 15 : index
    %c0_79 = arith.constant 0 : index
    %c0_80 = arith.constant 0 : index
    %98 = vector.load %arg6[%c15_78, %c0_79, %c0_80] : memref<18x24x4xf32, #tpu.memory_space<vmem>>, vector<1x24x4xf32>
    %c17_81 = arith.constant 17 : index
    %c0_82 = arith.constant 0 : index
    %c0_83 = arith.constant 0 : index
    %99 = vector.load %arg6[%c17_81, %c0_82, %c0_83] : memref<18x24x4xf32, #tpu.memory_space<vmem>>, vector<1x24x4xf32>
    tpu.vector_store %arg6[%c17_81, %c0_82, %c0_83], %98 {strides = array<i32>} : memref<18x24x4xf32, #tpu.memory_space<vmem>>, vector<1x24x4xf32>,
    %c0_84 = arith.constant 0 : index
    %c2_85 = arith.constant 2 : index
    %c0_86 = arith.constant 0 : index
    %100 = vector.load %arg6[%c0_84, %c2_85, %c0_86] : memref<18x24x4xf32, #tpu.memory_space<vmem>>, vector<18x1x4xf32>
    %c0_87 = arith.constant 0 : index
    %c0_88 = arith.constant 0 : index
    %c0_89 = arith.constant 0 : index
    %101 = vector.load %arg6[%c0_87, %c0_88, %c0_89] : memref<18x24x4xf32, #tpu.memory_space<vmem>>, vector<18x1x4xf32>
    tpu.vector_store %arg6[%c0_87, %c0_88, %c0_89], %100 {strides = array<i32>} : memref<18x24x4xf32, #tpu.memory_space<vmem>>, vector<18x1x4xf32>,
    %c0_90 = arith.constant 0 : index
    %c15_91 = arith.constant 15 : index
    %c0_92 = arith.constant 0 : index
    %102 = vector.load %arg6[%c0_90, %c15_91, %c0_92] : memref<18x24x4xf32, #tpu.memory_space<vmem>>, vector<18x1x4xf32>
    %c0_93 = arith.constant 0 : index
    %c17_94 = arith.constant 17 : index
    %c0_95 = arith.constant 0 : index
    %103 = vector.load %arg6[%c0_93, %c17_94, %c0_95] : memref<18x24x4xf32, #tpu.memory_space<vmem>>, vector<18x1x4xf32>
    tpu.vector_store %arg6[%c0_93, %c17_94, %c0_95], %102 {strides = array<i32>} : memref<18x24x4xf32, #tpu.memory_space<vmem>>, vector<18x1x4xf32>,
    %c0_96 = arith.constant 0 : index
    %c0_97 = arith.constant 0 : index
    %c0_98 = arith.constant 0 : index
    %104 = vector.load %arg6[%c0_96, %c0_97, %c0_98] : memref<18x24x4xf32, #tpu.memory_space<vmem>>, vector<18x24x4xf32>
    %105 = vector.shape_cast %104 : vector<18x24x4xf32> to vector<432x4xf32>
    %c431_i32_99 = arith.constant 431 : i32
    %106 = tpu.dynamic_rotate %105 by %c431_i32_99 dim 0 : vector<432x4xf32>, i32 -> vector<432x4xf32>
    %c430_i32_100 = arith.constant 430 : i32
    %107 = tpu.dynamic_rotate %105 by %c430_i32_100 dim 0 : vector<432x4xf32>, i32 -> vector<432x4xf32>
    %108 = vector.extract_strided_slice %105 {offsets = [0, 0], sizes = [384, 4], strides = [1, 1]} : vector<432x4xf32> to vector<384x4xf32>
    %109 = arith.truncf %108 : vector<384x4xf32> to vector<384x4xbf16>
    %c0_101 = arith.constant 0 : index
    %c0_102 = arith.constant 0 : index
    %c0_103 = arith.constant 0 : index
    %110 = vector.load %arg3[%c0_101, %c0_102, %c0_103] : memref<9x4x4xbf16, #tpu.memory_space<vmem>>, vector<1x4x4xbf16>
    %111 = vector.shape_cast %110 : vector<1x4x4xbf16> to vector<4x4xbf16>
    %cst_104 = arith.constant dense<0.000000e+00> : vector<384x4xf32>
    %112 = tpu.matmul %109, %111, %cst_104 {dimension_numbers = #tpu.dot_dimension_numbers<[1], [0], [0], [1], [0, 0, 1, 1], [], []>} : vector<384x4xbf16>, vector<4x4xbf16>, vector<384x4xf32> -> vector<384x4xf32>
    %113 = vector.extract_strided_slice %106 {offsets = [0, 0], sizes = [384, 4], strides = [1, 1]} : vector<432x4xf32> to vector<384x4xf32>
    %114 = arith.truncf %113 : vector<384x4xf32> to vector<384x4xbf16>
    %c1_105 = arith.constant 1 : index
    %c0_106 = arith.constant 0 : index
    %c0_107 = arith.constant 0 : index
    %115 = vector.load %arg3[%c1_105, %c0_106, %c0_107] : memref<9x4x4xbf16, #tpu.memory_space<vmem>>, vector<1x4x4xbf16>
    %116 = vector.shape_cast %115 : vector<1x4x4xbf16> to vector<4x4xbf16>
    %cst_108 = arith.constant dense<0.000000e+00> : vector<384x4xf32>
    %117 = tpu.matmul %114, %116, %cst_108 {dimension_numbers = #tpu.dot_dimension_numbers<[1], [0], [0], [1], [0, 0, 1, 1], [], []>} : vector<384x4xbf16>, vector<4x4xbf16>, vector<384x4xf32> -> vector<384x4xf32>
    %118 = arith.addf %112, %117 : vector<384x4xf32>
    %119 = vector.extract_strided_slice %107 {offsets = [0, 0], sizes = [384, 4], strides = [1, 1]} : vector<432x4xf32> to vector<384x4xf32>
    %120 = arith.truncf %119 : vector<384x4xf32> to vector<384x4xbf16>
    %c2_109 = arith.constant 2 : index
    %c0_110 = arith.constant 0 : index
    %c0_111 = arith.constant 0 : index
    %121 = vector.load %arg3[%c2_109, %c0_110, %c0_111] : memref<9x4x4xbf16, #tpu.memory_space<vmem>>, vector<1x4x4xbf16>
    %122 = vector.shape_cast %121 : vector<1x4x4xbf16> to vector<4x4xbf16>
    %cst_112 = arith.constant dense<0.000000e+00> : vector<384x4xf32>
    %123 = tpu.matmul %120, %122, %cst_112 {dimension_numbers = #tpu.dot_dimension_numbers<[1], [0], [0], [1], [0, 0, 1, 1], [], []>} : vector<384x4xbf16>, vector<4x4xbf16>, vector<384x4xf32> -> vector<384x4xf32>
    %124 = arith.addf %118, %123 : vector<384x4xf32>
    %125 = vector.extract_strided_slice %105 {offsets = [24, 0], sizes = [384, 4], strides = [1, 1]} : vector<432x4xf32> to vector<384x4xf32>
    %126 = arith.truncf %125 : vector<384x4xf32> to vector<384x4xbf16>
    %c3_113 = arith.constant 3 : index
    %c0_114 = arith.constant 0 : index
    %c0_115 = arith.constant 0 : index
    %127 = vector.load %arg3[%c3_113, %c0_114, %c0_115] : memref<9x4x4xbf16, #tpu.memory_space<vmem>>, vector<1x4x4xbf16>
    %128 = vector.shape_cast %127 : vector<1x4x4xbf16> to vector<4x4xbf16>
    %cst_116 = arith.constant dense<0.000000e+00> : vector<384x4xf32>
    %129 = tpu.matmul %126, %128, %cst_116 {dimension_numbers = #tpu.dot_dimension_numbers<[1], [0], [0], [1], [0, 0, 1, 1], [], []>} : vector<384x4xbf16>, vector<4x4xbf16>, vector<384x4xf32> -> vector<384x4xf32>
    %130 = arith.addf %124, %129 : vector<384x4xf32>
    %131 = vector.extract_strided_slice %106 {offsets = [24, 0], sizes = [384, 4], strides = [1, 1]} : vector<432x4xf32> to vector<384x4xf32>
    %132 = arith.truncf %131 : vector<384x4xf32> to vector<384x4xbf16>
    %c4_117 = arith.constant 4 : index
    %c0_118 = arith.constant 0 : index
    %c0_119 = arith.constant 0 : index
    %133 = vector.load %arg3[%c4_117, %c0_118, %c0_119] : memref<9x4x4xbf16, #tpu.memory_space<vmem>>, vector<1x4x4xbf16>
    %134 = vector.shape_cast %133 : vector<1x4x4xbf16> to vector<4x4xbf16>
    %cst_120 = arith.constant dense<0.000000e+00> : vector<384x4xf32>
    %135 = tpu.matmul %132, %134, %cst_120 {dimension_numbers = #tpu.dot_dimension_numbers<[1], [0], [0], [1], [0, 0, 1, 1], [], []>} : vector<384x4xbf16>, vector<4x4xbf16>, vector<384x4xf32> -> vector<384x4xf32>
    %136 = arith.addf %130, %135 : vector<384x4xf32>
    %137 = vector.extract_strided_slice %107 {offsets = [24, 0], sizes = [384, 4], strides = [1, 1]} : vector<432x4xf32> to vector<384x4xf32>
    %138 = arith.truncf %137 : vector<384x4xf32> to vector<384x4xbf16>
    %c5_121 = arith.constant 5 : index
    %c0_122 = arith.constant 0 : index
    %c0_123 = arith.constant 0 : index
    %139 = vector.load %arg3[%c5_121, %c0_122, %c0_123] : memref<9x4x4xbf16, #tpu.memory_space<vmem>>, vector<1x4x4xbf16>
    %140 = vector.shape_cast %139 : vector<1x4x4xbf16> to vector<4x4xbf16>
    %cst_124 = arith.constant dense<0.000000e+00> : vector<384x4xf32>
    %141 = tpu.matmul %138, %140, %cst_124 {dimension_numbers = #tpu.dot_dimension_numbers<[1], [0], [0], [1], [0, 0, 1, 1], [], []>} : vector<384x4xbf16>, vector<4x4xbf16>, vector<384x4xf32> -> vector<384x4xf32>
    %142 = arith.addf %136, %141 : vector<384x4xf32>
    %143 = vector.extract_strided_slice %105 {offsets = [48, 0], sizes = [384, 4], strides = [1, 1]} : vector<432x4xf32> to vector<384x4xf32>
    %144 = arith.truncf %143 : vector<384x4xf32> to vector<384x4xbf16>
    %c6_125 = arith.constant 6 : index
    %c0_126 = arith.constant 0 : index
    %c0_127 = arith.constant 0 : index
    %145 = vector.load %arg3[%c6_125, %c0_126, %c0_127] : memref<9x4x4xbf16, #tpu.memory_space<vmem>>, vector<1x4x4xbf16>
    %146 = vector.shape_cast %145 : vector<1x4x4xbf16> to vector<4x4xbf16>
    %cst_128 = arith.constant dense<0.000000e+00> : vector<384x4xf32>
    %147 = tpu.matmul %144, %146, %cst_128 {dimension_numbers = #tpu.dot_dimension_numbers<[1], [0], [0], [1], [0, 0, 1, 1], [], []>} : vector<384x4xbf16>, vector<4x4xbf16>, vector<384x4xf32> -> vector<384x4xf32>
    %148 = arith.addf %142, %147 : vector<384x4xf32>
    %149 = vector.extract_strided_slice %106 {offsets = [48, 0], sizes = [384, 4], strides = [1, 1]} : vector<432x4xf32> to vector<384x4xf32>
    %150 = arith.truncf %149 : vector<384x4xf32> to vector<384x4xbf16>
    %c7_129 = arith.constant 7 : index
    %c0_130 = arith.constant 0 : index
    %c0_131 = arith.constant 0 : index
    %151 = vector.load %arg3[%c7_129, %c0_130, %c0_131] : memref<9x4x4xbf16, #tpu.memory_space<vmem>>, vector<1x4x4xbf16>
    %152 = vector.shape_cast %151 : vector<1x4x4xbf16> to vector<4x4xbf16>
    %cst_132 = arith.constant dense<0.000000e+00> : vector<384x4xf32>
    %153 = tpu.matmul %150, %152, %cst_132 {dimension_numbers = #tpu.dot_dimension_numbers<[1], [0], [0], [1], [0, 0, 1, 1], [], []>} : vector<384x4xbf16>, vector<4x4xbf16>, vector<384x4xf32> -> vector<384x4xf32>
    %154 = arith.addf %148, %153 : vector<384x4xf32>
    %155 = vector.extract_strided_slice %107 {offsets = [48, 0], sizes = [384, 4], strides = [1, 1]} : vector<432x4xf32> to vector<384x4xf32>
    %156 = arith.truncf %155 : vector<384x4xf32> to vector<384x4xbf16>
    %c8_133 = arith.constant 8 : index
    %c0_134 = arith.constant 0 : index
    %c0_135 = arith.constant 0 : index
    %157 = vector.load %arg3[%c8_133, %c0_134, %c0_135] : memref<9x4x4xbf16, #tpu.memory_space<vmem>>, vector<1x4x4xbf16>
    %158 = vector.shape_cast %157 : vector<1x4x4xbf16> to vector<4x4xbf16>
    %cst_136 = arith.constant dense<0.000000e+00> : vector<384x4xf32>
    %159 = tpu.matmul %156, %158, %cst_136 {dimension_numbers = #tpu.dot_dimension_numbers<[1], [0], [0], [1], [0, 0, 1, 1], [], []>} : vector<384x4xbf16>, vector<4x4xbf16>, vector<384x4xf32> -> vector<384x4xf32>
    %160 = arith.addf %154, %159 : vector<384x4xf32>
    %161 = vector.broadcast %0 : vector<384x1xf32> to vector<384x4xf32>
    %162 = arith.mulf %160, %161 : vector<384x4xf32>
    %cst_137 = arith.constant dense<0.000000e+00> : vector<4xf32>
    %163 = vector.multi_reduction <add>, %162, %cst_137 [0] : vector<384x4xf32> to vector<4xf32>
    %164 = vector.shape_cast %163 : vector<4xf32> to vector<1x4xf32>
    %cst_138 = arith.constant 3.906250e-03 : f32
    %165 = vector.broadcast %cst_138 : f32 to vector<1x4xf32>
    %166 = arith.mulf %164, %165 : vector<1x4xf32>
    %167 = arith.mulf %162, %160 : vector<384x4xf32>
    %cst_139 = arith.constant dense<0.000000e+00> : vector<4xf32>
    %168 = vector.multi_reduction <add>, %167, %cst_139 [0] : vector<384x4xf32> to vector<4xf32>
    %169 = vector.shape_cast %168 : vector<4xf32> to vector<1x4xf32>
    %cst_140 = arith.constant 3.906250e-03 : f32
    %170 = vector.broadcast %cst_140 : f32 to vector<1x4xf32>
    %171 = arith.mulf %169, %170 : vector<1x4xf32>
    %172 = arith.mulf %166, %166 : vector<1x4xf32>
    %173 = arith.subf %171, %172 : vector<1x4xf32>
    %174 = vector.broadcast %166 : vector<1x4xf32> to vector<384x4xf32>
    %175 = arith.subf %160, %174 : vector<384x4xf32>
    %cst_141 = arith.constant 9.99999974E-6 : f32
    %176 = vector.broadcast %cst_141 : f32 to vector<1x4xf32>
    %177 = arith.addf %173, %176 : vector<1x4xf32>
    %178 = math.rsqrt %177 : vector<1x4xf32>
    %179 = vector.broadcast %178 : vector<1x4xf32> to vector<384x4xf32>
    %180 = arith.mulf %175, %179 : vector<384x4xf32>
    %c0_142 = arith.constant 0 : index
    %c0_143 = arith.constant 0 : index
    %c0_144 = arith.constant 0 : index
    %c0_145 = arith.constant 0 : index
    %181 = vector.load %arg1[%c0_142, %c0_143, %c0_144, %c0_145] : memref<1x16x16x4xf32, #tpu.memory_space<vmem>>, vector<1x16x16x4xf32>
    %182 = vector.shape_cast %181 : vector<1x16x16x4xf32> to vector<16x16x4xf32>
    %183 = vector.shape_cast %180 : vector<384x4xf32> to vector<16x24x4xf32>
    %184 = vector.extract_strided_slice %183 {offsets = [0, 0, 0], sizes = [16, 16, 4], strides = [1, 1, 1]} : vector<16x24x4xf32> to vector<16x16x4xf32>
    %185 = arith.addf %182, %184 : vector<16x16x4xf32>
    %c0_146 = arith.constant 0 : index
    %c0_147 = arith.constant 0 : index
    %c0_148 = arith.constant 0 : index
    %c0_149 = arith.constant 0 : index
    %186 = vector.load %arg5[%c0_146, %c0_147, %c0_148, %c0_149] : memref<1x16x16x4xf32, #tpu.memory_space<vmem>>, vector<1x16x16x4xf32>
    %187 = vector.shape_cast %186 : vector<1x16x16x4xf32> to vector<16x16x4xf32>
    %188 = vector.shape_cast %185 : vector<16x16x4xf32> to vector<1x16x16x4xf32>
    tpu.vector_store %arg5[%c0_146, %c0_147, %c0_148, %c0_149], %188 {strides = array<i32>} : memref<1x16x16x4xf32, #tpu.memory_space<vmem>>, vector<1x16x16x4xf32>,
    return
  }
  func.func @transform_0(%arg0: i32) -> (i32, i32, i32, i32) {
    %c0_i32 = arith.constant 0 : i32
    %c0_i32_0 = arith.constant 0 : i32
    %c0_i32_1 = arith.constant 0 : i32
    %c0_i32_2 = arith.constant 0 : i32
    return %arg0, %c0_i32, %c0_i32_0, %c0_i32_1 : i32, i32, i32, i32
  }
  func.func @transform_1(%arg0: i32) -> (i32, i32, i32) {
    %c0_i32 = arith.constant 0 : i32
    %c0_i32_0 = arith.constant 0 : i32
    %c0_i32_1 = arith.constant 0 : i32
    %c0_i32_2 = arith.constant 0 : i32
    return %c0_i32, %c0_i32_0, %c0_i32_1 : i32, i32, i32
  }
  func.func @transform_2(%arg0: i32) -> (i32, i32, i32) {
    %c0_i32 = arith.constant 0 : i32
    %c0_i32_0 = arith.constant 0 : i32
    %c0_i32_1 = arith.constant 0 : i32
    %c0_i32_2 = arith.constant 0 : i32
    return %c0_i32, %c0_i32_0, %c0_i32_1 : i32, i32, i32
  }
  func.func @transform_3(%arg0: i32) -> (i32, i32) {
    %c0_i32 = arith.constant 0 : i32
    %c0_i32_0 = arith.constant 0 : i32
    %c0_i32_1 = arith.constant 0 : i32
    return %c0_i32, %c0_i32_0 : i32, i32
  }
  func.func @transform_4(%arg0: i32) -> (i32, i32, i32, i32) {
    %c0_i32 = arith.constant 0 : i32
    %c0_i32_0 = arith.constant 0 : i32
    %c0_i32_1 = arith.constant 0 : i32
    %c0_i32_2 = arith.constant 0 : i32
    return %arg0, %c0_i32, %c0_i32_0, %c0_i32_1 : i32, i32, i32, i32
  }
}

</mosaic_0001>

<bundles_post_ra>
// kernel: tpu_custom_call.1
= control target key start
LH: loop header
LB: loop body
LE: loop exit
PB: predicated region body
PF: predicated region fallthrough
CT: control target
= control target key end

     0   :  { %s11085_s15 = smov 0   ;;  %s16116_s0 = inlined_call_operand.vmem [shape: f32[2,16,16,4], index: 0, kind: input, shape index: {}]   ;;  %s16117_s1 = inlined_call_operand.vmem [shape: bf16[9,4,4], index: 1, kind: input, shape index: {}]   ;;  %s16118_s2 = inlined_call_operand.vmem [shape: bf16[9,4,4], index: 2, kind: input, shape index: {}]   ;;  %s16119_s3 = inlined_call_operand.vmem [shape: f32[384,1], index: 3, kind: input, shape index: {}]   ;;  %s16120_s4 = inlined_call_operand.vmem [shape: f32[2,16,16,4], index: 4, kind: output, shape index: {}]  }
   0x1 LB: > { %s8435_s16 = sadd.s32 4294967295, %s11056_s15   ;;  %p8439_p0 = scmp.ge.s32.totalorder %s11056_s15, 1  ;;  %s11056_s15 = sphi %s11085_s15, %s14_s15  }
   0x2   : > { %p162_p1 = scmp.lt.s32.totalorder %s11056_s15, 3 }
   0x4   : > { %p163_p2 = pnand %p8439_p0, %p162_p1 }
   0x6   : > { %166 = sbr.rel (%p163_p2) target bundleno = 2425 (0x979), region = 36 }
   0xd   : > { %v8444_v0 = vld [vmem:[%s16117_s1 + $0x2] sm:$0x3]  ;;  %vm817_vm0 = vcmask 1041408   ;;  %p11098_p3 = scmp.lt.s32.totalorder %s8435_s16, 1  ;;  %vm247_vm1 = vcmask 29696   ;;  %v11058_v2 = vmov 0.0   ;;  %v528_v38 = vlaneseq }
   0xe   : > { %11014 = vmatprep.subr.msk.bf16.mxu0 %vm817_vm0, %v8444_v0  ;;  %v819_v1 = vsel %vm817_vm0, %v8444_v0, 0  ;;  %248 = vst.msk [vmem:[#allocation2 + $0x12] sm:$0x3f] %vm247_vm1, %v11058_v2  ;;  %250 = vst.msk [vmem:[#allocation2 + $0x42] sm:$0x3f] %vm247_vm1, %v11058_v2  ;;  %vm299_vm2 = vcmask 31744  }
   0xf   : > { %249 = vst.msk [vmem:[#allocation2 + $0x2a] sm:$0x3f] %vm247_vm1, %v11058_v2  ;;  %251 = vst.msk [vmem:[#allocation2 + $0x5a] sm:$0x3f] %vm247_vm1, %v11058_v2  ;;  %v11125_v3 = vld [vmem:[%s16117_s1] sm:$0x3]  ;;  %9347 = vmatpush3.bf16.msra.mxu0 %v819_v1 }
  0x10   : > { %252 = vst.msk [vmem:[#allocation2 + $0x72] sm:$0x3f] %vm247_vm1, %v11058_v2  ;;  %253 = vst.msk [vmem:[#allocation2 + $0x8a] sm:$0x3f] %vm247_vm1, %v11058_v2  ;;  %s17607_s16 = smov (!%p11098_p3, %s8435_s16), 1  ;;  %11015 = vmatprep.subr.msk.bf16.mxu0 %vm817_vm0, %v11125_v3  ;;  %vm365_vm3 = vcmask 24576  }
  0x11   : > { %254 = vst.msk [vmem:[#allocation2 + $0xa2] sm:$0x3f] %vm247_vm1, %v11058_v2  ;;  %255 = vst.msk [vmem:[#allocation2 + $0xba] sm:$0x3f] %vm247_vm1, %v11058_v2  ;;  %s8894_s22 = sshll.u32 %s17607_s16, 8  ;;  %v11210_v49 = vshrl.u32 %v528_v38, 7 }
  0x12   : > { %256 = vst.msk [vmem:[#allocation2 + $0xd2] sm:$0x3f] %vm247_vm1, %v11058_v2  ;;  %257 = vst.msk [vmem:[#allocation2 + $0xea] sm:$0x3f] %vm247_vm1, %v11058_v2  ;;  %s11141_s25 = scalar_lea.vmem %s16116_s0, %s8894_s22  ;;  %s16001_s23 = scalar_lea.vmem %s16120_s4, %s8894_s22 }
  0x13   : > { %258 = vst.msk [vmem:[#allocation2 + $0x102] sm:$0x3f] %vm247_vm1, %v11058_v2  ;;  %259 = vst.msk [vmem:[#allocation2 + $0x11a] sm:$0x3f] %vm247_vm1, %v11058_v2  ;;  %v266_v4 = vld [vmem:[%s11141_s25] sm:$0xff]  ;;  %v268_v5 = vld [vmem:[%s11141_s25 + $0x10] sm:$0xff] }
  0x14   : > { %260 = vst.msk [vmem:[#allocation2 + $0x132] sm:$0x3f] %vm247_vm1, %v11058_v2  ;;  %261 = vst.msk [vmem:[#allocation2 + $0x14a] sm:$0x3f] %vm247_vm1, %v11058_v2  ;;  %v269_v6 = vld [vmem:[%s11141_s25 + $0x18] sm:$0xff]  ;;  %v267_v7 = vld [vmem:[%s11141_s25 + $0x8] sm:$0xff] }
  0x15   : > { %262 = vst.msk [vmem:[#allocation2 + $0x162] sm:$0x3f] %vm247_vm1, %v11058_v2  ;;  %263 = vst.msk [vmem:[#allocation2 + $0x17a] sm:$0x3f] %vm247_vm1, %v11058_v2  ;;  %v270_v8 = vld [vmem:[%s11141_s25 + $0x20] sm:$0xff]  ;;  %v271_v9 = vld [vmem:[%s11141_s25 + $0x28] sm:$0xff] }
  0x16   : > { %264 = vst.msk [vmem:[#allocation2 + $0x192] sm:$0x3f] %vm247_vm1, %v11058_v2  ;;  %265 = vst.msk [vmem:[#allocation2 + $0x1aa] sm:$0x3f] %vm247_vm1, %v11058_v2  ;;  %v272_v10 = vld [vmem:[%s11141_s25 + $0x30] sm:$0xff]  ;;  %v273_v11 = vld [vmem:[%s11141_s25 + $0x38] sm:$0xff] }
  0x17   : > { %300 = vst.msk [vmem:[#allocation2 + $0x19] sm:$0xff] %vm299_vm2, %v266_v4  ;;  %302 = vst.msk [vmem:[#allocation2 + $0x31] sm:$0xff] %vm299_vm2, %v268_v5  ;;  %v274_v12 = vld [vmem:[%s11141_s25 + $0x40] sm:$0xff]  ;;  %v275_v13 = vld [vmem:[%s11141_s25 + $0x48] sm:$0xff]  ;;  %vm530_vm4 = vcmp.lt.s32.totalorder %v11210_v49, 7  ;;  %vm639_vm5 = vcmp.lt.s32.totalorder %v11210_v49, 6 }
  0x18   : > { %303 = vst.msk [vmem:[#allocation2 + $0x39] sm:$0xff] %vm299_vm2, %v269_v6  ;;  %301 = vst.msk [vmem:[#allocation2 + $0x21] sm:$0xff] %vm299_vm2, %v267_v7  ;;  %v276_v14 = vld [vmem:[%s11141_s25 + $0x50] sm:$0xff]  ;;  %v277_v15 = vld [vmem:[%s11141_s25 + $0x58] sm:$0xff] }
  0x19   : > { %304 = vst.msk [vmem:[#allocation2 + $0x49] sm:$0xff] %vm299_vm2, %v270_v8  ;;  %305 = vst.msk [vmem:[#allocation2 + $0x51] sm:$0xff] %vm299_vm2, %v271_v9  ;;  %v278_v16 = vld [vmem:[%s11141_s25 + $0x60] sm:$0xff]  ;;  %v279_v17 = vld [vmem:[%s11141_s25 + $0x68] sm:$0xff] }
  0x1a   : > { %306 = vst.msk [vmem:[#allocation2 + $0x61] sm:$0xff] %vm299_vm2, %v272_v10  ;;  %307 = vst.msk [vmem:[#allocation2 + $0x69] sm:$0xff] %vm299_vm2, %v273_v11  ;;  %v280_v18 = vld [vmem:[%s11141_s25 + $0x70] sm:$0xff]  ;;  %v281_v19 = vld [vmem:[%s11141_s25 + $0x78] sm:$0xff] }
  0x1b   : > { %308 = vst.msk [vmem:[#allocation2 + $0x79] sm:$0xff] %vm299_vm2, %v274_v12  ;;  %309 = vst.msk [vmem:[#allocation2 + $0x81] sm:$0xff] %vm299_vm2, %v275_v13  ;;  %v282_v20 = vld [vmem:[%s11141_s25 + $0x80] sm:$0xff]  ;;  %v283_v21 = vld [vmem:[%s11141_s25 + $0x88] sm:$0xff] }
  0x1c   : > { %310 = vst.msk [vmem:[#allocation2 + $0x91] sm:$0xff] %vm299_vm2, %v276_v14  ;;  %311 = vst.msk [vmem:[#allocation2 + $0x99] sm:$0xff] %vm299_vm2, %v277_v15  ;;  %v284_v22 = vld [vmem:[%s11141_s25 + $0x90] sm:$0xff]  ;;  %v285_v23 = vld [vmem:[%s11141_s25 + $0x98] sm:$0xff] }
  0x1d   : > { %312 = vst.msk [vmem:[#allocation2 + $0xa9] sm:$0xff] %vm299_vm2, %v278_v16  ;;  %313 = vst.msk [vmem:[#allocation2 + $0xb1] sm:$0xff] %vm299_vm2, %v279_v17  ;;  %v286_v24 = vld [vmem:[%s11141_s25 + $0xa0] sm:$0xff]  ;;  %v287_v25 = vld [vmem:[%s11141_s25 + $0xa8] sm:$0xff] }
  0x1e   : > { %314 = vst.msk [vmem:[#allocation2 + $0xc1] sm:$0xff] %vm299_vm2, %v280_v18  ;;  %315 = vst.msk [vmem:[#allocation2 + $0xc9] sm:$0xff] %vm299_vm2, %v281_v19  ;;  %v288_v26 = vld [vmem:[%s11141_s25 + $0xb0] sm:$0xff]  ;;  %v289_v27 = vld [vmem:[%s11141_s25 + $0xb8] sm:$0xff] }
  0x1f   : > { %316 = vst.msk [vmem:[#allocation2 + $0xd9] sm:$0xff] %vm299_vm2, %v282_v20  ;;  %317 = vst.msk [vmem:[#allocation2 + $0xe1] sm:$0xff] %vm299_vm2, %v283_v21  ;;  %v333_v28 = vld [vmem:[#allocation2 + $0x30] sm:$0xff]  ;;  %v11188_v29 = vld [vmem:[#allocation2 + $0x38] sm:$0xff] }
  0x20   : > { %318 = vst.msk [vmem:[#allocation2 + $0xf1] sm:$0xff] %vm299_vm2, %v284_v22  ;;  %319 = vst.msk [vmem:[#allocation2 + $0xf9] sm:$0xff] %vm299_vm2, %v285_v23  ;;  %v335_v30 = vld [vmem:[#allocation2 + $0x40] sm:$0xff]  ;;  %v348_v31 = vld [vmem:[#allocation2 + $0x1a] sm:$0x1]  ;;  %v481_v51 = vrot.slane %v11188_v29, 1 }
  0x21   : > { %320 = vst.msk [vmem:[#allocation2 + $0x109] sm:$0xff] %vm299_vm2, %v286_v24  ;;  %321 = vst.msk [vmem:[#allocation2 + $0x111] sm:$0xff] %vm299_vm2, %v287_v25  ;;  %v349_v32 = vld [vmem:[#allocation2 + $0x32] sm:$0x1]  ;;  %v386_v33 = vld [vmem:[#allocation2 + $0x3f] sm:$0x1] }
  0x22   : > { %322 = vst.msk [vmem:[#allocation2 + $0x121] sm:$0xff] %vm299_vm2, %v288_v26  ;;  %323 = vst.msk [vmem:[#allocation2 + $0x129] sm:$0xff] %vm299_vm2, %v289_v27  ;;  %v385_v34 = vld [vmem:[#allocation2 + $0x27] sm:$0x1]  ;;  %v350_v35 = vld [vmem:[#allocation2 + $0x4a] sm:$0x1] }
  0x23   : > { %336 = vst.msk [vmem:[#allocation2] sm:$0xff] %vm299_vm2, %v333_v28  ;;  %337 = vst.msk [vmem:[#allocation2 + $0x8] sm:$0xff] %vm299_vm2, %v11188_v29  ;;  %v351_v36 = vld [vmem:[#allocation2 + $0x62] sm:$0x1]  ;;  %v387_v37 = vld [vmem:[#allocation2 + $0x57] sm:$0x1] }
  0x24   : > { %338 = vst.msk [vmem:[#allocation2 + $0x10] sm:$0xff] %vm299_vm2, %v335_v30  ;;  %v388_v39 = vld [vmem:[#allocation2 + $0x6f] sm:$0x1]  ;;  %v352_v40 = vld [vmem:[#allocation2 + $0x7a] sm:$0x1]  ;;  %16610 = vst [vmem:[#allocation3_spill] sm:$0xff] %v11210_v49 }
  0x25   : > { %367 = vst.msk [vmem:[#allocation2 + $0x18] sm:$0x1] %vm365_vm3, %v348_v31  ;;  %368 = vst.msk [vmem:[#allocation2 + $0x30] sm:$0x1] %vm365_vm3, %v349_v32  ;;  %v353_v41 = vld [vmem:[#allocation2 + $0x92] sm:$0x1] }
  0x26   : > { %404 = vst.msk [vmem:[#allocation2 + $0x41] sm:$0x1] %vm365_vm3, %v386_v33  ;;  %403 = vst.msk [vmem:[#allocation2 + $0x29] sm:$0x1] %vm365_vm3, %v385_v34  ;;  %v389_v42 = vld [vmem:[#allocation2 + $0x87] sm:$0x1] }
  0x27   : > { %369 = vst.msk [vmem:[#allocation2 + $0x48] sm:$0x1] %vm365_vm3, %v350_v35  ;;  %370 = vst.msk [vmem:[#allocation2 + $0x60] sm:$0x1] %vm365_vm3, %v351_v36  ;;  %v390_v43 = vld [vmem:[#allocation2 + $0x9f] sm:$0x1] }
  0x28   : > { %405 = vst.msk [vmem:[#allocation2 + $0x59] sm:$0x1] %vm365_vm3, %v387_v37  ;;  %406 = vst.msk [vmem:[#allocation2 + $0x71] sm:$0x1] %vm365_vm3, %v388_v39  ;;  %v354_v44 = vld [vmem:[#allocation2 + $0xaa] sm:$0x1] }
  0x29   : > { %371 = vst.msk [vmem:[#allocation2 + $0x78] sm:$0x1] %vm365_vm3, %v352_v40  ;;  %372 = vst.msk [vmem:[#allocation2 + $0x90] sm:$0x1] %vm365_vm3, %v353_v41  ;;  %v355_v45 = vld [vmem:[#allocation2 + $0xc2] sm:$0x1] }
  0x2a   : > { %407 = vst.msk [vmem:[#allocation2 + $0x89] sm:$0x1] %vm365_vm3, %v389_v42  ;;  %408 = vst.msk [vmem:[#allocation2 + $0xa1] sm:$0x1] %vm365_vm3, %v390_v43  ;;  %v391_v46 = vld [vmem:[#allocation2 + $0xb7] sm:$0x1] }
  0x2b   : > { %373 = vst.msk [vmem:[#allocation2 + $0xa8] sm:$0x1] %vm365_vm3, %v354_v44  ;;  %v347_v47 = vld [vmem:[#allocation2 + $0x2] sm:$0x1]  ;;  %v384_v48 = vld [vmem:[#allocation2 + $0xf] sm:$0x1] }
  0x2c   : > { %374 = vst.msk [vmem:[#allocation2 + $0xc0] sm:$0x1] %vm365_vm3, %v355_v45  ;;  %409 = vst.msk [vmem:[#allocation2 + $0xb9] sm:$0x1] %vm365_vm3, %v391_v46  ;;  %v11216_v50 = vld [vmem:[#allocation2 + $0x30] sm:$0xff]  ;;  %v11219_v52 = vld [vmem:[#allocation2 + $0x18] sm:$0xff] }
  0x2d   : > { %366 = vst.msk [vmem:[#allocation2] sm:$0x1] %vm365_vm3, %v347_v47  ;;  %402 = vst.msk [vmem:[#allocation2 + $0x11] sm:$0x1] %vm365_vm3, %v384_v48  ;;  %v11221_v53 = vld [vmem:[#allocation2 + $0x20] sm:$0xff]  ;;  %v11223_v54 = vld [vmem:[#allocation2 + $0x28] sm:$0xff] }
  0x2e   : > { %v480_v55 = vrot.slane %v11216_v50, 1  ;;  %v479_v56 = vrot.slane %v11223_v54, 1  ;;  %v392_v57 = vld [vmem:[#allocation2 + $0xcf] sm:$0x1]  ;;  %v356_v59 = vld [vmem:[#allocation2 + $0xda] sm:$0x1] }
  0x2f   : > { %v11227_v58 = vld [vmem:[#allocation2 + $0x8] sm:$0xff]  ;;  %410 = vst.msk [vmem:[#allocation2 + $0xd1] sm:$0x1] %vm365_vm3, %v392_v57  ;;  %v477_v60 = vrot.slane %v11219_v52, 1  ;;  %v478_v61 = vrot.slane %v11221_v53, 1  ;;  %v11252_v7 = vld [vmem:[#allocation2 + $0x50] sm:$0xff] }
  0x30   : > { %v11235_v62 = vsel %vm530_vm4, %v479_v56, %v480_v55  ;;  %v11241_v63 = vsel %vm530_vm4, %v480_v55, %v481_v51  ;;  %375 = vst.msk [vmem:[#allocation2 + $0xd8] sm:$0x1] %vm365_vm3, %v356_v59  ;;  %v357_v1 = vld [vmem:[#allocation2 + $0xf2] sm:$0x1]  ;;  %v475_v2 = vrot.slane %v11227_v58, 1  ;;  %v11265_v13 = vld [vmem:[#allocation2 + $0x40] sm:$0xff] }
  0x31   : > { %16611 = vst [vmem:[#allocation4_spill] sm:$0xff] %v11235_v62  ;;  %16612 = vst [vmem:[#allocation5_spill] sm:$0xff] %v11241_v63  ;;  %v393_v4 = vld [vmem:[#allocation2 + $0xe7] sm:$0x1]  ;;  %v394_v8 = vld [vmem:[#allocation2 + $0xff] sm:$0x1]  ;;  %v11259_v11 = vsel %vm530_vm4, %v477_v60, %v478_v61  ;;  %v11263_v12 = vsel %vm530_vm4, %v478_v61, %v479_v56 }
  0x32   : > { %376 = vst.msk [vmem:[#allocation2 + $0xf0] sm:$0x1] %vm365_vm3, %v357_v1  ;;  %411 = vst.msk [vmem:[#allocation2 + $0xe9] sm:$0x1] %vm365_vm3, %v393_v4  ;;  %v11267_v14 = vld [vmem:[#allocation2 + $0x48] sm:$0xff]  ;;  %v290_v22 = vld [vmem:[%s11141_s25 + $0xc0] sm:$0xff]  ;;  %v721_v25 = vpack.c.bf16 %v11235_v62, %v11263_v12 }
  0x33   : > { %16614 = vst [vmem:[#allocation7_spill] sm:$0xff] %v11259_v11  ;;  %16615 = vst [vmem:[#allocation8_spill] sm:$0xff] %v11263_v12  ;;  %v358_v15 = vld [vmem:[#allocation2 + $0x10a] sm:$0x1]  ;;  %v359_v16 = vld [vmem:[#allocation2 + $0x122] sm:$0x1] }
  0x34   : > { %v11248_v5 = vld [vmem:[#allocation2] sm:$0xff]  ;;  %v11250_v6 = vld [vmem:[#allocation2 + $0x10] sm:$0xff]  ;;  %412 = vst.msk [vmem:[#allocation2 + $0x101] sm:$0x1] %vm365_vm3, %v394_v8  ;;  %377 = vst.msk [vmem:[#allocation2 + $0x108] sm:$0x1] %vm365_vm3, %v358_v15 }
  0x35   : > { %16613 = vst [vmem:[#allocation6_spill] sm:$0xff] %v11248_v5  ;;  %v16121_v9 = vrot.slane %v11248_v5, 1  ;;  %v476_v10 = vrot.slane %v11250_v6, 1  ;;  %v395_v17 = vld [vmem:[#allocation2 + $0x117] sm:$0x1]  ;;  %v482_v26 = vrot.slane %v11265_v13, 1 }
  0x36   : > { %v396_v18 = vld [vmem:[#allocation2 + $0x12f] sm:$0x1]  ;;  %378 = vst.msk [vmem:[#allocation2 + $0x120] sm:$0x1] %vm365_vm3, %v359_v16  ;;  %413 = vst.msk [vmem:[#allocation2 + $0x119] sm:$0x1] %vm365_vm3, %v395_v17 }
  0x37   : > { %v582_v19 = vsel %vm530_vm4, %v475_v2, %v476_v10  ;;  %v583_v20 = vsel %vm530_vm4, %v16121_v9, %v475_v2  ;;  %v581_v21 = vsel %vm530_vm4, %v476_v10, %v477_v60  ;;  %414 = vst.msk [vmem:[#allocation2 + $0x131] sm:$0x1] %vm365_vm3, %v396_v18  ;;  %v291_v27 = vld [vmem:[%s11141_s25 + $0xc8] sm:$0xff]  ;;  %v292_v28 = vld [vmem:[%s11141_s25 + $0xd0] sm:$0xff]  ;;  %v1119_v30 = vsel %vm817_vm0, %v11125_v3, 0  ;;  %v293_v33 = vld [vmem:[%s11141_s25 + $0xd8] sm:$0xff] }
  0x38   : > { %v719_v23 = vpack.c.bf16 %v582_v19, %v583_v20  ;;  %v720_v24 = vpack.c.bf16 %v11259_v11, %v581_v21  ;;  %324 = vst.msk [vmem:[#allocation2 + $0x139] sm:$0xff] %vm299_vm2, %v290_v22  ;;  %v483_v31 = vrot.slane %v11267_v14, 1  ;;  %v484_v32 = vrot.slane %v11252_v7, 1  ;;  %325 = vst.msk [vmem:[#allocation2 + $0x141] sm:$0xff] %vm299_vm2, %v291_v27  ;;  %v294_v34 = vld [vmem:[%s11141_s25 + $0xe0] sm:$0xff]  ;;  %v295_v35 = vld [vmem:[%s11141_s25 + $0xe8] sm:$0xff] }
  0x39   : > { %326 = vst.msk [vmem:[#allocation2 + $0x151] sm:$0xff] %vm299_vm2, %v292_v28  ;;  %327 = vst.msk [vmem:[#allocation2 + $0x159] sm:$0xff] %vm299_vm2, %v293_v33  ;;  %v296_v3 = vld [vmem:[%s11141_s25 + $0xf0] sm:$0xff]  ;;  %v11307_v36 = vld [vmem:[%s16117_s1 + $0x4] sm:$0x3]  ;;  %v11316_v37 = vsel %vm530_vm4, %v481_v51, %v482_v26 }
  0x3a   : > { %9348 = vmatprep.mubr.msk.bf16.mxu0 %vm299_vm2, %v719_v23  ;;  %328 = vst.msk [vmem:[#allocation2 + $0x169] sm:$0xff] %vm299_vm2, %v294_v34  ;;  %329 = vst.msk [vmem:[#allocation2 + $0x171] sm:$0xff] %vm299_vm2, %v295_v35  ;;  %v11320_v38 = vsel %vm530_vm4, %v483_v31, %v484_v32  ;;  %v11324_v39 = vsel %vm530_vm4, %v482_v26, %v483_v31  ;;  %v11326_v40 = vld [vmem:[#allocation2 + $0x58] sm:$0xff]  ;;  %v11328_v41 = vld [vmem:[#allocation2 + $0x60] sm:$0xff]  ;;  %v11338_v44 = vpack.c.bf16 %v11316_v37, %v11241_v63 }
  0x3b   : > { %9349 = vmatmul.mubr.msk.bf16.vlgmr.msra.gmra.mrb[0].mxu0 %vm299_vm2, %v720_v24  ;;  %330 = vst.msk [vmem:[#allocation2 + $0x181] sm:$0xff] %vm299_vm2, %v296_v3  ;;  %16616 = vst [vmem:[#allocation9_spill] sm:$0xff] %v11316_v37  ;;  %v11332_v42 = vld [vmem:[#allocation2 + $0x68] sm:$0xff]  ;;  %v11334_v43 = vld [vmem:[#allocation2 + $0x70] sm:$0xff]  ;;  %v11342_v46 = vpack.c.bf16 %v11320_v38, %v11324_v39  ;;  %v485_v47 = vrot.slane %v11326_v40, 1  ;;  %v486_v48 = vrot.slane %v11328_v41, 1 }
  0x3c   : > { %9397 = vmatpush3.bf16.msra.mxu0 %v1119_v30  ;;  %9352 = vmatprep.mubr.msk.bf16.mxu0 %vm299_vm2, %v721_v25  ;;  %16617 = vst [vmem:[#allocation10_spill] sm:$0xff] %v11320_v38  ;;  %16618 = vst [vmem:[#allocation11_spill] sm:$0xff] %v11324_v39  ;;  %v487_v55 = vrot.slane %v11332_v42, 1  ;;  %v488_v56 = vrot.slane %v11334_v43, 1  ;;  %v11381_v18 = vld [vmem:[#allocation2 + $0x78] sm:$0xff]  ;;  %v11383_v19 = vld [vmem:[#allocation2 + $0x80] sm:$0xff] }
  0x3d   : > { %11016 = vmatprep.subr.msk.bf16.mxu0 %vm817_vm0, %v11307_v36  ;;  %16619 = vst [vmem:[#allocation12_spill] sm:$0xff] %v11338_v44  ;;  %16620 = vst [vmem:[#allocation13_spill] sm:$0xff] %v11342_v46  ;;  %v11364_v10 = vsel %vm530_vm4, %v485_v47, %v486_v48  ;;  %v11368_v15 = vsel %vm530_vm4, %v484_v32, %v485_v47  ;;  %v11385_v20 = vld [vmem:[#allocation2 + $0x88] sm:$0xff]  ;;  %v11387_v21 = vld [vmem:[#allocation2 + $0x90] sm:$0xff]  ;;  %v489_v24 = vrot.slane %v11381_v18, 1  ;;  %v490_v25 = vrot.slane %v11383_v19, 1 }
  0x3e   : > { %16621 = vst [vmem:[#allocation14_spill] sm:$0xff] %v11364_v10  ;;  %16622 = vst [vmem:[#allocation15_spill] sm:$0xff] %v11368_v15  ;;  %v11375_v16 = vsel %vm530_vm4, %v487_v55, %v488_v56  ;;  %v11379_v17 = vsel %vm530_vm4, %v486_v48, %v487_v55  ;;  %v11391_v22 = vpack.c.bf16 %v11364_v10, %v11368_v15  ;;  %v491_v26 = vrot.slane %v11385_v20, 1  ;;  %v11421_v33 = vld [vmem:[#allocation2 + $0x98] sm:$0xff]  ;;  %v11423_v34 = vld [vmem:[#allocation2 + $0xa0] sm:$0xff] }
  0x3f   : > { %v360_v45 = vld [vmem:[#allocation2 + $0x13a] sm:$0x1]  ;;  %v397_v57 = vld [vmem:[#allocation2 + $0x147] sm:$0x1]  ;;  %16623 = vst [vmem:[#allocation16_spill] sm:$0xff] %v11375_v16  ;;  %16624 = vst [vmem:[#allocation17_spill] sm:$0xff] %v11379_v17  ;;  %v11395_v23 = vpack.c.bf16 %v11375_v16, %v11379_v17  ;;  %v11407_v28 = vsel %vm530_vm4, %v489_v24, %v490_v25  ;;  %v11411_v30 = vsel %vm530_vm4, %v488_v56, %v489_v24 }
  0x40   : > { %379 = vst.msk [vmem:[#allocation2 + $0x138] sm:$0x1] %vm365_vm3, %v360_v45  ;;  %v361_v51 = vld [vmem:[#allocation2 + $0x152] sm:$0x1]  ;;  %v398_v59 = vld [vmem:[#allocation2 + $0x15f] sm:$0x1]  ;;  %v11419_v32 = vsel %vm530_vm4, %v490_v25, %v491_v26  ;;  %v11431_v45 = vpack.c.bf16 %v11407_v28, %v11411_v30 }
  0x41   : > { %380 = vst.msk [vmem:[#allocation2 + $0x150] sm:$0x1] %vm365_vm3, %v361_v51  ;;  %415 = vst.msk [vmem:[#allocation2 + $0x149] sm:$0x1] %vm365_vm3, %v397_v57  ;;  %v340_v60 = vld [vmem:[#allocation2 + $0x168] sm:$0xff]  ;;  %v11352_v1 = vld [vmem:[#allocation2 + $0x170] sm:$0xff] }
  0x42   : > { %416 = vst.msk [vmem:[#allocation2 + $0x161] sm:$0x1] %vm365_vm3, %v398_v59  ;;  %v362_v61 = vld [vmem:[#allocation2 + $0x16a] sm:$0x1]  ;;  %v342_v2 = vld [vmem:[#allocation2 + $0x178] sm:$0xff]  ;;  %16625 = vst [vmem:[#allocation18_spill] sm:$0xff] %v11391_v22 }
  0x43   : > { %9353 = vmatmul.mubr.msk.bf16.gmra.mrb[4].mxu0 %vm299_vm2, %v11338_v44  ;;  %381 = vst.msk [vmem:[#allocation2 + $0x168] sm:$0x1] %vm365_vm3, %v362_v61  ;;  %v363_v4 = vld [vmem:[#allocation2 + $0x182] sm:$0x1]  ;;  %v399_v8 = vld [vmem:[#allocation2 + $0x177] sm:$0x1] }
  0x44   : > { %344 = vst.msk [vmem:[#allocation2 + $0x198] sm:$0xff] %vm299_vm2, %v340_v60  ;;  %345 = vst.msk [vmem:[#allocation2 + $0x1a0] sm:$0xff] %vm299_vm2, %v11352_v1  ;;  %9356 = vmatprep.mubr.msk.bf16.mxu0 %vm299_vm2, %v11342_v46  ;;  %v492_v27 = vrot.slane %v11387_v21, 1  ;;  %v11425_v35 = vld [vmem:[#allocation2 + $0xa8] sm:$0xff]  ;;  %v11427_v3 = vld [vmem:[#allocation2 + $0xb0] sm:$0xff]  ;;  %v493_v48 = vrot.slane %v11421_v33, 1 }
  0x45   : > { %382 = vst.msk [vmem:[#allocation2 + $0x180] sm:$0x1] %vm365_vm3, %v363_v4  ;;  %417 = vst.msk [vmem:[#allocation2 + $0x179] sm:$0x1] %vm365_vm3, %v399_v8  ;;  %v494_v51 = vrot.slane %v11423_v34, 1  ;;  %v495_v55 = vrot.slane %v11425_v35, 1 }
  0x46   : > { %346 = vst.msk [vmem:[#allocation2 + $0x1a8] sm:$0xff] %vm299_vm2, %v342_v2  ;;  %16626 = vst [vmem:[#allocation19_spill] sm:$0xff] %v11395_v23  ;;  %v11415_v31 = vsel %vm530_vm4, %v491_v26, %v492_v27  ;;  %v496_v56 = vrot.slane %v11427_v3, 1  ;;  %v11451_v59 = vsel %vm530_vm4, %v492_v27, %v493_v48  ;;  %v11461_v2 = vld [vmem:[#allocation2 + $0xb8] sm:$0xff]  ;;  %v11463_v4 = vld [vmem:[#allocation2 + $0xc0] sm:$0xff]  ;;  %v591_v63 = vrot.slane %v11216_v50, 2 }
  0x47   : > { %16627 = vst [vmem:[#allocation20_spill] sm:$0xff] %v11407_v28  ;;  %16628 = vst [vmem:[#allocation21_spill] sm:$0xff] %v11411_v30  ;;  %v11435_v47 = vpack.c.bf16 %v11415_v31, %v11419_v32  ;;  %v11447_v57 = vsel %vm530_vm4, %v493_v48, %v494_v51  ;;  %v11459_v61 = vsel %vm530_vm4, %v494_v51, %v495_v55  ;;  %v11465_v8 = vld [vmem:[#allocation2 + $0xc8] sm:$0xff]  ;;  %v11467_v24 = vld [vmem:[#allocation2 + $0xd0] sm:$0xff]  ;;  %v497_v27 = vrot.slane %v11461_v2, 1 }
  0x48   : > { %16629 = vst [vmem:[#allocation22_spill] sm:$0xff] %v11415_v31  ;;  %16630 = vst [vmem:[#allocation23_spill] sm:$0xff] %v11419_v32  ;;  %v11455_v60 = vsel %vm530_vm4, %v495_v55, %v496_v56  ;;  %v11471_v25 = vpack.c.bf16 %v11447_v57, %v11451_v59  ;;  %v498_v48 = vrot.slane %v11463_v4, 1  ;;  %v499_v51 = vrot.slane %v11465_v8, 1  ;;  %v11583_v31 = vld [vmem:[#allocation2 + $0x120] sm:$0xff]  ;;  %v11587_v32 = vld [vmem:[#allocation2 + $0x130] sm:$0xff] }
  0x49   : > { %16631 = vst [vmem:[#allocation24_spill] sm:$0xff] %v11431_v45  ;;  %16632 = vst [vmem:[#allocation25_spill] sm:$0xff] %v11435_v47  ;;  %v11475_v26 = vpack.c.bf16 %v11455_v60, %v11459_v61  ;;  %v500_v55 = vrot.slane %v11467_v24, 1  ;;  %v11491_v0 = vsel %vm530_vm4, %v496_v56, %v497_v27  ;;  %v512_v30 = vrot.slane %v11587_v32, 1  ;;  %v11623_v16 = vld [vmem:[#allocation2 + $0x140] sm:$0xff]  ;;  %v11627_v17 = vld [vmem:[#allocation2 + $0x150] sm:$0xff] }
  0x4a   : > { %16633 = vst [vmem:[#allocation26_spill] sm:$0xff] %v11447_v57  ;;  %16634 = vst [vmem:[#allocation27_spill] sm:$0xff] %v11451_v59  ;;  %v11487_v9 = vsel %vm530_vm4, %v497_v27, %v498_v48  ;;  %v516_v15 = vrot.slane %v11627_v17, 1  ;;  %v11663_v38 = vld [vmem:[#allocation2 + $0x160] sm:$0xff]  ;;  %v520_v62 = vrot.slane %v11352_v1, 1 }
  0x4b   : > { %9357 = vmatmul.mubr.msk.bf16.gmra.mrb[8].mxu0 %vm299_vm2, %v11391_v22  ;;  %16635 = vst [vmem:[#allocation28_spill] sm:$0xff] %v11455_v60  ;;  %16636 = vst [vmem:[#allocation29_spill] sm:$0xff] %v11459_v61  ;;  %v11507_v22 = vld [vmem:[#allocation2 + $0xf0] sm:$0xff]  ;;  %v11511_v56 = vpack.c.bf16 %v11487_v9, %v11491_v0  ;;  %v11543_v60 = vld [vmem:[#allocation2 + $0x100] sm:$0xff]  ;;  %v518_v39 = vrot.slane %v11663_v38, 1 }
  0x4c   : > { %9360 = vmatprep.mubr.msk.bf16.mxu0 %vm299_vm2, %v11395_v23  ;;  %16637 = vst [vmem:[#allocation30_spill] sm:$0xff] %v11471_v25  ;;  %16638 = vst [vmem:[#allocation31_spill] sm:$0xff] %v11475_v26  ;;  %v11503_v23 = vld [vmem:[#allocation2 + $0xe0] sm:$0xff]  ;;  %v504_v44 = vrot.slane %v11507_v22, 1  ;;  %v11547_v61 = vld [vmem:[#allocation2 + $0x110] sm:$0xff] }
  0x4d   : > { %16639 = vst [vmem:[#allocation32_spill] sm:$0xff] %v11487_v9  ;;  %16640 = vst [vmem:[#allocation33_spill] sm:$0xff] %v11491_v0  ;;  %v508_v59 = vrot.slane %v11547_v61, 1 }
  0x4e   : > { %16643 = vst [vmem:[#allocation36_spill] sm:$0xff] %v11511_v56 }
  0x53   : > { %9361 = vmatmul.mubr.msk.bf16.gmra.mrb[12].mxu0 %vm299_vm2, %v11431_v45  ;;  %v11499_v45 = vsel %vm530_vm4, %v498_v48, %v499_v51  ;;  %v502_v48 = vrot.slane %v11503_v23, 1 }
  0x54   : > { %9364 = vmatprep.mubr.msk.bf16.mxu0 %vm299_vm2, %v11435_v47  ;;  %v11495_v47 = vsel %vm530_vm4, %v499_v51, %v500_v55  ;;  %16642 = vst [vmem:[#allocation35_spill] sm:$0xff] %v11499_v45 }
  0x55   : > { %16641 = vst [vmem:[#allocation34_spill] sm:$0xff] %v11495_v47  ;;  %v11515_v27 = vpack.c.bf16 %v11495_v47, %v11499_v45 }
  0x57   : > { %16644 = vst [vmem:[#allocation37_spill] sm:$0xff] %v11515_v27 }
  0x5b   : > { %9365 = vmatmul.mubr.msk.bf16.gmra.mrb[16].mxu0 %vm299_vm2, %v11471_v25  ;;  %v11501_v25 = vld [vmem:[#allocation2 + $0xd8] sm:$0xff] }
  0x5c   : > { %9368 = vmatprep.mubr.msk.bf16.mxu0 %vm299_vm2, %v11475_v26  ;;  %v11505_v26 = vld [vmem:[#allocation2 + $0xe8] sm:$0xff]  ;;  %v501_v46 = vrot.slane %v11501_v25, 1 }
  0x5d   : > { %v503_v51 = vrot.slane %v11505_v26, 1 }
  0x5e   : > { %v11527_v9 = vsel %vm530_vm4, %v501_v46, %v502_v48  ;;  %v11531_v47 = vsel %vm530_vm4, %v500_v55, %v501_v46 }
  0x5f   : > { %16645 = vst [vmem:[#allocation38_spill] sm:$0xff] %v11527_v9  ;;  %16646 = vst [vmem:[#allocation39_spill] sm:$0xff] %v11531_v47  ;;  %v11535_v45 = vsel %vm530_vm4, %v503_v51, %v504_v44  ;;  %v11539_v0 = vsel %vm530_vm4, %v502_v48, %v503_v51  ;;  %v11551_v46 = vpack.c.bf16 %v11527_v9, %v11531_v47  ;;  %v506_v48 = vrot.slane %v11543_v60, 1 }
  0x60   : > { %16647 = vst [vmem:[#allocation40_spill] sm:$0xff] %v11535_v45  ;;  %16648 = vst [vmem:[#allocation41_spill] sm:$0xff] %v11539_v0  ;;  %v11555_v55 = vpack.c.bf16 %v11535_v45, %v11539_v0 }
  0x61   : > { %16649 = vst [vmem:[#allocation42_spill] sm:$0xff] %v11551_v46 }
  0x62   : > { %16650 = vst [vmem:[#allocation43_spill] sm:$0xff] %v11555_v55 }
  0x63   : > { %9369 = vmatmul.mubr.msk.bf16.gmra.mrb[20].mxu0 %vm299_vm2, %v11511_v56  ;;  %v11541_v56 = vld [vmem:[#allocation2 + $0xf8] sm:$0xff] }
  0x64   : > { %9372 = vmatprep.mubr.msk.bf16.mxu0 %vm299_vm2, %v11515_v27  ;;  %v11545_v27 = vld [vmem:[#allocation2 + $0x108] sm:$0xff]  ;;  %v505_v57 = vrot.slane %v11541_v56, 1 }
  0x65   : > { %v507_v51 = vrot.slane %v11545_v27, 1 }
  0x66   : > { %v11567_v9 = vsel %vm530_vm4, %v505_v57, %v506_v48  ;;  %v11571_v45 = vsel %vm530_vm4, %v504_v44, %v505_v57 }
  0x67   : > { %16651 = vst [vmem:[#allocation44_spill] sm:$0xff] %v11567_v9  ;;  %16652 = vst [vmem:[#allocation45_spill] sm:$0xff] %v11571_v45  ;;  %v11575_v0 = vsel %vm530_vm4, %v507_v51, %v508_v59  ;;  %v11579_v47 = vsel %vm530_vm4, %v506_v48, %v507_v51  ;;  %v11591_v44 = vpack.c.bf16 %v11567_v9, %v11571_v45  ;;  %v510_v48 = vrot.slane %v11583_v31, 1 }
  0x68   : > { %16653 = vst [vmem:[#allocation46_spill] sm:$0xff] %v11575_v0  ;;  %16654 = vst [vmem:[#allocation47_spill] sm:$0xff] %v11579_v47  ;;  %v11595_v57 = vpack.c.bf16 %v11575_v0, %v11579_v47 }
  0x69   : > { %16655 = vst [vmem:[#allocation48_spill] sm:$0xff] %v11591_v44 }
  0x6a   : > { %16656 = vst [vmem:[#allocation49_spill] sm:$0xff] %v11595_v57 }
  0x6b   : > { %9373 = vmatmul.mubr.msk.bf16.gmra.mrb[24].mxu0 %vm299_vm2, %v11551_v46  ;;  %v11581_v46 = vld [vmem:[#allocation2 + $0x118] sm:$0xff] }
  0x6c   : > { %9376 = vmatprep.mubr.msk.bf16.mxu0 %vm299_vm2, %v11555_v55  ;;  %v11585_v55 = vld [vmem:[#allocation2 + $0x128] sm:$0xff]  ;;  %v509_v28 = vrot.slane %v11581_v46, 1 }
  0x6d   : > { %v511_v51 = vrot.slane %v11585_v55, 1 }
  0x6e   : > { %v11607_v9 = vsel %vm530_vm4, %v509_v28, %v510_v48  ;;  %v11611_v0 = vsel %vm530_vm4, %v508_v59, %v509_v28 }
  0x6f   : > { %16657 = vst [vmem:[#allocation50_spill] sm:$0xff] %v11607_v9  ;;  %16658 = vst [vmem:[#allocation51_spill] sm:$0xff] %v11611_v0  ;;  %v11615_v47 = vsel %vm530_vm4, %v511_v51, %v512_v30  ;;  %v11619_v45 = vsel %vm530_vm4, %v510_v48, %v511_v51  ;;  %v11631_v28 = vpack.c.bf16 %v11607_v9, %v11611_v0  ;;  %v514_v48 = vrot.slane %v11623_v16, 1 }
  0x70   : > { %16659 = vst [vmem:[#allocation52_spill] sm:$0xff] %v11615_v47  ;;  %16660 = vst [vmem:[#allocation53_spill] sm:$0xff] %v11619_v45  ;;  %v11635_v59 = vpack.c.bf16 %v11615_v47, %v11619_v45 }
  0x71   : > { %16661 = vst [vmem:[#allocation54_spill] sm:$0xff] %v11631_v28 }
  0x72   : > { %16662 = vst [vmem:[#allocation55_spill] sm:$0xff] %v11635_v59 }
  0x73   : > { %9377 = vmatmul.mubr.msk.bf16.gmra.mrb[28].mxu0 %vm299_vm2, %v11591_v44  ;;  %v11621_v44 = vld [vmem:[#allocation2 + $0x138] sm:$0xff] }
  0x74   : > { %9380 = vmatprep.mubr.msk.bf16.mxu0 %vm299_vm2, %v11595_v57  ;;  %v11625_v57 = vld [vmem:[#allocation2 + $0x148] sm:$0xff]  ;;  %v513_v10 = vrot.slane %v11621_v44, 1 }
  0x75   : > { %v515_v51 = vrot.slane %v11625_v57, 1 }
  0x76   : > { %v11647_v9 = vsel %vm530_vm4, %v513_v10, %v514_v48  ;;  %v11651_v47 = vsel %vm530_vm4, %v512_v30, %v513_v10  ;;  %v16669_v10 = vrot.slane %v11223_v54, 2 }
  0x77   : > { %16663 = vst [vmem:[#allocation56_spill] sm:$0xff] %v11647_v9  ;;  %16664 = vst [vmem:[#allocation57_spill] sm:$0xff] %v11651_v47  ;;  %v11655_v45 = vsel %vm530_vm4, %v515_v51, %v516_v15  ;;  %v11659_v0 = vsel %vm530_vm4, %v514_v48, %v515_v51  ;;  %v11672_v30 = vpack.c.bf16 %v11647_v9, %v11651_v47  ;;  %v16671_v47 = vrot.slane %v11188_v29, 2 }
  0x78   : > { %16665 = vst [vmem:[#allocation58_spill] sm:$0xff] %v11655_v45  ;;  %16666 = vst [vmem:[#allocation59_spill] sm:$0xff] %v11659_v0  ;;  %v11676_v48 = vpack.c.bf16 %v11655_v45, %v11659_v0  ;;  %v11687_v9 = vsel %vm639_vm5, %v16669_v10, %v591_v63  ;;  %v11717_v0 = vld [vmem:[#allocation2 + $0x178] sm:$0xff] }
  0x79   : > { %16667 = vst [vmem:[#allocation60_spill] sm:$0xff] %v11672_v30  ;;  %16670 = vst [vmem:[#allocation62_spill] sm:$0xff] %v11687_v9  ;;  %v11693_v45 = vsel %vm639_vm5, %v591_v63, %v16671_v47 }
  0x7a   : > { %16668 = vst [vmem:[#allocation61_spill] sm:$0xff] %v11676_v48  ;;  %16672 = vst [vmem:[#allocation63_spill] sm:$0xff] %v11693_v45 }
  0x7b   : > { %9381 = vmatmul.mubr.msk.bf16.gmra.mrb[32].mxu0 %vm299_vm2, %v11631_v28  ;;  %v11661_v28 = vld [vmem:[#allocation2 + $0x158] sm:$0xff] }
  0x7c   : > { %9384 = vmatprep.mubr.msk.bf16.mxu0 %vm299_vm2, %v11635_v59  ;;  %v11665_v59 = vld [vmem:[#allocation2 + $0x168] sm:$0xff]  ;;  %v517_v51 = vrot.slane %v11661_v28, 1 }
  0x7d   : > { %v519_v37 = vrot.slane %v11665_v59, 1 }
  0x7e   : > { %v11703_v12 = vsel %vm530_vm4, %v517_v51, %v518_v39  ;;  %v11707_v10 = vsel %vm530_vm4, %v516_v15, %v517_v51  ;;  %v521_v51 = vrot.slane %v11717_v0, 1 }
  0x7f   : > { %v11711_v63 = vsel %vm530_vm4, %v519_v37, %v520_v62  ;;  %v11715_v47 = vsel %vm530_vm4, %v518_v39, %v519_v37 }
  0x80   : > { %16673 = vst [vmem:[#allocation64_spill] sm:$0xff] %v11711_v63  ;;  %16674 = vst [vmem:[#allocation65_spill] sm:$0xff] %v11715_v47  ;;  %v11727_v15 = vpack.c.bf16 %v11711_v63, %v11715_v47  ;;  %v11743_v39 = vsel %vm530_vm4, %v520_v62, %v521_v51  ;;  %v1445_v62 = vsel %vm817_vm0, %v11307_v36, 0  ;;  %v11784_v36 = vpack.c.bf16 %v11332_v42, %v11328_v41  ;;  %v11926_v47 = vld [vmem:[%s16117_s1 + $0x8] sm:$0x3] }
  0x81   : > { %16678 = vst [vmem:[#allocation69_spill] sm:$0xff] %v11743_v39 }
  0x82   : > { %16676 = vst [vmem:[#allocation67_spill] sm:$0xff] %v11727_v15  ;;  %16683 = vst [vmem:[#allocation74_spill] sm:$0xff] %v11784_v36 }
  0x83   : > { %9385 = vmatmul.mubr.msk.bf16.gmra.mrb[36].mxu0 %vm299_vm2, %v11672_v30  ;;  %v11719_v30 = vld [vmem:[#allocation2 + $0x180] sm:$0xff] }
  0x84   : > { %9388 = vmatprep.mubr.msk.bf16.mxu0 %vm299_vm2, %v11676_v48  ;;  %v11723_v48 = vpack.c.bf16 %v11703_v12, %v11707_v10  ;;  %v16181_v11 = vrot.slane %v11719_v30, 1 }
  0x86   : > { %16675 = vst [vmem:[#allocation66_spill] sm:$0xff] %v11723_v48  ;;  %v11739_v37 = vsel %vm530_vm4, %v521_v51, %v16181_v11  ;;  %v695_v11 = vpack.c.bf16 %v11219_v52, %v11250_v6  ;;  %v8518_v51 = vld [vmem:[%s16117_s1 + $0x6] sm:$0x3] }
  0x87   : > { %16677 = vst [vmem:[#allocation68_spill] sm:$0xff] %v11739_v37  ;;  %v11747_v63 = vpack.c.bf16 %v11739_v37, %v11743_v39  ;;  %v587_v37 = vrot.slane %v11250_v6, 2  ;;  %v11897_v39 = vpack.c.bf16 %v11717_v0, %v11352_v1 }
  0x89   : > { %16679 = vst [vmem:[#allocation70_spill] sm:$0xff] %v11747_v63  ;;  %16700 = vst [vmem:[#allocation91_spill] sm:$0xff] %v11897_v39 }
  0x8b   : > { %9389 = vmatmul.mubr.msk.bf16.gmra.mrb[40].mxu0 %vm299_vm2, %v11723_v48  ;;  %v694_v48 = vpack.c.bf16 %v11227_v58, %v11248_v5 }
  0x8c   : > { %9392 = vmatprep.mubr.msk.bf16.mxu0 %vm299_vm2, %v11727_v15  ;;  %v696_v15 = vpack.c.bf16 %v11223_v54, %v11221_v53 }
  0x93   : > { %9393 = vmatmul.mubr.msk.bf16.gmra.mrb[44].mxu0 %vm299_vm2, %v11747_v63  ;;  %v11772_v63 = vpack.c.bf16 %v11267_v14, %v11265_v13 }
  0x94   : > { %9398 = vmatprep.mubr.msk.bf16.mxu0 %vm299_vm2, %v694_v48  ;;  %v11768_v48 = vpack.c.bf16 %v11188_v29, %v11216_v50 }
  0x95   : > { %16681 = vst [vmem:[#allocation72_spill] sm:$0xff] %v11772_v63 }
  0x96   : > { %16680 = vst [vmem:[#allocation71_spill] sm:$0xff] %v11768_v48 }
  0x9b   : > { %9399 = vmatmul.mubr.msk.bf16.vlgmr.msra.gmra.mrb[0].mxu0 %vm299_vm2, %v695_v11  ;;  %v11780_v11 = vpack.c.bf16 %v11326_v40, %v11252_v7 }
  0x9c   : > { %9447 = vmatpush3.bf16.msra.mxu0 %v1445_v62  ;;  %9402 = vmatprep.mubr.msk.bf16.mxu0 %vm299_vm2, %v696_v15  ;;  %v11792_v15 = vpack.c.bf16 %v11381_v18, %v11334_v43  ;;  %v11796_v62 = vpack.c.bf16 %v11385_v20, %v11383_v19 }
  0x9d   : > { %11017 = vmatprep.subr.msk.bf16.mxu0 %vm817_vm0, %v8518_v51  ;;  %16682 = vst [vmem:[#allocation73_spill] sm:$0xff] %v11780_v11 }
  0x9e   : > { %16684 = vst [vmem:[#allocation75_spill] sm:$0xff] %v11792_v15  ;;  %16685 = vst [vmem:[#allocation76_spill] sm:$0xff] %v11796_v62 }
  0xa3   : > { %9403 = vmatmul.mubr.msk.bf16.gmra.mrb[4].mxu0 %vm299_vm2, %v11768_v48  ;;  %v586_v48 = vrot.slane %v11227_v58, 2  ;;  %v588_v58 = vrot.slane %v11219_v52, 2 }
  0xa4   : > { %9406 = vmatprep.mubr.msk.bf16.mxu0 %vm299_vm2, %v11772_v63  ;;  %v16206_v63 = vrot.slane %v11248_v5, 2 }
  0xab   : > { %9407 = vmatmul.mubr.msk.bf16.gmra.mrb[8].mxu0 %vm299_vm2, %v11780_v11  ;;  %v11804_v11 = vpack.c.bf16 %v11421_v33, %v11387_v21 }
  0xac   : > { %9410 = vmatprep.mubr.msk.bf16.mxu0 %vm299_vm2, %v11784_v36  ;;  %v11808_v36 = vpack.c.bf16 %v11425_v35, %v11423_v34 }
  0xad   : > { %16686 = vst [vmem:[#allocation77_spill] sm:$0xff] %v11804_v11 }
  0xae   : > { %16687 = vst [vmem:[#allocation78_spill] sm:$0xff] %v11808_v36 }
  0xb3   : > { %9411 = vmatmul.mubr.msk.bf16.gmra.mrb[12].mxu0 %vm299_vm2, %v11792_v15  ;;  %v11816_v15 = vpack.c.bf16 %v11461_v2, %v11427_v3 }
  0xb4   : > { %9414 = vmatprep.mubr.msk.bf16.mxu0 %vm299_vm2, %v11796_v62  ;;  %v11820_v62 = vpack.c.bf16 %v11465_v8, %v11463_v4 }
  0xb5   : > { %16688 = vst [vmem:[#allocation79_spill] sm:$0xff] %v11816_v15 }
  0xb6   : > { %16689 = vst [vmem:[#allocation80_spill] sm:$0xff] %v11820_v62 }
  0xbb   : > { %9415 = vmatmul.mubr.msk.bf16.gmra.mrb[16].mxu0 %vm299_vm2, %v11804_v11  ;;  %v11828_v11 = vpack.c.bf16 %v11501_v25, %v11467_v24 }
  0xbc   : > { %9418 = vmatprep.mubr.msk.bf16.mxu0 %vm299_vm2, %v11808_v36  ;;  %v11832_v36 = vpack.c.bf16 %v11505_v26, %v11503_v23 }
  0xbd   : > { %16690 = vst [vmem:[#allocation81_spill] sm:$0xff] %v11828_v11 }
  0xbe   : > { %16691 = vst [vmem:[#allocation82_spill] sm:$0xff] %v11832_v36 }
  0xc3   : > { %9419 = vmatmul.mubr.msk.bf16.gmra.mrb[20].mxu0 %vm299_vm2, %v11816_v15  ;;  %v11840_v15 = vpack.c.bf16 %v11541_v56, %v11507_v22 }
  0xc4   : > { %9422 = vmatprep.mubr.msk.bf16.mxu0 %vm299_vm2, %v11820_v62  ;;  %v11844_v62 = vpack.c.bf16 %v11545_v27, %v11543_v60 }
  0xc5   : > { %16692 = vst [vmem:[#allocation83_spill] sm:$0xff] %v11840_v15 }
  0xc6   : > { %16693 = vst [vmem:[#allocation84_spill] sm:$0xff] %v11844_v62 }
  0xcb   : > { %9423 = vmatmul.mubr.msk.bf16.gmra.mrb[24].mxu0 %vm299_vm2, %v11828_v11  ;;  %v11852_v11 = vpack.c.bf16 %v11581_v46, %v11547_v61 }
  0xcc   : > { %9426 = vmatprep.mubr.msk.bf16.mxu0 %vm299_vm2, %v11832_v36  ;;  %v11856_v36 = vpack.c.bf16 %v11585_v55, %v11583_v31 }
  0xcd   : > { %16694 = vst [vmem:[#allocation85_spill] sm:$0xff] %v11852_v11 }
  0xce   : > { %16695 = vst [vmem:[#allocation86_spill] sm:$0xff] %v11856_v36 }
  0xd3   : > { %9427 = vmatmul.mubr.msk.bf16.gmra.mrb[28].mxu0 %vm299_vm2, %v11840_v15  ;;  %v11864_v15 = vpack.c.bf16 %v11621_v44, %v11587_v32 }
  0xd4   : > { %9430 = vmatprep.mubr.msk.bf16.mxu0 %vm299_vm2, %v11844_v62  ;;  %v11868_v62 = vpack.c.bf16 %v11625_v57, %v11623_v16 }
  0xd5   : > { %16696 = vst [vmem:[#allocation87_spill] sm:$0xff] %v11864_v15 }
  0xd6   : > { %16697 = vst [vmem:[#allocation88_spill] sm:$0xff] %v11868_v62 }
  0xdb   : > { %9431 = vmatmul.mubr.msk.bf16.gmra.mrb[32].mxu0 %vm299_vm2, %v11852_v11  ;;  %v11876_v11 = vpack.c.bf16 %v11661_v28, %v11627_v17 }
  0xdc   : > { %9434 = vmatprep.mubr.msk.bf16.mxu0 %vm299_vm2, %v11856_v36  ;;  %v11880_v36 = vpack.c.bf16 %v11665_v59, %v11663_v38 }
  0xdd   : > { %16698 = vst [vmem:[#allocation89_spill] sm:$0xff] %v11876_v11 }
  0xde   : > { %16699 = vst [vmem:[#allocation90_spill] sm:$0xff] %v11880_v36 }
  0xe3   : > { %9435 = vmatmul.mubr.msk.bf16.gmra.mrb[36].mxu0 %vm299_vm2, %v11864_v15  ;;  %v692_v15 = vsel %vm639_vm5, %v16206_v63, %v586_v48  ;;  %v16702_v63 = vrot.slane %v11223_v54, 2 }
  0xe4   : > { %9438 = vmatprep.mubr.msk.bf16.mxu0 %vm299_vm2, %v11868_v62  ;;  %v691_v62 = vsel %vm639_vm5, %v586_v48, %v587_v37 }
  0xe5   : > { %v1346_v6 = vpack.c.bf16 %v691_v62, %v692_v15 }
  0xeb   : > { %9439 = vmatmul.mubr.msk.bf16.gmra.mrb[40].mxu0 %vm299_vm2, %v11876_v11  ;;  %v589_v11 = vrot.slane %v11221_v53, 2 }
  0xec   : > { %9442 = vmatprep.mubr.msk.bf16.mxu0 %vm299_vm2, %v11880_v36  ;;  %v690_v36 = vsel %vm639_vm5, %v587_v37, %v588_v58  ;;  %v1819_v37 = vsel %vm817_vm0, %v8518_v51, 0 }
  0xed   : > { %v11908_v48 = vsel %vm639_vm5, %v588_v58, %v589_v11  ;;  %v11914_v5 = vsel %vm639_vm5, %v589_v11, %v16702_v63  ;;  %v595_v58 = vrot.slane %v11252_v7, 2  ;;  %v16704_v63 = vrot.slane %v11188_v29, 2 }
  0xee   : > { %16701 = vst [vmem:[#allocation92_spill] sm:$0xff] %v11908_v48  ;;  %16703 = vst [vmem:[#allocation93_spill] sm:$0xff] %v11914_v5  ;;  %v1347_v15 = vpack.c.bf16 %v11908_v48, %v690_v36  ;;  %v1348_v62 = vpack.c.bf16 %v11687_v9, %v11914_v5  ;;  %v598_v9 = vrot.slane %v11332_v42, 2  ;;  %v603_v5 = vrot.slane %v11387_v21, 2 }
  0xef   : > { %v615_v48 = vrot.slane %v11507_v22, 2 }
  0xf3   : > { %9443 = vmatmul.mubr.msk.bf16.gmra.mrb[44].mxu0 %vm299_vm2, %v11897_v39  ;;  %v593_v39 = vrot.slane %v11265_v13, 2 }
  0xf4   : > { %9448 = vmatprep.mubr.msk.bf16.mxu0 %vm299_vm2, %v1346_v6  ;;  %v594_v6 = vrot.slane %v11267_v14, 2 }
  0xf5   : > { %v11934_v11 = vsel %vm639_vm5, %v16704_v63, %v593_v39  ;;  %v597_v63 = vrot.slane %v11328_v41, 2 }
  0xf6   : > { %16705 = vst [vmem:[#allocation94_spill] sm:$0xff] %v11934_v11  ;;  %v11938_v51 = vsel %vm639_vm5, %v594_v6, %v595_v58  ;;  %v11942_v36 = vsel %vm639_vm5, %v593_v39, %v594_v6  ;;  %v599_v39 = vrot.slane %v11334_v43, 2 }
  0xf7   : > { %16706 = vst [vmem:[#allocation95_spill] sm:$0xff] %v11938_v51  ;;  %16707 = vst [vmem:[#allocation96_spill] sm:$0xff] %v11942_v36 }
  0xfb   : > { %9449 = vmatmul.mubr.msk.bf16.vlgmr.msra.gmra.mrb[0].mxu0 %vm299_vm2, %v1347_v15  ;;  %v11948_v15 = vpack.c.bf16 %v11934_v11, %v11693_v45  ;;  %v11972_v45 = vsel %vm639_vm5, %v598_v9, %v599_v39  ;;  %v600_v11 = vrot.slane %v11381_v18, 2 }
  0xfc   : > { %9497 = vmatpush3.bf16.msra.mxu0 %v1819_v37  ;;  %9452 = vmatprep.mubr.msk.bf16.mxu0 %vm299_vm2, %v1348_v62  ;;  %v11952_v62 = vpack.c.bf16 %v11938_v51, %v11942_v36  ;;  %v596_v37 = vrot.slane %v11326_v40, 2  ;;  %16712 = vst [vmem:[#allocation101_spill] sm:$0xff] %v11972_v45  ;;  %v11976_v36 = vsel %vm639_vm5, %v597_v63, %v598_v9 }
  0xfd   : > { %11018 = vmatprep.subr.msk.bf16.mxu0 %vm817_vm0, %v11926_v47  ;;  %16708 = vst [vmem:[#allocation97_spill] sm:$0xff] %v11948_v15  ;;  %16713 = vst [vmem:[#allocation102_spill] sm:$0xff] %v11976_v36 }
  0xfe   : > { %16709 = vst [vmem:[#allocation98_spill] sm:$0xff] %v11952_v62  ;;  %v11964_v6 = vsel %vm639_vm5, %v596_v37, %v597_v63  ;;  %v11968_v51 = vsel %vm639_vm5, %v595_v58, %v596_v37  ;;  %v601_v58 = vrot.slane %v11383_v19, 2  ;;  %v602_v37 = vrot.slane %v11385_v20, 2 }
  0xff   : > { %16710 = vst [vmem:[#allocation99_spill] sm:$0xff] %v11964_v6  ;;  %16711 = vst [vmem:[#allocation100_spill] sm:$0xff] %v11968_v51  ;;  %v12000_v63 = vsel %vm639_vm5, %v599_v39, %v600_v11  ;;  %v606_v39 = vrot.slane %v11425_v35, 2 }
 0x100   : > { %v11996_v9 = vsel %vm639_vm5, %v600_v11, %v601_v58  ;;  %16717 = vst [vmem:[#allocation106_spill] sm:$0xff] %v12000_v63  ;;  %v605_v11 = vrot.slane %v11423_v34, 2 }
 0x101   : > { %16716 = vst [vmem:[#allocation105_spill] sm:$0xff] %v11996_v9 }
 0x103   : > { %9453 = vmatmul.mubr.msk.bf16.gmra.mrb[4].mxu0 %vm299_vm2, %v11948_v15  ;;  %v11980_v15 = vpack.c.bf16 %v11964_v6, %v11968_v51  ;;  %v604_v6 = vrot.slane %v11421_v33, 2  ;;  %v607_v51 = vrot.slane %v11427_v3, 2 }
 0x104   : > { %9456 = vmatprep.mubr.msk.bf16.mxu0 %vm299_vm2, %v11952_v62  ;;  %v11984_v62 = vpack.c.bf16 %v11972_v45, %v11976_v36  ;;  %v12004_v45 = vsel %vm639_vm5, %v602_v37, %v603_v5  ;;  %v12008_v36 = vsel %vm639_vm5, %v601_v58, %v602_v37 }
 0x105   : > { %16714 = vst [vmem:[#allocation103_spill] sm:$0xff] %v11980_v15  ;;  %16718 = vst [vmem:[#allocation107_spill] sm:$0xff] %v12004_v45  ;;  %v12028_v58 = vsel %vm639_vm5, %v604_v6, %v605_v11  ;;  %v12032_v37 = vsel %vm639_vm5, %v603_v5, %v604_v6  ;;  %v608_v5 = vrot.slane %v11461_v2, 2  ;;  %v609_v6 = vrot.slane %v11463_v4, 2 }
 0x106   : > { %16715 = vst [vmem:[#allocation104_spill] sm:$0xff] %v11984_v62  ;;  %16719 = vst [vmem:[#allocation108_spill] sm:$0xff] %v12008_v36 }
 0x107   : > { %16722 = vst [vmem:[#allocation111_spill] sm:$0xff] %v12028_v58  ;;  %16723 = vst [vmem:[#allocation112_spill] sm:$0xff] %v12032_v37 }
 0x10b   : > { %9457 = vmatmul.mubr.msk.bf16.gmra.mrb[8].mxu0 %vm299_vm2, %v11980_v15  ;;  %v12012_v15 = vpack.c.bf16 %v11996_v9, %v12000_v63  ;;  %v610_v9 = vrot.slane %v11465_v8, 2  ;;  %v611_v63 = vrot.slane %v11467_v24, 2 }
 0x10c   : > { %9460 = vmatprep.mubr.msk.bf16.mxu0 %vm299_vm2, %v11984_v62  ;;  %v12016_v62 = vpack.c.bf16 %v12004_v45, %v12008_v36  ;;  %v12036_v45 = vsel %vm639_vm5, %v606_v39, %v607_v51  ;;  %v12040_v36 = vsel %vm639_vm5, %v605_v11, %v606_v39  ;;  %v12060_v11 = vsel %vm639_vm5, %v608_v5, %v609_v6 }
 0x10d   : > { %16720 = vst [vmem:[#allocation109_spill] sm:$0xff] %v12012_v15  ;;  %16724 = vst [vmem:[#allocation113_spill] sm:$0xff] %v12036_v45  ;;  %v12064_v39 = vsel %vm639_vm5, %v607_v51, %v608_v5  ;;  %v613_v51 = vrot.slane %v11503_v23, 2  ;;  %v297_v5 = vld [vmem:[%s11141_s25 + $0xf8] sm:$0xff] }
 0x10e   : > { %16721 = vst [vmem:[#allocation110_spill] sm:$0xff] %v12016_v62  ;;  %16725 = vst [vmem:[#allocation114_spill] sm:$0xff] %v12040_v36 }
 0x10f   : > { %16728 = vst [vmem:[#allocation117_spill] sm:$0xff] %v12060_v11  ;;  %16729 = vst [vmem:[#allocation118_spill] sm:$0xff] %v12064_v39 }
 0x110   : > { %331 = vst.msk [vmem:[#allocation2 + $0x189] sm:$0xff] %vm299_vm2, %v297_v5 }
 0x113   : > { %9461 = vmatmul.mubr.msk.bf16.gmra.mrb[12].mxu0 %vm299_vm2, %v12012_v15  ;;  %v12044_v15 = vpack.c.bf16 %v12028_v58, %v12032_v37  ;;  %v612_v58 = vrot.slane %v11501_v25, 2  ;;  %v614_v37 = vrot.slane %v11505_v26, 2 }
 0x114   : > { %9464 = vmatprep.mubr.msk.bf16.mxu0 %vm299_vm2, %v12016_v62  ;;  %v12048_v62 = vpack.c.bf16 %v12036_v45, %v12040_v36  ;;  %v12068_v45 = vsel %vm639_vm5, %v610_v9, %v611_v63  ;;  %v12072_v36 = vsel %vm639_vm5, %v609_v6, %v610_v9 }
 0x115   : > { %16726 = vst [vmem:[#allocation115_spill] sm:$0xff] %v12044_v15  ;;  %16730 = vst [vmem:[#allocation119_spill] sm:$0xff] %v12068_v45  ;;  %v12094_v9 = vsel %vm639_vm5, %v612_v58, %v613_v51  ;;  %v12098_v6 = vsel %vm639_vm5, %v611_v63, %v612_v58  ;;  %v12106_v5 = vsel %vm639_vm5, %v613_v51, %v614_v37  ;;  %v617_v63 = vrot.slane %v11543_v60, 2 }
 0x116   : > { %16727 = vst [vmem:[#allocation116_spill] sm:$0xff] %v12048_v62  ;;  %16731 = vst [vmem:[#allocation120_spill] sm:$0xff] %v12072_v36 }
 0x117   : > { %16734 = vst [vmem:[#allocation123_spill] sm:$0xff] %v12094_v9  ;;  %16736 = vst [vmem:[#allocation125_spill] sm:$0xff] %v12106_v5  ;;  %v400_v58 = vld [vmem:[#allocation2 + $0x18f] sm:$0x1] }
 0x118   : > { %418 = vst.msk [vmem:[#allocation2 + $0x191] sm:$0x1] %vm365_vm3, %v400_v58 }
 0x11b   : > { %9465 = vmatmul.mubr.msk.bf16.gmra.mrb[16].mxu0 %vm299_vm2, %v12044_v15  ;;  %v12076_v15 = vpack.c.bf16 %v12060_v11, %v12064_v39  ;;  %v618_v11 = vrot.slane %v11545_v27, 2  ;;  %v619_v39 = vrot.slane %v11547_v61, 2 }
 0x11c   : > { %9468 = vmatprep.mubr.msk.bf16.mxu0 %vm299_vm2, %v12048_v62  ;;  %v12080_v62 = vpack.c.bf16 %v12068_v45, %v12072_v36  ;;  %v12102_v45 = vsel %vm639_vm5, %v614_v37, %v615_v48  ;;  %v616_v36 = vrot.slane %v11541_v56, 2 }
 0x11d   : > { %16732 = vst [vmem:[#allocation121_spill] sm:$0xff] %v12076_v15  ;;  %16735 = vst [vmem:[#allocation124_spill] sm:$0xff] %v12102_v45  ;;  %v12139_v58 = vsel %vm639_vm5, %v617_v63, %v618_v11 }
 0x11e   : > { %16733 = vst [vmem:[#allocation122_spill] sm:$0xff] %v12080_v62  ;;  %v12127_v37 = vsel %vm639_vm5, %v616_v36, %v617_v63  ;;  %v12131_v51 = vsel %vm639_vm5, %v615_v48, %v616_v36  ;;  %16742 = vst [vmem:[#allocation131_spill] sm:$0xff] %v12139_v58  ;;  %v621_v48 = vrot.slane %v11583_v31, 2  ;;  %v622_v36 = vrot.slane %v11585_v55, 2 }
 0x11f   : > { %16739 = vst [vmem:[#allocation128_spill] sm:$0xff] %v12127_v37  ;;  %16740 = vst [vmem:[#allocation129_spill] sm:$0xff] %v12131_v51 }
 0x123   : > { %9469 = vmatmul.mubr.msk.bf16.gmra.mrb[20].mxu0 %vm299_vm2, %v12076_v15  ;;  %v12110_v15 = vpack.c.bf16 %v12094_v9, %v12098_v6  ;;  %v623_v9 = vrot.slane %v11587_v32, 2 }
 0x124   : > { %9472 = vmatprep.mubr.msk.bf16.mxu0 %vm299_vm2, %v12080_v62  ;;  %v12114_v62 = vpack.c.bf16 %v12102_v45, %v12106_v5  ;;  %v12135_v45 = vsel %vm639_vm5, %v618_v11, %v619_v39  ;;  %v620_v5 = vrot.slane %v11581_v46, 2 }
 0x125   : > { %16737 = vst [vmem:[#allocation126_spill] sm:$0xff] %v12110_v15  ;;  %16741 = vst [vmem:[#allocation130_spill] sm:$0xff] %v12135_v45 }
 0x126   : > { %16738 = vst [vmem:[#allocation127_spill] sm:$0xff] %v12114_v62  ;;  %v12159_v11 = vsel %vm639_vm5, %v620_v5, %v621_v48  ;;  %v12163_v63 = vsel %vm639_vm5, %v619_v39, %v620_v5  ;;  %v625_v39 = vrot.slane %v11623_v16, 2  ;;  %v626_v5 = vrot.slane %v11625_v57, 2 }
 0x127   : > { %16745 = vst [vmem:[#allocation134_spill] sm:$0xff] %v12159_v11  ;;  %16746 = vst [vmem:[#allocation135_spill] sm:$0xff] %v12163_v63 }
 0x12b   : > { %9473 = vmatmul.mubr.msk.bf16.gmra.mrb[24].mxu0 %vm299_vm2, %v12110_v15  ;;  %v12143_v15 = vpack.c.bf16 %v12127_v37, %v12131_v51  ;;  %v624_v37 = vrot.slane %v11621_v44, 2  ;;  %v627_v51 = vrot.slane %v11627_v17, 2 }
 0x12c   : > { %9476 = vmatprep.mubr.msk.bf16.mxu0 %vm299_vm2, %v12114_v62  ;;  %v12147_v62 = vpack.c.bf16 %v12135_v45, %v12139_v58  ;;  %v12167_v45 = vsel %vm639_vm5, %v622_v36, %v623_v9  ;;  %v12171_v58 = vsel %vm639_vm5, %v621_v48, %v622_v36 }
 0x12d   : > { %16743 = vst [vmem:[#allocation132_spill] sm:$0xff] %v12143_v15  ;;  %16747 = vst [vmem:[#allocation136_spill] sm:$0xff] %v12167_v45  ;;  %v12191_v48 = vsel %vm639_vm5, %v624_v37, %v625_v39  ;;  %v12195_v36 = vsel %vm639_vm5, %v623_v9, %v624_v37  ;;  %v629_v9 = vrot.slane %v11663_v38, 2  ;;  %v630_v37 = vrot.slane %v11665_v59, 2 }
 0x12e   : > { %16744 = vst [vmem:[#allocation133_spill] sm:$0xff] %v12147_v62  ;;  %16748 = vst [vmem:[#allocation137_spill] sm:$0xff] %v12171_v58 }
 0x12f   : > { %16751 = vst [vmem:[#allocation140_spill] sm:$0xff] %v12191_v48 }
 0x133   : > { %9477 = vmatmul.mubr.msk.bf16.gmra.mrb[28].mxu0 %vm299_vm2, %v12143_v15  ;;  %v12175_v15 = vpack.c.bf16 %v12159_v11, %v12163_v63  ;;  %v628_v11 = vrot.slane %v11661_v28, 2  ;;  %v631_v63 = vrot.slane %v11352_v1, 2 }
 0x134   : > { %9480 = vmatprep.mubr.msk.bf16.mxu0 %vm299_vm2, %v12147_v62  ;;  %v12179_v62 = vpack.c.bf16 %v12167_v45, %v12171_v58  ;;  %v12199_v45 = vsel %vm639_vm5, %v626_v5, %v627_v51  ;;  %v12203_v58 = vsel %vm639_vm5, %v625_v39, %v626_v5 }
 0x135   : > { %16749 = vst [vmem:[#allocation138_spill] sm:$0xff] %v12175_v15  ;;  %16752 = vst [vmem:[#allocation141_spill] sm:$0xff] %v12199_v45  ;;  %v12223_v39 = vsel %vm639_vm5, %v628_v11, %v629_v9  ;;  %v12227_v5 = vsel %vm639_vm5, %v627_v51, %v628_v11  ;;  %v16267_v51 = vrot.slane %v11719_v30, 2 }
 0x136   : > { %16750 = vst [vmem:[#allocation139_spill] sm:$0xff] %v12179_v62  ;;  %16753 = vst [vmem:[#allocation142_spill] sm:$0xff] %v12203_v58 }
 0x13b   : > { %9481 = vmatmul.mubr.msk.bf16.gmra.mrb[32].mxu0 %vm299_vm2, %v12175_v15  ;;  %v12207_v15 = vpack.c.bf16 %v12191_v48, %v12195_v36  ;;  %v632_v48 = vrot.slane %v11717_v0, 2 }
 0x13c   : > { %9484 = vmatprep.mubr.msk.bf16.mxu0 %vm299_vm2, %v12179_v62  ;;  %v12211_v62 = vpack.c.bf16 %v12199_v45, %v12203_v58  ;;  %v12231_v45 = vsel %vm639_vm5, %v630_v37, %v631_v63  ;;  %v12235_v58 = vsel %vm639_vm5, %v629_v9, %v630_v37 }
 0x13d   : > { %16754 = vst [vmem:[#allocation143_spill] sm:$0xff] %v12207_v15  ;;  %v12255_v11 = vsel %vm639_vm5, %v632_v48, %v16267_v51  ;;  %v12259_v9 = vsel %vm639_vm5, %v631_v63, %v632_v48  ;;  %v1721_v51 = vpack.c.bf16 %v11216_v50, %v11223_v54  ;;  %v2193_v63 = vsel %vm817_vm0, %v11926_v47, 0  ;;  %v8568_v48 = vld [vmem:[%s16117_s1 + $0xa] sm:$0x3]  ;;  %v16772_v47 = vld [vmem:[#allocation23_spill] sm:$0xff] }
 0x13e   : > { %16755 = vst [vmem:[#allocation144_spill] sm:$0xff] %v12211_v62  ;;  %v12263_v37 = vpack.c.bf16 %v12255_v11, %v12259_v9  ;;  %v1723_v50 = vpack.c.bf16 %v11252_v7, %v11267_v14  ;;  %v1727_v54 = vpack.c.bf16 %v11387_v21, %v11385_v20  ;;  %v1728_v7 = vpack.c.bf16 %v11423_v34, %v11421_v33  ;;  %v12343_v33 = vld [vmem:[#allocation2 + $0x188] sm:$0xff]  ;;  %v16758_v34 = vld [vmem:[#allocation7_spill] sm:$0xff] }
 0x13f   : > { %v1730_v14 = vpack.c.bf16 %v11463_v4, %v11461_v2  ;;  %v1736_v20 = vpack.c.bf16 %v11583_v31, %v11581_v46  ;;  %v1737_v21 = vpack.c.bf16 %v11587_v32, %v11585_v55  ;;  %v1740_v31 = vpack.c.bf16 %v11663_v38, %v11661_v28  ;;  %v8593_v2 = vld [vmem:[%s16117_s1 + $0xc] sm:$0x3]  ;;  %v16762_v4 = vld [vmem:[#allocation5_spill] sm:$0xff] }
 0x140   : > { %v1741_v32 = vpack.c.bf16 %v11352_v1, %v11665_v59  ;;  %v16760_v1 = vld [vmem:[#allocation9_spill] sm:$0xff]  ;;  %v16771_v59 = vld [vmem:[#allocation20_spill] sm:$0xff] }
 0x141   : > { %v16768_v46 = vld [vmem:[#allocation17_spill] sm:$0xff] }
 0x143   : > { %9485 = vmatmul.mubr.msk.bf16.gmra.mrb[36].mxu0 %vm299_vm2, %v12207_v15  ;;  %v12239_v15 = vpack.c.bf16 %v12223_v39, %v12227_v5 }
 0x144   : > { %9488 = vmatprep.mubr.msk.bf16.mxu0 %vm299_vm2, %v12211_v62  ;;  %v12243_v62 = vpack.c.bf16 %v12231_v45, %v12235_v58 }
 0x145   : > { %16756 = vst [vmem:[#allocation145_spill] sm:$0xff] %v12239_v15 }
 0x146   : > { %16757 = vst [vmem:[#allocation146_spill] sm:$0xff] %v12243_v62 }
 0x14b   : > { %9489 = vmatmul.mubr.msk.bf16.gmra.mrb[40].mxu0 %vm299_vm2, %v12239_v15  ;;  %v1720_v15 = vpack.c.bf16 %v11221_v53, %v11219_v52  ;;  %v1725_v52 = vpack.c.bf16 %v11334_v43, %v11332_v42  ;;  %v1726_v53 = vpack.c.bf16 %v11383_v19, %v11381_v18  ;;  %v364_v42 = vld [vmem:[#allocation2 + $0x19a] sm:$0x1]  ;;  %v1733_v43 = vpack.c.bf16 %v11507_v22, %v11505_v26  ;;  %v16766_v26 = vld [vmem:[#allocation15_spill] sm:$0xff] }
 0x14c   : > { %9492 = vmatprep.mubr.msk.bf16.mxu0 %vm299_vm2, %v12243_v62  ;;  %v1722_v62 = vpack.c.bf16 %v11265_v13, %v11188_v29  ;;  %v1724_v29 = vpack.c.bf16 %v11328_v41, %v11326_v40  ;;  %v1729_v13 = vpack.c.bf16 %v11427_v3, %v11425_v35  ;;  %v1731_v40 = vpack.c.bf16 %v11467_v24, %v11465_v8  ;;  %v16759_v35 = vld [vmem:[#allocation8_spill] sm:$0xff] }
 0x14d   : > { %v1732_v41 = vpack.c.bf16 %v11503_v23, %v11501_v25  ;;  %383 = vst.msk [vmem:[#allocation2 + $0x198] sm:$0x1] %vm365_vm3, %v364_v42  ;;  %v1734_v18 = vpack.c.bf16 %v11543_v60, %v11541_v56  ;;  %v1735_v19 = vpack.c.bf16 %v11547_v61, %v11545_v27  ;;  %v1738_v22 = vpack.c.bf16 %v11623_v16, %v11621_v44  ;;  %v16763_v8 = vld [vmem:[#allocation4_spill] sm:$0xff]  ;;  %v16765_v25 = vld [vmem:[#allocation10_spill] sm:$0xff] }
 0x14e   : > { %v1739_v23 = vpack.c.bf16 %v11627_v17, %v11625_v57  ;;  %v1742_v16 = vpack.c.bf16 %v11719_v30, %v11717_v0  ;;  %v12345_v17 = vld [vmem:[#allocation2 + $0x190] sm:$0xff]  ;;  %v2094_v3 = vpack.c.bf16 %v16759_v35, %v16758_v34  ;;  %v2567_v61 = vsel %vm817_vm0, %v8568_v48, 0  ;;  %v16767_v27 = vld [vmem:[#allocation14_spill] sm:$0xff]  ;;  %v16769_v44 = vld [vmem:[#allocation16_spill] sm:$0xff] }
 0x14f   : > { %v1743_v38 = vpack.c.bf16 %v12345_v17, %v12343_v33  ;;  %v16761_v0 = vld [vmem:[#allocation11_spill] sm:$0xff]  ;;  %v16764_v24 = vpack.c.bf16 %v16762_v4, %v16763_v8  ;;  %v2097_v56 = vpack.c.bf16 %v16766_v26, %v16765_v25  ;;  %v2098_v55 = vpack.c.bf16 %v16768_v46, %v16767_v27  ;;  %v16770_v57 = vld [vmem:[#allocation21_spill] sm:$0xff]  ;;  %v16791_v35 = vld [vmem:[#allocation50_spill] sm:$0xff] }
 0x150   : > { %v2096_v60 = vpack.c.bf16 %v16761_v0, %v16760_v1  ;;  %v2099_v28 = vpack.c.bf16 %v16770_v57, %v16769_v44  ;;  %v16793_v0 = vld [vmem:[#allocation52_spill] sm:$0xff]  ;;  %v16796_v8 = vld [vmem:[#allocation59_spill] sm:$0xff]  ;;  %v16797_v25 = vld [vmem:[#allocation58_spill] sm:$0xff]  ;;  %v523_v46 = vrot.slane %v12343_v33, 1 }
 0x151   : > { %v16795_v4 = vld [vmem:[#allocation56_spill] sm:$0xff]  ;;  %v2113_v26 = vpack.c.bf16 %v11707_v10, %v16797_v25 }
 0x152   : > { %v16825_v25 = vld [vmem:[#allocation120_spill] sm:$0xff] }
 0x153   : > { %9493 = vmatmul.mubr.msk.bf16.gmra.mrb[44].mxu0 %vm299_vm2, %v12263_v37 }
 0x154   : > { %9498 = vmatprep.mubr.msk.bf16.mxu0 %vm299_vm2, %v1720_v15  ;;  %v2100_v15 = vpack.c.bf16 %v16772_v47, %v16771_v59  ;;  %v12426_v57 = vld [vmem:[#allocation2 + $0x198] sm:$0xff]  ;;  %v16801_v59 = vld [vmem:[#allocation69_spill] sm:$0xff] }
 0x155   : > { %v16802_v47 = vld [vmem:[#allocation68_spill] sm:$0xff] }
 0x15b   : > { %9499 = vmatmul.mubr.msk.bf16.vlgmr.msra.gmra.mrb[0].mxu0 %vm299_vm2, %v1721_v51  ;;  %v16774_v51 = vld [vmem:[#allocation27_spill] sm:$0xff] }
 0x15c   : > { %9547 = vmatpush3.bf16.msra.mxu0 %v2193_v63  ;;  %9502 = vmatprep.mubr.msk.bf16.mxu0 %vm299_vm2, %v1722_v62  ;;  %v16773_v62 = vld [vmem:[#allocation22_spill] sm:$0xff] }
 0x15d   : > { %11019 = vmatprep.subr.msk.bf16.mxu0 %vm817_vm0, %v8568_v48  ;;  %v2101_v63 = vpack.c.bf16 %v16774_v51, %v16773_v62  ;;  %v16775_v48 = vld [vmem:[#allocation26_spill] sm:$0xff]  ;;  %v525_v62 = vrot.slane %v12426_v57, 1 }
 0x163   : > { %9503 = vmatmul.mubr.msk.bf16.gmra.mrb[4].mxu0 %vm299_vm2, %v1723_v50  ;;  %v16776_v50 = vld [vmem:[#allocation29_spill] sm:$0xff] }
 0x164   : > { %9506 = vmatprep.mubr.msk.bf16.mxu0 %vm299_vm2, %v1724_v29  ;;  %v2102_v29 = vpack.c.bf16 %v16776_v50, %v16775_v48  ;;  %v16803_v50 = vld [vmem:[#allocation92_spill] sm:$0xff] }
 0x16b   : > { %9507 = vmatmul.mubr.msk.bf16.gmra.mrb[8].mxu0 %vm299_vm2, %v1725_v52  ;;  %v16777_v52 = vld [vmem:[#allocation28_spill] sm:$0xff] }
 0x16c   : > { %9510 = vmatprep.mubr.msk.bf16.mxu0 %vm299_vm2, %v1726_v53  ;;  %v16778_v53 = vld [vmem:[#allocation33_spill] sm:$0xff] }
 0x173   : > { %9511 = vmatmul.mubr.msk.bf16.gmra.mrb[12].mxu0 %vm299_vm2, %v1727_v54  ;;  %v2103_v54 = vpack.c.bf16 %v16778_v53, %v16777_v52  ;;  %v16805_v53 = vld [vmem:[#allocation94_spill] sm:$0xff] }
 0x174   : > { %9514 = vmatprep.mubr.msk.bf16.mxu0 %vm299_vm2, %v1728_v7  ;;  %v16779_v7 = vld [vmem:[#allocation32_spill] sm:$0xff] }
 0x17b   : > { %9515 = vmatmul.mubr.msk.bf16.gmra.mrb[16].mxu0 %vm299_vm2, %v1729_v13  ;;  %v16780_v13 = vld [vmem:[#allocation35_spill] sm:$0xff] }
 0x17c   : > { %9518 = vmatprep.mubr.msk.bf16.mxu0 %vm299_vm2, %v1730_v14  ;;  %v2104_v14 = vpack.c.bf16 %v16780_v13, %v16779_v7  ;;  %v2857_v13 = vsel %vm817_vm0, %v8593_v2, 0 }
 0x183   : > { %9519 = vmatmul.mubr.msk.bf16.gmra.mrb[20].mxu0 %vm299_vm2, %v1731_v40  ;;  %v16781_v40 = vld [vmem:[#allocation34_spill] sm:$0xff] }
 0x184   : > { %9522 = vmatprep.mubr.msk.bf16.mxu0 %vm299_vm2, %v1732_v41  ;;  %v16782_v41 = vld [vmem:[#allocation39_spill] sm:$0xff] }
 0x185   : > { %v2105_v42 = vpack.c.bf16 %v16782_v41, %v16781_v40  ;;  %v16807_v40 = vld [vmem:[#allocation63_spill] sm:$0xff]  ;;  %v16808_v41 = vld [vmem:[#allocation62_spill] sm:$0xff] }
 0x18b   : > { %9523 = vmatmul.mubr.msk.bf16.gmra.mrb[24].mxu0 %vm299_vm2, %v1733_v43  ;;  %v16783_v43 = vld [vmem:[#allocation38_spill] sm:$0xff] }
 0x18c   : > { %9526 = vmatprep.mubr.msk.bf16.mxu0 %vm299_vm2, %v1734_v18  ;;  %v16784_v18 = vld [vmem:[#allocation41_spill] sm:$0xff] }
 0x193   : > { %9527 = vmatmul.mubr.msk.bf16.gmra.mrb[28].mxu0 %vm299_vm2, %v1735_v19  ;;  %v2106_v19 = vpack.c.bf16 %v16784_v18, %v16783_v43  ;;  %v16810_v43 = vld [vmem:[#allocation95_spill] sm:$0xff]  ;;  %v16811_v18 = vld [vmem:[#allocation100_spill] sm:$0xff] }
 0x194   : > { %9530 = vmatprep.mubr.msk.bf16.mxu0 %vm299_vm2, %v1736_v20  ;;  %v16785_v20 = vld [vmem:[#allocation40_spill] sm:$0xff] }
 0x19b   : > { %9531 = vmatmul.mubr.msk.bf16.gmra.mrb[32].mxu0 %vm299_vm2, %v1737_v21  ;;  %v16786_v21 = vld [vmem:[#allocation45_spill] sm:$0xff] }
 0x19c   : > { %9534 = vmatprep.mubr.msk.bf16.mxu0 %vm299_vm2, %v1738_v22  ;;  %v2107_v22 = vpack.c.bf16 %v16786_v21, %v16785_v20  ;;  %v16812_v20 = vld [vmem:[#allocation99_spill] sm:$0xff]  ;;  %v16813_v21 = vld [vmem:[#allocation102_spill] sm:$0xff] }
 0x1a3   : > { %9535 = vmatmul.mubr.msk.bf16.gmra.mrb[36].mxu0 %vm299_vm2, %v1739_v23  ;;  %v16787_v23 = vld [vmem:[#allocation44_spill] sm:$0xff] }
 0x1a4   : > { %9538 = vmatprep.mubr.msk.bf16.mxu0 %vm299_vm2, %v1740_v31  ;;  %v16788_v31 = vld [vmem:[#allocation47_spill] sm:$0xff] }
 0x1ab   : > { %9539 = vmatmul.mubr.msk.bf16.gmra.mrb[40].mxu0 %vm299_vm2, %v1741_v32  ;;  %v2108_v32 = vpack.c.bf16 %v16788_v31, %v16787_v23  ;;  %v16815_v23 = vld [vmem:[#allocation106_spill] sm:$0xff] }
 0x1ac   : > { %9542 = vmatprep.mubr.msk.bf16.mxu0 %vm299_vm2, %v1742_v16  ;;  %v16789_v16 = vld [vmem:[#allocation46_spill] sm:$0xff] }
 0x1b3   : > { %9543 = vmatmul.mubr.msk.bf16.gmra.mrb[44].mxu0 %vm299_vm2, %v1743_v38  ;;  %v16790_v38 = vld [vmem:[#allocation51_spill] sm:$0xff] }
 0x1b4   : > { %9548 = vmatprep.mubr.msk.bf16.mxu0 %vm299_vm2, %v2094_v3  ;;  %v2109_v34 = vpack.c.bf16 %v16790_v38, %v16789_v16  ;;  %v16792_v3 = vld [vmem:[#allocation53_spill] sm:$0xff]  ;;  %v16817_v16 = vld [vmem:[#allocation108_spill] sm:$0xff] }
 0x1b5   : > { %v2110_v1 = vpack.c.bf16 %v16792_v3, %v16791_v35  ;;  %v16819_v35 = vld [vmem:[#allocation112_spill] sm:$0xff] }
 0x1bb   : > { %9549 = vmatmul.mubr.msk.bf16.vlgmr.msra.gmra.mrb[0].mxu0 %vm299_vm2, %v16764_v24  ;;  %v2112_v24 = vpack.c.bf16 %v16796_v8, %v16795_v4  ;;  %v16823_v4 = vld [vmem:[#allocation118_spill] sm:$0xff] }
 0x1bc   : > { %9597 = vmatpush3.bf16.msra.mxu0 %v2567_v61  ;;  %9552 = vmatprep.mubr.msk.bf16.mxu0 %vm299_vm2, %v2096_v60  ;;  %v16794_v60 = vld [vmem:[#allocation57_spill] sm:$0xff] }
 0x1bd   : > { %11020 = vmatprep.subr.msk.bf16.mxu0 %vm817_vm0, %v8593_v2  ;;  %v2111_v61 = vpack.c.bf16 %v16794_v60, %v16793_v0  ;;  %v2472_v2 = vpack.c.bf16 %v16813_v21, %v16812_v20  ;;  %v16821_v0 = vld [vmem:[#allocation114_spill] sm:$0xff]  ;;  %v2488_v20 = vpack.c.bf16 %v12235_v58, %v12223_v39  ;;  %v634_v21 = vrot.slane %v12343_v33, 2 }
 0x1be   : > { %v635_v58 = vrot.slane %v12345_v17, 2  ;;  %v636_v39 = vrot.slane %v12426_v57, 2 }
 0x1c3   : > { %9553 = vmatmul.mubr.msk.bf16.gmra.mrb[4].mxu0 %vm299_vm2, %v2097_v56  ;;  %v16798_v56 = vld [vmem:[#allocation65_spill] sm:$0xff] }
 0x1c4   : > { %9556 = vmatprep.mubr.msk.bf16.mxu0 %vm299_vm2, %v2098_v55  ;;  %v2114_v27 = vpack.c.bf16 %v16798_v56, %v11703_v12  ;;  %v16799_v55 = vrot.slane %v11719_v30, 1  ;;  %v16826_v56 = vld [vmem:[#allocation119_spill] sm:$0xff] }
 0x1c6   : > { %v12424_v44 = vsel %vm530_vm4, %v16799_v55, %v523_v46  ;;  %v16828_v55 = vld [vmem:[#allocation125_spill] sm:$0xff] }
 0x1c7   : > { %v2116_v12 = vpack.c.bf16 %v12424_v44, %v16802_v47 }
 0x1cb   : > { %9557 = vmatmul.mubr.msk.bf16.gmra.mrb[8].mxu0 %vm299_vm2, %v2099_v28  ;;  %v16800_v28 = vld [vmem:[#allocation64_spill] sm:$0xff] }
 0x1cc   : > { %9560 = vmatprep.mubr.msk.bf16.mxu0 %vm299_vm2, %v2100_v15  ;;  %v2115_v10 = vpack.c.bf16 %v16801_v59, %v16800_v28  ;;  %v524_v15 = vrot.slane %v12345_v17, 1  ;;  %v16829_v59 = vld [vmem:[#allocation124_spill] sm:$0xff] }
 0x1ce   : > { %v12440_v51 = vsel %vm530_vm4, %v524_v15, %v525_v62 }
 0x1d3   : > { %9561 = vmatmul.mubr.msk.bf16.gmra.mrb[12].mxu0 %vm299_vm2, %v2101_v63  ;;  %v12444_v63 = vsel %vm530_vm4, %v523_v46, %v524_v15  ;;  %v16827_v46 = vld [vmem:[#allocation123_spill] sm:$0xff] }
 0x1d4   : > { %9564 = vmatprep.mubr.msk.bf16.mxu0 %vm299_vm2, %v2102_v29  ;;  %v2117_v48 = vpack.c.bf16 %v12440_v51, %v12444_v63  ;;  %v16804_v29 = vld [vmem:[#allocation93_spill] sm:$0xff]  ;;  %v2480_v28 = vpack.c.bf16 %v16828_v55, %v16827_v46  ;;  %v16832_v15 = vld [vmem:[#allocation131_spill] sm:$0xff]  ;;  %v200_v55 = vld [vmem:[%s16119_s3 + $0x8] sm:$0xff] }
 0x1d5   : > { %v2468_v52 = vpack.c.bf16 %v16804_v29, %v16803_v50  ;;  %v401_v50 = vld [vmem:[#allocation2 + $0x1a7] sm:$0x1]  ;;  %v16834_v29 = vld [vmem:[#allocation135_spill] sm:$0xff] }
 0x1d6   : > { %419 = vst.msk [vmem:[#allocation2 + $0x1a9] sm:$0x1] %vm365_vm3, %v401_v50  ;;  %v201_v46 = vld [vmem:[%s16119_s3 + $0x10] sm:$0xff]  ;;  %v206_v50 = vld [vmem:[%s16119_s3 + $0x38] sm:$0xff] }
 0x1db   : > { %9565 = vmatmul.mubr.msk.bf16.gmra.mrb[16].mxu0 %vm299_vm2, %v2103_v54  ;;  %v16806_v54 = vld [vmem:[#allocation96_spill] sm:$0xff] }
 0x1dc   : > { %9568 = vmatprep.mubr.msk.bf16.mxu0 %vm299_vm2, %v2104_v14  ;;  %v2470_v7 = vpack.c.bf16 %v16806_v54, %v16805_v53  ;;  %v8618_v14 = vld [vmem:[%s16117_s1 + $0xe] sm:$0x3]  ;;  %v16836_v54 = vld [vmem:[#allocation137_spill] sm:$0xff] }
 0x1dd   : > { %v16835_v53 = vld [vmem:[#allocation134_spill] sm:$0xff] }
 0x1e3   : > { %9569 = vmatmul.mubr.msk.bf16.gmra.mrb[20].mxu0 %vm299_vm2, %v2105_v42  ;;  %v16809_v42 = vpack.c.bf16 %v16807_v40, %v16808_v41  ;;  %v16838_v41 = vld [vmem:[#allocation140_spill] sm:$0xff] }
 0x1e4   : > { %9572 = vmatprep.mubr.msk.bf16.mxu0 %vm299_vm2, %v2106_v19  ;;  %v2471_v19 = vpack.c.bf16 %v16811_v18, %v16810_v43  ;;  %v16840_v18 = vld [vmem:[#allocation141_spill] sm:$0xff] }
 0x1eb   : > { %9573 = vmatmul.mubr.msk.bf16.gmra.mrb[24].mxu0 %vm299_vm2, %v2107_v22  ;;  %v16814_v22 = vld [vmem:[#allocation101_spill] sm:$0xff] }
 0x1ec   : > { %9576 = vmatprep.mubr.msk.bf16.mxu0 %vm299_vm2, %v2108_v32  ;;  %v2473_v31 = vpack.c.bf16 %v16815_v23, %v16814_v22  ;;  %v16816_v32 = vld [vmem:[#allocation105_spill] sm:$0xff]  ;;  %v2489_v22 = vpack.c.bf16 %v12259_v9, %v12231_v45  ;;  %v12538_v23 = vsel %vm639_vm5, %v635_v58, %v636_v39  ;;  %v12542_v45 = vsel %vm639_vm5, %v634_v21, %v635_v58  ;;  %v16842_v9 = vld [vmem:[#allocation71_spill] sm:$0xff] }
 0x1ed   : > { %v2474_v38 = vpack.c.bf16 %v16817_v16, %v16816_v32  ;;  %v12553_v32 = vld [vmem:[%s16117_s1 + $0x10] sm:$0x3]  ;;  %v16843_v16 = vld [vmem:[#allocation72_spill] sm:$0xff] }
 0x1ee   : > { %v3437_v58 = vsel %vm817_vm0, %v12553_v32, 0 }
 0x1f3   : > { %9577 = vmatmul.mubr.msk.bf16.gmra.mrb[28].mxu0 %vm299_vm2, %v2109_v34  ;;  %v16818_v34 = vld [vmem:[#allocation107_spill] sm:$0xff] }
 0x1f4   : > { %9580 = vmatprep.mubr.msk.bf16.mxu0 %vm299_vm2, %v2110_v1  ;;  %v2475_v3 = vpack.c.bf16 %v16819_v35, %v16818_v34  ;;  %v16820_v1 = vld [vmem:[#allocation111_spill] sm:$0xff]  ;;  %v16845_v34 = vld [vmem:[#allocation74_spill] sm:$0xff] }
 0x1f5   : > { %v2476_v60 = vpack.c.bf16 %v16821_v0, %v16820_v1  ;;  %v16846_v35 = vld [vmem:[#allocation75_spill] sm:$0xff]  ;;  %v16849_v1 = vld [vmem:[#allocation78_spill] sm:$0xff] }
 0x1f6   : > { %v16850_v0 = vld [vmem:[#allocation79_spill] sm:$0xff] }
 0x1fb   : > { %9581 = vmatmul.mubr.msk.bf16.gmra.mrb[32].mxu0 %vm299_vm2, %v2111_v61  ;;  %v16822_v61 = vld [vmem:[#allocation113_spill] sm:$0xff] }
 0x1fc   : > { %9584 = vmatprep.mubr.msk.bf16.mxu0 %vm299_vm2, %v2112_v24  ;;  %v2477_v8 = vpack.c.bf16 %v16823_v4, %v16822_v61  ;;  %v16824_v24 = vld [vmem:[#allocation117_spill] sm:$0xff]  ;;  %v16853_v4 = vld [vmem:[#allocation82_spill] sm:$0xff] }
 0x1fd   : > { %v16852_v61 = vld [vmem:[#allocation81_spill] sm:$0xff] }
 0x203   : > { %9585 = vmatmul.mubr.msk.bf16.gmra.mrb[36].mxu0 %vm299_vm2, %v2113_v26  ;;  %v2478_v26 = vpack.c.bf16 %v16825_v25, %v16824_v24  ;;  %v16855_v24 = vld [vmem:[#allocation84_spill] sm:$0xff]  ;;  %v199_v25 = vld [vmem:[%s16119_s3] sm:$0xff] }
 0x204   : > { %9588 = vmatprep.mubr.msk.bf16.mxu0 %vm299_vm2, %v2114_v27  ;;  %v2479_v27 = vpack.c.bf16 %v12098_v6, %v16826_v56  ;;  %v16833_v6 = vld [vmem:[#allocation130_spill] sm:$0xff]  ;;  %v11059_v56 = vmov 0  }
 0x205   : > { %11042 = vset.pattern.permute.xlu0 %v11059_v56  ;;  %11043 = vset.pattern.permute.xlu1 %v11059_v56  ;;  %v232_v56 = vld [vmem:[%s16119_s3 + $0x108] sm:$0xff] }
 0x206   : > { %3714 = vperm.xlu0 %11042, %v199_v25   ;;  %3724 = vperm.xlu1 %11043, %v201_v46   ;;  %v231_v25 = vld [vmem:[%s16119_s3 + $0x100] sm:$0xff]  ;;  %v16871_v46 = vld [vmem:[#allocation36_spill] sm:$0xff] }
 0x20a   : > { %3719 = vperm.xlu0 %11042, %v200_v55   ;;  %v234_v55 = vld [vmem:[%s16119_s3 + $0x118] sm:$0xff] }
 0x20b   : > { %9589 = vmatmul.mubr.msk.bf16.gmra.mrb[40].mxu0 %vm299_vm2, %v2115_v10  ;;  %v16830_v10 = vld [vmem:[#allocation129_spill] sm:$0xff] }
 0x20c   : > { %9592 = vmatprep.mubr.msk.bf16.mxu0 %vm299_vm2, %v2116_v12  ;;  %v2481_v47 = vpack.c.bf16 %v16830_v10, %v16829_v59  ;;  %v16831_v12 = vld [vmem:[#allocation128_spill] sm:$0xff]  ;;  %v203_v10 = vld [vmem:[%s16119_s3 + $0x20] sm:$0xff] }
 0x20d   : > { %v202_v59 = vld [vmem:[%s16119_s3 + $0x18] sm:$0xff] }
 0x20e   : > { %3729 = vperm.xlu1 %11043, %v202_v59   ;;  %3734 = vperm.xlu0 %11042, %v203_v10   ;;  %v16872_v59 = vld [vmem:[#allocation37_spill] sm:$0xff]  ;;  %v236_v10 = vld [vmem:[%s16119_s3 + $0x128] sm:$0xff] }
 0x213   : > { %9593 = vmatmul.mubr.msk.bf16.gmra.mrb[44].mxu0 %vm299_vm2, %v2117_v48  ;;  %v2482_v48 = vpack.c.bf16 %v16832_v15, %v16831_v12  ;;  %v204_v12 = vld [vmem:[%s16119_s3 + $0x28] sm:$0xff]  ;;  %v205_v15 = vld [vmem:[%s16119_s3 + $0x30] sm:$0xff] }
 0x214   : > { %9598 = vmatprep.mubr.msk.bf16.mxu0 %vm299_vm2, %v2468_v52  ;;  %v2483_v52 = vpack.c.bf16 %v16834_v29, %v16833_v6  ;;  %3739 = vperm.xlu1 %11043, %v204_v12   ;;  %v207_v6 = vld [vmem:[%s16119_s3 + $0x40] sm:$0xff]  ;;  %v16861_v29 = vld [vmem:[#allocation90_spill] sm:$0xff] }
 0x215   : > { %3744 = vperm.xlu0 %11042, %v205_v15   ;;  %v16873_v12 = vld [vmem:[#allocation42_spill] sm:$0xff]  ;;  %v238_v15 = vld [vmem:[%s16119_s3 + $0x138] sm:$0xff] }
 0x218   : > { %3749 = vperm.xlu1 %11043, %v206_v50   ;;  %v16874_v50 = vld [vmem:[#allocation43_spill] sm:$0xff] }
 0x219   : > { %3754 = vperm.xlu0 %11042, %v207_v6   ;;  %v240_v6 = vld [vmem:[%s16119_s3 + $0x148] sm:$0xff] }
 0x21b   : > { %9599 = vmatmul.mubr.msk.bf16.vlgmr.msra.gmra.mrb[0].mxu0 %vm299_vm2, %v16809_v42  ;;  %v16839_v42 = vld [vmem:[#allocation142_spill] sm:$0xff] }
 0x21c   : > { %9647 = vmatpush3.bf16.msra.mxu0 %v2857_v13  ;;  %9602 = vmatprep.mubr.msk.bf16.mxu0 %vm299_vm2, %v2470_v7  ;;  %v2484_v7 = vpack.c.bf16 %v16836_v54, %v16835_v53  ;;  %v16837_v13 = vld [vmem:[#allocation136_spill] sm:$0xff]  ;;  %v2486_v43 = vpack.c.bf16 %v16839_v42, %v16838_v41  ;;  %v209_v53 = vld [vmem:[%s16119_s3 + $0x50] sm:$0xff]  ;;  %v2843_v41 = vpack.c.bf16 %v12426_v57, %v12345_v17  ;;  %v212_v42 = vld [vmem:[%s16119_s3 + $0x68] sm:$0xff] }
 0x21d   : > { %11021 = vmatprep.subr.msk.bf16.mxu0 %vm817_vm0, %v8618_v14  ;;  %v2485_v40 = vpack.c.bf16 %v12195_v36, %v16837_v13  ;;  %v16841_v36 = vrot.slane %v11719_v30, 2  ;;  %v16862_v54 = vld [vmem:[#allocation91_spill] sm:$0xff]  ;;  %3764 = vperm.xlu0 %11042, %v209_v53   ;;  %v211_v13 = vld [vmem:[%s16119_s3 + $0x60] sm:$0xff]  ;;  %v242_v53 = vld [vmem:[%s16119_s3 + $0x158] sm:$0xff] }
 0x21e   : > { %v215_v17 = vld [vmem:[%s16119_s3 + $0x80] sm:$0xff] }
 0x221   : > { %3774 = vperm.xlu0 %11042, %v211_v13   ;;  %v244_v13 = vld [vmem:[%s16119_s3 + $0x168] sm:$0xff] }
 0x223   : > { %9603 = vmatmul.mubr.msk.bf16.gmra.mrb[4].mxu0 %vm299_vm2, %v2471_v19  ;;  %v2487_v19 = vpack.c.bf16 %v12227_v5, %v16840_v18  ;;  %v12648_v18 = vld [vmem:[#allocation2 + $0x1a0] sm:$0xff] }
 0x224   : > { %9606 = vmatprep.mubr.msk.bf16.mxu0 %vm299_vm2, %v2472_v2  ;;  %v12524_v2 = vsel %vm639_vm5, %v16841_v36, %v634_v21  ;;  %v217_v21 = vld [vmem:[%s16119_s3 + $0x90] sm:$0xff]  ;;  %v16863_v36 = vld [vmem:[#allocation12_spill] sm:$0xff] }
 0x225   : > { %v2490_v5 = vpack.c.bf16 %v12524_v2, %v12255_v11  ;;  %v2491_v11 = vpack.c.bf16 %v12538_v23, %v12542_v45 }
 0x22b   : > { %9607 = vmatmul.mubr.msk.bf16.gmra.mrb[8].mxu0 %vm299_vm2, %v2473_v31  ;;  %v3147_v31 = vsel %vm817_vm0, %v8618_v14, 0  ;;  %v16847_v14 = vld [vmem:[#allocation76_spill] sm:$0xff] }
 0x22c   : > { %9610 = vmatprep.mubr.msk.bf16.mxu0 %vm299_vm2, %v2474_v38  ;;  %v16844_v38 = vld [vmem:[#allocation73_spill] sm:$0xff] }
 0x233   : > { %9611 = vmatmul.mubr.msk.bf16.gmra.mrb[12].mxu0 %vm299_vm2, %v2475_v3  ;;  %v16848_v3 = vld [vmem:[#allocation77_spill] sm:$0xff] }
 0x234   : > { %9614 = vmatprep.mubr.msk.bf16.mxu0 %vm299_vm2, %v2476_v60  ;;  %v16851_v60 = vld [vmem:[#allocation80_spill] sm:$0xff] }
 0x23b   : > { %9615 = vmatmul.mubr.msk.bf16.gmra.mrb[16].mxu0 %vm299_vm2, %v2477_v8  ;;  %v16854_v8 = vld [vmem:[#allocation83_spill] sm:$0xff] }
 0x23c   : > { %9618 = vmatprep.mubr.msk.bf16.mxu0 %vm299_vm2, %v2478_v26  ;;  %v16856_v26 = vld [vmem:[#allocation85_spill] sm:$0xff] }
 0x243   : > { %9619 = vmatmul.mubr.msk.bf16.gmra.mrb[20].mxu0 %vm299_vm2, %v2479_v27  ;;  %v16857_v27 = vld [vmem:[#allocation86_spill] sm:$0xff] }
 0x244   : > { %9622 = vmatprep.mubr.msk.bf16.mxu0 %vm299_vm2, %v2480_v28  ;;  %v16858_v28 = vld [vmem:[#allocation87_spill] sm:$0xff] }
 0x24b   : > { %9623 = vmatmul.mubr.msk.bf16.gmra.mrb[24].mxu0 %vm299_vm2, %v2481_v47  ;;  %v16859_v47 = vld [vmem:[#allocation88_spill] sm:$0xff] }
 0x24c   : > { %9626 = vmatprep.mubr.msk.bf16.mxu0 %vm299_vm2, %v2482_v48  ;;  %v16860_v48 = vld [vmem:[#allocation89_spill] sm:$0xff] }
 0x253   : > { %9627 = vmatmul.mubr.msk.bf16.gmra.mrb[28].mxu0 %vm299_vm2, %v2483_v52  ;;  %v208_v52 = vld [vmem:[%s16119_s3 + $0x48] sm:$0xff] }
 0x254   : > { %9630 = vmatprep.mubr.msk.bf16.mxu0 %vm299_vm2, %v2484_v7  ;;  %3759 = vperm.xlu1 %11043, %v208_v52   ;;  %v210_v7 = vld [vmem:[%s16119_s3 + $0x58] sm:$0xff] }
 0x255   : > { %v16875_v52 = vld [vmem:[#allocation48_spill] sm:$0xff] }
 0x258   : > { %3769 = vperm.xlu1 %11043, %v210_v7   ;;  %v16876_v7 = vld [vmem:[#allocation49_spill] sm:$0xff] }
 0x25b   : > { %9631 = vmatmul.mubr.msk.bf16.gmra.mrb[32].mxu0 %vm299_vm2, %v2485_v40  ;;  %v2842_v40 = vpack.c.bf16 %v12343_v33, %v11719_v30  ;;  %v12650_v30 = vld [vmem:[#allocation2 + $0x1a8] sm:$0xff]  ;;  %v214_v33 = vld [vmem:[%s16119_s3 + $0x78] sm:$0xff] }
 0x25c   : > { %9634 = vmatprep.mubr.msk.bf16.mxu0 %vm299_vm2, %v2486_v43  ;;  %v213_v43 = vld [vmem:[%s16119_s3 + $0x70] sm:$0xff]  ;;  %3779 = vperm.xlu1 %11043, %v212_v42   ;;  %v246_v42 = vld [vmem:[%s16119_s3 + $0x178] sm:$0xff] }
 0x25d   : > { %3784 = vperm.xlu0 %11042, %v213_v43   ;;  %v16878_v43 = vld [vmem:[#allocation55_spill] sm:$0xff] }
 0x260   : > { %3789 = vperm.xlu1 %11043, %v214_v33   ;;  %v16879_v33 = vld [vmem:[#allocation60_spill] sm:$0xff] }
 0x261   : > { %3794 = vperm.xlu0 %11042, %v215_v17   ;;  %v16880_v17 = vld [vmem:[#allocation61_spill] sm:$0xff] }
 0x263   : > { %9635 = vmatmul.mubr.msk.bf16.gmra.mrb[36].mxu0 %vm299_vm2, %v2487_v19  ;;  %v2844_v19 = vpack.c.bf16 %v12650_v30, %v12648_v18 }
 0x264   : > { %9638 = vmatprep.mubr.msk.bf16.mxu0 %vm299_vm2, %v2488_v20  ;;  %v216_v20 = vld [vmem:[%s16119_s3 + $0x88] sm:$0xff] }
 0x265   : > { %3799 = vperm.xlu1 %11043, %v216_v20   ;;  %3804 = vperm.xlu0 %11042, %v217_v21   ;;  %v526_v20 = vrot.slane %v12648_v18, 1  ;;  %v16882_v21 = vld [vmem:[#allocation67_spill] sm:$0xff] }
 0x26b   : > { %9639 = vmatmul.mubr.msk.bf16.gmra.mrb[40].mxu0 %vm299_vm2, %v2489_v22  ;;  %v218_v22 = vld [vmem:[%s16119_s3 + $0x98] sm:$0xff] }
 0x26c   : > { %9642 = vmatprep.mubr.msk.bf16.mxu0 %vm299_vm2, %v2490_v5  ;;  %v219_v5 = vld [vmem:[%s16119_s3 + $0xa0] sm:$0xff]  ;;  %3809 = vperm.xlu1 %11043, %v218_v22   ;;  %v532_v22 = vsel %vm530_vm4, %v525_v62, %v526_v20 }
 0x26d   : > { %3814 = vperm.xlu0 %11042, %v219_v5   ;;  %v3132_v5 = vpack.c.bf16 %v12444_v63, %v12424_v44  ;;  %v16886_v44 = vld [vmem:[#allocation97_spill] sm:$0xff]  ;;  %v16888_v63 = vld [vmem:[#allocation103_spill] sm:$0xff] }
 0x273   : > { %9643 = vmatmul.mubr.msk.bf16.gmra.mrb[44].mxu0 %vm299_vm2, %v2491_v11  ;;  %v16864_v11 = vld [vmem:[#allocation13_spill] sm:$0xff] }
 0x274   : > { %9648 = vmatprep.mubr.msk.bf16.mxu0 %vm299_vm2, %v16842_v9  ;;  %v220_v9 = vld [vmem:[%s16119_s3 + $0xa8] sm:$0xff] }
 0x275   : > { %3819 = vperm.xlu1 %11043, %v220_v9  }
 0x27b   : > { %9649 = vmatmul.mubr.msk.bf16.vlgmr.msra.gmra.mrb[0].mxu0 %vm299_vm2, %v16843_v16  ;;  %v16865_v16 = vld [vmem:[#allocation18_spill] sm:$0xff] }
 0x27c   : > { %9697 = vmatpush3.bf16.msra.mxu0 %v3147_v31  ;;  %9652 = vmatprep.mubr.msk.bf16.mxu0 %vm299_vm2, %v16844_v38  ;;  %v221_v31 = vld [vmem:[%s16119_s3 + $0xb0] sm:$0xff]  ;;  %v223_v38 = vld [vmem:[%s16119_s3 + $0xc0] sm:$0xff] }
 0x27d   : > { %11022 = vmatprep.subr.msk.bf16.mxu0 %vm817_vm0, %v12553_v32  ;;  %3824 = vperm.xlu0 %11042, %v221_v31   ;;  %v222_v32 = vld [vmem:[%s16119_s3 + $0xb8] sm:$0xff]  ;;  %v16884_v31 = vld [vmem:[#allocation6_spill] sm:$0xff] }
 0x27e   : > { %3829 = vperm.xlu1 %11043, %v222_v32  }
 0x281   : > { %3834 = vperm.xlu0 %11042, %v223_v38   ;;  %v16889_v38 = vld [vmem:[#allocation104_spill] sm:$0xff] }
 0x283   : > { %9653 = vmatmul.mubr.msk.bf16.gmra.mrb[4].mxu0 %vm299_vm2, %v16845_v34  ;;  %v16866_v34 = vld [vmem:[#allocation19_spill] sm:$0xff] }
 0x284   : > { %9656 = vmatprep.mubr.msk.bf16.mxu0 %vm299_vm2, %v16846_v35  ;;  %v224_v35 = vld [vmem:[%s16119_s3 + $0xc8] sm:$0xff] }
 0x285   : > { %3839 = vperm.xlu1 %11043, %v224_v35   ;;  %v16891_v35 = vld [vmem:[#allocation110_spill] sm:$0xff] }
 0x28b   : > { %9657 = vmatmul.mubr.msk.bf16.gmra.mrb[8].mxu0 %vm299_vm2, %v16847_v14  ;;  %v225_v14 = vld [vmem:[%s16119_s3 + $0xd0] sm:$0xff] }
 0x28c   : > { %9660 = vmatprep.mubr.msk.bf16.mxu0 %vm299_vm2, %v16848_v3  ;;  %v16867_v3 = vld [vmem:[#allocation24_spill] sm:$0xff]  ;;  %3844 = vperm.xlu0 %11042, %v225_v14   ;;  %v16892_v14 = vld [vmem:[#allocation115_spill] sm:$0xff] }
 0x293   : > { %9661 = vmatmul.mubr.msk.bf16.gmra.mrb[12].mxu0 %vm299_vm2, %v16849_v1  ;;  %v226_v1 = vld [vmem:[%s16119_s3 + $0xd8] sm:$0xff] }
 0x294   : > { %9664 = vmatprep.mubr.msk.bf16.mxu0 %vm299_vm2, %v16850_v0  ;;  %v227_v0 = vld [vmem:[%s16119_s3 + $0xe0] sm:$0xff]  ;;  %3849 = vperm.xlu1 %11043, %v226_v1  }
 0x295   : > { %3854 = vperm.xlu0 %11042, %v227_v0   ;;  %v16894_v1 = vld [vmem:[#allocation121_spill] sm:$0xff]  ;;  %v16895_v0 = vld [vmem:[#allocation122_spill] sm:$0xff] }
 0x29b   : > { %9665 = vmatmul.mubr.msk.bf16.gmra.mrb[16].mxu0 %vm299_vm2, %v16851_v60  ;;  %v16868_v60 = vld [vmem:[#allocation25_spill] sm:$0xff] }
 0x29c   : > { %9668 = vmatprep.mubr.msk.bf16.mxu0 %vm299_vm2, %v16852_v61  ;;  %v228_v61 = vld [vmem:[%s16119_s3 + $0xe8] sm:$0xff] }
 0x29d   : > { %3859 = vperm.xlu1 %11043, %v228_v61   ;;  %v16897_v61 = vld [vmem:[#allocation127_spill] sm:$0xff] }
 0x2a3   : > { %9669 = vmatmul.mubr.msk.bf16.gmra.mrb[20].mxu0 %vm299_vm2, %v16853_v4  ;;  %v229_v4 = vld [vmem:[%s16119_s3 + $0xf0] sm:$0xff] }
 0x2a4   : > { %9672 = vmatprep.mubr.msk.bf16.mxu0 %vm299_vm2, %v16854_v8  ;;  %v16869_v8 = vld [vmem:[#allocation30_spill] sm:$0xff]  ;;  %3864 = vperm.xlu0 %11042, %v229_v4   ;;  %v16898_v4 = vld [vmem:[#allocation132_spill] sm:$0xff] }
 0x2a8   : > { %3874 = vperm.xlu0 %11042, %v231_v25   ;;  %v16901_v25 = vld [vmem:[#allocation139_spill] sm:$0xff] }
 0x2ab   : > { %9673 = vmatmul.mubr.msk.bf16.gmra.mrb[24].mxu0 %vm299_vm2, %v16855_v24  ;;  %v230_v24 = vld [vmem:[%s16119_s3 + $0xf8] sm:$0xff] }
 0x2ac   : > { %9676 = vmatprep.mubr.msk.bf16.mxu0 %vm299_vm2, %v16856_v26  ;;  %3869 = vperm.xlu1 %11043, %v230_v24   ;;  %v16870_v26 = vld [vmem:[#allocation31_spill] sm:$0xff]  ;;  %v16900_v24 = vld [vmem:[#allocation138_spill] sm:$0xff] }
 0x2b0   : > { %3879 = vperm.xlu1 %11043, %v232_v56   ;;  %v16903_v56 = vld [vmem:[#allocation144_spill] sm:$0xff] }
 0x2b3   : > { %9677 = vmatmul.mubr.msk.bf16.gmra.mrb[28].mxu0 %vm299_vm2, %v16857_v27  ;;  %v233_v27 = vld [vmem:[%s16119_s3 + $0x110] sm:$0xff] }
 0x2b4   : > { %9680 = vmatprep.mubr.msk.bf16.mxu0 %vm299_vm2, %v16858_v28  ;;  %3884 = vperm.xlu0 %11042, %v233_v27   ;;  %v235_v28 = vld [vmem:[%s16119_s3 + $0x120] sm:$0xff] }
 0x2b5   : > { %3889 = vperm.xlu1 %11043, %v234_v55   ;;  %v16904_v27 = vld [vmem:[#allocation145_spill] sm:$0xff]  ;;  %v16905_v55 = vld [vmem:[#allocation146_spill] sm:$0xff] }
 0x2b8   : > { %3894 = vperm.xlu0 %11042, %v235_v28  }
 0x2b9   : > { %3899 = vperm.xlu1 %11043, %v236_v10  }
 0x2bb   : > { %9681 = vmatmul.mubr.msk.bf16.gmra.mrb[32].mxu0 %vm299_vm2, %v16859_v47  ;;  %v237_v47 = vld [vmem:[%s16119_s3 + $0x130] sm:$0xff] }
 0x2bc   : > { %9684 = vmatprep.mubr.msk.bf16.mxu0 %vm299_vm2, %v16860_v48  ;;  %3904 = vperm.xlu0 %11042, %v237_v47   ;;  %v239_v48 = vld [vmem:[%s16119_s3 + $0x140] sm:$0xff]  ;;  %v638_v47 = vrot.slane %v12650_v30, 2 }
 0x2bd   : > { %3909 = vperm.xlu1 %11043, %v238_v15  }
 0x2c0   : > { %3914 = vperm.xlu0 %11042, %v239_v48  }
 0x2c1   : > { %3919 = vperm.xlu1 %11043, %v240_v6  }
 0x2c3   : > { %9685 = vmatmul.mubr.msk.bf16.gmra.mrb[36].mxu0 %vm299_vm2, %v16861_v29  ;;  %v241_v29 = vld [vmem:[%s16119_s3 + $0x150] sm:$0xff] }
 0x2c4   : > { %9688 = vmatprep.mubr.msk.bf16.mxu0 %vm299_vm2, %v16862_v54  ;;  %3924 = vperm.xlu0 %11042, %v241_v29   ;;  %v243_v54 = vld [vmem:[%s16119_s3 + $0x160] sm:$0xff] }
 0x2c5   : > { %3929 = vperm.xlu1 %11043, %v242_v53  }
 0x2c8   : > { %3934 = vperm.xlu0 %11042, %v243_v54  }
 0x2c9   : > { %3939 = vperm.xlu1 %11043, %v244_v13  }
 0x2cb   : > { %9689 = vmatmul.mubr.msk.bf16.gmra.mrb[40].mxu0 %vm299_vm2, %v2842_v40  ;;  %v245_v40 = vld [vmem:[%s16119_s3 + $0x170] sm:$0xff] }
 0x2cc   : > { %9692 = vmatprep.mubr.msk.bf16.mxu0 %vm299_vm2, %v2843_v41  ;;  %v16877_v41 = vld [vmem:[#allocation54_spill] sm:$0xff]  ;;  %3944 = vperm.xlu0 %11042, %v245_v40  }
 0x2cd   : > { %3949 = vperm.xlu1 %11043, %v246_v42  }
 0x2d3   : > { %9693 = vmatmul.mubr.msk.bf16.gmra.mrb[44].mxu0 %vm299_vm2, %v2844_v19  ;;  %v16881_v19 = vld [vmem:[#allocation66_spill] sm:$0xff] }
 0x2d4   : > { %9698 = vmatprep.mubr.msk.bf16.mxu0 %vm299_vm2, %v16863_v36  ;;  %v16883_v36 = vld [vmem:[#allocation70_spill] sm:$0xff] }
 0x2db   : > { %9699 = vmatmul.mubr.msk.bf16.vlgmr.msra.gmra.mrb[0].mxu0 %vm299_vm2, %v16864_v11  ;;  %v527_v11 = vrot.slane %v12650_v30, 1 }
 0x2dc   : > { %9747 = vmatpush3.bf16.msra.mxu0 %v3437_v58  ;;  %9702 = vmatprep.mubr.msk.bf16.mxu0 %vm299_vm2, %v16865_v16  ;;  %v3133_v58 = vpack.c.bf16 %v532_v22, %v12440_v51  ;;  %v16885_v16 = vrot.slane %v16884_v31, 1  ;;  %v16887_v51 = vld [vmem:[#allocation98_spill] sm:$0xff] }
 0x2dd   : > { %v531_v9 = vsel %vm530_vm4, %v526_v20, %v527_v11 }
 0x2de   : > { %v584_v32 = vsel %vm530_vm4, %v527_v11, %v16885_v16 }
 0x2df   : > { %v3134_v62 = vpack.c.bf16 %v584_v32, %v531_v9 }
 0x2e3   : > { %9703 = vmatmul.mubr.msk.bf16.gmra.mrb[4].mxu0 %vm299_vm2, %v16866_v34  ;;  %v16890_v34 = vld [vmem:[#allocation109_spill] sm:$0xff] }
 0x2e4   : > { %9706 = vmatprep.mubr.msk.bf16.mxu0 %vm299_vm2, %v16867_v3  ;;  %v16893_v3 = vld [vmem:[#allocation116_spill] sm:$0xff] }
 0x2eb   : > { %9707 = vmatmul.mubr.msk.bf16.gmra.mrb[8].mxu0 %vm299_vm2, %v16868_v60  ;;  %v16896_v60 = vld [vmem:[#allocation126_spill] sm:$0xff] }
 0x2ec   : > { %9710 = vmatprep.mubr.msk.bf16.mxu0 %vm299_vm2, %v16869_v8  ;;  %v16899_v8 = vld [vmem:[#allocation133_spill] sm:$0xff] }
 0x2f3   : > { %9711 = vmatmul.mubr.msk.bf16.gmra.mrb[12].mxu0 %vm299_vm2, %v16870_v26  ;;  %v16902_v26 = vld [vmem:[#allocation143_spill] sm:$0xff] }
 0x2f4   : > { %9714 = vmatprep.mubr.msk.bf16.mxu0 %vm299_vm2, %v16871_v46  ;;  %v637_v46 = vrot.slane %v12648_v18, 2 }
 0x2f6   : > { %v641_v28 = vsel %vm639_vm5, %v636_v39, %v637_v46  ;;  %v640_v18 = vsel %vm639_vm5, %v637_v46, %v638_v47 }
 0x2f7   : > { %v3423_v10 = vpack.c.bf16 %v641_v28, %v12538_v23  ;;  %v12878_v23 = vpop.permute.xlu1 %3724 }
 0x2f8   : > { %16908 = vst [vmem:[#allocation8_spill] sm:$0xff] %v12878_v23 }
 0x2fb   : > { %9715 = vmatmul.mubr.msk.bf16.gmra.mrb[16].mxu0 %vm299_vm2, %v16872_v59  ;;  %v3422_v59 = vpack.c.bf16 %v12542_v45, %v12524_v2  ;;  %v12876_v2 = vpop.permute.xlu0 %3714  ;;  %v12882_v30 = vpop.permute.xlu1 %3729 }
 0x2fc   : > { %9718 = vmatprep.mubr.msk.bf16.mxu0 %vm299_vm2, %v16873_v12  ;;  %16907 = vst [vmem:[#allocation7_spill] sm:$0xff] %v12876_v2  ;;  %16910 = vst [vmem:[#allocation11_spill] sm:$0xff] %v12882_v30 }
 0x2ff   : > { %v12880_v45 = vpop.permute.xlu0 %3719  ;;  %v12886_v15 = vpop.permute.xlu1 %3739 }
 0x300   : > { %16909 = vst [vmem:[#allocation9_spill] sm:$0xff] %v12880_v45  ;;  %16912 = vst [vmem:[#allocation4_spill] sm:$0xff] %v12886_v15 }
 0x303   : > { %9719 = vmatmul.mubr.msk.bf16.gmra.mrb[20].mxu0 %vm299_vm2, %v16874_v50  ;;  %v12884_v12 = vpop.permute.xlu0 %3734  ;;  %v12890_v50 = vpop.permute.xlu1 %3749 }
 0x304   : > { %9722 = vmatprep.mubr.msk.bf16.mxu0 %vm299_vm2, %v16875_v52  ;;  %16911 = vst [vmem:[#allocation5_spill] sm:$0xff] %v12884_v12  ;;  %16914 = vst [vmem:[#allocation15_spill] sm:$0xff] %v12890_v50 }
 0x307   : > { %v12888_v48 = vpop.permute.xlu0 %3744  ;;  %v12894_v29 = vpop.permute.xlu1 %3759 }
 0x308   : > { %16913 = vst [vmem:[#allocation10_spill] sm:$0xff] %v12888_v48  ;;  %16916 = vst [vmem:[#allocation17_spill] sm:$0xff] %v12894_v29 }
 0x30b   : > { %9723 = vmatmul.mubr.msk.bf16.gmra.mrb[24].mxu0 %vm299_vm2, %v16876_v7  ;;  %v12892_v6 = vpop.permute.xlu0 %3754  ;;  %v12898_v53 = vpop.permute.xlu1 %3769 }
 0x30c   : > { %9726 = vmatprep.mubr.msk.bf16.mxu0 %vm299_vm2, %v16877_v41  ;;  %16915 = vst [vmem:[#allocation14_spill] sm:$0xff] %v12892_v6  ;;  %16918 = vst [vmem:[#allocation21_spill] sm:$0xff] %v12898_v53 }
 0x30f   : > { %v12896_v52 = vpop.permute.xlu0 %3764  ;;  %v12902_v7 = vpop.permute.xlu1 %3779 }
 0x310   : > { %16917 = vst [vmem:[#allocation16_spill] sm:$0xff] %v12896_v52  ;;  %16920 = vst [vmem:[#allocation23_spill] sm:$0xff] %v12902_v7 }
 0x313   : > { %9727 = vmatmul.mubr.msk.bf16.gmra.mrb[28].mxu0 %vm299_vm2, %v16878_v43  ;;  %v12900_v54 = vpop.permute.xlu0 %3774  ;;  %v12906_v40 = vpop.permute.xlu1 %3789 }
 0x314   : > { %9730 = vmatprep.mubr.msk.bf16.mxu0 %vm299_vm2, %v16879_v33  ;;  %16919 = vst [vmem:[#allocation20_spill] sm:$0xff] %v12900_v54  ;;  %16922 = vst [vmem:[#allocation27_spill] sm:$0xff] %v12906_v40 }
 0x317   : > { %v12904_v13 = vpop.permute.xlu0 %3784  ;;  %v12914_v33 = vpop.permute.xlu1 %3799 }
 0x318   : > { %16921 = vst [vmem:[#allocation22_spill] sm:$0xff] %v12904_v13  ;;  %16924 = vst [vmem:[#allocation29_spill] sm:$0xff] %v12914_v33 }
 0x31b   : > { %9731 = vmatmul.mubr.msk.bf16.gmra.mrb[32].mxu0 %vm299_vm2, %v16880_v17  ;;  %v12908_v41 = vpop.permute.xlu0 %3794 }
 0x31c   : > { %9734 = vmatprep.mubr.msk.bf16.mxu0 %vm299_vm2, %v16881_v19  ;;  %16923 = vst [vmem:[#allocation26_spill] sm:$0xff] %v12908_v41 }
 0x323   : > { %9735 = vmatmul.mubr.msk.bf16.gmra.mrb[36].mxu0 %vm299_vm2, %v16882_v21 }
 0x324   : > { %9738 = vmatprep.mubr.msk.bf16.mxu0 %vm299_vm2, %v16883_v36 }
 0x32b   : > { %9739 = vmatmul.mubr.msk.bf16.gmra.mrb[40].mxu0 %vm299_vm2, %v3132_v5 }
 0x32c   : > { %9742 = vmatprep.mubr.msk.bf16.mxu0 %vm299_vm2, %v3133_v58  ;;  %v12929_v58 = vpop.permute.xlu0 %3804 }
 0x32d   : > { %16925 = vst [vmem:[#allocation28_spill] sm:$0xff] %v12929_v58 }
 0x333   : > { %9743 = vmatmul.mubr.msk.bf16.gmra.mrb[44].mxu0 %vm299_vm2, %v3134_v62  ;;  %v12935_v62 = vpop.permute.xlu1 %3809 }
 0x334   : > { %9748 = vmatprep.mubr.msk.bf16.mxu0 %vm299_vm2, %v16886_v44  ;;  %16926 = vst [vmem:[#allocation33_spill] sm:$0xff] %v12935_v62 }
 0x33b   : > { %9749 = vmatmul.mubr.msk.bf16.vlgmr.msra.gmra.mrb[0].mxu0 %vm299_vm2, %v16887_v51 }
 0x33c   : > { %9752 = vmatprep.mubr.msk.bf16.mxu0 %vm299_vm2, %v16888_v63 }
 0x343   : > { %9753 = vmatmul.mubr.msk.bf16.gmra.mrb[4].mxu0 %vm299_vm2, %v16889_v38 }
 0x344   : > { %9756 = vmatprep.mubr.msk.bf16.mxu0 %vm299_vm2, %v16890_v34 }
 0x34b   : > { %9757 = vmatmul.mubr.msk.bf16.gmra.mrb[8].mxu0 %vm299_vm2, %v16891_v35 }
 0x34c   : > { %9760 = vmatprep.mubr.msk.bf16.mxu0 %vm299_vm2, %v16892_v14 }
 0x353   : > { %9761 = vmatmul.mubr.msk.bf16.gmra.mrb[12].mxu0 %vm299_vm2, %v16893_v3 }
 0x354   : > { %9764 = vmatprep.mubr.msk.bf16.mxu0 %vm299_vm2, %v16894_v1 }
 0x35b   : > { %9765 = vmatmul.mubr.msk.bf16.gmra.mrb[16].mxu0 %vm299_vm2, %v16895_v0 }
 0x35c   : > { %9768 = vmatprep.mubr.msk.bf16.mxu0 %vm299_vm2, %v16896_v60 }
 0x363   : > { %9769 = vmatmul.mubr.msk.bf16.gmra.mrb[20].mxu0 %vm299_vm2, %v16897_v61 }
 0x364   : > { %9772 = vmatprep.mubr.msk.bf16.mxu0 %vm299_vm2, %v16898_v4 }
 0x36b   : > { %9773 = vmatmul.mubr.msk.bf16.gmra.mrb[24].mxu0 %vm299_vm2, %v16899_v8 }
 0x36c   : > { %9776 = vmatprep.mubr.msk.bf16.mxu0 %vm299_vm2, %v16900_v24 }
 0x373   : > { %9777 = vmatmul.mubr.msk.bf16.gmra.mrb[28].mxu0 %vm299_vm2, %v16901_v25 }
 0x374   : > { %9780 = vmatprep.mubr.msk.bf16.mxu0 %vm299_vm2, %v16902_v26  ;;  %v12955_v26 = vpop.permute.xlu0 %3814 }
 0x375   : > { %16927 = vst [vmem:[#allocation32_spill] sm:$0xff] %v12955_v26 }
 0x37b   : > { %9781 = vmatmul.mubr.msk.bf16.gmra.mrb[32].mxu0 %vm299_vm2, %v16903_v56 }
 0x37c   : > { %9784 = vmatprep.mubr.msk.bf16.mxu0 %vm299_vm2, %v16904_v27 }
 0x383   : > { %9785 = vmatmul.mubr.msk.bf16.gmra.mrb[36].mxu0 %vm299_vm2, %v16905_v55 }
 0x384   : > { %9788 = vmatprep.mubr.msk.bf16.mxu0 %vm299_vm2, %v12263_v37  ;;  %v16906_v37 = vrot.slane %v16884_v31, 2 }
 0x386   : > { %v693_v57 = vsel %vm639_vm5, %v638_v47, %v16906_v37  ;;  %v12964_v47 = vpop.permute.xlu1 %3819 }
 0x387   : > { %v3424_v39 = vpack.c.bf16 %v693_v57, %v640_v18  ;;  %16928 = vst [vmem:[#allocation35_spill] sm:$0xff] %v12964_v47 }
 0x38b   : > { %9789 = vmatmul.mubr.msk.bf16.gmra.mrb[40].mxu0 %vm299_vm2, %v3422_v59 }
 0x38c   : > { %9792 = vmatprep.mubr.msk.bf16.mxu0 %vm299_vm2, %v3423_v10 }
 0x393   : > { %9793 = vmatmul.mubr.msk.bf16.gmra.mrb[44].mxu0 %vm299_vm2, %v3424_v39 }
 0x40e   : > { %v12910_v42 = vpop.f32.mrb[0].mxu0 }
 0x40f   : > { %v12912_v43 = vpop.f32.mrb[1].mxu0  ;;  %v3954_v17 = vmul.f32 %v12910_v42, %v12878_v23 }
 0x410   : > { %v3952_v19 = vmul.f32 %v12876_v2, %v12912_v43  ;;  %v12920_v20 = vpop.f32.mrb[2].mxu0 }
 0x411   : > { %v12922_v21 = vpop.f32.mrb[3].mxu0  ;;  %v3955_v22 = vmul.f32 %v12920_v20, %v12882_v30  ;;  %v4104_v11 = vmul.f32 %v12910_v42, %v3954_v17  ;;  %v4003_v44 = vsel %vm299_vm2, %v3954_v17, 0.0 }
 0x412   : > { %v4102_v36 = vmul.f32 %v3952_v19, %v12912_v43  ;;  %v3953_v5 = vmul.f32 %v12880_v45, %v12922_v21  ;;  %v4000_v9 = vsel %vm299_vm2, %v3952_v19, 0.0 }
 0x413   : > { %v4105_v63 = vmul.f32 %v12920_v20, %v3955_v22  ;;  %v4153_v1 = vsel %vm299_vm2, %v4104_v11, 0.0  ;;  %v4005_v0 = vsel %vm299_vm2, %v3955_v22, 0.0 }
 0x414   : > { %v4001_v31 = vsel %vm299_vm2, %v3953_v5, 0.0  ;;  %v4103_v16 = vmul.f32 %v3953_v5, %v12922_v21  ;;  %v4150_v51 = vsel %vm299_vm2, %v4102_v36, 0.0 }
 0x415   : > { %v4002_v32 = vadd.f32 %v4001_v31, %v4000_v9  ;;  %v4155_v56 = vsel %vm299_vm2, %v4105_v63, 0.0 }
 0x416   : > { %v4151_v38 = vsel %vm299_vm2, %v4103_v16, 0.0  ;;  %v12941_v34 = vpop.f32.mrb[4].mxu0  ;;  %v12977_v16 = vpop.permute.xlu0 %3824 }
 0x417   : > { %v4004_v35 = vadd.f32 %v4003_v44, %v4002_v32  ;;  %v4152_v14 = vadd.f32 %v4151_v38, %v4150_v51  ;;  %v12943_v3 = vpop.f32.mrb[5].mxu0  ;;  %v3958_v8 = vmul.f32 %v12941_v34, %v12888_v48  ;;  %16929 = vst [vmem:[#allocation34_spill] sm:$0xff] %v12977_v16 }
 0x418   : > { %v3956_v60 = vmul.f32 %v12884_v12, %v12943_v3  ;;  %v12949_v61 = vpop.f32.mrb[6].mxu0 }
 0x419   : > { %v4154_v4 = vadd.f32 %v4153_v1, %v4152_v14  ;;  %v4006_v24 = vadd.f32 %v4005_v0, %v4004_v35  ;;  %v12953_v25 = vpop.f32.mrb[7].mxu0  ;;  %v3959_v10 = vmul.f32 %v12949_v61, %v12890_v50  ;;  %v4108_v57 = vmul.f32 %v12941_v34, %v3958_v8  ;;  %v12989_v0 = vpop.permute.xlu1 %3829 }
 0x41a   : > { %v4007_v27 = vsel %vm299_vm2, %v3956_v60, 0.0  ;;  %v4106_v46 = vmul.f32 %v3956_v60, %v12943_v3  ;;  %v3957_v55 = vmul.f32 %v12886_v15, %v12953_v25  ;;  %v4011_v36 = vsel %vm299_vm2, %v3958_v8, 0.0  ;;  %16930 = vst [vmem:[#allocation39_spill] sm:$0xff] %v12989_v0 }
 0x41b   : > { %v4008_v28 = vadd.f32 %v4007_v27, %v4006_v24  ;;  %v4156_v59 = vadd.f32 %v4155_v56, %v4154_v4  ;;  %v4109_v5 = vmul.f32 %v12949_v61, %v3959_v10  ;;  %v4013_v32 = vsel %vm299_vm2, %v3959_v10, 0.0 }
 0x41c   : > { %v4157_v18 = vsel %vm299_vm2, %v4106_v46, 0.0  ;;  %v4009_v37 = vsel %vm299_vm2, %v3957_v55, 0.0  ;;  %v4107_v19 = vmul.f32 %v3957_v55, %v12953_v25  ;;  %v4161_v38 = vsel %vm299_vm2, %v4108_v57, 0.0  ;;  %v13002_v57 = vpop.permute.xlu0 %3834 }
 0x41d   : > { %v4158_v39 = vadd.f32 %v4157_v18, %v4156_v59  ;;  %v4010_v17 = vadd.f32 %v4009_v37, %v4008_v28  ;;  %v4163_v56 = vsel %vm299_vm2, %v4109_v5, 0.0  ;;  %16931 = vst [vmem:[#allocation38_spill] sm:$0xff] %v13002_v57 }
 0x41e   : > { %v12971_v22 = vpop.f32.mrb[8].mxu0  ;;  %v4159_v9 = vsel %vm299_vm2, %v4107_v19, 0.0 }
 0x41f   : > { %v4012_v11 = vadd.f32 %v4011_v36, %v4010_v17  ;;  %v12975_v31 = vpop.f32.mrb[9].mxu0  ;;  %v4160_v44 = vadd.f32 %v4159_v9, %v4158_v39  ;;  %v3962_v35 = vmul.f32 %v12971_v22, %v12896_v52 }
 0x420   : > { %v3960_v51 = vmul.f32 %v12892_v6, %v12975_v31  ;;  %v12982_v63 = vpop.f32.mrb[10].mxu0 }
 0x421   : > { %v4014_v14 = vadd.f32 %v4013_v32, %v4012_v11  ;;  %v12987_v1 = vpop.f32.mrb[11].mxu0  ;;  %v4162_v60 = vadd.f32 %v4161_v38, %v4160_v44  ;;  %v3963_v46 = vmul.f32 %v12982_v63, %v12898_v53  ;;  %v4112_v18 = vmul.f32 %v12971_v22, %v3962_v35  ;;  %v13011_v32 = vpop.permute.xlu1 %3839 }
 0x422   : > { %v4015_v4 = vsel %vm299_vm2, %v3960_v51, 0.0  ;;  %v4110_v8 = vmul.f32 %v3960_v51, %v12975_v31  ;;  %v3961_v24 = vmul.f32 %v12894_v29, %v12987_v1  ;;  %v4019_v39 = vsel %vm299_vm2, %v3962_v35, 0.0  ;;  %16932 = vst [vmem:[#allocation41_spill] sm:$0xff] %v13011_v32 }
 0x423   : > { %v4016_v27 = vadd.f32 %v4015_v4, %v4014_v14  ;;  %v4164_v55 = vadd.f32 %v4163_v56, %v4162_v60  ;;  %v4113_v5 = vmul.f32 %v12982_v63, %v3963_v46  ;;  %v4021_v44 = vsel %vm299_vm2, %v3963_v46, 0.0 }
 0x424   : > { %v4165_v28 = vsel %vm299_vm2, %v4110_v8, 0.0  ;;  %v4017_v59 = vsel %vm299_vm2, %v3961_v24, 0.0  ;;  %v4111_v10 = vmul.f32 %v3961_v24, %v12987_v1  ;;  %v4169_v35 = vsel %vm299_vm2, %v4112_v18, 0.0 }
 0x425   : > { %v4018_v37 = vadd.f32 %v4017_v59, %v4016_v27  ;;  %v4166_v17 = vadd.f32 %v4165_v28, %v4164_v55  ;;  %v4171_v55 = vsel %vm299_vm2, %v4113_v5, 0.0 }
 0x426   : > { %v4167_v19 = vsel %vm299_vm2, %v4111_v10, 0.0  ;;  %v13006_v36 = vpop.f32.mrb[12].mxu0  ;;  %v13030_v10 = vpop.permute.xlu0 %3844 }
 0x427   : > { %v4020_v11 = vadd.f32 %v4019_v39, %v4018_v37  ;;  %v13009_v9 = vpop.f32.mrb[13].mxu0  ;;  %v4168_v51 = vadd.f32 %v4167_v19, %v4166_v17  ;;  %v3966_v60 = vmul.f32 %v13006_v36, %v12904_v13  ;;  %16933 = vst [vmem:[#allocation40_spill] sm:$0xff] %v13030_v10 }
 0x428   : > { %v3964_v38 = vmul.f32 %v12900_v54, %v13009_v9  ;;  %v13016_v14 = vpop.f32.mrb[14].mxu0 }
 0x429   : > { %v4022_v4 = vadd.f32 %v4021_v44, %v4020_v11  ;;  %v13021_v8 = vpop.f32.mrb[15].mxu0  ;;  %v4170_v24 = vadd.f32 %v4169_v35, %v4168_v51  ;;  %v3967_v59 = vmul.f32 %v13016_v14, %v12906_v40  ;;  %v4116_v19 = vmul.f32 %v13006_v36, %v3966_v60  ;;  %v13036_v44 = vpop.permute.xlu1 %3849 }
 0x42a   : > { %v4023_v56 = vsel %vm299_vm2, %v3964_v38, 0.0  ;;  %v4114_v27 = vmul.f32 %v3964_v38, %v13009_v9  ;;  %v3965_v46 = vmul.f32 %v12902_v7, %v13021_v8  ;;  %16934 = vst [vmem:[#allocation45_spill] sm:$0xff] %v13036_v44  ;;  %v4027_v5 = vsel %vm299_vm2, %v3966_v60, 0.0 }
 0x42b   : > { %v4024_v28 = vadd.f32 %v4023_v56, %v4022_v4  ;;  %v4172_v18 = vadd.f32 %v4171_v55, %v4170_v24  ;;  %v4117_v4 = vmul.f32 %v13016_v14, %v3967_v59  ;;  %v4177_v60 = vsel %vm299_vm2, %v4116_v19, 0.0 }
 0x42c   : > { %v4173_v37 = vsel %vm299_vm2, %v4114_v27, 0.0  ;;  %v4025_v39 = vsel %vm299_vm2, %v3965_v46, 0.0  ;;  %v4115_v17 = vmul.f32 %v3965_v46, %v13021_v8  ;;  %v4029_v27 = vsel %vm299_vm2, %v3967_v59, 0.0 }
 0x42d   : > { %v4026_v11 = vadd.f32 %v4025_v39, %v4024_v28  ;;  %v4174_v51 = vadd.f32 %v4173_v37, %v4172_v18 }
 0x42e   : > { %v4175_v38 = vsel %vm299_vm2, %v4115_v17, 0.0  ;;  %v13040_v35 = vpop.f32.mrb[16].mxu0  ;;  %v13055_v17 = vpop.permute.xlu0 %3854 }
 0x42f   : > { %v4028_v24 = vadd.f32 %v4027_v5, %v4026_v11  ;;  %v13043_v56 = vpop.f32.mrb[17].mxu0  ;;  %v4176_v46 = vadd.f32 %v4175_v38, %v4174_v51  ;;  %v3970_v18 = vmul.f32 %v13040_v35, %v12929_v58  ;;  %16935 = vst [vmem:[#allocation44_spill] sm:$0xff] %v13055_v17  ;;  %v4179_v38 = vsel %vm299_vm2, %v4117_v4, 0.0  ;;  %v13064_v58 = vpop.permute.xlu1 %3859 }
 0x430   : > { %v3968_v55 = vmul.f32 %v12908_v41, %v13043_v56  ;;  %v13048_v28 = vpop.f32.mrb[18].mxu0  ;;  %16936 = vst [vmem:[#allocation47_spill] sm:$0xff] %v13064_v58 }
 0x431   : > { %v4030_v37 = vadd.f32 %v4029_v27, %v4028_v24  ;;  %v13053_v39 = vpop.f32.mrb[19].mxu0  ;;  %v4178_v11 = vadd.f32 %v4177_v60, %v4176_v46  ;;  %v3971_v19 = vmul.f32 %v13048_v28, %v12935_v62 }
 0x432   : > { %v4031_v5 = vsel %vm299_vm2, %v3968_v55, 0.0  ;;  %v4118_v59 = vmul.f32 %v3968_v55, %v13043_v56  ;;  %v3969_v51 = vmul.f32 %v12914_v33, %v13053_v39  ;;  %v4120_v55 = vmul.f32 %v13040_v35, %v3970_v18 }
 0x433   : > { %v4032_v41 = vadd.f32 %v4031_v5, %v4030_v37  ;;  %v4180_v24 = vadd.f32 %v4179_v38, %v4178_v11  ;;  %v4035_v33 = vsel %vm299_vm2, %v3970_v18, 0.0  ;;  %v4121_v5 = vmul.f32 %v13048_v28, %v3971_v19 }
 0x434   : > { %v4181_v27 = vsel %vm299_vm2, %v4118_v59, 0.0  ;;  %v4033_v46 = vsel %vm299_vm2, %v3969_v51, 0.0  ;;  %v4119_v60 = vmul.f32 %v3969_v51, %v13053_v39  ;;  %v13077_v59 = vpop.permute.xlu0 %3864  ;;  %v4037_v38 = vsel %vm299_vm2, %v3971_v19, 0.0 }
 0x435   : > { %v4034_v40 = vadd.f32 %v4033_v46, %v4032_v41  ;;  %v4182_v7 = vadd.f32 %v4181_v27, %v4180_v24  ;;  %16937 = vst [vmem:[#allocation46_spill] sm:$0xff] %v13077_v59  ;;  %v4185_v18 = vsel %vm299_vm2, %v4120_v55, 0.0 }
 0x436   : > { %v4183_v4 = vsel %vm299_vm2, %v4119_v60, 0.0  ;;  %v13072_v37 = vpop.f32.mrb[20].mxu0 }
 0x437   : > { %v4036_v62 = vadd.f32 %v4035_v33, %v4034_v40  ;;  %v13075_v11 = vpop.f32.mrb[21].mxu0  ;;  %v4184_v51 = vadd.f32 %v4183_v4, %v4182_v7  ;;  %v3974_v24 = vmul.f32 %v13072_v37, %v12977_v16  ;;  %v13089_v40 = vpop.permute.xlu1 %3869  ;;  %v4187_v4 = vsel %vm299_vm2, %v4121_v5, 0.0 }
 0x438   : > { %v3972_v41 = vmul.f32 %v12955_v26, %v13075_v11  ;;  %v13082_v46 = vpop.f32.mrb[22].mxu0  ;;  %16938 = vst [vmem:[#allocation51_spill] sm:$0xff] %v13089_v40 }
 0x439   : > { %v4038_v27 = vadd.f32 %v4037_v38, %v4036_v62  ;;  %v13087_v60 = vpop.f32.mrb[23].mxu0  ;;  %v4186_v33 = vadd.f32 %v4185_v18, %v4184_v51  ;;  %v3975_v55 = vmul.f32 %v13082_v46, %v12989_v0  ;;  %v4124_v18 = vmul.f32 %v13072_v37, %v3974_v24 }
 0x43a   : > { %v4039_v13 = vsel %vm299_vm2, %v3972_v41, 0.0  ;;  %v4122_v7 = vmul.f32 %v3972_v41, %v13075_v11  ;;  %v3973_v19 = vmul.f32 %v12964_v47, %v13087_v60  ;;  %v13102_v41 = vpop.permute.xlu0 %3874  ;;  %v4043_v47 = vsel %vm299_vm2, %v3974_v24, 0.0 }
 0x43b   : > { %v4040_v26 = vadd.f32 %v4039_v13, %v4038_v27  ;;  %v4188_v16 = vadd.f32 %v4187_v4, %v4186_v33  ;;  %16939 = vst [vmem:[#allocation50_spill] sm:$0xff] %v13102_v41  ;;  %v4125_v27 = vmul.f32 %v13082_v46, %v3975_v55  ;;  %v13111_v4 = vpop.permute.xlu1 %3879 }
 0x43c   : > { %v4189_v62 = vsel %vm299_vm2, %v4122_v7, 0.0  ;;  %v4041_v38 = vsel %vm299_vm2, %v3973_v19, 0.0  ;;  %v4123_v51 = vmul.f32 %v3973_v19, %v13087_v60  ;;  %16940 = vst [vmem:[#allocation53_spill] sm:$0xff] %v13111_v4  ;;  %v4045_v19 = vsel %vm299_vm2, %v3975_v55, 0.0 }
 0x43d   : > { %v4042_v54 = vadd.f32 %v4041_v38, %v4040_v26  ;;  %v4190_v53 = vadd.f32 %v4189_v62, %v4188_v16  ;;  %v4193_v16 = vsel %vm299_vm2, %v4124_v18, 0.0  ;;  %v4195_v55 = vsel %vm299_vm2, %v4125_v27, 0.0 }
 0x43e   : > { %v4191_v13 = vsel %vm299_vm2, %v4123_v51, 0.0  ;;  %v13106_v5 = vpop.f32.mrb[24].mxu0 }
 0x43f   : > { %v4044_v33 = vadd.f32 %v4043_v47, %v4042_v54  ;;  %v13109_v7 = vpop.f32.mrb[25].mxu0  ;;  %v4192_v0 = vadd.f32 %v4191_v13, %v4190_v53  ;;  %v3978_v24 = vmul.f32 %v13106_v5, %v13030_v10  ;;  %v13136_v52 = vpop.permute.xlu1 %3889 }
 0x440   : > { %v3976_v26 = vmul.f32 %v13002_v57, %v13109_v7  ;;  %v13116_v38 = vpop.f32.mrb[26].mxu0  ;;  %v13130_v57 = vpop.permute.xlu0 %3884  ;;  %16942 = vst [vmem:[#allocation57_spill] sm:$0xff] %v13136_v52 }
 0x441   : > { %v4046_v62 = vadd.f32 %v4045_v19, %v4044_v33  ;;  %v13121_v51 = vpop.f32.mrb[27].mxu0  ;;  %v4194_v54 = vadd.f32 %v4193_v16, %v4192_v0  ;;  %v3979_v18 = vmul.f32 %v13116_v38, %v13036_v44  ;;  %16941 = vst [vmem:[#allocation52_spill] sm:$0xff] %v13130_v57  ;;  %v4051_v27 = vsel %vm299_vm2, %v3978_v24, 0.0 }
 0x442   : > { %v4047_v47 = vsel %vm299_vm2, %v3976_v26, 0.0  ;;  %v4126_v29 = vmul.f32 %v3976_v26, %v13109_v7  ;;  %v3977_v53 = vmul.f32 %v13011_v32, %v13121_v51  ;;  %v4128_v26 = vmul.f32 %v13106_v5, %v3978_v24 }
 0x443   : > { %v4048_v13 = vadd.f32 %v4047_v47, %v4046_v62  ;;  %v4196_v10 = vadd.f32 %v4195_v55, %v4194_v54  ;;  %v4129_v54 = vmul.f32 %v13116_v38, %v3979_v18  ;;  %v4053_v32 = vsel %vm299_vm2, %v3979_v18, 0.0 }
 0x444   : > { %v4197_v33 = vsel %vm299_vm2, %v4126_v29, 0.0  ;;  %v4049_v0 = vsel %vm299_vm2, %v3977_v53, 0.0  ;;  %v4127_v19 = vmul.f32 %v3977_v53, %v13121_v51  ;;  %v4201_v24 = vsel %vm299_vm2, %v4128_v26, 0.0  ;;  %v13155_v6 = vpop.permute.xlu0 %3894 }
 0x445   : > { %v4050_v16 = vadd.f32 %v4049_v0, %v4048_v13  ;;  %v4198_v62 = vadd.f32 %v4197_v33, %v4196_v10  ;;  %16943 = vst [vmem:[#allocation56_spill] sm:$0xff] %v13155_v6 }
 0x446   : > { %v4199_v47 = vsel %vm299_vm2, %v4127_v19, 0.0  ;;  %v13140_v44 = vpop.f32.mrb[28].mxu0 }
 0x447   : > { %v4052_v55 = vadd.f32 %v4051_v27, %v4050_v16  ;;  %v13143_v29 = vpop.f32.mrb[29].mxu0  ;;  %v4200_v53 = vadd.f32 %v4199_v47, %v4198_v62  ;;  %v3982_v10 = vmul.f32 %v13140_v44, %v13077_v59  ;;  %v4203_v47 = vsel %vm299_vm2, %v4129_v54, 0.0  ;;  %v13164_v59 = vpop.permute.xlu1 %3899 }
 0x448   : > { %v3980_v13 = vmul.f32 %v13055_v17, %v13143_v29  ;;  %v13148_v0 = vpop.f32.mrb[30].mxu0  ;;  %16944 = vst [vmem:[#allocation59_spill] sm:$0xff] %v13164_v59 }
 0x449   : > { %v4054_v33 = vadd.f32 %v4053_v32, %v4052_v55  ;;  %v13153_v19 = vpop.f32.mrb[31].mxu0  ;;  %v4202_v16 = vadd.f32 %v4201_v24, %v4200_v53  ;;  %v3983_v26 = vmul.f32 %v13148_v0, %v13089_v40 }
 0x44a   : > { %v4055_v27 = vsel %vm299_vm2, %v3980_v13, 0.0  ;;  %v4130_v18 = vmul.f32 %v3980_v13, %v13143_v29  ;;  %v3981_v62 = vmul.f32 %v13064_v58, %v13153_v19  ;;  %v4132_v13 = vmul.f32 %v13140_v44, %v3982_v10 }
 0x44b   : > { %v4056_v17 = vadd.f32 %v4055_v27, %v4054_v33  ;;  %v4204_v32 = vadd.f32 %v4203_v47, %v4202_v16  ;;  %v4059_v58 = vsel %vm299_vm2, %v3982_v10, 0.0  ;;  %v4133_v27 = vmul.f32 %v13148_v0, %v3983_v26 }
 0x44c   : > { %v4205_v55 = vsel %vm299_vm2, %v4130_v18, 0.0  ;;  %v4057_v53 = vsel %vm299_vm2, %v3981_v62, 0.0  ;;  %v4131_v24 = vmul.f32 %v3981_v62, %v13153_v19  ;;  %v13177_v18 = vpop.permute.xlu0 %3904  ;;  %v4061_v47 = vsel %vm299_vm2, %v3983_v26, 0.0 }
 0x44d   : > { %v4058_v50 = vadd.f32 %v4057_v53, %v4056_v17  ;;  %v4206_v15 = vadd.f32 %v4205_v55, %v4204_v32  ;;  %16945 = vst [vmem:[#allocation58_spill] sm:$0xff] %v13177_v18  ;;  %v4209_v10 = vsel %vm299_vm2, %v4132_v13, 0.0  ;;  %v8668_v13 = vld [vmem:[%s16118_s2 + $0x2] sm:$0x3] }
 0x44e   : > { %v4207_v54 = vsel %vm299_vm2, %v4131_v24, 0.0  ;;  %v13172_v33 = vpop.f32.mrb[32].mxu0  ;;  %11023 = vmatprep.subr.msk.bf16.mxu1 %vm817_vm0, %v8668_v13  ;;  %v5023_v12 = vsel %vm817_vm0, %v8668_v13, 0 }
 0x44f   : > { %v4060_v40 = vadd.f32 %v4059_v58, %v4058_v50  ;;  %v13175_v16 = vpop.f32.mrb[33].mxu0  ;;  %v4208_v62 = vadd.f32 %v4207_v54, %v4206_v15  ;;  %v3986_v32 = vmul.f32 %v13172_v33, %v13130_v57  ;;  %v13189_v50 = vpop.permute.xlu1 %3909  ;;  %v4211_v54 = vsel %vm299_vm2, %v4133_v27, 0.0  ;;  %9797 = vmatpush3.bf16.msra.mxu1 %v5023_v12 }
 0x450   : > { %v3984_v17 = vmul.f32 %v13102_v41, %v13175_v16  ;;  %v13182_v53 = vpop.f32.mrb[34].mxu0  ;;  %16946 = vst [vmem:[#allocation65_spill] sm:$0xff] %v13189_v50  ;;  %v13207_v45 = vpop.permute.xlu0 %3914 }
 0x451   : > { %v4062_v55 = vadd.f32 %v4061_v47, %v4060_v40  ;;  %v13187_v24 = vpop.f32.mrb[35].mxu0  ;;  %v4210_v58 = vadd.f32 %v4209_v10, %v4208_v62  ;;  %v3987_v40 = vmul.f32 %v13182_v53, %v13136_v52  ;;  %16947 = vst [vmem:[#allocation64_spill] sm:$0xff] %v13207_v45 }
 0x452   : > { %v4063_v48 = vsel %vm299_vm2, %v3984_v17, 0.0  ;;  %v4134_v15 = vmul.f32 %v3984_v17, %v13175_v16  ;;  %v3985_v26 = vmul.f32 %v13111_v4, %v13187_v24  ;;  %v4136_v4 = vmul.f32 %v13172_v33, %v3986_v32 }
 0x453   : > { %v4064_v57 = vadd.f32 %v4063_v48, %v4062_v55  ;;  %v4212_v47 = vadd.f32 %v4211_v54, %v4210_v58  ;;  %v4067_v48 = vsel %vm299_vm2, %v3986_v32, 0.0  ;;  %v4137_v58 = vmul.f32 %v13182_v53, %v3987_v40 }
 0x454   : > { %v4213_v62 = vsel %vm299_vm2, %v4134_v15, 0.0  ;;  %v4065_v17 = vsel %vm299_vm2, %v3985_v26, 0.0  ;;  %v4135_v10 = vmul.f32 %v3985_v26, %v13187_v24  ;;  %v13216_v26 = vpop.permute.xlu1 %3919 }
 0x455   : > { %v4066_v41 = vadd.f32 %v4065_v17, %v4064_v57  ;;  %v4214_v27 = vadd.f32 %v4213_v62, %v4212_v47  ;;  %16949 = vst [vmem:[#allocation68_spill] sm:$0xff] %v13216_v26  ;;  %v4069_v57 = vsel %vm299_vm2, %v3987_v40, 0.0  ;;  %v4217_v47 = vsel %vm299_vm2, %v4136_v4, 0.0 }
 0x456   : > { %v4215_v55 = vsel %vm299_vm2, %v4135_v10, 0.0  ;;  %v13211_v52 = vpop.f32.mrb[36].mxu0 }
 0x457   : > { %16948 = vst [vmem:[#allocation69_spill] sm:$0xff] %v13211_v52  ;;  %v4068_v15 = vadd.f32 %v4067_v48, %v4066_v41  ;;  %v13214_v54 = vpop.f32.mrb[37].mxu0  ;;  %v4216_v13 = vadd.f32 %v4215_v55, %v4214_v27  ;;  %v3990_v12 = vmul.f32 %v13211_v52, %v13177_v18  ;;  %v4219_v27 = vsel %vm299_vm2, %v4137_v58, 0.0 }
 0x458   : > { %v3988_v17 = vmul.f32 %v13155_v6, %v13214_v54  ;;  %v13221_v32 = vpop.f32.mrb[38].mxu0  ;;  %v13235_v6 = vpop.permute.xlu0 %3924 }
 0x459   : > { %16950 = vst [vmem:[#allocation92_spill] sm:$0xff] %v13221_v32  ;;  %v4070_v62 = vadd.f32 %v4069_v57, %v4068_v15  ;;  %v13226_v10 = vpop.f32.mrb[39].mxu0  ;;  %v4218_v41 = vadd.f32 %v4217_v47, %v4216_v13  ;;  %v3991_v4 = vmul.f32 %v13221_v32, %v13189_v50  ;;  %16952 = vst [vmem:[#allocation94_spill] sm:$0xff] %v13235_v6  ;;  %v13241_v2 = vpop.permute.xlu1 %3929  ;;  %v4075_v58 = vsel %vm299_vm2, %v3990_v12, 0.0 }
 0x45a   : > { %16951 = vst [vmem:[#allocation93_spill] sm:$0xff] %v13226_v10  ;;  %v4071_v48 = vsel %vm299_vm2, %v3988_v17, 0.0  ;;  %v4138_v30 = vmul.f32 %v3988_v17, %v13214_v54  ;;  %v3989_v40 = vmul.f32 %v13164_v59, %v13226_v10  ;;  %v4140_v17 = vmul.f32 %v13211_v52, %v3990_v12  ;;  %16953 = vst [vmem:[#allocation96_spill] sm:$0xff] %v13241_v2 }
 0x45b   : > { %v4072_v55 = vadd.f32 %v4071_v48, %v4070_v62  ;;  %v4220_v18 = vadd.f32 %v4219_v27, %v4218_v41  ;;  %v4141_v41 = vmul.f32 %v13221_v32, %v3991_v4  ;;  %v4077_v59 = vsel %vm299_vm2, %v3991_v4, 0.0 }
 0x45c   : > { %v4221_v15 = vsel %vm299_vm2, %v4138_v30, 0.0  ;;  %v4073_v57 = vsel %vm299_vm2, %v3989_v40, 0.0  ;;  %v4139_v13 = vmul.f32 %v3989_v40, %v13226_v10  ;;  %v4225_v12 = vsel %vm299_vm2, %v4140_v17, 0.0  ;;  %v13267_v4 = vpop.permute.xlu0 %3934 }
 0x45d   : > { %v4074_v47 = vadd.f32 %v4073_v57, %v4072_v55  ;;  %v4222_v62 = vadd.f32 %v4221_v15, %v4220_v18  ;;  %v13258_v18 = vld [vmem:[%s16118_s2] sm:$0x3]  ;;  %16959 = vst [vmem:[#allocation102_spill] sm:$0xff] %v13267_v4  ;;  %v4227_v17 = vsel %vm299_vm2, %v4141_v41, 0.0 }
 0x45e   : > { %v4223_v48 = vsel %vm299_vm2, %v4139_v13, 0.0  ;;  %v13245_v50 = vpop.f32.mrb[40].mxu0  ;;  %16957 = vst [vmem:[#allocation100_spill] sm:$0xff] %v13258_v18  ;;  %11024 = vmatprep.subr.msk.bf16.mxu1 %vm817_vm0, %v13258_v18 }
 0x45f   : > { %16954 = vst [vmem:[#allocation63_spill] sm:$0xff] %v13245_v50  ;;  %v4076_v27 = vadd.f32 %v4075_v58, %v4074_v47  ;;  %v13248_v30 = vpop.f32.mrb[41].mxu0  ;;  %v4224_v40 = vadd.f32 %v4223_v48, %v4222_v62  ;;  %v3994_v15 = vmul.f32 %v13245_v50, %v13235_v6 }
 0x460   : > { %16955 = vst [vmem:[#allocation62_spill] sm:$0xff] %v13248_v30  ;;  %v3992_v55 = vmul.f32 %v13207_v45, %v13248_v30  ;;  %v13253_v57 = vpop.f32.mrb[42].mxu0 }
 0x461   : > { %16956 = vst [vmem:[#allocation95_spill] sm:$0xff] %v13253_v57  ;;  %v4078_v13 = vadd.f32 %v4077_v59, %v4076_v27  ;;  %v13263_v47 = vpop.f32.mrb[43].mxu0  ;;  %v4226_v58 = vadd.f32 %v4225_v12, %v4224_v40  ;;  %v3995_v59 = vmul.f32 %v13253_v57, %v13241_v2  ;;  %v13276_v27 = vpop.permute.xlu1 %3939 }
 0x462   : > { %16958 = vst [vmem:[#allocation99_spill] sm:$0xff] %v13263_v47  ;;  %v4079_v62 = vsel %vm299_vm2, %v3992_v55, 0.0  ;;  %v4142_v48 = vmul.f32 %v3992_v55, %v13248_v30  ;;  %v3993_v45 = vmul.f32 %v13216_v26, %v13263_v47  ;;  %16960 = vst [vmem:[#allocation101_spill] sm:$0xff] %v13276_v27  ;;  %v4144_v55 = vmul.f32 %v13245_v50, %v3994_v15 }
 0x463   : > { %v4080_v23 = vadd.f32 %v4079_v62, %v4078_v13  ;;  %v4228_v6 = vadd.f32 %v4227_v17, %v4226_v58  ;;  %v4083_v26 = vsel %vm299_vm2, %v3994_v15, 0.0  ;;  %v4145_v62 = vmul.f32 %v13253_v57, %v3995_v59 }
 0x464   : > { %v4229_v18 = vsel %vm299_vm2, %v4142_v48, 0.0  ;;  %v4081_v40 = vsel %vm299_vm2, %v3993_v45, 0.0  ;;  %v4143_v12 = vmul.f32 %v3993_v45, %v13263_v47  ;;  %v13289_v48 = vpop.permute.xlu0 %3944  ;;  %v4085_v17 = vsel %vm299_vm2, %v3995_v59, 0.0 }
 0x465   : > { %v4082_v49 = vadd.f32 %v4081_v40, %v4080_v23  ;;  %v4230_v30 = vadd.f32 %v4229_v18, %v4228_v6  ;;  %16961 = vst [vmem:[#allocation106_spill] sm:$0xff] %v13289_v48  ;;  %v4233_v6 = vsel %vm299_vm2, %v4144_v55, 0.0 }
 0x466   : > { %v4231_v41 = vsel %vm299_vm2, %v4143_v12, 0.0  ;;  %v13284_v13 = vpop.f32.mrb[44].mxu0 }
 0x467   : > { %v4084_v2 = vadd.f32 %v4083_v26, %v4082_v49  ;;  %v13287_v58 = vpop.f32.mrb[45].mxu0  ;;  %v4232_v45 = vadd.f32 %v4231_v41, %v4230_v30  ;;  %v3998_v18 = vmul.f32 %v13284_v13, %v13289_v48  ;;  %v13301_v49 = vpop.permute.xlu1 %3949  ;;  %v4235_v41 = vsel %vm299_vm2, %v4145_v62, 0.0 }
 0x468   : > { %v3996_v23 = vmul.f32 %v13267_v4, %v13287_v58  ;;  %v13294_v40 = vpop.f32.mrb[46].mxu0  ;;  %16963 = vst [vmem:[#allocation108_spill] sm:$0xff] %v13301_v49 }
 0x469   : > { %16962 = vst [vmem:[#allocation105_spill] sm:$0xff] %v13294_v40  ;;  %v4086_v15 = vadd.f32 %v4085_v17, %v4084_v2  ;;  %v13299_v12 = vpop.f32.mrb[47].mxu0  ;;  %v4234_v26 = vadd.f32 %v4233_v6, %v4232_v45  ;;  %v3999_v55 = vmul.f32 %v13294_v40, %v13301_v49  ;;  %v4148_v6 = vmul.f32 %v13284_v13, %v3998_v18 }
 0x46a   : > { %v4087_v57 = vsel %vm299_vm2, %v3996_v23, 0.0  ;;  %v4146_v30 = vmul.f32 %v3996_v23, %v13287_v58  ;;  %v3997_v59 = vmul.f32 %v13276_v27, %v13299_v12  ;;  %v4091_v23 = vsel %vm299_vm2, %v3998_v18, 0.0 }
 0x46b   : > { %v4088_v4 = vadd.f32 %v4087_v57, %v4086_v15  ;;  %v4236_v48 = vadd.f32 %v4235_v41, %v4234_v26  ;;  %v4149_v57 = vmul.f32 %v13294_v40, %v3999_v55  ;;  %v4093_v15 = vsel %vm299_vm2, %v3999_v55, 0.0 }
 0x46c   : > { %v4237_v2 = vsel %vm299_vm2, %v4146_v30, 0.0  ;;  %v4089_v17 = vsel %vm299_vm2, %v3997_v59, 0.0  ;;  %v4147_v45 = vmul.f32 %v3997_v59, %v13299_v12  ;;  %v4241_v30 = vsel %vm299_vm2, %v4148_v6, 0.0 }
 0x46d   : > { %v4090_v50 = vadd.f32 %v4089_v17, %v4088_v4  ;;  %v4238_v47 = vadd.f32 %v4237_v2, %v4236_v48  ;;  %v4243_v59 = vsel %vm299_vm2, %v4149_v57, 0.0 }
 0x46e   : > { %v4239_v27 = vsel %vm299_vm2, %v4147_v45, 0.0 }
 0x46f   : > { %v4092_v62 = vadd.f32 %v4091_v23, %v4090_v50  ;;  %v4240_v26 = vadd.f32 %v4239_v27, %v4238_v47 }
 0x471   : > { %v4094_v41 = vadd.f32 %v4093_v15, %v4092_v62  ;;  %v4242_v49 = vadd.f32 %v4241_v30, %v4240_v26 }
 0x473   : > { %v4095_v32 = vrot.slane %v4094_v41, 4  ;;  %v4244_v52 = vadd.f32 %v4243_v59, %v4242_v49 }
 0x475   : > { %v4096_v4 = vadd.f32 %v4095_v32, %v4094_v41  ;;  %v4245_v17 = vrot.slane %v4244_v52, 4 }
 0x477   : > { %v4097_v18 = vrot.slane %v4096_v4, 2  ;;  %v4246_v48 = vadd.f32 %v4245_v17, %v4244_v52 }
 0x479   : > { %v4098_v2 = vadd.f32 %v4097_v18, %v4096_v4  ;;  %v4247_v45 = vrot.slane %v4246_v48, 2 }
 0x47b   : > { %v4099_v10 = vrot.slane %v4098_v2, 1  ;;  %v4248_v40 = vadd.f32 %v4247_v45, %v4246_v48 }
 0x47d   : > { %v4100_v50 = vadd.f32 %v4099_v10, %v4098_v2  ;;  %v4249_v23 = vrot.slane %v4248_v40, 1  ;;  %v16971_v2 = vld [vmem:[#allocation105_spill] sm:$0xff] }
 0x47f   : > { %v13320_v55 = vmul.f32 0.00390625, %v4100_v50  ;;  %v4250_v47 = vadd.f32 %v4249_v23, %v4248_v40  ;;  %v16972_v23 = vld [vmem:[#allocation3_spill] sm:$0xff] }
 0x480   : > { %vm4448_vm6 = vcmp.lt.s32.totalorder %v16972_v23, 1 }
 0x481   : > { %v4252_v27 = vmul.f32 %v13320_v55, %v13320_v55  ;;  %v4298_v6 = vsub.f32 %v13287_v58, %v13320_v55  ;;  %v4299_v32 = vsub.f32 %v13299_v12, %v13320_v55  ;;  %v4300_v52 = vsub.f32 %v13284_v13, %v13320_v55 }
 0x482   : > { %v4251_v49 = vmul.f32 0.00390625, %v4250_v47  ;;  %v4254_v10 = vsub.f32 %v12912_v43, %v13320_v55  ;;  %v4255_v57 = vsub.f32 %v12922_v21, %v13320_v55  ;;  %v4256_v40 = vsub.f32 %v12910_v42, %v13320_v55 }
 0x483   : > { %v4257_v62 = vsub.f32 %v12920_v20, %v13320_v55  ;;  %v4258_v58 = vsub.f32 %v12943_v3, %v13320_v55  ;;  %v4259_v12 = vsub.f32 %v12953_v25, %v13320_v55  ;;  %v4260_v13 = vsub.f32 %v12941_v34, %v13320_v55 }
 0x484   : > { %v4253_v15 = vsub.f32 %v4251_v49, %v4252_v27  ;;  %v4261_v43 = vsub.f32 %v12949_v61, %v13320_v55  ;;  %v4262_v21 = vsub.f32 %v12975_v31, %v13320_v55  ;;  %v4263_v42 = vsub.f32 %v12987_v1, %v13320_v55 }
 0x485   : > { %v4264_v20 = vsub.f32 %v12971_v22, %v13320_v55  ;;  %v4265_v3 = vsub.f32 %v12982_v63, %v13320_v55  ;;  %v4266_v25 = vsub.f32 %v13009_v9, %v13320_v55  ;;  %v4267_v34 = vsub.f32 %v13021_v8, %v13320_v55 }
 0x486   : > { %v4302_v26 = vadd.f32 1e-05, %v4253_v15  ;;  %v4268_v61 = vsub.f32 %v13006_v36, %v13320_v55  ;;  %v4269_v31 = vsub.f32 %v13016_v14, %v13320_v55  ;;  %v4270_v1 = vsub.f32 %v13043_v56, %v13320_v55 }
 0x487   : > { %v4271_v22 = vsub.f32 %v13053_v39, %v13320_v55  ;;  %v4272_v63 = vsub.f32 %v13040_v35, %v13320_v55  ;;  %v4273_v9 = vsub.f32 %v13048_v28, %v13320_v55  ;;  %v4274_v8 = vsub.f32 %v13075_v11, %v13320_v55 }
 0x488   : > { %11044 = vrsqrt.f32 %v4302_v26  ;;  %v4275_v36 = vsub.f32 %v13087_v60, %v13320_v55  ;;  %v4276_v14 = vsub.f32 %v13072_v37, %v13320_v55  ;;  %v4277_v56 = vsub.f32 %v13082_v46, %v13320_v55 }
 0x489   : > { %v4278_v39 = vsub.f32 %v13109_v7, %v13320_v55  ;;  %v4279_v35 = vsub.f32 %v13121_v51, %v13320_v55  ;;  %v4280_v28 = vsub.f32 %v13106_v5, %v13320_v55  ;;  %v4281_v11 = vsub.f32 %v13116_v38, %v13320_v55 }
 0x48a   : > { %v4282_v60 = vsub.f32 %v13143_v29, %v13320_v55  ;;  %v4283_v37 = vsub.f32 %v13153_v19, %v13320_v55  ;;  %v4284_v46 = vsub.f32 %v13140_v44, %v13320_v55  ;;  %v4285_v7 = vsub.f32 %v13148_v0, %v13320_v55  ;;  %v16964_v44 = vld [vmem:[#allocation93_spill] sm:$0xff] }
 0x48b   : > { %v4286_v51 = vsub.f32 %v13175_v16, %v13320_v55  ;;  %v4287_v5 = vsub.f32 %v13187_v24, %v13320_v55  ;;  %v4288_v38 = vsub.f32 %v13172_v33, %v13320_v55  ;;  %v4289_v29 = vsub.f32 %v13182_v53, %v13320_v55  ;;  %v16965_v0 = vld [vmem:[#allocation69_spill] sm:$0xff]  ;;  %v16966_v16 = vld [vmem:[#allocation92_spill] sm:$0xff]  ;;  %v16967_v24 = vld [vmem:[#allocation62_spill] sm:$0xff] }
 0x48c   : > { %v4290_v19 = vsub.f32 %v13214_v54, %v13320_v55  ;;  %v4291_v30 = vsub.f32 %v16964_v44, %v13320_v55  ;;  %v4292_v41 = vsub.f32 %v16965_v0, %v13320_v55  ;;  %v4293_v59 = vsub.f32 %v16966_v16, %v13320_v55  ;;  %v16968_v33 = vld [vmem:[#allocation99_spill] sm:$0xff] }
 0x48d   : > { %v4294_v4 = vsub.f32 %v16967_v24, %v13320_v55  ;;  %v4295_v17 = vsub.f32 %v16968_v33, %v13320_v55  ;;  %v16969_v53 = vld [vmem:[#allocation63_spill] sm:$0xff]  ;;  %v4301_v45 = vsub.f32 %v16971_v2, %v13320_v55 }
 0x48e   : > { %v4296_v18 = vsub.f32 %v16969_v53, %v13320_v55  ;;  %v16970_v54 = vld [vmem:[#allocation95_spill] sm:$0xff] }
 0x48f   : > { %v4297_v48 = vsub.f32 %v16970_v54, %v13320_v55 }
 0x492   : > { %v11045_v50 = vpop.eup %11044 }
 0x493   : > { %v4348_v47 = vmul.f32 %v11045_v50, %v4298_v6  ;;  %v4349_v27 = vmul.f32 %v11045_v50, %v4299_v32  ;;  %v4350_v49 = vmul.f32 %v11045_v50, %v4300_v52  ;;  %v13421_v15 = vmul.f32 %v11045_v50, %v4254_v10 }
 0x494   : > { %v13423_v26 = vmul.f32 %v11045_v50, %v4255_v57  ;;  %v13425_v44 = vmul.f32 %v11045_v50, %v4256_v40  ;;  %v13427_v0 = vmul.f32 %v11045_v50, %v4257_v62  ;;  %v13429_v16 = vmul.f32 %v11045_v50, %v4258_v58 }
 0x495   : > { %v4396_v24 = vmax.f32 %v4348_v47, 0.0  ;;  %v4397_v33 = vmax.f32 %v4349_v27, 0.0  ;;  %v4398_v53 = vmax.f32 %v4350_v49, 0.0  ;;  %v13431_v55 = vmul.f32 %v11045_v50, %v4259_v12 }
 0x496   : > { %v13433_v54 = vmul.f32 %v11045_v50, %v4260_v13  ;;  %v13435_v6 = vmul.f32 %v11045_v50, %v4261_v43  ;;  %v13437_v32 = vmul.f32 %v11045_v50, %v4262_v21  ;;  %v13439_v52 = vmul.f32 %v11045_v50, %v4263_v42 }
 0x497   : > { %v13441_v10 = vrot.slane %v4396_v24, 7  ;;  %v4445_v57 = vrot.slane %v4397_v33, 7  ;;  %v13443_v40 = vrot.slane %v4398_v53, 7  ;;  %v13445_v62 = vmul.f32 %v11045_v50, %v4264_v20 }
 0x498   : > { %v13447_v58 = vmul.f32 %v11045_v50, %v4265_v3  ;;  %v13449_v2 = vmul.f32 %v11045_v50, %v4266_v25  ;;  %v13451_v12 = vmul.f32 %v11045_v50, %v4267_v34  ;;  %v13453_v13 = vmul.f32 %v11045_v50, %v4268_v61 }
 0x499   : > { %v4450_v43 = vsel %vm4448_vm6, %v4445_v57, %v13443_v40  ;;  %v4451_v21 = vsel %vm4448_vm6, %v13441_v10, %v4445_v57  ;;  %v13461_v42 = vmul.f32 %v11045_v50, %v4269_v31  ;;  %v13463_v20 = vmul.f32 %v11045_v50, %v4270_v1 }
 0x49a   : > { %4542 = vst.msk [vmem:[#allocation2 + $0x180] sm:$0xff] %vm299_vm2, %v4451_v21  ;;  %4543 = vst.msk [vmem:[#allocation2 + $0x188] sm:$0xff] %vm299_vm2, %v4450_v43  ;;  %v13467_v3 = vmul.f32 %v11045_v50, %v4271_v22  ;;  %v13469_v25 = vmul.f32 %v11045_v50, %v4272_v63  ;;  %v13471_v34 = vmul.f32 %v11045_v50, %v4273_v9 }
 0x49b   : > { %v13473_v61 = vmul.f32 %v11045_v50, %v4274_v8  ;;  %v13475_v47 = vmul.f32 %v11045_v50, %v4275_v36  ;;  %v13477_v27 = vmul.f32 %v11045_v50, %v4276_v14  ;;  %v13479_v31 = vmul.f32 %v11045_v50, %v4277_v56 }
 0x49c   : > { %v13481_v1 = vmul.f32 %v11045_v50, %v4278_v39  ;;  %v13483_v49 = vmul.f32 %v11045_v50, %v4279_v35  ;;  %v13485_v24 = vmul.f32 %v11045_v50, %v4280_v28  ;;  %v13487_v22 = vmul.f32 %v11045_v50, %v4281_v11 }
 0x49d   : > { %v13489_v63 = vmul.f32 %v11045_v50, %v4282_v60  ;;  %v13491_v9 = vmul.f32 %v11045_v50, %v4283_v37  ;;  %v13493_v8 = vmul.f32 %v11045_v50, %v4284_v46  ;;  %v13495_v36 = vmul.f32 %v11045_v50, %v4285_v7 }
 0x49e   : > { %v13497_v14 = vmul.f32 %v11045_v50, %v4286_v51  ;;  %v13499_v56 = vmul.f32 %v11045_v50, %v4287_v5  ;;  %v13501_v39 = vmul.f32 %v11045_v50, %v4288_v38  ;;  %v13503_v35 = vmul.f32 %v11045_v50, %v4289_v29 }
 0x49f   : > { %v13505_v28 = vmul.f32 %v11045_v50, %v4290_v19  ;;  %v13507_v11 = vmul.f32 %v11045_v50, %v4291_v30  ;;  %v13509_v60 = vmul.f32 %v11045_v50, %v4292_v41  ;;  %v13511_v37 = vmul.f32 %v11045_v50, %v4293_v59 }
 0x4a0   : > { %v13513_v46 = vmul.f32 %v11045_v50, %v4294_v4  ;;  %v13515_v7 = vmul.f32 %v11045_v50, %v4295_v17  ;;  %v13517_v51 = vmul.f32 %v11045_v50, %v4296_v18  ;;  %v13519_v5 = vmul.f32 %v11045_v50, %v4297_v48 }
 0x4a1   : > { %v13521_v38 = vmul.f32 %v11045_v50, %v4301_v45  ;;  %v4573_v29 = vld [vmem:[#allocation2 + $0x182] sm:$0x1]  ;;  %v4352_v19 = vmax.f32 %v13421_v15, 0.0  ;;  %v4353_v30 = vmax.f32 %v13423_v26, 0.0  ;;  %v4354_v41 = vmax.f32 %v13425_v44, 0.0 }
 0x4a2   : > { %v4355_v59 = vmax.f32 %v13427_v0, 0.0  ;;  %4591 = vst.msk [vmem:[#allocation2 + $0x180] sm:$0x1] %vm365_vm3, %v4573_v29  ;;  %v4356_v4 = vmax.f32 %v13429_v16, 0.0  ;;  %v4357_v17 = vmax.f32 %v13431_v55, 0.0  ;;  %v4358_v18 = vmax.f32 %v13433_v54, 0.0 }
 0x4a3   : > { %v4359_v48 = vmax.f32 %v13435_v6, 0.0  ;;  %v4360_v45 = vmax.f32 %v13437_v32, 0.0  ;;  %v4361_v50 = vmax.f32 %v13439_v52, 0.0  ;;  %v4362_v15 = vmax.f32 %v13445_v62, 0.0 }
 0x4a4   : > { %v4363_v26 = vmax.f32 %v13447_v58, 0.0  ;;  %v4364_v44 = vmax.f32 %v13449_v2, 0.0  ;;  %v4365_v0 = vmax.f32 %v13451_v12, 0.0  ;;  %v4366_v16 = vmax.f32 %v13453_v13, 0.0 }
 0x4a5   : > { %v4367_v33 = vmax.f32 %v13461_v42, 0.0  ;;  %v4368_v53 = vmax.f32 %v13463_v20, 0.0  ;;  %v4369_v55 = vmax.f32 %v13467_v3, 0.0  ;;  %v4370_v54 = vmax.f32 %v13469_v25, 0.0 }
 0x4a6   : > { %v4371_v6 = vmax.f32 %v13471_v34, 0.0  ;;  %v4372_v32 = vmax.f32 %v13473_v61, 0.0  ;;  %v4373_v52 = vmax.f32 %v13475_v47, 0.0  ;;  %v4374_v57 = vmax.f32 %v13477_v27, 0.0 }
 0x4a7   : > { %v4375_v62 = vmax.f32 %v13479_v31, 0.0  ;;  %v4376_v58 = vmax.f32 %v13481_v1, 0.0  ;;  %v4377_v2 = vmax.f32 %v13483_v49, 0.0  ;;  %v4378_v12 = vmax.f32 %v13485_v24, 0.0 }
 0x4a8   : > { %v4379_v13 = vmax.f32 %v13487_v22, 0.0  ;;  %v4380_v43 = vmax.f32 %v13489_v63, 0.0  ;;  %v4381_v21 = vmax.f32 %v13491_v9, 0.0  ;;  %v4382_v42 = vmax.f32 %v13493_v8, 0.0 }
 0x4a9   : > { %v4383_v20 = vmax.f32 %v13495_v36, 0.0  ;;  %v4384_v3 = vmax.f32 %v13497_v14, 0.0  ;;  %v4385_v25 = vmax.f32 %v13499_v56, 0.0  ;;  %v4386_v34 = vmax.f32 %v13501_v39, 0.0 }
 0x4aa   : > { %v4387_v61 = vmax.f32 %v13503_v35, 0.0  ;;  %v4388_v47 = vmax.f32 %v13505_v28, 0.0  ;;  %v4389_v27 = vmax.f32 %v13507_v11, 0.0  ;;  %v4390_v31 = vmax.f32 %v13509_v60, 0.0 }
 0x4ab   : > { %v4391_v1 = vmax.f32 %v13511_v37, 0.0  ;;  %v4392_v49 = vmax.f32 %v13513_v46, 0.0  ;;  %v4393_v24 = vmax.f32 %v13515_v7, 0.0  ;;  %v4394_v22 = vmax.f32 %v13517_v51, 0.0 }
 0x4ac   : > { %v4395_v63 = vmax.f32 %v13519_v5, 0.0  ;;  %v4399_v9 = vmax.f32 %v13521_v38, 0.0  ;;  %v13569_v8 = vrot.slane %v4352_v19, 7  ;;  %v13571_v36 = vrot.slane %v4353_v30, 7 }
 0x4ad   : > { %v13573_v14 = vrot.slane %v4354_v41, 7  ;;  %v13575_v56 = vrot.slane %v4355_v59, 7  ;;  %v13577_v39 = vrot.slane %v4356_v4, 7  ;;  %v13579_v35 = vrot.slane %v4357_v17, 7 }
 0x4ae   : > { %16973 = vst [vmem:[#allocation107_spill] sm:$0xff] %v13569_v8  ;;  %16974 = vst [vmem:[#allocation112_spill] sm:$0xff] %v13571_v36  ;;  %v13581_v28 = vrot.slane %v4358_v18, 7  ;;  %v13583_v11 = vrot.slane %v4359_v48, 7  ;;  %v13585_v60 = vrot.slane %v4360_v45, 7  ;;  %v13587_v37 = vrot.slane %v4361_v50, 7 }
 0x4af   : > { %16975 = vst [vmem:[#allocation111_spill] sm:$0xff] %v13573_v14  ;;  %16976 = vst [vmem:[#allocation114_spill] sm:$0xff] %v13575_v56  ;;  %v13589_v46 = vrot.slane %v4362_v15, 7  ;;  %v13591_v7 = vrot.slane %v4363_v26, 7  ;;  %v13593_v51 = vrot.slane %v4364_v44, 7  ;;  %v13595_v5 = vrot.slane %v4365_v0, 7 }
 0x4b0   : > { %v13597_v38 = vrot.slane %v4366_v16, 7  ;;  %v13599_v29 = vrot.slane %v4367_v33, 7  ;;  %v13601_v19 = vrot.slane %v4368_v53, 7  ;;  %v13603_v30 = vrot.slane %v4369_v55, 7 }
 0x4b1   : > { %v13605_v41 = vrot.slane %v4370_v54, 7  ;;  %v13607_v59 = vrot.slane %v4371_v6, 7  ;;  %v13609_v4 = vrot.slane %v4372_v32, 7  ;;  %v13611_v17 = vrot.slane %v4373_v52, 7 }
 0x4b2   : > { %v13613_v18 = vrot.slane %v4374_v57, 7  ;;  %v13615_v48 = vrot.slane %v4375_v62, 7  ;;  %v4424_v45 = vrot.slane %v4376_v58, 7  ;;  %v4425_v50 = vrot.slane %v4377_v2, 7 }
 0x4b3   : > { %v4426_v15 = vrot.slane %v4378_v12, 7  ;;  %v4427_v26 = vrot.slane %v4379_v13, 7  ;;  %v4428_v44 = vrot.slane %v4380_v43, 7  ;;  %v4429_v0 = vrot.slane %v4381_v21, 7 }
 0x4b4   : > { %v4430_v16 = vrot.slane %v4382_v42, 7  ;;  %v4431_v33 = vrot.slane %v4383_v20, 7  ;;  %v4432_v53 = vrot.slane %v4384_v3, 7  ;;  %v4433_v55 = vrot.slane %v4385_v25, 7  ;;  %v4609_v20 = vld [vmem:[#allocation2 + $0x18f] sm:$0x1] }
 0x4b5   : > { %v4434_v54 = vrot.slane %v4386_v34, 7  ;;  %v4435_v6 = vrot.slane %v4387_v61, 7  ;;  %v4436_v32 = vrot.slane %v4388_v47, 7  ;;  %v4437_v8 = vrot.slane %v4389_v27, 7 }
 0x4b6   : > { %v4438_v52 = vrot.slane %v4390_v31, 7  ;;  %v4439_v36 = vrot.slane %v4391_v1, 7  ;;  %v4440_v57 = vrot.slane %v4392_v49, 7  ;;  %v4441_v14 = vrot.slane %v4393_v24, 7 }
 0x4b7   : > { %v4442_v62 = vrot.slane %v4394_v22, 7  ;;  %v4443_v56 = vrot.slane %v4395_v63, 7  ;;  %v13617_v58 = vrot.slane %v4399_v9, 7  ;;  %v4459_v12 = vsel %vm4448_vm6, %v4436_v32, %v4437_v8 }
 0x4b8   : > { %v4458_v2 = vsel %vm4448_vm6, %v4437_v8, %v4438_v52  ;;  %v4455_v43 = vsel %vm4448_vm6, %v4440_v57, %v4441_v14  ;;  %v4456_v21 = vsel %vm4448_vm6, %v4439_v36, %v4440_v57  ;;  %v4457_v42 = vsel %vm4448_vm6, %v4438_v52, %v4439_v36  ;;  %4534 = vst.msk [vmem:[#allocation2 + $0x140] sm:$0xff] %vm299_vm2, %v4459_v12 }
 0x4b9   : > { %v4454_v13 = vsel %vm4448_vm6, %v4441_v14, %v4442_v62  ;;  %4535 = vst.msk [vmem:[#allocation2 + $0x148] sm:$0xff] %vm299_vm2, %v4458_v2  ;;  %v4449_v3 = vsel %vm4448_vm6, %v13443_v40, %v13617_v58  ;;  %v4452_v25 = vsel %vm4448_vm6, %v4443_v56, %v13441_v10  ;;  %v4453_v34 = vsel %vm4448_vm6, %v4442_v62, %v4443_v56 }
 0x4ba   : > { %v4460_v61 = vsel %vm4448_vm6, %v4435_v6, %v4436_v32  ;;  %4536 = vst.msk [vmem:[#allocation2 + $0x150] sm:$0xff] %vm299_vm2, %v4457_v42  ;;  %4537 = vst.msk [vmem:[#allocation2 + $0x158] sm:$0xff] %vm299_vm2, %v4456_v21  ;;  %v4461_v40 = vsel %vm4448_vm6, %v4434_v54, %v4435_v6  ;;  %v4462_v10 = vsel %vm4448_vm6, %v4433_v55, %v4434_v54 }
 0x4bb   : > { %4538 = vst.msk [vmem:[#allocation2 + $0x160] sm:$0xff] %vm299_vm2, %v4455_v43  ;;  %4539 = vst.msk [vmem:[#allocation2 + $0x168] sm:$0xff] %vm299_vm2, %v4454_v13  ;;  %v4463_v47 = vsel %vm4448_vm6, %v4432_v53, %v4433_v55  ;;  %v4464_v27 = vsel %vm4448_vm6, %v4431_v33, %v4432_v53  ;;  %v4465_v31 = vsel %vm4448_vm6, %v4430_v16, %v4431_v33  ;;  %v16980_v33 = vld [vmem:[#allocation112_spill] sm:$0xff]  ;;  %v16981_v55 = vld [vmem:[#allocation107_spill] sm:$0xff] }
 0x4bc   : > { %4533 = vst.msk [vmem:[#allocation2 + $0x138] sm:$0xff] %vm299_vm2, %v4460_v61  ;;  %4540 = vst.msk [vmem:[#allocation2 + $0x170] sm:$0xff] %vm299_vm2, %v4453_v34  ;;  %v4466_v1 = vsel %vm4448_vm6, %v4429_v0, %v4430_v16  ;;  %v4467_v49 = vsel %vm4448_vm6, %v4428_v44, %v4429_v0  ;;  %v4468_v24 = vsel %vm4448_vm6, %v4427_v26, %v4428_v44  ;;  %v16977_v44 = vld [vmem:[#allocation114_spill] sm:$0xff] }
 0x4bd   : > { %4541 = vst.msk [vmem:[#allocation2 + $0x178] sm:$0xff] %vm299_vm2, %v4452_v25  ;;  %4544 = vst.msk [vmem:[#allocation2 + $0x190] sm:$0xff] %vm299_vm2, %v4449_v3  ;;  %v4469_v22 = vsel %vm4448_vm6, %v4426_v15, %v4427_v26  ;;  %v4470_v63 = vsel %vm4448_vm6, %v4425_v50, %v4426_v15  ;;  %v4471_v9 = vsel %vm4448_vm6, %v4424_v45, %v4425_v50 }
 0x4be   : > { %4529 = vst.msk [vmem:[#allocation2 + $0x118] sm:$0xff] %vm299_vm2, %v4464_v27  ;;  %4530 = vst.msk [vmem:[#allocation2 + $0x120] sm:$0xff] %vm299_vm2, %v4463_v47  ;;  %v4472_v8 = vsel %vm4448_vm6, %v13615_v48, %v4424_v45  ;;  %v4473_v36 = vsel %vm4448_vm6, %v13613_v18, %v13615_v48  ;;  %v4474_v14 = vsel %vm4448_vm6, %v13611_v17, %v13613_v18 }
 0x4bf   : > { %4531 = vst.msk [vmem:[#allocation2 + $0x128] sm:$0xff] %vm299_vm2, %v4462_v10  ;;  %4532 = vst.msk [vmem:[#allocation2 + $0x130] sm:$0xff] %vm299_vm2, %v4461_v40  ;;  %v4475_v56 = vsel %vm4448_vm6, %v13609_v4, %v13611_v17  ;;  %v4476_v45 = vsel %vm4448_vm6, %v13607_v59, %v13609_v4  ;;  %v4477_v18 = vsel %vm4448_vm6, %v13605_v41, %v13607_v59 }
 0x4c0   : > { %4627 = vst.msk [vmem:[#allocation2 + $0x191] sm:$0x1] %vm365_vm3, %v4609_v20  ;;  %v4478_v17 = vsel %vm4448_vm6, %v13603_v30, %v13605_v41  ;;  %v4479_v4 = vsel %vm4448_vm6, %v13601_v19, %v13603_v30  ;;  %v4480_v48 = vsel %vm4448_vm6, %v13599_v29, %v13601_v19  ;;  %v4481_v41 = vsel %vm4448_vm6, %v13597_v38, %v13599_v29  ;;  %v4606_v29 = vld [vmem:[#allocation2 + $0x147] sm:$0x1] }
 0x4c1   : > { %4525 = vst.msk [vmem:[#allocation2 + $0xf8] sm:$0xff] %vm299_vm2, %v4468_v24  ;;  %4526 = vst.msk [vmem:[#allocation2 + $0x100] sm:$0xff] %vm299_vm2, %v4467_v49  ;;  %v4482_v30 = vsel %vm4448_vm6, %v13595_v5, %v13597_v38  ;;  %v4483_v19 = vsel %vm4448_vm6, %v13593_v51, %v13595_v5  ;;  %v4484_v59 = vsel %vm4448_vm6, %v13591_v7, %v13593_v51  ;;  %v4607_v52 = vld [vmem:[#allocation2 + $0x15f] sm:$0x1] }
 0x4c2   : > { %4527 = vst.msk [vmem:[#allocation2 + $0x108] sm:$0xff] %vm299_vm2, %v4466_v1  ;;  %4528 = vst.msk [vmem:[#allocation2 + $0x110] sm:$0xff] %vm299_vm2, %v4465_v31  ;;  %v4485_v38 = vsel %vm4448_vm6, %v13589_v46, %v13591_v7  ;;  %v4486_v5 = vsel %vm4448_vm6, %v13587_v37, %v13589_v46  ;;  %v4487_v51 = vsel %vm4448_vm6, %v13585_v60, %v13587_v37  ;;  %v4551_v7 = vld [vmem:[#allocation2 + $0x168] sm:$0xff]  ;;  %v4571_v46 = vld [vmem:[#allocation2 + $0x152] sm:$0x1] }
 0x4c3   : > { %4521 = vst.msk [vmem:[#allocation2 + $0xd8] sm:$0xff] %vm299_vm2, %v4472_v8  ;;  %4522 = vst.msk [vmem:[#allocation2 + $0xe0] sm:$0xff] %vm299_vm2, %v4471_v9  ;;  %v4488_v50 = vsel %vm4448_vm6, %v13583_v11, %v13585_v60  ;;  %v4572_v15 = vld [vmem:[#allocation2 + $0x16a] sm:$0x1]  ;;  %v4489_v37 = vsel %vm4448_vm6, %v13581_v28, %v13583_v11  ;;  %v4490_v60 = vsel %vm4448_vm6, %v13579_v35, %v13581_v28  ;;  %v13787_v11 = vld [vmem:[#allocation2 + $0x170] sm:$0xff] }
 0x4c4   : > { %4523 = vst.msk [vmem:[#allocation2 + $0xe8] sm:$0xff] %vm299_vm2, %v4470_v63  ;;  %4524 = vst.msk [vmem:[#allocation2 + $0xf0] sm:$0xff] %vm299_vm2, %v4469_v22  ;;  %v4491_v26 = vsel %vm4448_vm6, %v13577_v39, %v13579_v35  ;;  %v4492_v0 = vsel %vm4448_vm6, %v16977_v44, %v13577_v39  ;;  %v4553_v28 = vld [vmem:[#allocation2 + $0x178] sm:$0xff]  ;;  %v16979_v39 = vld [vmem:[#allocation111_spill] sm:$0xff]  ;;  %v4495_v54 = vsel %vm4448_vm6, %v16981_v55, %v16980_v33 }
 0x4c5   : > { %4517 = vst.msk [vmem:[#allocation2 + $0xb8] sm:$0xff] %vm299_vm2, %v4476_v45  ;;  %4518 = vst.msk [vmem:[#allocation2 + $0xc0] sm:$0xff] %vm299_vm2, %v4475_v56  ;;  %v4570_v16 = vld [vmem:[#allocation2 + $0x13a] sm:$0x1]  ;;  %v4493_v35 = vsel %vm4448_vm6, %v16979_v39, %v16977_v44  ;;  %v4494_v53 = vsel %vm4448_vm6, %v16980_v33, %v16979_v39  ;;  %v4496_v6 = vsel %vm4448_vm6, %v13617_v58, %v16981_v55  ;;  %v4569_v32 = vld [vmem:[#allocation2 + $0x122] sm:$0x1] }
 0x4c6   : > { %4519 = vst.msk [vmem:[#allocation2 + $0xc8] sm:$0xff] %vm299_vm2, %v4474_v14  ;;  %4520 = vst.msk [vmem:[#allocation2 + $0xd0] sm:$0xff] %vm299_vm2, %v4473_v36  ;;  %v4608_v57 = vld [vmem:[#allocation2 + $0x177] sm:$0x1] }
 0x4c7   : > { %4513 = vst.msk [vmem:[#allocation2 + $0x98] sm:$0xff] %vm299_vm2, %v4480_v48  ;;  %4514 = vst.msk [vmem:[#allocation2 + $0xa0] sm:$0xff] %vm299_vm2, %v4479_v4 }
 0x4c8   : > { %4515 = vst.msk [vmem:[#allocation2 + $0xa8] sm:$0xff] %vm299_vm2, %v4478_v17  ;;  %4516 = vst.msk [vmem:[#allocation2 + $0xb0] sm:$0xff] %vm299_vm2, %v4477_v18  ;;  %v4603_v58 = vld [vmem:[#allocation2 + $0xff] sm:$0x1]  ;;  %v13855_v18 = vld [vmem:[#allocation2 + $0x140] sm:$0xff] }
 0x4c9   : > { %4509 = vst.msk [vmem:[#allocation2 + $0x78] sm:$0xff] %vm299_vm2, %v4484_v59  ;;  %4510 = vst.msk [vmem:[#allocation2 + $0x80] sm:$0xff] %vm299_vm2, %v4483_v19  ;;  %v4568_v62 = vld [vmem:[#allocation2 + $0x10a] sm:$0x1]  ;;  %v4604_v2 = vld [vmem:[#allocation2 + $0x117] sm:$0x1] }
 0x4ca   : > { %4511 = vst.msk [vmem:[#allocation2 + $0x88] sm:$0xff] %vm299_vm2, %v4482_v30  ;;  %4512 = vst.msk [vmem:[#allocation2 + $0x90] sm:$0xff] %vm299_vm2, %v4481_v41  ;;  %v4566_v12 = vld [vmem:[#allocation2 + $0xda] sm:$0x1]  ;;  %v4602_v43 = vld [vmem:[#allocation2 + $0xe7] sm:$0x1] }
 0x4cb   : > { %4624 = vst.msk [vmem:[#allocation2 + $0x149] sm:$0x1] %vm365_vm3, %v4606_v29  ;;  %16978 = vst [vmem:[#allocation113_spill] sm:$0xff] %v13787_v11  ;;  %v4567_v13 = vld [vmem:[#allocation2 + $0xf2] sm:$0x1]  ;;  %v13857_v17 = vld [vmem:[#allocation2 + $0x180] sm:$0xff] }
 0x4cc   : > { %4505 = vst.msk [vmem:[#allocation2 + $0x58] sm:$0xff] %vm299_vm2, %v4488_v50  ;;  %4506 = vst.msk [vmem:[#allocation2 + $0x60] sm:$0xff] %vm299_vm2, %v4487_v51  ;;  %v4565_v21 = vld [vmem:[#allocation2 + $0xc2] sm:$0x1] }
 0x4cd   : > { %4507 = vst.msk [vmem:[#allocation2 + $0x68] sm:$0xff] %vm299_vm2, %v4486_v5  ;;  %4508 = vst.msk [vmem:[#allocation2 + $0x70] sm:$0xff] %vm299_vm2, %v4485_v38  ;;  %v4601_v42 = vld [vmem:[#allocation2 + $0xcf] sm:$0x1] }
 0x4ce   : > { %4554 = vst.msk [vmem:[#allocation2 + $0x198] sm:$0xff] %vm299_vm2, %v4551_v7  ;;  %4501 = vst.msk [vmem:[#allocation2 + $0x38] sm:$0xff] %vm299_vm2, %v4492_v0  ;;  %v4599_v3 = vld [vmem:[#allocation2 + $0x9f] sm:$0x1]  ;;  %v13871_v5 = vld [vmem:[#allocation2 + $0xc8] sm:$0xff] }
 0x4cf   : > { %4589 = vst.msk [vmem:[#allocation2 + $0x150] sm:$0x1] %vm365_vm3, %v4571_v46  ;;  %4590 = vst.msk [vmem:[#allocation2 + $0x168] sm:$0x1] %vm365_vm3, %v4572_v15  ;;  %v4564_v20 = vld [vmem:[#allocation2 + $0xaa] sm:$0x1] }
 0x4d0   : > { %4502 = vst.msk [vmem:[#allocation2 + $0x40] sm:$0xff] %vm299_vm2, %v4491_v26  ;;  %4503 = vst.msk [vmem:[#allocation2 + $0x48] sm:$0xff] %vm299_vm2, %v4490_v60  ;;  %v4600_v25 = vld [vmem:[#allocation2 + $0xb7] sm:$0x1]  ;;  %v4562_v34 = vld [vmem:[#allocation2 + $0x7a] sm:$0x1] }
 0x4d1   : > { %4504 = vst.msk [vmem:[#allocation2 + $0x50] sm:$0xff] %vm299_vm2, %v4489_v37  ;;  %4555 = vst.msk [vmem:[#allocation2 + $0x1a0] sm:$0xff] %vm299_vm2, %v13787_v11  ;;  %v4563_v61 = vld [vmem:[#allocation2 + $0x92] sm:$0x1]  ;;  %v4598_v40 = vld [vmem:[#allocation2 + $0x87] sm:$0x1] }
 0x4d2   : > { %4556 = vst.msk [vmem:[#allocation2 + $0x1a8] sm:$0xff] %vm299_vm2, %v4553_v28  ;;  %4497 = vst.msk [vmem:[#allocation2 + $0x18] sm:$0xff] %vm299_vm2, %v4496_v6  ;;  %v16993_v15 = vld [vmem:[#allocation100_spill] sm:$0xff] }
 0x4d3   : > { %4588 = vst.msk [vmem:[#allocation2 + $0x138] sm:$0x1] %vm365_vm3, %v4570_v16  ;;  %4587 = vst.msk [vmem:[#allocation2 + $0x120] sm:$0x1] %vm365_vm3, %v4569_v32  ;;  %v4561_v10 = vld [vmem:[#allocation2 + $0x62] sm:$0x1] }
 0x4d4   : > { %4498 = vst.msk [vmem:[#allocation2 + $0x20] sm:$0xff] %vm299_vm2, %v4495_v54  ;;  %4499 = vst.msk [vmem:[#allocation2 + $0x28] sm:$0xff] %vm299_vm2, %v4494_v53  ;;  %v4597_v27 = vld [vmem:[#allocation2 + $0x6f] sm:$0x1]  ;;  %v13886_v37 = vsel %vm817_vm0, %v16993_v15, 0 }
 0x4d5   : > { %4500 = vst.msk [vmem:[#allocation2 + $0x30] sm:$0xff] %vm299_vm2, %v4493_v35  ;;  %v4574_v47 = vld [vmem:[#allocation2 + $0x19a] sm:$0x1]  ;;  %v4595_v8 = vld [vmem:[#allocation2 + $0x3f] sm:$0x1]  ;;  %16984 = vst [vmem:[#allocation120_spill] sm:$0xff] %v13855_v18 }
 0x4d6   : > { %4625 = vst.msk [vmem:[#allocation2 + $0x161] sm:$0x1] %vm365_vm3, %v4607_v52  ;;  %4626 = vst.msk [vmem:[#allocation2 + $0x179] sm:$0x1] %vm365_vm3, %v4608_v57  ;;  %v13837_v31 = vld [vmem:[#allocation2 + $0x38] sm:$0xff]  ;;  %v13874_v50 = vld [vmem:[#allocation2 + $0x68] sm:$0xff] }
 0x4d7   : > { %4586 = vst.msk [vmem:[#allocation2 + $0x108] sm:$0x1] %vm365_vm3, %v4568_v62  ;;  %4621 = vst.msk [vmem:[#allocation2 + $0x101] sm:$0x1] %vm365_vm3, %v4603_v58  ;;  %v4547_v1 = vld [vmem:[#allocation2 + $0x40] sm:$0xff]  ;;  %v4690_v38 = vrot.slane %v13837_v31, 1 }
 0x4d8   : > { %4622 = vst.msk [vmem:[#allocation2 + $0x119] sm:$0x1] %vm365_vm3, %v4604_v2  ;;  %4584 = vst.msk [vmem:[#allocation2 + $0xd8] sm:$0x1] %vm365_vm3, %v4566_v12  ;;  %v4560_v49 = vld [vmem:[#allocation2 + $0x4a] sm:$0x1] }
 0x4d9   : > { %4585 = vst.msk [vmem:[#allocation2 + $0xf0] sm:$0x1] %vm365_vm3, %v4567_v13  ;;  %4620 = vst.msk [vmem:[#allocation2 + $0xe9] sm:$0x1] %vm365_vm3, %v4602_v43  ;;  %v4558_v22 = vld [vmem:[#allocation2 + $0x1a] sm:$0x1] }
 0x4da   : > { %4583 = vst.msk [vmem:[#allocation2 + $0xc0] sm:$0x1] %vm365_vm3, %v4565_v21  ;;  %4619 = vst.msk [vmem:[#allocation2 + $0xd1] sm:$0x1] %vm365_vm3, %v4601_v42  ;;  %v4596_v36 = vld [vmem:[#allocation2 + $0x57] sm:$0x1] }
 0x4db   : > { %4582 = vst.msk [vmem:[#allocation2 + $0xa8] sm:$0x1] %vm365_vm3, %v4564_v20  ;;  %4617 = vst.msk [vmem:[#allocation2 + $0xa1] sm:$0x1] %vm365_vm3, %v4599_v3  ;;  %v4594_v9 = vld [vmem:[#allocation2 + $0x27] sm:$0x1] }
 0x4dc   : > { %4618 = vst.msk [vmem:[#allocation2 + $0xb9] sm:$0x1] %vm365_vm3, %v4600_v25  ;;  %4580 = vst.msk [vmem:[#allocation2 + $0x78] sm:$0x1] %vm365_vm3, %v4562_v34  ;;  %v4545_v24 = vld [vmem:[#allocation2 + $0x30] sm:$0xff]  ;;  %v13853_v56 = vld [vmem:[#allocation2 + $0x20] sm:$0xff] }
 0x4dd   : > { %4581 = vst.msk [vmem:[#allocation2 + $0x90] sm:$0x1] %vm365_vm3, %v4563_v61  ;;  %4616 = vst.msk [vmem:[#allocation2 + $0x89] sm:$0x1] %vm365_vm3, %v4598_v40  ;;  %v4559_v63 = vld [vmem:[#allocation2 + $0x32] sm:$0x1] }
 0x4de   : > { %16982 = vst [vmem:[#allocation118_spill] sm:$0xff] %v13837_v31  ;;  %4579 = vst.msk [vmem:[#allocation2 + $0x60] sm:$0x1] %vm365_vm3, %v4561_v10  ;;  %v4610_v14 = vld [vmem:[#allocation2 + $0x1a7] sm:$0x1]  ;;  %v16333_v19 = vrot.slane %v13853_v56, 2 }
 0x4df   : > { %4592 = vst.msk [vmem:[#allocation2 + $0x198] sm:$0x1] %vm365_vm3, %v4574_v47  ;;  %4615 = vst.msk [vmem:[#allocation2 + $0x71] sm:$0x1] %vm365_vm3, %v4597_v27  ;;  %v4687_v6 = vrot.slane %v13853_v56, 1  ;;  %v4696_v57 = vrot.slane %v13874_v50, 1 }
 0x4e0   : > { %4549 = vst.msk [vmem:[#allocation2 + $0x8] sm:$0xff] %vm299_vm2, %v13837_v31  ;;  %4550 = vst.msk [vmem:[#allocation2 + $0x10] sm:$0xff] %vm299_vm2, %v4547_v1  ;;  %v4605_v43 = vld [vmem:[#allocation2 + $0x12f] sm:$0x1]  ;;  %v13939_v27 = vld [vmem:[#allocation2 + $0x50] sm:$0xff] }
 0x4e1   : > { %4578 = vst.msk [vmem:[#allocation2 + $0x48] sm:$0x1] %vm365_vm3, %v4560_v49  ;;  %4576 = vst.msk [vmem:[#allocation2 + $0x18] sm:$0x1] %vm365_vm3, %v4558_v22  ;;  %v14036_v53 = vld [vmem:[#allocation2 + $0xc0] sm:$0xff]  ;;  %v14079_v0 = vld [vmem:[#allocation2 + $0xf0] sm:$0xff] }
 0x4e2   : > { %4548 = vst.msk [vmem:[#allocation2] sm:$0xff] %vm299_vm2, %v4545_v24  ;;  %16983 = vst [vmem:[#allocation117_spill] sm:$0xff] %v13853_v56  ;;  %v13876_v7 = vld [vmem:[#allocation2 + $0xa0] sm:$0xff]  ;;  %v13894_v44 = vld [vmem:[#allocation2 + $0xa8] sm:$0xff] }
 0x4e3   : > { %4577 = vst.msk [vmem:[#allocation2 + $0x30] sm:$0x1] %vm365_vm3, %v4559_v63  ;;  %4612 = vst.msk [vmem:[#allocation2 + $0x29] sm:$0x1] %vm365_vm3, %v4594_v9  ;;  %v13892_v26 = vld [vmem:[#allocation2 + $0x78] sm:$0xff]  ;;  %v16336_v62 = vrot.slane %v13876_v7, 1 }
 0x4e4   : > { %4613 = vst.msk [vmem:[#allocation2 + $0x41] sm:$0x1] %vm365_vm3, %v4595_v8  ;;  %4614 = vst.msk [vmem:[#allocation2 + $0x59] sm:$0x1] %vm365_vm3, %v4596_v36  ;;  %v13903_v39 = vld [vmem:[#allocation2 + $0x88] sm:$0xff]  ;;  %v13905_v35 = vld [vmem:[#allocation2 + $0x90] sm:$0xff] }
 0x4e5   : > { %4628 = vst.msk [vmem:[#allocation2 + $0x1a9] sm:$0x1] %vm365_vm3, %v4610_v14  ;;  %16985 = vst [vmem:[#allocation119_spill] sm:$0xff] %v13857_v17  ;;  %v13901_v16 = vld [vmem:[#allocation2 + $0x60] sm:$0xff]  ;;  %v4704_v13 = vrot.slane %v13894_v44, 1  ;;  %v4698_v20 = vrot.slane %v13892_v26, 1 }
 0x4e6   : > { %16989 = vst [vmem:[#allocation129_spill] sm:$0xff] %v13871_v5  ;;  %16990 = vst [vmem:[#allocation128_spill] sm:$0xff] %v13874_v50  ;;  %v13915_v52 = vld [vmem:[#allocation2 + $0x70] sm:$0xff]  ;;  %v16335_v42 = vrot.slane %v13901_v16, 1  ;;  %v4700_v3 = vrot.slane %v13903_v39, 1  ;;  %v4701_v25 = vrot.slane %v13905_v35, 1 }
 0x4e7   : > { %v4593_v45 = vld [vmem:[#allocation2 + $0xf] sm:$0x1]  ;;  %16991 = vst [vmem:[#allocation131_spill] sm:$0xff] %v13876_v7  ;;  %16995 = vst [vmem:[#allocation134_spill] sm:$0xff] %v13892_v26  ;;  %v4697_v22 = vrot.slane %v13915_v52, 1  ;;  %v13945_v63 = vld [vmem:[#allocation2 + $0x80] sm:$0xff] }
 0x4e8   : > { %4611 = vst.msk [vmem:[#allocation2 + $0x11] sm:$0x1] %vm365_vm3, %v4593_v45  ;;  %v13860_v48 = vld [vmem:[#allocation2 + $0x18] sm:$0xff]  ;;  %16996 = vst [vmem:[#allocation137_spill] sm:$0xff] %v13894_v44  ;;  %v13910_v54 = vld [vmem:[#allocation2 + $0x8] sm:$0xff] }
 0x4e9   : > { %v4557_v4 = vld [vmem:[#allocation2 + $0x2] sm:$0x1]  ;;  %16986 = vst [vmem:[#allocation123_spill] sm:$0xff] %v13860_v48  ;;  %v4794_v30 = vrot.slane %v13860_v48, 2  ;;  %16998 = vst [vmem:[#allocation140_spill] sm:$0xff] %v13903_v39  ;;  %v4686_v58 = vrot.slane %v13860_v48, 1 }
 0x4ea   : > { %v13862_v41 = vld [vmem:[#allocation2 + $0x30] sm:$0xff]  ;;  %4575 = vst.msk [vmem:[#allocation2] sm:$0x1] %vm365_vm3, %v4557_v4  ;;  %v13867_v59 = vld [vmem:[#allocation2 + $0x28] sm:$0xff]  ;;  %16999 = vst [vmem:[#allocation142_spill] sm:$0xff] %v13905_v35  ;;  %v4684_v61 = vrot.slane %v13910_v54, 1 }
 0x4eb   : > { %16987 = vst [vmem:[#allocation125_spill] sm:$0xff] %v13862_v41  ;;  %16988 = vst [vmem:[#allocation124_spill] sm:$0xff] %v13867_v59  ;;  %v4689_v29 = vrot.slane %v13862_v41, 1  ;;  %v4688_v51 = vrot.slane %v13867_v59, 1  ;;  %v13882_v46 = vsel %vm639_vm5, %v4794_v30, %v16333_v19  ;;  %v13920_v2 = vld [vmem:[#allocation2 + $0x40] sm:$0xff]  ;;  %v13922_v12 = vld [vmem:[#allocation2 + $0x48] sm:$0xff]  ;;  %v13959_v14 = vsel %vm530_vm4, %v4686_v58, %v4687_v6 }
 0x4ec   : > { %16992 = vst [vmem:[#allocation130_spill] sm:$0xff] %v13882_v46  ;;  %17000 = vst [vmem:[#allocation141_spill] sm:$0xff] %v13910_v54  ;;  %v4691_v49 = vrot.slane %v13920_v2, 1  ;;  %v4692_v24 = vrot.slane %v13922_v12, 1  ;;  %v13947_v9 = vld [vmem:[#allocation2 + $0x98] sm:$0xff]  ;;  %v13963_v4 = vld [vmem:[#allocation2 + $0xb0] sm:$0xff] }
 0x4ed   : > { %v13890_v60 = vsel %vm530_vm4, %v4689_v29, %v4690_v38  ;;  %v13899_v28 = vsel %vm530_vm4, %v4688_v51, %v4689_v29  ;;  %17001 = vst [vmem:[#allocation71_spill] sm:$0xff] %v13915_v52  ;;  %17002 = vst [vmem:[#allocation72_spill] sm:$0xff] %v13920_v2  ;;  %v13976_v32 = vld [vmem:[#allocation2 + $0x58] sm:$0xff]  ;;  %v4702_v55 = vrot.slane %v13947_v9, 1 }
 0x4ee   : > { %16994 = vst [vmem:[#allocation135_spill] sm:$0xff] %v13890_v60  ;;  %16997 = vst [vmem:[#allocation136_spill] sm:$0xff] %v13899_v28  ;;  %v4694_v15 = vrot.slane %v13976_v32, 1 }
 0x4ef   : > { %17003 = vst [vmem:[#allocation73_spill] sm:$0xff] %v13922_v12  ;;  %v13925_v21 = vld [vmem:[#allocation2 + $0x10] sm:$0xff]  ;;  %4623 = vst.msk [vmem:[#allocation2 + $0x131] sm:$0x1] %vm365_vm3, %v4605_v43  ;;  %v13974_v43 = vsel %vm530_vm4, %v4687_v6, %v4688_v51  ;;  %v13993_v51 = vsel %vm530_vm4, %v16335_v42, %v4696_v57  ;;  %v4705_v6 = vrot.slane %v13963_v4, 1 }
 0x4f0   : > { %17004 = vst [vmem:[#allocation74_spill] sm:$0xff] %v13925_v21  ;;  %v4685_v40 = vrot.slane %v13925_v21, 1  ;;  %v16334_v10 = vrot.slane %v13925_v21, 2  ;;  %17006 = vst [vmem:[#allocation76_spill] sm:$0xff] %v13939_v27  ;;  %v14053_v42 = vld [vmem:[#allocation2 + $0xd0] sm:$0xff] }
 0x4f1   : > { %v13932_v34 = vld [vmem:[#allocation2] sm:$0xff]  ;;  %17007 = vst [vmem:[#allocation77_spill] sm:$0xff] %v13947_v9  ;;  %17009 = vst [vmem:[#allocation79_spill] sm:$0xff] %v13959_v14  ;;  %v4709_v46 = vrot.slane %v14053_v42, 1 }
 0x4f2   : > { %17005 = vst [vmem:[#allocation75_spill] sm:$0xff] %v13932_v34  ;;  %v16332_v1 = vrot.slane %v13932_v34, 1  ;;  %v4788_v8 = vsel %vm530_vm4, %v4684_v61, %v4685_v40  ;;  %v13955_v36 = vsel %vm639_vm5, %v16334_v10, %v4794_v30  ;;  %v4787_v45 = vsel %vm530_vm4, %v4685_v40, %v4686_v58  ;;  %17010 = vst [vmem:[#allocation80_spill] sm:$0xff] %v13974_v43 }
 0x4f3   : > { %17008 = vst [vmem:[#allocation78_spill] sm:$0xff] %v13955_v36  ;;  %v4925_v30 = vpack.c.bf16 %v13959_v14, %v4787_v45  ;;  %v4693_v58 = vrot.slane %v13939_v27, 1  ;;  %v4699_v40 = vrot.slane %v13945_v63, 1  ;;  %v13987_v45 = vsel %vm530_vm4, %v4696_v57, %v4697_v22  ;;  %17013 = vst [vmem:[#allocation83_spill] sm:$0xff] %v13993_v51  ;;  %v14011_v57 = vld [vmem:[%s16118_s2 + $0x4] sm:$0x3] }
 0x4f4   : > { %v4789_v29 = vsel %vm530_vm4, %v16332_v1, %v4684_v61  ;;  %v13983_v61 = vsel %vm530_vm4, %v4690_v38, %v4691_v49  ;;  %17012 = vst [vmem:[#allocation82_spill] sm:$0xff] %v13987_v45  ;;  %17016 = vst [vmem:[#allocation86_spill] sm:$0xff] %v14011_v57  ;;  %v14020_v1 = vsel %vm530_vm4, %v4700_v3, %v4701_v25  ;;  %v14097_v36 = vld [vmem:[#allocation2 + $0x100] sm:$0xff]  ;;  %v17052_v14 = vrot.slane %v13871_v5, 1 }
 0x4f5   : > { %v4924_v47 = vpack.c.bf16 %v4788_v8, %v4789_v29  ;;  %17011 = vst [vmem:[#allocation81_spill] sm:$0xff] %v13983_v61  ;;  %v4926_v8 = vpack.c.bf16 %v13899_v28, %v13974_v43  ;;  %v14001_v38 = vsel %vm530_vm4, %v4692_v24, %v4693_v58  ;;  %v14005_v29 = vsel %vm530_vm4, %v4691_v49, %v4692_v24 }
 0x4f6   : > { %17014 = vst [vmem:[#allocation84_spill] sm:$0xff] %v14001_v38  ;;  %17015 = vst [vmem:[#allocation85_spill] sm:$0xff] %v14005_v29  ;;  %v14026_v49 = vsel %vm530_vm4, %v4702_v55, %v16336_v62  ;;  %v14032_v24 = vsel %vm530_vm4, %v4704_v13, %v4705_v6  ;;  %v14043_v19 = vpack.c.bf16 %v13983_v61, %v13890_v60  ;;  %v14055_v62 = vld [vmem:[#allocation2 + $0xd8] sm:$0xff]  ;;  %v17034_v28 = vrot.slane %v13901_v16, 1  ;;  %v14095_v60 = vld [vmem:[#allocation2 + $0xe0] sm:$0xff] }
 0x4f7   : > { %9798 = vmatprep.mubr.msk.bf16.mxu1 %vm299_vm2, %v4924_v47  ;;  %v14016_v47 = vsel %vm530_vm4, %v4698_v20, %v4699_v40  ;;  %17018 = vst [vmem:[#allocation88_spill] sm:$0xff] %v14020_v1  ;;  %17019 = vst [vmem:[#allocation89_spill] sm:$0xff] %v14026_v49  ;;  %v14047_v10 = vsel %vm530_vm4, %v4697_v22, %v4698_v20  ;;  %v14051_v33 = vsel %vm530_vm4, %v4699_v40, %v4700_v3  ;;  %v14077_v40 = vld [vmem:[#allocation2 + $0xe8] sm:$0xff]  ;;  %v14130_v61 = vld [vmem:[#allocation2 + $0x110] sm:$0xff] }
 0x4f8   : > { %9799 = vmatmul.mubr.msk.bf16.vlgmr.msra.gmra.mrb[0].mxu1 %vm299_vm2, %v4925_v30  ;;  %17017 = vst [vmem:[#allocation87_spill] sm:$0xff] %v14016_v47  ;;  %17020 = vst [vmem:[#allocation90_spill] sm:$0xff] %v14032_v24  ;;  %v14034_v30 = vld [vmem:[#allocation2 + $0xb8] sm:$0xff]  ;;  %v14067_v20 = vsel %vm530_vm4, %v4701_v25, %v4702_v55  ;;  %v17030_v3 = vrot.slane %v13876_v7, 1  ;;  %v14087_v55 = vsel %vm530_vm4, %v4694_v15, %v17034_v28  ;;  %v14146_v43 = vld [vmem:[#allocation2 + $0x130] sm:$0xff] }
 0x4f9   : > { %17021 = vst [vmem:[#allocation91_spill] sm:$0xff] %v14036_v53  ;;  %9847 = vmatpush3.bf16.msra.mxu1 %v13886_v37  ;;  %9802 = vmatprep.mubr.msk.bf16.mxu1 %vm299_vm2, %v4926_v8  ;;  %17022 = vst [vmem:[#allocation12_spill] sm:$0xff] %v14043_v19  ;;  %v14059_v37 = vpack.c.bf16 %v14001_v38, %v14005_v29  ;;  %v14063_v8 = vpack.c.bf16 %v13987_v45, %v13993_v51  ;;  %v14111_v45 = vld [vmem:[#allocation2 + $0x108] sm:$0xff]  ;;  %v4711_v29 = vrot.slane %v14095_v60, 1 }
 0x4fa   : > { %17023 = vst [vmem:[#allocation13_spill] sm:$0xff] %v14047_v10  ;;  %17024 = vst [vmem:[#allocation18_spill] sm:$0xff] %v14051_v33  ;;  %v14075_v22 = vsel %vm530_vm4, %v17030_v3, %v4704_v13  ;;  %11025 = vmatprep.subr.msk.bf16.mxu1 %vm817_vm0, %v14011_v57  ;;  %v14091_v25 = vsel %vm530_vm4, %v4693_v58, %v4694_v15  ;;  %v4706_v13 = vrot.slane %v14034_v30, 1  ;;  %v4707_v3 = vrot.slane %v14036_v53, 1  ;;  %v14109_v58 = vld [vmem:[#allocation2 + $0xf8] sm:$0xff]  ;;  %v14185_v7 = vld [vmem:[#allocation2 + $0x128] sm:$0xff] }
 0x4fb   : > { %17025 = vst [vmem:[#allocation19_spill] sm:$0xff] %v14053_v42  ;;  %17026 = vst [vmem:[#allocation24_spill] sm:$0xff] %v14055_v62  ;;  %v14101_v57 = vpack.c.bf16 %v14016_v47, %v14047_v10  ;;  %v14105_v28 = vpack.c.bf16 %v14020_v1, %v14051_v33  ;;  %v4710_v15 = vrot.slane %v14055_v62, 1  ;;  %v14116_v38 = vpack.c.bf16 %v14026_v49, %v14067_v20 }
 0x4fc   : > { %17027 = vst [vmem:[#allocation25_spill] sm:$0xff] %v14059_v37  ;;  %17028 = vst [vmem:[#allocation30_spill] sm:$0xff] %v14063_v8  ;;  %v4712_v47 = vrot.slane %v14077_v40, 1  ;;  %v4713_v10 = vrot.slane %v14079_v0, 1  ;;  %v14122_v1 = vpack.c.bf16 %v14087_v55, %v14091_v25  ;;  %v14126_v33 = vpack.c.bf16 %v14032_v24, %v14075_v22  ;;  %v14142_v24 = vld [vmem:[#allocation2 + $0x118] sm:$0xff] }
 0x4fd   : > { %17029 = vst [vmem:[#allocation31_spill] sm:$0xff] %v14067_v20  ;;  %17031 = vst [vmem:[#allocation36_spill] sm:$0xff] %v14075_v22  ;;  %v4715_v51 = vrot.slane %v14097_v36, 1  ;;  %v14134_v49 = vsel %vm530_vm4, %v4706_v13, %v4707_v3  ;;  %v14138_v20 = vsel %vm530_vm4, %v4705_v6, %v4706_v13  ;;  %v14144_v22 = vld [vmem:[#allocation2 + $0x120] sm:$0xff]  ;;  %v14154_v44 = vsel %vm530_vm4, %v17052_v14, %v4709_v46 }
 0x4fe   : > { %17032 = vst [vmem:[#allocation37_spill] sm:$0xff] %v14077_v40  ;;  %17033 = vst [vmem:[#allocation42_spill] sm:$0xff] %v14079_v0  ;;  %v17054_v6 = vmov %v17052_v14  ;;  %v14164_v9 = vsel %vm530_vm4, %v4710_v15, %v4711_v29  ;;  %v14168_v17 = vsel %vm530_vm4, %v4709_v46, %v4710_v15  ;;  %v14174_v14 = vsel %vm530_vm4, %v4712_v47, %v4713_v10 }
 0x4ff   : > { %17035 = vst [vmem:[#allocation43_spill] sm:$0xff] %v14087_v55  ;;  %17036 = vst [vmem:[#allocation48_spill] sm:$0xff] %v14091_v25  ;;  %v4714_v55 = vrot.slane %v14109_v58, 1  ;;  %v4716_v25 = vrot.slane %v14111_v45, 1  ;;  %v14160_v13 = vsel %vm530_vm4, %v4707_v3, %v17054_v6  ;;  %v4717_v6 = vrot.slane %v14130_v61, 1 }
 0x500   : > { %17037 = vst [vmem:[#allocation49_spill] sm:$0xff] %v14095_v60  ;;  %17038 = vst [vmem:[#allocation54_spill] sm:$0xff] %v14097_v36  ;;  %9803 = vmatmul.mubr.msk.bf16.gmra.mrb[4].mxu1 %vm299_vm2, %v14043_v19  ;;  %v14178_v19 = vsel %vm530_vm4, %v4711_v29, %v4712_v47  ;;  %v4718_v15 = vrot.slane %v14142_v24, 1  ;;  %v14196_v29 = vpack.c.bf16 %v14134_v49, %v14138_v20  ;;  %v4720_v48 = vrot.slane %v14185_v7, 1 }
 0x501   : > { %17039 = vst [vmem:[#allocation55_spill] sm:$0xff] %v14101_v57  ;;  %17040 = vst [vmem:[#allocation60_spill] sm:$0xff] %v14105_v28  ;;  %9806 = vmatprep.mubr.msk.bf16.mxu1 %vm299_vm2, %v14059_v37  ;;  %v14182_v3 = vsel %vm530_vm4, %v4713_v10, %v4714_v55  ;;  %v14189_v46 = vsel %vm530_vm4, %v4714_v55, %v4715_v51  ;;  %v4719_v37 = vrot.slane %v14144_v22, 1 }
 0x502   : > { %17041 = vst [vmem:[#allocation61_spill] sm:$0xff] %v14109_v58  ;;  %17042 = vst [vmem:[#allocation66_spill] sm:$0xff] %v14111_v45  ;;  %v14200_v10 = vsel %vm530_vm4, %v4716_v25, %v4717_v6  ;;  %v14204_v47 = vsel %vm530_vm4, %v4715_v51, %v4716_v25  ;;  %v14210_v11 = vpack.c.bf16 %v14154_v44, %v14160_v13 }
 0x503   : > { %17043 = vst [vmem:[#allocation67_spill] sm:$0xff] %v14116_v38  ;;  %17044 = vst [vmem:[#allocation70_spill] sm:$0xff] %v14122_v1  ;;  %v14221_v51 = vpack.c.bf16 %v14164_v9, %v14168_v17  ;;  %v14225_v25 = vpack.c.bf16 %v14174_v14, %v14178_v19  ;;  %v14229_v55 = vpack.c.bf16 %v14189_v46, %v14182_v3 }
 0x504   : > { %17045 = vst [vmem:[#allocation6_spill] sm:$0xff] %v14126_v33  ;;  %17046 = vst [vmem:[#allocation97_spill] sm:$0xff] %v14130_v61 }
 0x505   : > { %17047 = vst [vmem:[#allocation98_spill] sm:$0xff] %v14134_v49  ;;  %17048 = vst [vmem:[#allocation103_spill] sm:$0xff] %v14138_v20  ;;  %v14217_v20 = vpack.c.bf16 %v13922_v12, %v13920_v2  ;;  %v14235_v49 = vpack.c.bf16 %v13892_v26, %v13915_v52 }
 0x506   : > { %17049 = vst [vmem:[#allocation104_spill] sm:$0xff] %v14142_v24  ;;  %17050 = vst [vmem:[#allocation109_spill] sm:$0xff] %v14144_v22 }
 0x507   : > { %17051 = vst [vmem:[#allocation110_spill] sm:$0xff] %v14146_v43  ;;  %17053 = vst [vmem:[#allocation115_spill] sm:$0xff] %v14154_v44  ;;  %v14231_v44 = vld [vmem:[#allocation2 + $0x138] sm:$0xff] }
 0x508   : > { %17055 = vst [vmem:[#allocation116_spill] sm:$0xff] %v14160_v13  ;;  %17056 = vst [vmem:[#allocation121_spill] sm:$0xff] %v14164_v9  ;;  %v14243_v9 = vsel %vm530_vm4, %v4718_v15, %v4719_v37  ;;  %9807 = vmatmul.mubr.msk.bf16.gmra.mrb[8].mxu1 %vm299_vm2, %v14122_v1  ;;  %v4802_v13 = vrot.slane %v13976_v32, 2 }
 0x509   : > { %17057 = vst [vmem:[#allocation122_spill] sm:$0xff] %v14168_v17  ;;  %17058 = vst [vmem:[#allocation126_spill] sm:$0xff] %v14174_v14  ;;  %v14247_v14 = vsel %vm530_vm4, %v4717_v6, %v4718_v15  ;;  %v14267_v6 = vpack.c.bf16 %v14077_v40, %v14095_v60  ;;  %v14271_v15 = vpack.c.bf16 %v14109_v58, %v14079_v0  ;;  %9810 = vmatprep.mubr.msk.bf16.mxu1 %vm299_vm2, %v14063_v8 }
 0x50a   : > { %17059 = vst [vmem:[#allocation127_spill] sm:$0xff] %v14178_v19  ;;  %17060 = vst [vmem:[#allocation132_spill] sm:$0xff] %v14182_v3  ;;  %v14255_v3 = vld [vmem:[#allocation2 + $0x150] sm:$0xff]  ;;  %v17096_v19 = vrot.slane %v13932_v34, 2 }
 0x50b   : > { %17061 = vst [vmem:[#allocation133_spill] sm:$0xff] %v14185_v7  ;;  %17062 = vst [vmem:[#allocation138_spill] sm:$0xff] %v14189_v46 }
 0x50c   : > { %17063 = vst [vmem:[#allocation139_spill] sm:$0xff] %v14196_v29  ;;  %17064 = vst [vmem:[#allocation143_spill] sm:$0xff] %v14200_v10 }
 0x50d   : > { %17065 = vst [vmem:[#allocation144_spill] sm:$0xff] %v14204_v47  ;;  %17066 = vst [vmem:[#allocation145_spill] sm:$0xff] %v14210_v11 }
 0x50e   : > { %17067 = vst [vmem:[#allocation146_spill] sm:$0xff] %v14217_v20  ;;  %17068 = vst [vmem:[#allocation93_spill] sm:$0xff] %v14221_v51  ;;  %v14239_v20 = vpack.c.bf16 %v14200_v10, %v14204_v47  ;;  %v14259_v10 = vld [vmem:[#allocation2 + $0x168] sm:$0xff]  ;;  %v14281_v47 = vsel %vm530_vm4, %v4719_v37, %v4720_v48 }
 0x50f   : > { %17069 = vst [vmem:[#allocation69_spill] sm:$0xff] %v14225_v25  ;;  %17070 = vst [vmem:[#allocation92_spill] sm:$0xff] %v14229_v55  ;;  %v17076_v55 = vrot.slane %v14146_v43, 1 }
 0x510   : > { %17071 = vst [vmem:[#allocation62_spill] sm:$0xff] %v14231_v44  ;;  %17072 = vst [vmem:[#allocation99_spill] sm:$0xff] %v14235_v49  ;;  %v14257_v49 = vld [vmem:[#allocation2 + $0x160] sm:$0xff]  ;;  %9811 = vmatmul.mubr.msk.bf16.gmra.mrb[12].mxu1 %vm299_vm2, %v14101_v57 }
 0x511   : > { %17073 = vst [vmem:[#allocation63_spill] sm:$0xff] %v14239_v20  ;;  %17074 = vst [vmem:[#allocation95_spill] sm:$0xff] %v14243_v9  ;;  %v14253_v46 = vsel %vm530_vm4, %v4720_v48, %v17076_v55  ;;  %v14263_v20 = vpack.c.bf16 %v14055_v62, %v14053_v42  ;;  %v14275_v55 = vpack.c.bf16 %v14111_v45, %v14097_v36  ;;  %v4722_v48 = vrot.slane %v14231_v44, 1 }
 0x512   : > { %17075 = vst [vmem:[#allocation105_spill] sm:$0xff] %v14247_v14  ;;  %17077 = vst [vmem:[#allocation3_spill] sm:$0xff] %v14253_v46  ;;  %v14306_v1 = vpack.c.bf16 %v14259_v10, %v14257_v49  ;;  %9814 = vmatprep.mubr.msk.bf16.mxu1 %vm299_vm2, %v14105_v28 }
 0x513   : > { %17078 = vst [vmem:[#allocation114_spill] sm:$0xff] %v14255_v3  ;;  %17079 = vst [vmem:[#allocation111_spill] sm:$0xff] %v14257_v49 }
 0x514   : > { %17080 = vst [vmem:[#allocation112_spill] sm:$0xff] %v14259_v10  ;;  %17081 = vst [vmem:[#allocation107_spill] sm:$0xff] %v14263_v20  ;;  %v14283_v20 = vld [vmem:[#allocation2 + $0x158] sm:$0xff] }
 0x515   : > { %17082 = vst [vmem:[#allocation100_spill] sm:$0xff] %v14267_v6  ;;  %17083 = vst [vmem:[#allocation147_spill] sm:$0xff] %v14271_v15  ;;  %v14287_v6 = vpack.c.bf16 %v14142_v24, %v14130_v61  ;;  %v14291_v15 = vpack.c.bf16 %v14185_v7, %v14144_v22  ;;  %v14302_v37 = vpack.c.bf16 %v14283_v20, %v14255_v3 }
 0x516   : > { %17084 = vst [vmem:[#allocation148_spill] sm:$0xff] %v14275_v55  ;;  %17085 = vst [vmem:[#allocation149_spill] sm:$0xff] %v14281_v47  ;;  %v14295_v55 = vpack.c.bf16 %v14231_v44, %v14146_v43 }
 0x517   : > { %17086 = vst [vmem:[#allocation150_spill] sm:$0xff] %v14283_v20  ;;  %17087 = vst [vmem:[#allocation151_spill] sm:$0xff] %v14287_v6  ;;  %v17092_v6 = vrot.slane %v13925_v21, 2  ;;  %v4798_v21 = vrot.slane %v13837_v31, 2 }
 0x518   : > { %17088 = vst [vmem:[#allocation152_spill] sm:$0xff] %v14291_v15  ;;  %17089 = vst [vmem:[#allocation153_spill] sm:$0xff] %v14295_v55  ;;  %v17093_v15 = vrot.slane %v13910_v54, 2  ;;  %v4801_v54 = vrot.slane %v13939_v27, 2  ;;  %v4805_v27 = vrot.slane %v13915_v52, 2  ;;  %9815 = vmatmul.mubr.msk.bf16.gmra.mrb[16].mxu1 %vm299_vm2, %v14116_v38  ;;  %v4823_v38 = vrot.slane %v14097_v36, 2 }
 0x519   : > { %17090 = vst [vmem:[#allocation154_spill] sm:$0xff] %v14302_v37  ;;  %17091 = vst [vmem:[#allocation155_spill] sm:$0xff] %v14306_v1  ;;  %v4796_v37 = vrot.slane %v13867_v59, 2  ;;  %v4797_v1 = vrot.slane %v13862_v41, 2  ;;  %9818 = vmatprep.mubr.msk.bf16.mxu1 %vm299_vm2, %v14126_v33  ;;  %v4825_v33 = vrot.slane %v14130_v61, 2  ;;  %v17200_v61 = vld [vmem:[#allocation116_spill] sm:$0xff] }
 0x51a   : > { %v14314_v55 = vsel %vm639_vm5, %v17093_v15, %v17092_v6  ;;  %v17095_v8 = vmov %v17093_v15  ;;  %v4799_v6 = vrot.slane %v13920_v2, 2  ;;  %v4800_v15 = vrot.slane %v13922_v12, 2  ;;  %v14347_v2 = vld [vmem:[#allocation2 + $0x148] sm:$0xff] }
 0x51b   : > { %17094 = vst [vmem:[#allocation156_spill] sm:$0xff] %v14314_v55  ;;  %v14322_v17 = vsel %vm639_vm5, %v17096_v19, %v17095_v8  ;;  %v14334_v34 = vsel %vm639_vm5, %v4796_v37, %v4797_v1  ;;  %v17099_v19 = vrot.slane %v13853_v56, 2  ;;  %v14344_v31 = vsel %vm639_vm5, %v4797_v1, %v4798_v21  ;;  %17101 = vst [vmem:[#allocation160_spill] sm:$0xff] %v14347_v2  ;;  %v17202_v36 = vld [vmem:[#allocation122_spill] sm:$0xff] }
 0x51c   : > { %17097 = vst [vmem:[#allocation157_spill] sm:$0xff] %v14322_v17  ;;  %17098 = vst [vmem:[#allocation158_spill] sm:$0xff] %v14334_v34  ;;  %v14353_v17 = vsel %vm639_vm5, %v4798_v21, %v4799_v6  ;;  %v4803_v12 = vrot.slane %v13901_v16, 2  ;;  %v14372_v21 = vsel %vm639_vm5, %v4801_v54, %v4802_v13  ;;  %v4804_v34 = vrot.slane %v13874_v50, 2 }
 0x51d   : > { %v14340_v8 = vsel %vm639_vm5, %v17099_v19, %v4796_v37  ;;  %17100 = vst [vmem:[#allocation159_spill] sm:$0xff] %v14344_v31  ;;  %17102 = vst [vmem:[#allocation161_spill] sm:$0xff] %v14353_v17  ;;  %v14359_v37 = vsel %vm639_vm5, %v4800_v15, %v4801_v54  ;;  %v14363_v1 = vpack.c.bf16 %v14353_v17, %v14344_v31  ;;  %v4806_v31 = vrot.slane %v13892_v26, 2 }
 0x51e   : > { %17103 = vst [vmem:[#allocation162_spill] sm:$0xff] %v14359_v37  ;;  %v14367_v19 = vsel %vm639_vm5, %v4799_v6, %v4800_v15  ;;  %17106 = vst [vmem:[#allocation165_spill] sm:$0xff] %v14372_v21  ;;  %v4724_v6 = vrot.slane %v14347_v2, 1  ;;  %v4725_v15 = vrot.slane %v14255_v3, 1  ;;  %v14387_v54 = vsel %vm639_vm5, %v4802_v13, %v4803_v12 }
 0x51f   : > { %17104 = vst [vmem:[#allocation163_spill] sm:$0xff] %v14363_v1  ;;  %17105 = vst [vmem:[#allocation164_spill] sm:$0xff] %v14367_v19  ;;  %v14376_v55 = vpack.c.bf16 %v14359_v37, %v14367_v19  ;;  %v14394_v52 = vpack.c.bf16 %v14387_v54, %v14372_v21  ;;  %v14398_v57 = vsel %vm639_vm5, %v4804_v34, %v4805_v27  ;;  %v17113_v1 = vrot.slane %v13855_v18, 1 }
 0x520   : > { %17108 = vst [vmem:[#allocation167_spill] sm:$0xff] %v14387_v54  ;;  %17110 = vst [vmem:[#allocation169_spill] sm:$0xff] %v14398_v57  ;;  %v14402_v26 = vsel %vm639_vm5, %v4803_v12, %v4804_v34  ;;  %v14406_v13 = vsel %vm639_vm5, %v4805_v27, %v4806_v31  ;;  %v17118_v34 = vrot.slane %v13945_v63, 2  ;;  %v14436_v50 = vpack.c.bf16 %v14253_v46, %v14281_v47 }
 0x521   : > { %17107 = vst [vmem:[#allocation166_spill] sm:$0xff] %v14376_v55  ;;  %17109 = vst [vmem:[#allocation168_spill] sm:$0xff] %v14394_v52  ;;  %v14412_v28 = vsel %vm530_vm4, %v4722_v48, %v17113_v1  ;;  %v17115_v52 = vrot.slane %v14146_v43, 1  ;;  %v14422_v12 = vpack.c.bf16 %v14398_v57, %v14402_v26  ;;  %v14432_v1 = vpack.c.bf16 %v14243_v9, %v14247_v14  ;;  %v17295_v9 = vld [vmem:[#allocation148_spill] sm:$0xff] }
 0x522   : > { %17111 = vst [vmem:[#allocation170_spill] sm:$0xff] %v14402_v26  ;;  %17112 = vst [vmem:[#allocation171_spill] sm:$0xff] %v14406_v13  ;;  %v14428_v27 = vsel %vm639_vm5, %v4806_v31, %v17118_v34  ;;  %v14445_v31 = vld [vmem:[#allocation2 + $0x178] sm:$0xff]  ;;  %v4814_v34 = vrot.slane %v14034_v30, 2  ;;  %v17125_v57 = vrot.slane %v13855_v18, 1  ;;  %9819 = vmatmul.mubr.msk.bf16.gmra.mrb[20].mxu1 %vm299_vm2, %v14196_v29 }
 0x523   : > { %17114 = vst [vmem:[#allocation172_spill] sm:$0xff] %v14412_v28  ;;  %v14418_v55 = vsel %vm530_vm4, %v17115_v52, %v4722_v48  ;;  %17117 = vst [vmem:[#allocation174_spill] sm:$0xff] %v14422_v12  ;;  %v14441_v48 = vpack.c.bf16 %v14428_v27, %v14406_v13  ;;  %v14458_v12 = vsel %vm530_vm4, %v4724_v6, %v4725_v15  ;;  %v17126_v13 = vrot.slane %v14283_v20, 1  ;;  %v17311_v21 = vld [vmem:[#allocation158_spill] sm:$0xff] }
 0x524   : > { %17116 = vst [vmem:[#allocation173_spill] sm:$0xff] %v14418_v55  ;;  %17119 = vst [vmem:[#allocation175_spill] sm:$0xff] %v14428_v27  ;;  %v14451_v26 = vpack.c.bf16 %v14412_v28, %v14418_v55  ;;  %v14464_v27 = vsel %vm530_vm4, %v17125_v57, %v4724_v6  ;;  %9822 = vmatprep.mubr.msk.bf16.mxu1 %vm299_vm2, %v14210_v11  ;;  %v17174_v59 = vrot.slane %v14445_v31, 1 }
 0x525   : > { %17120 = vst [vmem:[#allocation176_spill] sm:$0xff] %v14432_v1  ;;  %17121 = vst [vmem:[#allocation177_spill] sm:$0xff] %v14436_v50  ;;  %v4815_v1 = vrot.slane %v14036_v53, 2  ;;  %v4816_v50 = vrot.slane %v13871_v5, 2  ;;  %v17128_v5 = vrot.slane %v13963_v4, 2  ;;  %v17197_v53 = vld [vmem:[#allocation90_spill] sm:$0xff] }
 0x526   : > { %17122 = vst [vmem:[#allocation178_spill] sm:$0xff] %v14441_v48  ;;  %17123 = vst [vmem:[#allocation179_spill] sm:$0xff] %v14445_v31  ;;  %v4817_v48 = vrot.slane %v14053_v42, 2  ;;  %v4822_v42 = vrot.slane %v14109_v58, 2 }
 0x527   : > { %17124 = vst [vmem:[#allocation180_spill] sm:$0xff] %v14451_v26  ;;  %v14470_v26 = vsel %vm530_vm4, %v4725_v15, %v17126_v13  ;;  %v14474_v52 = vsel %vm639_vm5, %v4814_v34, %v4815_v1  ;;  %v14481_v54 = vsel %vm639_vm5, %v17128_v5, %v4814_v34  ;;  %v14489_v6 = vsel %vm639_vm5, %v4815_v1, %v4816_v50 }
 0x528   : > { %17127 = vst [vmem:[#allocation181_spill] sm:$0xff] %v14474_v52  ;;  %17129 = vst [vmem:[#allocation182_spill] sm:$0xff] %v14481_v54  ;;  %v14485_v57 = vsel %vm639_vm5, %v4816_v50, %v4817_v48  ;;  %v14495_v15 = vpack.c.bf16 %v14474_v52, %v14481_v54  ;;  %v4818_v5 = vrot.slane %v14055_v62, 2  ;;  %v4819_v34 = vrot.slane %v14095_v60, 2 }
 0x529   : > { %17130 = vst [vmem:[#allocation183_spill] sm:$0xff] %v14485_v57  ;;  %17131 = vst [vmem:[#allocation184_spill] sm:$0xff] %v14489_v6  ;;  %v14499_v13 = vpack.c.bf16 %v14485_v57, %v14489_v6  ;;  %v4820_v50 = vrot.slane %v14077_v40, 2  ;;  %v4821_v1 = vrot.slane %v14079_v0, 2  ;;  %v4824_v57 = vrot.slane %v14111_v45, 2  ;;  %v17199_v45 = vld [vmem:[#allocation98_spill] sm:$0xff] }
 0x52a   : > { %17132 = vst [vmem:[#allocation185_spill] sm:$0xff] %v14495_v15  ;;  %v14511_v15 = vsel %vm639_vm5, %v4818_v5, %v4819_v34  ;;  %9823 = vmatmul.mubr.msk.bf16.gmra.mrb[24].mxu1 %vm299_vm2, %v14221_v51  ;;  %v17296_v0 = vld [vmem:[#allocation151_spill] sm:$0xff] }
 0x52b   : > { %17133 = vst [vmem:[#allocation186_spill] sm:$0xff] %v14499_v13  ;;  %17134 = vst [vmem:[#allocation187_spill] sm:$0xff] %v14511_v15  ;;  %v14515_v13 = vsel %vm639_vm5, %v4817_v48, %v4818_v5  ;;  %v14525_v52 = vsel %vm639_vm5, %v4820_v50, %v4821_v1  ;;  %v14529_v54 = vsel %vm639_vm5, %v4819_v34, %v4820_v50  ;;  %9826 = vmatprep.mubr.msk.bf16.mxu1 %vm299_vm2, %v14225_v25  ;;  %v17196_v25 = vld [vmem:[#allocation36_spill] sm:$0xff] }
 0x52c   : > { %17135 = vst [vmem:[#allocation188_spill] sm:$0xff] %v14515_v13  ;;  %v14521_v6 = vpack.c.bf16 %v14511_v15, %v14515_v13  ;;  %17137 = vst [vmem:[#allocation190_spill] sm:$0xff] %v14525_v52  ;;  %v14533_v48 = vsel %vm639_vm5, %v4822_v42, %v4823_v38  ;;  %v14537_v5 = vpack.c.bf16 %v14525_v52, %v14529_v54  ;;  %v4830_v13 = vrot.slane %v14231_v44, 2 }
 0x52d   : > { %17138 = vst [vmem:[#allocation191_spill] sm:$0xff] %v14529_v54  ;;  %17139 = vst [vmem:[#allocation192_spill] sm:$0xff] %v14533_v48  ;;  %v14541_v15 = vsel %vm639_vm5, %v4821_v1, %v4822_v42  ;;  %v14549_v34 = vsel %vm639_vm5, %v4823_v38, %v4824_v57  ;;  %v4827_v42 = vrot.slane %v14144_v22, 2  ;;  %v4828_v1 = vrot.slane %v14185_v7, 2  ;;  %v17198_v7 = vld [vmem:[#allocation103_spill] sm:$0xff]  ;;  %v17210_v22 = vld [vmem:[#allocation92_spill] sm:$0xff] }
 0x52e   : > { %17136 = vst [vmem:[#allocation189_spill] sm:$0xff] %v14521_v6  ;;  %17140 = vst [vmem:[#allocation193_spill] sm:$0xff] %v14537_v5  ;;  %v14545_v6 = vsel %vm639_vm5, %v4824_v57, %v4825_v33  ;;  %v14553_v50 = vpack.c.bf16 %v14533_v48, %v14541_v15  ;;  %v4826_v5 = vrot.slane %v14142_v24, 2  ;;  %v4829_v54 = vrot.slane %v14146_v43, 2  ;;  %v14796_v24 = vld [vmem:[#allocation2 + $0x190] sm:$0xff] }
 0x52f   : > { %17141 = vst [vmem:[#allocation194_spill] sm:$0xff] %v14545_v6  ;;  %17142 = vst [vmem:[#allocation195_spill] sm:$0xff] %v14549_v34  ;;  %v14557_v52 = vpack.c.bf16 %v14545_v6, %v14549_v34  ;;  %v4831_v38 = vrot.slane %v13855_v18, 2  ;;  %v4833_v6 = vrot.slane %v14255_v3, 2  ;;  %v14587_v34 = vsel %vm639_vm5, %v4827_v42, %v4828_v1 }
 0x530   : > { %17143 = vst [vmem:[#allocation196_spill] sm:$0xff] %v14553_v50  ;;  %v14567_v57 = vsel %vm639_vm5, %v4826_v5, %v4827_v42  ;;  %v14571_v50 = vsel %vm639_vm5, %v4825_v33, %v4826_v5  ;;  %v14583_v18 = vsel %vm639_vm5, %v4828_v1, %v4829_v54  ;;  %17149 = vst [vmem:[#allocation202_spill] sm:$0xff] %v14587_v34  ;;  %v4733_v37 = vrot.slane %v14796_v24, 1 }
 0x531   : > { %17144 = vst [vmem:[#allocation197_spill] sm:$0xff] %v14557_v52  ;;  %17145 = vst [vmem:[#allocation198_spill] sm:$0xff] %v14567_v57  ;;  %v4832_v52 = vrot.slane %v14347_v2, 2  ;;  %v14579_v44 = vpack.c.bf16 %v14567_v57, %v14571_v50  ;;  %v14591_v33 = vsel %vm639_vm5, %v4830_v13, %v4831_v38  ;;  %v14597_v5 = vpack.c.bf16 %v14583_v18, %v14587_v34  ;;  %v17244_v2 = vld [vmem:[#allocation177_spill] sm:$0xff] }
 0x532   : > { %17146 = vst [vmem:[#allocation199_spill] sm:$0xff] %v14571_v50  ;;  %17148 = vst [vmem:[#allocation201_spill] sm:$0xff] %v14583_v18  ;;  %v14601_v29 = vsel %vm639_vm5, %v4829_v54, %v4830_v13  ;;  %v4835_v54 = vrot.slane %v14257_v49, 2  ;;  %v4808_v13 = vrot.slane %v13903_v39, 2  ;;  %v4809_v18 = vrot.slane %v13905_v35, 2  ;;  %9827 = vmatmul.mubr.msk.bf16.gmra.mrb[28].mxu1 %vm299_vm2, %v17210_v22  ;;  %v17297_v50 = vld [vmem:[#allocation152_spill] sm:$0xff] }
 0x533   : > { %17147 = vst [vmem:[#allocation200_spill] sm:$0xff] %v14579_v44  ;;  %17150 = vst [vmem:[#allocation203_spill] sm:$0xff] %v14591_v33  ;;  %v14605_v44 = vsel %vm639_vm5, %v4832_v52, %v4833_v6  ;;  %v14609_v42 = vsel %vm639_vm5, %v4831_v38, %v4832_v52  ;;  %v14613_v1 = vpack.c.bf16 %v14591_v33, %v14601_v29  ;;  %v4836_v34 = vrot.slane %v14259_v10, 2  ;;  %v17157_v52 = vld [vmem:[#allocation113_spill] sm:$0xff] }
 0x534   : > { %17151 = vst [vmem:[#allocation204_spill] sm:$0xff] %v14597_v5  ;;  %17152 = vst [vmem:[#allocation205_spill] sm:$0xff] %v14601_v29  ;;  %v14617_v11 = vpack.c.bf16 %v14605_v44, %v14609_v42  ;;  %v4834_v5 = vrot.slane %v14283_v20, 2  ;;  %v16527_v38 = vrot.slane %v17157_v52, 2  ;;  %v17166_v39 = vrot.slane %v14283_v20, 1  ;;  %v17227_v20 = vld [vmem:[#allocation187_spill] sm:$0xff] }
 0x535   : > { %17153 = vst [vmem:[#allocation206_spill] sm:$0xff] %v14605_v44  ;;  %17154 = vst [vmem:[#allocation207_spill] sm:$0xff] %v14609_v42  ;;  %v17161_v42 = vld [vmem:[#allocation131_spill] sm:$0xff] }
 0x536   : > { %17155 = vst [vmem:[#allocation208_spill] sm:$0xff] %v14613_v1  ;;  %17156 = vst [vmem:[#allocation209_spill] sm:$0xff] %v14617_v11  ;;  %v14627_v33 = vsel %vm639_vm5, %v4834_v5, %v4835_v54  ;;  %v14631_v1 = vsel %vm639_vm5, %v4833_v6, %v4834_v5  ;;  %v4811_v35 = vrot.slane %v17161_v42, 2  ;;  %v14646_v57 = vsel %vm639_vm5, %v4836_v34, %v16527_v38  ;;  %v17176_v11 = vld [vmem:[#allocation137_spill] sm:$0xff]  ;;  %v17228_v51 = vld [vmem:[#allocation191_spill] sm:$0xff] }
 0x537   : > { %17158 = vst [vmem:[#allocation113_spill] sm:$0xff] %v14627_v33  ;;  %17159 = vst [vmem:[#allocation210_spill] sm:$0xff] %v14631_v1  ;;  %v14640_v29 = vpack.c.bf16 %v14627_v33, %v14631_v1  ;;  %v14650_v6 = vsel %vm639_vm5, %v4835_v54, %v4836_v34  ;;  %v17165_v5 = vrot.slane %v14257_v49, 1  ;;  %v17168_v42 = vrot.slane %v14259_v10, 1  ;;  %v17292_v1 = vld [vmem:[#allocation107_spill] sm:$0xff] }
 0x538   : > { %17163 = vst [vmem:[#allocation212_spill] sm:$0xff] %v14646_v57  ;;  %17164 = vst [vmem:[#allocation213_spill] sm:$0xff] %v14650_v6  ;;  %v4812_v33 = vrot.slane %v17176_v11, 2 }
 0x539   : > { %17162 = vst [vmem:[#allocation211_spill] sm:$0xff] %v14640_v29  ;;  %v14658_v44 = vsel %vm530_vm4, %v17166_v39, %v17165_v5  ;;  %v17167_v29 = vrot.slane %v17157_v52, 1  ;;  %v17169_v41 = vmov %v17168_v42  ;;  %v17170_v34 = vmov %v17165_v5  ;;  %v17172_v5 = vld [vmem:[#allocation119_spill] sm:$0xff] }
 0x53a   : > { %v14674_v54 = vsel %vm530_vm4, %v17170_v34, %v17169_v41  ;;  %v14678_v39 = vpack.c.bf16 %v14646_v57, %v14650_v6  ;;  %v17173_v56 = vrot.slane %v17172_v5, 1  ;;  %v17177_v34 = vmov %v17174_v59 }
 0x53b   : > { %v14666_v38 = vsel %vm530_vm4, %v17168_v42, %v17167_v29  ;;  %v17175_v42 = vld [vmem:[#allocation77_spill] sm:$0xff]  ;;  %v14794_v43 = vsel %vm639_vm5, %v4811_v35, %v4812_v33  ;;  %v17212_v22 = vrot.slane %v17172_v5, 2  ;;  %v14962_v23 = vpack.c.bf16 %v14658_v44, %v14470_v26 }
 0x53c   : > { %17171 = vst [vmem:[#allocation214_spill] sm:$0xff] %v14678_v39  ;;  %v14686_v29 = vsel %vm530_vm4, %v17174_v59, %v17173_v56  ;;  %v4810_v10 = vrot.slane %v17175_v42, 2  ;;  %v17178_v39 = vrot.slane %v17157_v52, 1  ;;  %v14704_v56 = vsel %vm639_vm5, %v4808_v13, %v4809_v18 }
 0x53d   : > { %v17179_v59 = vrot.slane %v13945_v63, 2  ;;  %17260 = vst [vmem:[#allocation216_spill] sm:$0xff] %v14962_v23 }
 0x53e   : > { %v14700_v57 = vsel %vm530_vm4, %v17178_v39, %v17177_v34  ;;  %v14718_v39 = vsel %vm639_vm5, %v4810_v10, %v4811_v35  ;;  %v17180_v34 = vrot.slane %v13963_v4, 2  ;;  %v17214_v35 = vld [vmem:[#allocation130_spill] sm:$0xff] }
 0x53f   : > { %v14710_v41 = vsel %vm639_vm5, %v17179_v59, %v4808_v13  ;;  %v14728_v59 = vsel %vm639_vm5, %v4809_v18, %v4810_v10  ;;  %v4838_v13 = vrot.slane %v14445_v31, 2  ;;  %v14762_v31 = vld [vmem:[#allocation2 + $0x188] sm:$0xff]  ;;  %v17215_v18 = vrot.slane %v17157_v52, 2 }
 0x540   : > { %v14740_v11 = vsel %vm639_vm5, %v4812_v33, %v17180_v34  ;;  %v17211_v34 = vld [vmem:[#allocation63_spill] sm:$0xff]  ;;  %v4732_v10 = vrot.slane %v14762_v31, 1  ;;  %v14863_v33 = vld [vmem:[#allocation2 + $0x1a0] sm:$0xff]  ;;  %v4840_v14 = vrot.slane %v14762_v31, 2 }
 0x541   : > { %9830 = vmatprep.mubr.msk.bf16.mxu1 %vm299_vm2, %v17211_v34  ;;  %v14807_v49 = vsel %vm639_vm5, %v4838_v13, %v17212_v22  ;;  %v14809_v34 = vld [vmem:[#allocation2 + $0x198] sm:$0xff]  ;;  %v14821_v46 = vsel %vm639_vm5, %v17215_v18, %v4838_v13  ;;  %v17216_v22 = vrot.slane %v17172_v5, 1  ;;  %17238 = vst [vmem:[#allocation77_spill] sm:$0xff] %v14863_v33  ;;  %v14865_v13 = vld [vmem:[#allocation2 + $0x1a8] sm:$0xff]  ;;  %v4735_v17 = vrot.slane %v14863_v33, 1 }
 0x542   : > { %17213 = vst [vmem:[#allocation119_spill] sm:$0xff] %v14809_v34  ;;  %17239 = vst [vmem:[#allocation36_spill] sm:$0xff] %v14865_v13  ;;  %v17240_v18 = vld [vmem:[#allocation176_spill] sm:$0xff]  ;;  %v14871_v60 = vsel %vm530_vm4, %v4732_v10, %v4733_v37  ;;  %v4842_v28 = vrot.slane %v14809_v34, 2  ;;  %v4736_v40 = vrot.slane %v14865_v13, 1  ;;  %v4844_v58 = vrot.slane %v14865_v13, 2 }
 0x543   : > { %v14827_v55 = vsel %vm530_vm4, %v17216_v22, %v4732_v10  ;;  %v4734_v22 = vrot.slane %v14809_v34, 1  ;;  %9831 = vmatmul.mubr.msk.bf16.gmra.mrb[32].mxu1 %vm299_vm2, %v17240_v18  ;;  %v4841_v18 = vrot.slane %v14796_v24, 2  ;;  %v4843_v10 = vrot.slane %v14863_v33, 2 }
 0x544   : > { %9834 = vmatprep.mubr.msk.bf16.mxu1 %vm299_vm2, %v17244_v2  ;;  %v17245_v2 = vrot.slane %v17172_v5, 2 }
 0x545   : > { %v14888_v47 = vsel %vm530_vm4, %v4733_v37, %v4734_v22  ;;  %v14901_v6 = vsel %vm639_vm5, %v4841_v18, %v4842_v28  ;;  %v14905_v37 = vsel %vm639_vm5, %v4840_v14, %v4841_v18  ;;  %v14916_v13 = vsel %vm530_vm4, %v4734_v22, %v4735_v17  ;;  %v17251_v18 = vld [vmem:[#allocation75_spill] sm:$0xff]  ;;  %v17259_v22 = vld [vmem:[#allocation180_spill] sm:$0xff] }
 0x546   : > { %v14897_v62 = vsel %vm639_vm5, %v17245_v2, %v4840_v14  ;;  %17247 = vst [vmem:[#allocation103_spill] sm:$0xff] %v14901_v6  ;;  %17248 = vst [vmem:[#allocation98_spill] sm:$0xff] %v14905_v37  ;;  %v14922_v14 = vsel %vm530_vm4, %v4735_v17, %v4736_v40  ;;  %v17252_v33 = vrot.slane %v17251_v18, 1  ;;  %v14936_v5 = vsel %vm639_vm5, %v4842_v28, %v4843_v10  ;;  %v17265_v2 = vld [vmem:[#allocation86_spill] sm:$0xff]  ;;  %v17285_v37 = vld [vmem:[#allocation131_spill] sm:$0xff] }
 0x547   : > { %17246 = vst [vmem:[#allocation90_spill] sm:$0xff] %v14897_v62  ;;  %17249 = vst [vmem:[#allocation116_spill] sm:$0xff] %v14916_v13  ;;  %v14940_v17 = vsel %vm639_vm5, %v4843_v10, %v4844_v58  ;;  %v17256_v19 = vrot.slane %v17251_v18, 2  ;;  %v17263_v10 = vld [vmem:[#allocation141_spill] sm:$0xff]  ;;  %v17269_v13 = vld [vmem:[#allocation124_spill] sm:$0xff] }
 0x548   : > { %17250 = vst [vmem:[#allocation122_spill] sm:$0xff] %v14922_v14  ;;  %v14928_v34 = vsel %vm530_vm4, %v4736_v40, %v17252_v33  ;;  %17254 = vst [vmem:[#allocation187_spill] sm:$0xff] %v14936_v5  ;;  %v14950_v33 = vpack.c.bf16 %v14458_v12, %v14464_v27  ;;  %v17264_v28 = vpack.c.bf16 %v17263_v10, %v17251_v18  ;;  %v17266_v5 = vld [vmem:[#allocation123_spill] sm:$0xff]  ;;  %v17267_v14 = vld [vmem:[#allocation74_spill] sm:$0xff] }
 0x549   : > { %17253 = vst [vmem:[#allocation130_spill] sm:$0xff] %v14928_v34  ;;  %17255 = vst [vmem:[#allocation191_spill] sm:$0xff] %v14940_v17  ;;  %v14946_v40 = vsel %vm639_vm5, %v4844_v58, %v17256_v19  ;;  %v14966_v58 = vpack.c.bf16 %v14666_v38, %v14674_v54  ;;  %v14974_v19 = vpack.c.bf16 %v14686_v29, %v14700_v57  ;;  %v5649_v17 = vsel %vm817_vm0, %v17265_v2, 0  ;;  %v17272_v18 = vld [vmem:[#allocation125_spill] sm:$0xff]  ;;  %v17275_v10 = vld [vmem:[#allocation146_spill] sm:$0xff] }
 0x54a   : > { %17257 = vst [vmem:[#allocation75_spill] sm:$0xff] %v14946_v40  ;;  %17258 = vst [vmem:[#allocation215_spill] sm:$0xff] %v14950_v33  ;;  %v8742_v40 = vld [vmem:[%s16118_s2 + $0x6] sm:$0x3]  ;;  %v17268_v34 = vpack.c.bf16 %v17266_v5, %v17267_v14  ;;  %v17276_v14 = vld [vmem:[#allocation76_spill] sm:$0xff] }
 0x54b   : > { %9835 = vmatmul.mubr.msk.bf16.gmra.mrb[36].mxu1 %vm299_vm2, %v17259_v22  ;;  %17261 = vst [vmem:[#allocation217_spill] sm:$0xff] %v14966_v58  ;;  %17262 = vst [vmem:[#allocation218_spill] sm:$0xff] %v14974_v19  ;;  %v17282_v22 = vld [vmem:[#allocation99_spill] sm:$0xff]  ;;  %v17286_v6 = vld [vmem:[#allocation137_spill] sm:$0xff] }
 0x54c   : > { %9838 = vmatprep.mubr.msk.bf16.mxu1 %vm299_vm2, %v14950_v33 }
 0x553   : > { %9839 = vmatmul.mubr.msk.bf16.gmra.mrb[40].mxu1 %vm299_vm2, %v14962_v23 }
 0x554   : > { %9842 = vmatprep.mubr.msk.bf16.mxu1 %vm299_vm2, %v14966_v58 }
 0x55b   : > { %9843 = vmatmul.mubr.msk.bf16.gmra.mrb[44].mxu1 %vm299_vm2, %v14974_v19  ;;  %v17270_v19 = vld [vmem:[#allocation117_spill] sm:$0xff] }
 0x55c   : > { %9848 = vmatprep.mubr.msk.bf16.mxu1 %vm299_vm2, %v17264_v28  ;;  %v17271_v58 = vpack.c.bf16 %v17269_v13, %v17270_v19  ;;  %v17273_v28 = vld [vmem:[#allocation118_spill] sm:$0xff] }
 0x55d   : > { %v14998_v2 = vpack.c.bf16 %v17273_v28, %v17272_v18 }
 0x55f   : > { %17274 = vst [vmem:[#allocation141_spill] sm:$0xff] %v14998_v2 }
 0x563   : > { %9849 = vmatmul.mubr.msk.bf16.vlgmr.msra.gmra.mrb[0].mxu1 %vm299_vm2, %v17268_v34  ;;  %v15006_v34 = vpack.c.bf16 %v13976_v32, %v17276_v14 }
 0x564   : > { %9897 = vmatpush3.bf16.msra.mxu1 %v5649_v17  ;;  %9852 = vmatprep.mubr.msk.bf16.mxu1 %vm299_vm2, %v17271_v58  ;;  %v17278_v17 = vld [vmem:[#allocation128_spill] sm:$0xff] }
 0x565   : > { %11026 = vmatprep.subr.msk.bf16.mxu1 %vm817_vm0, %v8742_v40  ;;  %17277 = vst [vmem:[#allocation86_spill] sm:$0xff] %v15006_v34  ;;  %v15010_v23 = vpack.c.bf16 %v17278_v17, %v13901_v16  ;;  %v17280_v58 = vld [vmem:[#allocation140_spill] sm:$0xff] }
 0x566   : > { %v15018_v33 = vpack.c.bf16 %v17280_v58, %v13945_v63 }
 0x567   : > { %17279 = vst [vmem:[#allocation123_spill] sm:$0xff] %v15010_v23 }
 0x568   : > { %17281 = vst [vmem:[#allocation74_spill] sm:$0xff] %v15018_v33 }
 0x56b   : > { %9853 = vmatmul.mubr.msk.bf16.gmra.mrb[4].mxu1 %vm299_vm2, %v14998_v2 }
 0x56c   : > { %9856 = vmatprep.mubr.msk.bf16.mxu1 %vm299_vm2, %v17275_v10  ;;  %v17283_v10 = vld [vmem:[#allocation142_spill] sm:$0xff] }
 0x56d   : > { %v15026_v2 = vpack.c.bf16 %v17175_v42, %v17283_v10 }
 0x56f   : > { %17284 = vst [vmem:[#allocation124_spill] sm:$0xff] %v15026_v2 }
 0x573   : > { %9857 = vmatmul.mubr.msk.bf16.gmra.mrb[8].mxu1 %vm299_vm2, %v15006_v34  ;;  %v15030_v34 = vpack.c.bf16 %v17286_v6, %v17285_v37 }
 0x574   : > { %9860 = vmatprep.mubr.msk.bf16.mxu1 %vm299_vm2, %v15010_v23  ;;  %v17289_v23 = vld [vmem:[#allocation91_spill] sm:$0xff] }
 0x575   : > { %17287 = vst [vmem:[#allocation117_spill] sm:$0xff] %v15030_v34 }
 0x57b   : > { %9861 = vmatmul.mubr.msk.bf16.gmra.mrb[12].mxu1 %vm299_vm2, %v17282_v22  ;;  %v15038_v22 = vpack.c.bf16 %v14034_v30, %v13963_v4 }
 0x57c   : > { %9864 = vmatprep.mubr.msk.bf16.mxu1 %vm299_vm2, %v15018_v33  ;;  %v17290_v33 = vld [vmem:[#allocation129_spill] sm:$0xff] }
 0x57d   : > { %17288 = vst [vmem:[#allocation125_spill] sm:$0xff] %v15038_v22  ;;  %v15042_v62 = vpack.c.bf16 %v17290_v33, %v17289_v23 }
 0x57f   : > { %17291 = vst [vmem:[#allocation118_spill] sm:$0xff] %v15042_v62 }
 0x583   : > { %9865 = vmatmul.mubr.msk.bf16.gmra.mrb[16].mxu1 %vm299_vm2, %v15026_v2  ;;  %v17293_v2 = vld [vmem:[#allocation100_spill] sm:$0xff] }
 0x584   : > { %9868 = vmatprep.mubr.msk.bf16.mxu1 %vm299_vm2, %v15030_v34  ;;  %v17294_v34 = vld [vmem:[#allocation147_spill] sm:$0xff] }
 0x58b   : > { %9869 = vmatmul.mubr.msk.bf16.gmra.mrb[20].mxu1 %vm299_vm2, %v15038_v22  ;;  %v17298_v22 = vld [vmem:[#allocation120_spill] sm:$0xff] }
 0x58c   : > { %9872 = vmatprep.mubr.msk.bf16.mxu1 %vm299_vm2, %v15042_v62  ;;  %v17299_v62 = vld [vmem:[#allocation160_spill] sm:$0xff] }
 0x58d   : > { %v15062_v48 = vpack.c.bf16 %v17299_v62, %v17298_v22  ;;  %v17306_v22 = vld [vmem:[#allocation156_spill] sm:$0xff] }
 0x58f   : > { %17300 = vst [vmem:[#allocation76_spill] sm:$0xff] %v15062_v48 }
 0x593   : > { %9873 = vmatmul.mubr.msk.bf16.gmra.mrb[24].mxu1 %vm299_vm2, %v17292_v1  ;;  %v17301_v1 = vld [vmem:[#allocation153_spill] sm:$0xff] }
 0x594   : > { %9876 = vmatprep.mubr.msk.bf16.mxu1 %vm299_vm2, %v17293_v2 }
 0x59b   : > { %9877 = vmatmul.mubr.msk.bf16.gmra.mrb[28].mxu1 %vm299_vm2, %v17294_v34  ;;  %v17302_v34 = vld [vmem:[#allocation154_spill] sm:$0xff] }
 0x59c   : > { %9880 = vmatprep.mubr.msk.bf16.mxu1 %vm299_vm2, %v17295_v9  ;;  %v17303_v9 = vld [vmem:[#allocation155_spill] sm:$0xff] }
 0x5a3   : > { %9881 = vmatmul.mubr.msk.bf16.gmra.mrb[32].mxu1 %vm299_vm2, %v17296_v0  ;;  %v17304_v0 = vld [vmem:[#allocation179_spill] sm:$0xff] }
 0x5a4   : > { %9884 = vmatprep.mubr.msk.bf16.mxu1 %vm299_vm2, %v17297_v50  ;;  %v15074_v2 = vpack.c.bf16 %v17304_v0, %v17157_v52  ;;  %v17307_v50 = vld [vmem:[#allocation157_spill] sm:$0xff] }
 0x5a5   : > { %v17308_v3 = vpack.c.bf16 %v17306_v22, %v17307_v50  ;;  %v17314_v50 = vld [vmem:[#allocation166_spill] sm:$0xff]  ;;  %v15117_v22 = vpack.c.bf16 %v14740_v11, %v14794_v43 }
 0x5a6   : > { %17305 = vst [vmem:[#allocation128_spill] sm:$0xff] %v15074_v2 }
 0x5a7   : > { %17320 = vst [vmem:[#allocation131_spill] sm:$0xff] %v15117_v22 }
 0x5ab   : > { %9885 = vmatmul.mubr.msk.bf16.gmra.mrb[36].mxu1 %vm299_vm2, %v17301_v1 }
 0x5ac   : > { %9888 = vmatprep.mubr.msk.bf16.mxu1 %vm299_vm2, %v15062_v48  ;;  %v6023_v48 = vsel %vm817_vm0, %v8742_v40, 0  ;;  %v17315_v40 = vld [vmem:[#allocation168_spill] sm:$0xff] }
 0x5b3   : > { %9889 = vmatmul.mubr.msk.bf16.gmra.mrb[40].mxu1 %vm299_vm2, %v17302_v34  ;;  %v8767_v34 = vld [vmem:[%s16118_s2 + $0x8] sm:$0x3] }
 0x5b4   : > { %9892 = vmatprep.mubr.msk.bf16.mxu1 %vm299_vm2, %v17303_v9  ;;  %v17309_v9 = vld [vmem:[#allocation78_spill] sm:$0xff] }
 0x5b5   : > { %v17310_v1 = vpack.c.bf16 %v17214_v35, %v17309_v9  ;;  %v17316_v9 = vld [vmem:[#allocation174_spill] sm:$0xff] }
 0x5bb   : > { %9893 = vmatmul.mubr.msk.bf16.gmra.mrb[44].mxu1 %vm299_vm2, %v15074_v2  ;;  %v17312_v2 = vpack.c.bf16 %v17311_v21, %v14340_v8 }
 0x5bc   : > { %9898 = vmatprep.mubr.msk.bf16.mxu1 %vm299_vm2, %v17308_v3  ;;  %v17313_v3 = vld [vmem:[#allocation163_spill] sm:$0xff] }
 0x5c3   : > { %9899 = vmatmul.mubr.msk.bf16.vlgmr.msra.gmra.mrb[0].mxu1 %vm299_vm2, %v17310_v1  ;;  %v17318_v1 = vld [vmem:[#allocation178_spill] sm:$0xff] }
 0x5c4   : > { %9947 = vmatpush3.bf16.msra.mxu1 %v6023_v48  ;;  %9902 = vmatprep.mubr.msk.bf16.mxu1 %vm299_vm2, %v17312_v2  ;;  %v15105_v48 = vpack.c.bf16 %v14704_v56, %v14710_v41  ;;  %v15113_v2 = vpack.c.bf16 %v14718_v39, %v14728_v59 }
 0x5c5   : > { %11027 = vmatprep.subr.msk.bf16.mxu1 %vm817_vm0, %v8767_v34 }
 0x5c6   : > { %17317 = vst [vmem:[#allocation140_spill] sm:$0xff] %v15105_v48  ;;  %17319 = vst [vmem:[#allocation142_spill] sm:$0xff] %v15113_v2 }
 0x5cb   : > { %9903 = vmatmul.mubr.msk.bf16.gmra.mrb[4].mxu1 %vm299_vm2, %v17313_v3  ;;  %v17326_v3 = vld [vmem:[#allocation197_spill] sm:$0xff] }
 0x5cc   : > { %9906 = vmatprep.mubr.msk.bf16.mxu1 %vm299_vm2, %v17314_v50  ;;  %v17325_v50 = vld [vmem:[#allocation196_spill] sm:$0xff] }
 0x5d3   : > { %9907 = vmatmul.mubr.msk.bf16.gmra.mrb[8].mxu1 %vm299_vm2, %v17315_v40  ;;  %v17324_v40 = vld [vmem:[#allocation193_spill] sm:$0xff] }
 0x5d4   : > { %9910 = vmatprep.mubr.msk.bf16.mxu1 %vm299_vm2, %v17316_v9  ;;  %v17321_v9 = vld [vmem:[#allocation185_spill] sm:$0xff] }
 0x5db   : > { %9911 = vmatmul.mubr.msk.bf16.gmra.mrb[12].mxu1 %vm299_vm2, %v17318_v1  ;;  %v17322_v1 = vld [vmem:[#allocation186_spill] sm:$0xff] }
 0x5dc   : > { %9914 = vmatprep.mubr.msk.bf16.mxu1 %vm299_vm2, %v15105_v48  ;;  %v17323_v48 = vld [vmem:[#allocation189_spill] sm:$0xff] }
 0x5e3   : > { %9915 = vmatmul.mubr.msk.bf16.gmra.mrb[16].mxu1 %vm299_vm2, %v15113_v2  ;;  %v17327_v2 = vld [vmem:[#allocation200_spill] sm:$0xff] }
 0x5e4   : > { %9918 = vmatprep.mubr.msk.bf16.mxu1 %vm299_vm2, %v15117_v22  ;;  %v17328_v22 = vld [vmem:[#allocation204_spill] sm:$0xff] }
 0x5eb   : > { %9919 = vmatmul.mubr.msk.bf16.gmra.mrb[20].mxu1 %vm299_vm2, %v17321_v9  ;;  %v17329_v9 = vld [vmem:[#allocation208_spill] sm:$0xff] }
 0x5ec   : > { %9922 = vmatprep.mubr.msk.bf16.mxu1 %vm299_vm2, %v17322_v1  ;;  %v17330_v1 = vld [vmem:[#allocation209_spill] sm:$0xff] }
 0x5f3   : > { %9923 = vmatmul.mubr.msk.bf16.gmra.mrb[24].mxu1 %vm299_vm2, %v17323_v48  ;;  %v17331_v48 = vld [vmem:[#allocation211_spill] sm:$0xff] }
 0x5f4   : > { %9926 = vmatprep.mubr.msk.bf16.mxu1 %vm299_vm2, %v17324_v40  ;;  %v17332_v40 = vld [vmem:[#allocation214_spill] sm:$0xff] }
 0x5fb   : > { %9927 = vmatmul.mubr.msk.bf16.gmra.mrb[28].mxu1 %vm299_vm2, %v17325_v50 }
 0x5fc   : > { %9930 = vmatprep.mubr.msk.bf16.mxu1 %vm299_vm2, %v17326_v3  ;;  %v15149_v3 = vpack.c.bf16 %v14807_v49, %v14821_v46 }
 0x603   : > { %9931 = vmatmul.mubr.msk.bf16.gmra.mrb[32].mxu1 %vm299_vm2, %v17327_v2  ;;  %v17335_v2 = vpack.c.bf16 %v17272_v18, %v17269_v13  ;;  %v17339_v18 = vld [vmem:[#allocation134_spill] sm:$0xff] }
 0x604   : > { %9934 = vmatprep.mubr.msk.bf16.mxu1 %vm299_vm2, %v17328_v22  ;;  %v17333_v22 = vpack.c.bf16 %v17270_v19, %v17266_v5  ;;  %v17336_v5 = vld [vmem:[#allocation73_spill] sm:$0xff] }
 0x605   : > { %v5927_v19 = vpack.c.bf16 %v17276_v14, %v17336_v5  ;;  %v5931_v14 = vpack.c.bf16 %v17283_v10, %v17280_v58  ;;  %v17345_v58 = vld [vmem:[#allocation42_spill] sm:$0xff]  ;;  %v17354_v5 = vld [vmem:[#allocation109_spill] sm:$0xff] }
 0x60b   : > { %9935 = vmatmul.mubr.msk.bf16.gmra.mrb[36].mxu1 %vm299_vm2, %v17329_v9  ;;  %v17334_v9 = vld [vmem:[#allocation72_spill] sm:$0xff] }
 0x60c   : > { %9938 = vmatprep.mubr.msk.bf16.mxu1 %vm299_vm2, %v17330_v1  ;;  %v6397_v1 = vsel %vm817_vm0, %v8767_v34, 0  ;;  %v17338_v34 = vld [vmem:[#allocation71_spill] sm:$0xff] }
 0x60d   : > { %v5929_v13 = vpack.c.bf16 %v17338_v34, %v17278_v17  ;;  %v11048_v34 = vld [vmem:[#allocation2 + $0x140] sm:$0xff] }
 0x613   : > { %9939 = vmatmul.mubr.msk.bf16.gmra.mrb[40].mxu1 %vm299_vm2, %v17331_v48  ;;  %v5926_v48 = vpack.c.bf16 %v17334_v9, %v17273_v28  ;;  %v17337_v28 = vpack.c.bf16 %v13901_v16, %v13976_v32  ;;  %v5930_v9 = vpack.c.bf16 %v13945_v63, %v17339_v18  ;;  %v5933_v16 = vpack.c.bf16 %v13963_v4, %v17286_v6  ;;  %v17341_v63 = vld [vmem:[#allocation19_spill] sm:$0xff]  ;;  %v17348_v6 = vld [vmem:[#allocation54_spill] sm:$0xff] }
 0x614   : > { %9942 = vmatprep.mubr.msk.bf16.mxu1 %vm299_vm2, %v17332_v40  ;;  %v8792_v40 = vld [vmem:[%s16118_s2 + $0xa] sm:$0x3]  ;;  %v17340_v32 = vpack.c.bf16 %v17289_v23, %v14034_v30  ;;  %v5935_v10 = vpack.c.bf16 %v17341_v63, %v17290_v33  ;;  %v17351_v23 = vld [vmem:[#allocation97_spill] sm:$0xff]  ;;  %v17363_v63 = vld [vmem:[#allocation111_spill] sm:$0xff] }
 0x61b   : > { %9943 = vmatmul.mubr.msk.bf16.gmra.mrb[44].mxu1 %vm299_vm2, %v15149_v3 }
 0x61c   : > { %9948 = vmatprep.mubr.msk.bf16.mxu1 %vm299_vm2, %v17333_v22  ;;  %v17352_v22 = vld [vmem:[#allocation66_spill] sm:$0xff] }
 0x61d   : > { %v17353_v33 = vpack.c.bf16 %v17351_v23, %v17352_v22  ;;  %v17371_v23 = vld [vmem:[#allocation136_spill] sm:$0xff] }
 0x623   : > { %9949 = vmatmul.mubr.msk.bf16.vlgmr.msra.gmra.mrb[0].mxu1 %vm299_vm2, %v17335_v2  ;;  %v17349_v2 = vld [vmem:[#allocation61_spill] sm:$0xff] }
 0x624   : > { %9997 = vmatpush3.bf16.msra.mxu1 %v6397_v1  ;;  %9952 = vmatprep.mubr.msk.bf16.mxu1 %vm299_vm2, %v5926_v48  ;;  %v5932_v48 = vpack.c.bf16 %v17285_v37, %v17175_v42  ;;  %v17342_v42 = vld [vmem:[#allocation49_spill] sm:$0xff]  ;;  %v17343_v37 = vld [vmem:[#allocation24_spill] sm:$0xff]  ;;  %v17350_v30 = vpack.c.bf16 %v17348_v6, %v17349_v2  ;;  %v17368_v6 = vld [vmem:[#allocation79_spill] sm:$0xff] }
 0x625   : > { %11028 = vmatprep.subr.msk.bf16.mxu1 %vm817_vm0, %v8792_v40  ;;  %v17344_v17 = vpack.c.bf16 %v17342_v42, %v17343_v37  ;;  %v17346_v1 = vld [vmem:[#allocation37_spill] sm:$0xff]  ;;  %v17366_v37 = vld [vmem:[#allocation112_spill] sm:$0xff] }
 0x626   : > { %v17347_v4 = vpack.c.bf16 %v17345_v58, %v17346_v1  ;;  %v15234_v58 = vld [vmem:[#allocation2 + $0x180] sm:$0xff] }
 0x627   : > { %v5946_v1 = vpack.c.bf16 %v15234_v58, %v17304_v0  ;;  %v8817_v0 = vld [vmem:[%s16118_s2 + $0xc] sm:$0x3] }
 0x62b   : > { %9953 = vmatmul.mubr.msk.bf16.gmra.mrb[4].mxu1 %vm299_vm2, %v5927_v19  ;;  %v17355_v19 = vld [vmem:[#allocation104_spill] sm:$0xff] }
 0x62c   : > { %9956 = vmatprep.mubr.msk.bf16.mxu1 %vm299_vm2, %v17337_v28  ;;  %v17356_v28 = vpack.c.bf16 %v17354_v5, %v17355_v19  ;;  %v17374_v5 = vld [vmem:[#allocation81_spill] sm:$0xff] }
 0x633   : > { %9957 = vmatmul.mubr.msk.bf16.gmra.mrb[8].mxu1 %vm299_vm2, %v5929_v13  ;;  %v17357_v13 = vld [vmem:[#allocation62_spill] sm:$0xff] }
 0x634   : > { %9960 = vmatprep.mubr.msk.bf16.mxu1 %vm299_vm2, %v5930_v9  ;;  %v5942_v18 = vpack.c.bf16 %v11048_v34, %v17357_v13  ;;  %v17358_v9 = vld [vmem:[#allocation110_spill] sm:$0xff]  ;;  %v17377_v34 = vld [vmem:[#allocation84_spill] sm:$0xff]  ;;  %v17379_v13 = vld [vmem:[#allocation83_spill] sm:$0xff] }
 0x63b   : > { %9961 = vmatmul.mubr.msk.bf16.gmra.mrb[12].mxu1 %vm299_vm2, %v5931_v14  ;;  %v17359_v14 = vld [vmem:[#allocation133_spill] sm:$0xff] }
 0x63c   : > { %9964 = vmatprep.mubr.msk.bf16.mxu1 %vm299_vm2, %v5932_v48  ;;  %v17360_v48 = vpack.c.bf16 %v17358_v9, %v17359_v14  ;;  %v17382_v14 = vld [vmem:[#allocation13_spill] sm:$0xff] }
 0x643   : > { %9965 = vmatmul.mubr.msk.bf16.gmra.mrb[16].mxu1 %vm299_vm2, %v5933_v16  ;;  %v17361_v16 = vld [vmem:[#allocation114_spill] sm:$0xff] }
 0x644   : > { %9968 = vmatprep.mubr.msk.bf16.mxu1 %vm299_vm2, %v17340_v32  ;;  %v17362_v32 = vpack.c.bf16 %v17361_v16, %v17299_v62  ;;  %v5947_v62 = vpack.c.bf16 %v14796_v24, %v14762_v31 }
 0x64b   : > { %9969 = vmatmul.mubr.msk.bf16.gmra.mrb[20].mxu1 %vm299_vm2, %v5935_v10  ;;  %v17364_v10 = vld [vmem:[#allocation150_spill] sm:$0xff] }
 0x64c   : > { %9972 = vmatprep.mubr.msk.bf16.mxu1 %vm299_vm2, %v17344_v17  ;;  %v17365_v42 = vpack.c.bf16 %v17363_v63, %v17364_v10  ;;  %v5945_v17 = vpack.c.bf16 %v17157_v52, %v17366_v37  ;;  %v6771_v52 = vsel %vm817_vm0, %v8792_v40, 0  ;;  %v17386_v63 = vld [vmem:[#allocation87_spill] sm:$0xff]  ;;  %v17389_v37 = vld [vmem:[#allocation88_spill] sm:$0xff] }
 0x653   : > { %9973 = vmatmul.mubr.msk.bf16.gmra.mrb[24].mxu1 %vm299_vm2, %v17347_v4  ;;  %v17367_v4 = vld [vmem:[#allocation80_spill] sm:$0xff] }
 0x654   : > { %9976 = vmatprep.mubr.msk.bf16.mxu1 %vm299_vm2, %v17350_v30  ;;  %v17369_v2 = vpack.c.bf16 %v17367_v4, %v17368_v6  ;;  %v17370_v30 = vld [vmem:[#allocation135_spill] sm:$0xff]  ;;  %v17393_v4 = vpack.c.bf16 %v17198_v7, %v17197_v53  ;;  %v17394_v6 = vpack.c.bf16 %v17200_v61, %v17199_v45  ;;  %v17403_v53 = vld [vmem:[#allocation144_spill] sm:$0xff]  ;;  %v17406_v45 = vld [vmem:[#allocation105_spill] sm:$0xff] }
 0x655   : > { %v17372_v22 = vpack.c.bf16 %v17370_v30, %v17371_v23  ;;  %v17397_v30 = vld [vmem:[#allocation127_spill] sm:$0xff]  ;;  %v17398_v23 = vld [vmem:[#allocation121_spill] sm:$0xff] }
 0x65b   : > { %9977 = vmatmul.mubr.msk.bf16.gmra.mrb[28].mxu1 %vm299_vm2, %v17353_v33  ;;  %v17373_v33 = vld [vmem:[#allocation85_spill] sm:$0xff] }
 0x65c   : > { %9980 = vmatprep.mubr.msk.bf16.mxu1 %vm299_vm2, %v17356_v28  ;;  %v17375_v19 = vpack.c.bf16 %v17373_v33, %v17374_v5  ;;  %v17376_v28 = vld [vmem:[#allocation48_spill] sm:$0xff]  ;;  %v17401_v33 = vld [vmem:[#allocation126_spill] sm:$0xff] }
 0x65d   : > { %v17378_v40 = vpack.c.bf16 %v17376_v28, %v17377_v34  ;;  %v17404_v5 = vld [vmem:[#allocation138_spill] sm:$0xff]  ;;  %v17409_v28 = vld [vmem:[#allocation149_spill] sm:$0xff]  ;;  %v17410_v34 = vld [vmem:[#allocation95_spill] sm:$0xff] }
 0x65e   : > { %v17405_v61 = vpack.c.bf16 %v17403_v53, %v17404_v5  ;;  %v17446_v53 = vld [vmem:[#allocation183_spill] sm:$0xff]  ;;  %v17452_v5 = vld [vmem:[#allocation192_spill] sm:$0xff] }
 0x663   : > { %9981 = vmatmul.mubr.msk.bf16.gmra.mrb[32].mxu1 %vm299_vm2, %v17360_v48  ;;  %v17383_v48 = vld [vmem:[#allocation82_spill] sm:$0xff] }
 0x664   : > { %9984 = vmatprep.mubr.msk.bf16.mxu1 %vm299_vm2, %v5942_v18  ;;  %v17380_v18 = vld [vmem:[#allocation43_spill] sm:$0xff]  ;;  %v17384_v16 = vpack.c.bf16 %v17382_v14, %v17383_v48  ;;  %v17415_v14 = vld [vmem:[#allocation172_spill] sm:$0xff] }
 0x665   : > { %v17381_v9 = vpack.c.bf16 %v17379_v13, %v17380_v18  ;;  %v17412_v13 = vld [vmem:[#allocation173_spill] sm:$0xff]  ;;  %v17413_v18 = vld [vmem:[#allocation3_spill] sm:$0xff]  ;;  %v17416_v48 = vpack.c.bf16 %v14464_v27, %v17415_v14  ;;  %v17420_v27 = vpack.c.bf16 %v14827_v55, %v14686_v29  ;;  %v17424_v29 = vld [vmem:[#allocation164_spill] sm:$0xff] }
 0x666   : > { %v17466_v14 = vld [vmem:[#allocation210_spill] sm:$0xff] }
 0x66b   : > { %9985 = vmatmul.mubr.msk.bf16.gmra.mrb[36].mxu1 %vm299_vm2, %v17362_v32  ;;  %v17385_v32 = vld [vmem:[#allocation18_spill] sm:$0xff] }
 0x66c   : > { %9988 = vmatprep.mubr.msk.bf16.mxu1 %vm299_vm2, %v17365_v42  ;;  %v17387_v10 = vpack.c.bf16 %v17385_v32, %v17386_v63  ;;  %v17388_v42 = vld [vmem:[#allocation31_spill] sm:$0xff]  ;;  %v17418_v32 = vpack.c.bf16 %v14674_v54, %v14658_v44  ;;  %v17419_v63 = vpack.c.bf16 %v14700_v57, %v14666_v38  ;;  %v17421_v44 = vpack.c.bf16 %v14340_v8, %v17214_v35  ;;  %v8842_v57 = vld [vmem:[%s16118_s2 + $0xe] sm:$0x3]  ;;  %v17427_v8 = vld [vmem:[#allocation165_spill] sm:$0xff] }
 0x66d   : > { %v17422_v38 = vld [vmem:[#allocation159_spill] sm:$0xff]  ;;  %v17428_v35 = vld [vmem:[#allocation162_spill] sm:$0xff] }
 0x66e   : > { %v17423_v54 = vpack.c.bf16 %v17422_v38, %v17311_v21  ;;  %v17433_v21 = vld [vmem:[#allocation171_spill] sm:$0xff] }
 0x673   : > { %9989 = vmatmul.mubr.msk.bf16.gmra.mrb[40].mxu1 %vm299_vm2, %v5945_v17  ;;  %v17390_v17 = vpack.c.bf16 %v17388_v42, %v17389_v37  ;;  %v17430_v37 = vld [vmem:[#allocation170_spill] sm:$0xff] }
 0x674   : > { %9992 = vmatprep.mubr.msk.bf16.mxu1 %vm299_vm2, %v5946_v1  ;;  %v17391_v1 = vld [vmem:[#allocation89_spill] sm:$0xff] }
 0x67b   : > { %9993 = vmatmul.mubr.msk.bf16.gmra.mrb[44].mxu1 %vm299_vm2, %v5947_v62  ;;  %v17392_v62 = vpack.c.bf16 %v17196_v25, %v17391_v1  ;;  %v17399_v25 = vpack.c.bf16 %v17397_v30, %v17398_v23  ;;  %v17439_v30 = vpack.c.bf16 %v14794_v43, %v14718_v39  ;;  %v17440_v23 = vld [vmem:[#allocation182_spill] sm:$0xff]  ;;  %v17448_v43 = vpack.c.bf16 %v17228_v51, %v17227_v20  ;;  %v17460_v51 = vld [vmem:[#allocation205_spill] sm:$0xff] }
 0x67c   : > { %9998 = vmatprep.mubr.msk.bf16.mxu1 %vm299_vm2, %v17369_v2  ;;  %v17395_v2 = vld [vmem:[#allocation115_spill] sm:$0xff]  ;;  %v17449_v39 = vld [vmem:[#allocation190_spill] sm:$0xff] }
 0x683   : > { %9999 = vmatmul.mubr.msk.bf16.vlgmr.msra.gmra.mrb[0].mxu1 %vm299_vm2, %v17372_v22  ;;  %v17400_v22 = vld [vmem:[#allocation132_spill] sm:$0xff] }
 0x684   : > { %10047 = vmatpush3.bf16.msra.mxu1 %v6771_v52  ;;  %10002 = vmatprep.mubr.msk.bf16.mxu1 %vm299_vm2, %v17375_v19  ;;  %v17396_v52 = vpack.c.bf16 %v17202_v36, %v17395_v2  ;;  %v17402_v7 = vpack.c.bf16 %v17400_v22, %v17401_v33  ;;  %v17407_v19 = vld [vmem:[#allocation143_spill] sm:$0xff]  ;;  %v17442_v22 = vld [vmem:[#allocation184_spill] sm:$0xff]  ;;  %v17443_v33 = vld [vmem:[#allocation181_spill] sm:$0xff] }
 0x685   : > { %11029 = vmatprep.subr.msk.bf16.mxu1 %vm817_vm0, %v8817_v0  ;;  %v17408_v36 = vpack.c.bf16 %v17406_v45, %v17407_v19  ;;  %v17454_v45 = vld [vmem:[#allocation199_spill] sm:$0xff]  ;;  %v17455_v19 = vld [vmem:[#allocation194_spill] sm:$0xff] }
 0x68b   : > { %10003 = vmatmul.mubr.msk.bf16.gmra.mrb[4].mxu1 %vm299_vm2, %v17378_v40  ;;  %v17411_v40 = vpack.c.bf16 %v17409_v28, %v17410_v34  ;;  %v17457_v28 = vld [vmem:[#allocation202_spill] sm:$0xff] }
 0x68c   : > { %10006 = vmatprep.mubr.msk.bf16.mxu1 %vm299_vm2, %v17381_v9  ;;  %v17414_v9 = vpack.c.bf16 %v17412_v13, %v17413_v18  ;;  %v17458_v34 = vld [vmem:[#allocation198_spill] sm:$0xff]  ;;  %v17463_v13 = vld [vmem:[#allocation207_spill] sm:$0xff] }
 0x68d   : > { %v17459_v20 = vpack.c.bf16 %v17457_v28, %v17458_v34  ;;  %v17464_v18 = vld [vmem:[#allocation203_spill] sm:$0xff]  ;;  %v17511_v28 = vld [vmem:[#allocation6_spill] sm:$0xff] }
 0x68e   : > { %v17512_v34 = vld [vmem:[#allocation139_spill] sm:$0xff] }
 0x693   : > { %10007 = vmatmul.mubr.msk.bf16.gmra.mrb[8].mxu1 %vm299_vm2, %v17384_v16  ;;  %v17417_v16 = vpack.c.bf16 %v14470_v26, %v14458_v12  ;;  %v6321_v26 = vpack.c.bf16 %v14888_v47, %v14871_v60  ;;  %v7061_v12 = vsel %vm817_vm0, %v8817_v0, 0  ;;  %v17429_v0 = vpack.c.bf16 %v17427_v8, %v17428_v35  ;;  %v17480_v35 = vld [vmem:[#allocation146_spill] sm:$0xff] }
 0x694   : > { %10010 = vmatprep.mubr.msk.bf16.mxu1 %vm299_vm2, %v17387_v10  ;;  %v17425_v10 = vld [vmem:[#allocation161_spill] sm:$0xff]  ;;  %v7351_v8 = vsel %vm817_vm0, %v8842_v57, 0 }
 0x695   : > { %v17426_v42 = vpack.c.bf16 %v17424_v29, %v17425_v10  ;;  %v17477_v29 = vld [vmem:[#allocation98_spill] sm:$0xff] }
 0x69b   : > { %10011 = vmatmul.mubr.msk.bf16.gmra.mrb[12].mxu1 %vm299_vm2, %v17390_v17  ;;  %v17431_v17 = vld [vmem:[#allocation167_spill] sm:$0xff] }
 0x69c   : > { %10014 = vmatprep.mubr.msk.bf16.mxu1 %vm299_vm2, %v17392_v62  ;;  %v17432_v1 = vpack.c.bf16 %v17430_v37, %v17431_v17  ;;  %v17434_v62 = vld [vmem:[#allocation169_spill] sm:$0xff]  ;;  %v17483_v37 = vld [vmem:[#allocation99_spill] sm:$0xff]  ;;  %v17485_v17 = vld [vmem:[#allocation124_spill] sm:$0xff] }
 0x6a3   : > { %10015 = vmatmul.mubr.msk.bf16.gmra.mrb[16].mxu1 %vm299_vm2, %v17393_v4  ;;  %v17435_v4 = vpack.c.bf16 %v17433_v21, %v17434_v62  ;;  %v17487_v21 = vld [vmem:[#allocation125_spill] sm:$0xff]  ;;  %v17488_v62 = vld [vmem:[#allocation118_spill] sm:$0xff] }
 0x6a4   : > { %10018 = vmatprep.mubr.msk.bf16.mxu1 %vm299_vm2, %v17394_v6  ;;  %v17436_v6 = vld [vmem:[#allocation175_spill] sm:$0xff] }
 0x6a5   : > { %v17437_v2 = vpack.c.bf16 %v14710_v41, %v17436_v6  ;;  %v17444_v41 = vpack.c.bf16 %v17442_v22, %v17443_v33  ;;  %v17490_v6 = vld [vmem:[#allocation100_spill] sm:$0xff]  ;;  %v17497_v33 = vld [vmem:[#allocation154_spill] sm:$0xff] }
 0x6a6   : > { %v17496_v22 = vld [vmem:[#allocation76_spill] sm:$0xff] }
 0x6ab   : > { %10019 = vmatmul.mubr.msk.bf16.gmra.mrb[20].mxu1 %vm299_vm2, %v17396_v52  ;;  %v17438_v52 = vpack.c.bf16 %v14728_v59, %v14704_v56  ;;  %v17451_v59 = vld [vmem:[#allocation195_spill] sm:$0xff] }
 0x6ac   : > { %10022 = vmatprep.mubr.msk.bf16.mxu1 %vm299_vm2, %v17399_v25  ;;  %v17441_v25 = vpack.c.bf16 %v17440_v23, %v14740_v11  ;;  %v17450_v11 = vpack.c.bf16 %v14541_v15, %v17449_v39  ;;  %v17494_v23 = vld [vmem:[#allocation152_spill] sm:$0xff]  ;;  %v17502_v39 = vld [vmem:[#allocation77_spill] sm:$0xff] }
 0x6b3   : > { %10023 = vmatmul.mubr.msk.bf16.gmra.mrb[24].mxu1 %vm299_vm2, %v17402_v7  ;;  %v17445_v7 = vld [vmem:[#allocation188_spill] sm:$0xff] }
 0x6b4   : > { %10026 = vmatprep.mubr.msk.bf16.mxu1 %vm299_vm2, %v17405_v61  ;;  %v17447_v56 = vpack.c.bf16 %v17445_v7, %v17446_v53  ;;  %v17453_v61 = vpack.c.bf16 %v17451_v59, %v17452_v5  ;;  %v17499_v7 = vld [vmem:[#allocation128_spill] sm:$0xff]  ;;  %v7046_v53 = vpack.c.bf16 %v14762_v31, %v15234_v58  ;;  %v17506_v31 = vld [vmem:[#allocation70_spill] sm:$0xff]  ;;  %v17508_v58 = vld [vmem:[#allocation55_spill] sm:$0xff] }
 0x6b5   : > { %v17504_v5 = vld [vmem:[#allocation12_spill] sm:$0xff] }
 0x6bb   : > { %10027 = vmatmul.mubr.msk.bf16.gmra.mrb[28].mxu1 %vm299_vm2, %v17408_v36  ;;  %v17456_v36 = vpack.c.bf16 %v17454_v45, %v17455_v19  ;;  %v17505_v45 = vld [vmem:[#allocation25_spill] sm:$0xff]  ;;  %v17509_v19 = vld [vmem:[#allocation60_spill] sm:$0xff] }
 0x6bc   : > { %10030 = vmatprep.mubr.msk.bf16.mxu1 %vm299_vm2, %v17411_v40  ;;  %v17461_v40 = vld [vmem:[#allocation201_spill] sm:$0xff] }
 0x6bd   : > { %v17462_v15 = vpack.c.bf16 %v17460_v51, %v17461_v40  ;;  %v17514_v51 = vld [vmem:[#allocation93_spill] sm:$0xff] }
 0x6be   : > { %v17515_v40 = vld [vmem:[#allocation69_spill] sm:$0xff] }
 0x6c3   : > { %10031 = vmatmul.mubr.msk.bf16.gmra.mrb[32].mxu1 %vm299_vm2, %v17414_v9  ;;  %v17465_v9 = vpack.c.bf16 %v17463_v13, %v17464_v18  ;;  %v17517_v13 = vld [vmem:[#allocation63_spill] sm:$0xff]  ;;  %v17518_v18 = vld [vmem:[#allocation176_spill] sm:$0xff] }
 0x6c4   : > { %10034 = vmatprep.mubr.msk.bf16.mxu1 %vm299_vm2, %v17416_v48  ;;  %v17467_v48 = vld [vmem:[#allocation206_spill] sm:$0xff] }
 0x6cb   : > { %10035 = vmatmul.mubr.msk.bf16.gmra.mrb[36].mxu1 %vm299_vm2, %v17417_v16  ;;  %v17468_v16 = vpack.c.bf16 %v17466_v14, %v17467_v48  ;;  %v17520_v14 = vld [vmem:[#allocation180_spill] sm:$0xff]  ;;  %v17521_v48 = vld [vmem:[#allocation215_spill] sm:$0xff] }
 0x6cc   : > { %10038 = vmatprep.mubr.msk.bf16.mxu1 %vm299_vm2, %v17418_v32  ;;  %v17469_v32 = vld [vmem:[#allocation213_spill] sm:$0xff] }
 0x6d3   : > { %10039 = vmatmul.mubr.msk.bf16.gmra.mrb[40].mxu1 %vm299_vm2, %v17419_v63  ;;  %v17470_v63 = vld [vmem:[#allocation113_spill] sm:$0xff] }
 0x6d4   : > { %10042 = vmatprep.mubr.msk.bf16.mxu1 %vm299_vm2, %v17420_v27  ;;  %v17471_v27 = vpack.c.bf16 %v17469_v32, %v17470_v63  ;;  %v17523_v32 = vld [vmem:[#allocation217_spill] sm:$0xff]  ;;  %v17524_v63 = vld [vmem:[#allocation218_spill] sm:$0xff] }
 0x6db   : > { %10043 = vmatmul.mubr.msk.bf16.gmra.mrb[44].mxu1 %vm299_vm2, %v6321_v26  ;;  %v17472_v26 = vld [vmem:[#allocation212_spill] sm:$0xff] }
 0x6dc   : > { %10048 = vmatprep.mubr.msk.bf16.mxu1 %vm299_vm2, %v17421_v44  ;;  %v17473_v44 = vpack.c.bf16 %v14821_v46, %v17472_v26  ;;  %v8867_v46 = vld [vmem:[%s16118_s2 + $0x10] sm:$0x3]  ;;  %v17526_v26 = vld [vmem:[#allocation116_spill] sm:$0xff] }
 0x6e3   : > { %10049 = vmatmul.mubr.msk.bf16.vlgmr.msra.gmra.mrb[0].mxu1 %vm299_vm2, %v17423_v54  ;;  %v17476_v54 = vld [vmem:[#allocation103_spill] sm:$0xff] }
 0x6e4   : > { %10097 = vmatpush3.bf16.msra.mxu1 %v7061_v12  ;;  %10052 = vmatprep.mubr.msk.bf16.mxu1 %vm299_vm2, %v17426_v42  ;;  %v17474_v12 = vld [vmem:[#allocation90_spill] sm:$0xff]  ;;  %v17478_v10 = vpack.c.bf16 %v17476_v54, %v17477_v29  ;;  %v17479_v42 = vld [vmem:[#allocation141_spill] sm:$0xff] }
 0x6e5   : > { %11030 = vmatprep.subr.msk.bf16.mxu1 %vm817_vm0, %v8842_v57  ;;  %v17475_v38 = vpack.c.bf16 %v17474_v12, %v14807_v49  ;;  %v17481_v49 = vld [vmem:[#allocation86_spill] sm:$0xff] }
 0x6e6   : > { %v17484_v57 = vld [vmem:[#allocation74_spill] sm:$0xff] }
 0x6eb   : > { %10053 = vmatmul.mubr.msk.bf16.gmra.mrb[4].mxu1 %vm299_vm2, %v17429_v0  ;;  %v17482_v0 = vld [vmem:[#allocation123_spill] sm:$0xff] }
 0x6ec   : > { %10056 = vmatprep.mubr.msk.bf16.mxu1 %vm299_vm2, %v17432_v1  ;;  %v17486_v1 = vld [vmem:[#allocation117_spill] sm:$0xff] }
 0x6f3   : > { %10057 = vmatmul.mubr.msk.bf16.gmra.mrb[8].mxu1 %vm299_vm2, %v17435_v4  ;;  %v17489_v4 = vld [vmem:[#allocation107_spill] sm:$0xff] }
 0x6f4   : > { %10060 = vmatprep.mubr.msk.bf16.mxu1 %vm299_vm2, %v17437_v2  ;;  %v17491_v2 = vld [vmem:[#allocation147_spill] sm:$0xff] }
 0x6fb   : > { %10061 = vmatmul.mubr.msk.bf16.gmra.mrb[12].mxu1 %vm299_vm2, %v17438_v52  ;;  %v17492_v52 = vld [vmem:[#allocation148_spill] sm:$0xff] }
 0x6fc   : > { %10064 = vmatprep.mubr.msk.bf16.mxu1 %vm299_vm2, %v17439_v30  ;;  %v17493_v30 = vld [vmem:[#allocation151_spill] sm:$0xff] }
 0x703   : > { %10065 = vmatmul.mubr.msk.bf16.gmra.mrb[16].mxu1 %vm299_vm2, %v17441_v25  ;;  %v17495_v25 = vld [vmem:[#allocation153_spill] sm:$0xff] }
 0x704   : > { %10068 = vmatprep.mubr.msk.bf16.mxu1 %vm299_vm2, %v17444_v41  ;;  %v17498_v41 = vld [vmem:[#allocation155_spill] sm:$0xff] }
 0x70b   : > { %10069 = vmatmul.mubr.msk.bf16.gmra.mrb[20].mxu1 %vm299_vm2, %v17447_v56  ;;  %v17500_v56 = vld [vmem:[#allocation119_spill] sm:$0xff] }
 0x70c   : > { %10072 = vmatprep.mubr.msk.bf16.mxu1 %vm299_vm2, %v17448_v43  ;;  %v17501_v43 = vpack.c.bf16 %v17500_v56, %v14796_v24  ;;  %v17507_v24 = vld [vmem:[#allocation30_spill] sm:$0xff]  ;;  %v17556_v56 = vld [vmem:[#allocation8_spill] sm:$0xff] }
 0x713   : > { %10073 = vmatmul.mubr.msk.bf16.gmra.mrb[24].mxu1 %vm299_vm2, %v17450_v11  ;;  %v17503_v11 = vld [vmem:[#allocation36_spill] sm:$0xff] }
 0x714   : > { %10076 = vmatprep.mubr.msk.bf16.mxu1 %vm299_vm2, %v17453_v61  ;;  %v7048_v59 = vpack.c.bf16 %v17503_v11, %v17502_v39  ;;  %v7641_v61 = vsel %vm817_vm0, %v8867_v46, 0  ;;  %v17558_v11 = vld [vmem:[#allocation11_spill] sm:$0xff] }
 0x71b   : > { %10077 = vmatmul.mubr.msk.bf16.gmra.mrb[28].mxu1 %vm299_vm2, %v17456_v36  ;;  %v17510_v36 = vld [vmem:[#allocation67_spill] sm:$0xff] }
 0x71c   : > { %10080 = vmatprep.mubr.msk.bf16.mxu1 %vm299_vm2, %v17459_v20  ;;  %v17513_v20 = vld [vmem:[#allocation145_spill] sm:$0xff] }
 0x723   : > { %10081 = vmatmul.mubr.msk.bf16.gmra.mrb[32].mxu1 %vm299_vm2, %v17462_v15  ;;  %v17516_v15 = vld [vmem:[#allocation92_spill] sm:$0xff] }
 0x724   : > { %10084 = vmatprep.mubr.msk.bf16.mxu1 %vm299_vm2, %v17465_v9  ;;  %v17519_v9 = vld [vmem:[#allocation177_spill] sm:$0xff] }
 0x72b   : > { %10085 = vmatmul.mubr.msk.bf16.gmra.mrb[36].mxu1 %vm299_vm2, %v17468_v16  ;;  %v17522_v16 = vld [vmem:[#allocation216_spill] sm:$0xff] }
 0x72c   : > { %10088 = vmatprep.mubr.msk.bf16.mxu1 %vm299_vm2, %v17471_v27  ;;  %v17525_v27 = vpack.c.bf16 %v14871_v60, %v14827_v55  ;;  %v17534_v60 = vld [vmem:[#allocation174_spill] sm:$0xff]  ;;  %v17536_v55 = vld [vmem:[#allocation140_spill] sm:$0xff] }
 0x733   : > { %10089 = vmatmul.mubr.msk.bf16.gmra.mrb[40].mxu1 %vm299_vm2, %v17473_v44  ;;  %v17527_v44 = vpack.c.bf16 %v17526_v26, %v14888_v47  ;;  %v17535_v47 = vld [vmem:[#allocation178_spill] sm:$0xff] }
 0x734   : > { %10092 = vmatprep.mubr.msk.bf16.mxu1 %vm299_vm2, %v17475_v38  ;;  %v17528_v38 = vld [vmem:[#allocation130_spill] sm:$0xff] }
 0x73b   : > { %10093 = vmatmul.mubr.msk.bf16.gmra.mrb[44].mxu1 %vm299_vm2, %v17478_v10  ;;  %v17529_v10 = vld [vmem:[#allocation122_spill] sm:$0xff] }
 0x73c   : > { %10098 = vmatprep.mubr.msk.bf16.mxu1 %vm299_vm2, %v17479_v42  ;;  %v17530_v42 = vpack.c.bf16 %v17528_v38, %v17529_v10 }
 0x743   : > { %10099 = vmatmul.mubr.msk.bf16.vlgmr.msra.gmra.mrb[0].mxu1 %vm299_vm2, %v17480_v35  ;;  %v17533_v35 = vld [vmem:[#allocation168_spill] sm:$0xff] }
 0x744   : > { %10147 = vmatpush3.bf16.msra.mxu1 %v7351_v8  ;;  %10102 = vmatprep.mubr.msk.bf16.mxu1 %vm299_vm2, %v17481_v49  ;;  %v17531_v8 = vld [vmem:[#allocation163_spill] sm:$0xff]  ;;  %v17537_v49 = vld [vmem:[#allocation142_spill] sm:$0xff] }
 0x745   : > { %11031 = vmatprep.subr.msk.bf16.mxu1 %vm817_vm0, %v8867_v46  ;;  %v17532_v46 = vld [vmem:[#allocation166_spill] sm:$0xff] }
 0x74b   : > { %10103 = vmatmul.mubr.msk.bf16.gmra.mrb[4].mxu1 %vm299_vm2, %v17482_v0  ;;  %v17538_v0 = vld [vmem:[#allocation131_spill] sm:$0xff] }
 0x74c   : > { %10106 = vmatprep.mubr.msk.bf16.mxu1 %vm299_vm2, %v17483_v37  ;;  %v17539_v37 = vld [vmem:[#allocation185_spill] sm:$0xff] }
 0x753   : > { %10107 = vmatmul.mubr.msk.bf16.gmra.mrb[8].mxu1 %vm299_vm2, %v17484_v57  ;;  %v17540_v57 = vld [vmem:[#allocation186_spill] sm:$0xff] }
 0x754   : > { %10110 = vmatprep.mubr.msk.bf16.mxu1 %vm299_vm2, %v17485_v17  ;;  %v17541_v17 = vld [vmem:[#allocation189_spill] sm:$0xff] }
 0x75b   : > { %10111 = vmatmul.mubr.msk.bf16.gmra.mrb[12].mxu1 %vm299_vm2, %v17486_v1  ;;  %v17542_v1 = vld [vmem:[#allocation193_spill] sm:$0xff] }
 0x75c   : > { %10114 = vmatprep.mubr.msk.bf16.mxu1 %vm299_vm2, %v17487_v21  ;;  %v17543_v21 = vld [vmem:[#allocation197_spill] sm:$0xff] }
 0x763   : > { %10115 = vmatmul.mubr.msk.bf16.gmra.mrb[16].mxu1 %vm299_vm2, %v17488_v62  ;;  %v17544_v62 = vld [vmem:[#allocation200_spill] sm:$0xff] }
 0x764   : > { %10118 = vmatprep.mubr.msk.bf16.mxu1 %vm299_vm2, %v17489_v4  ;;  %v17545_v4 = vld [vmem:[#allocation204_spill] sm:$0xff] }
 0x76b   : > { %10119 = vmatmul.mubr.msk.bf16.gmra.mrb[20].mxu1 %vm299_vm2, %v17490_v6  ;;  %v17546_v6 = vld [vmem:[#allocation208_spill] sm:$0xff] }
 0x76c   : > { %10122 = vmatprep.mubr.msk.bf16.mxu1 %vm299_vm2, %v17491_v2  ;;  %v17547_v2 = vld [vmem:[#allocation209_spill] sm:$0xff] }
 0x773   : > { %10123 = vmatmul.mubr.msk.bf16.gmra.mrb[24].mxu1 %vm299_vm2, %v17492_v52  ;;  %v17548_v52 = vld [vmem:[#allocation211_spill] sm:$0xff] }
 0x774   : > { %10126 = vmatprep.mubr.msk.bf16.mxu1 %vm299_vm2, %v17493_v30  ;;  %v17549_v30 = vld [vmem:[#allocation214_spill] sm:$0xff] }
 0x77b   : > { %10127 = vmatmul.mubr.msk.bf16.gmra.mrb[28].mxu1 %vm299_vm2, %v17494_v23  ;;  %v17551_v23 = vld [vmem:[#allocation187_spill] sm:$0xff] }
 0x77c   : > { %10130 = vmatprep.mubr.msk.bf16.mxu1 %vm299_vm2, %v17495_v25  ;;  %v17552_v25 = vpack.c.bf16 %v17551_v23, %v17476_v54  ;;  %v17564_v23 = vld [vmem:[#allocation14_spill] sm:$0xff] }
 0x783   : > { %10131 = vmatmul.mubr.msk.bf16.gmra.mrb[32].mxu1 %vm299_vm2, %v17496_v22  ;;  %v17553_v22 = vld [vmem:[#allocation75_spill] sm:$0xff] }
 0x784   : > { %10134 = vmatprep.mubr.msk.bf16.mxu1 %vm299_vm2, %v17497_v33  ;;  %v17554_v33 = vld [vmem:[#allocation191_spill] sm:$0xff] }
 0x78b   : > { %10135 = vmatmul.mubr.msk.bf16.gmra.mrb[36].mxu1 %vm299_vm2, %v17498_v41  ;;  %v17555_v41 = vpack.c.bf16 %v17553_v22, %v17554_v33 }
 0x78c   : > { %10138 = vmatprep.mubr.msk.bf16.mxu1 %vm299_vm2, %v17499_v7 }
 0x793   : > { %10139 = vmatmul.mubr.msk.bf16.gmra.mrb[40].mxu1 %vm299_vm2, %v7046_v53 }
 0x794   : > { %10142 = vmatprep.mubr.msk.bf16.mxu1 %vm299_vm2, %v17501_v43  ;;  %v17557_v43 = vld [vmem:[#allocation7_spill] sm:$0xff] }
 0x79b   : > { %10143 = vmatmul.mubr.msk.bf16.gmra.mrb[44].mxu1 %vm299_vm2, %v7048_v59 }
 0x79c   : > { %10148 = vmatprep.mubr.msk.bf16.mxu1 %vm299_vm2, %v17504_v5  ;;  %v17559_v5 = vld [vmem:[#allocation9_spill] sm:$0xff] }
 0x7a3   : > { %10149 = vmatmul.mubr.msk.bf16.vlgmr.msra.gmra.mrb[0].mxu1 %vm299_vm2, %v17505_v45 }
 0x7a4   : > { %10197 = vmatpush3.bf16.msra.mxu1 %v7641_v61  ;;  %10152 = vmatprep.mubr.msk.bf16.mxu1 %vm299_vm2, %v17506_v31 }
 0x7ab   : > { %10153 = vmatmul.mubr.msk.bf16.gmra.mrb[4].mxu1 %vm299_vm2, %v17507_v24 }
 0x7ac   : > { %10156 = vmatprep.mubr.msk.bf16.mxu1 %vm299_vm2, %v17508_v58 }
 0x7b3   : > { %10157 = vmatmul.mubr.msk.bf16.gmra.mrb[8].mxu1 %vm299_vm2, %v17509_v19 }
 0x7b4   : > { %10160 = vmatprep.mubr.msk.bf16.mxu1 %vm299_vm2, %v17510_v36 }
 0x7bb   : > { %10161 = vmatmul.mubr.msk.bf16.gmra.mrb[12].mxu1 %vm299_vm2, %v17511_v28 }
 0x7bc   : > { %10164 = vmatprep.mubr.msk.bf16.mxu1 %vm299_vm2, %v17512_v34 }
 0x7c3   : > { %10165 = vmatmul.mubr.msk.bf16.gmra.mrb[16].mxu1 %vm299_vm2, %v17513_v20 }
 0x7c4   : > { %10168 = vmatprep.mubr.msk.bf16.mxu1 %vm299_vm2, %v17514_v51 }
 0x7cb   : > { %10169 = vmatmul.mubr.msk.bf16.gmra.mrb[20].mxu1 %vm299_vm2, %v17515_v40 }
 0x7cc   : > { %10172 = vmatprep.mubr.msk.bf16.mxu1 %vm299_vm2, %v17516_v15 }
 0x7d3   : > { %10173 = vmatmul.mubr.msk.bf16.gmra.mrb[24].mxu1 %vm299_vm2, %v17517_v13 }
 0x7d4   : > { %10176 = vmatprep.mubr.msk.bf16.mxu1 %vm299_vm2, %v17518_v18 }
 0x7db   : > { %10177 = vmatmul.mubr.msk.bf16.gmra.mrb[28].mxu1 %vm299_vm2, %v17519_v9 }
 0x7dc   : > { %10180 = vmatprep.mubr.msk.bf16.mxu1 %vm299_vm2, %v17520_v14  ;;  %v17560_v14 = vld [vmem:[#allocation5_spill] sm:$0xff] }
 0x7e3   : > { %10181 = vmatmul.mubr.msk.bf16.gmra.mrb[32].mxu1 %vm299_vm2, %v17521_v48 }
 0x7e4   : > { %10184 = vmatprep.mubr.msk.bf16.mxu1 %vm299_vm2, %v17522_v16 }
 0x7eb   : > { %10185 = vmatmul.mubr.msk.bf16.gmra.mrb[36].mxu1 %vm299_vm2, %v17523_v32 }
 0x7ec   : > { %10188 = vmatprep.mubr.msk.bf16.mxu1 %vm299_vm2, %v17524_v63  ;;  %v17561_v63 = vld [vmem:[#allocation10_spill] sm:$0xff] }
 0x7f3   : > { %10189 = vmatmul.mubr.msk.bf16.gmra.mrb[40].mxu1 %vm299_vm2, %v17525_v27 }
 0x7f4   : > { %10192 = vmatprep.mubr.msk.bf16.mxu1 %vm299_vm2, %v17527_v44 }
 0x7fb   : > { %10193 = vmatmul.mubr.msk.bf16.gmra.mrb[44].mxu1 %vm299_vm2, %v17530_v42 }
 0x7fc   : > { %10198 = vmatprep.mubr.msk.bf16.mxu1 %vm299_vm2, %v17531_v8  ;;  %v17562_v8 = vld [vmem:[#allocation4_spill] sm:$0xff] }
 0x803   : > { %10199 = vmatmul.mubr.msk.bf16.vlgmr.msra.gmra.mrb[0].mxu1 %vm299_vm2, %v17532_v46 }
 0x804   : > { %10202 = vmatprep.mubr.msk.bf16.mxu1 %vm299_vm2, %v17533_v35 }
 0x80b   : > { %10203 = vmatmul.mubr.msk.bf16.gmra.mrb[4].mxu1 %vm299_vm2, %v17534_v60 }
 0x80c   : > { %10206 = vmatprep.mubr.msk.bf16.mxu1 %vm299_vm2, %v17535_v47  ;;  %v17563_v47 = vld [vmem:[#allocation15_spill] sm:$0xff] }
 0x813   : > { %10207 = vmatmul.mubr.msk.bf16.gmra.mrb[8].mxu1 %vm299_vm2, %v17536_v55 }
 0x814   : > { %10210 = vmatprep.mubr.msk.bf16.mxu1 %vm299_vm2, %v17537_v49 }
 0x81b   : > { %10211 = vmatmul.mubr.msk.bf16.gmra.mrb[12].mxu1 %vm299_vm2, %v17538_v0 }
 0x81c   : > { %10214 = vmatprep.mubr.msk.bf16.mxu1 %vm299_vm2, %v17539_v37 }
 0x823   : > { %10215 = vmatmul.mubr.msk.bf16.gmra.mrb[16].mxu1 %vm299_vm2, %v17540_v57 }
 0x824   : > { %10218 = vmatprep.mubr.msk.bf16.mxu1 %vm299_vm2, %v17541_v17 }
 0x82b   : > { %10219 = vmatmul.mubr.msk.bf16.gmra.mrb[20].mxu1 %vm299_vm2, %v17542_v1 }
 0x82c   : > { %10222 = vmatprep.mubr.msk.bf16.mxu1 %vm299_vm2, %v17325_v50  ;;  %v17550_v50 = vpack.c.bf16 %v17477_v29, %v17474_v12 }
 0x833   : > { %10223 = vmatmul.mubr.msk.bf16.gmra.mrb[24].mxu1 %vm299_vm2, %v17543_v21 }
 0x834   : > { %10226 = vmatprep.mubr.msk.bf16.mxu1 %vm299_vm2, %v17544_v62 }
 0x83b   : > { %10227 = vmatmul.mubr.msk.bf16.gmra.mrb[28].mxu1 %vm299_vm2, %v17545_v4 }
 0x83c   : > { %10230 = vmatprep.mubr.msk.bf16.mxu1 %vm299_vm2, %v17546_v6 }
 0x843   : > { %10231 = vmatmul.mubr.msk.bf16.gmra.mrb[32].mxu1 %vm299_vm2, %v17547_v2 }
 0x844   : > { %10234 = vmatprep.mubr.msk.bf16.mxu1 %vm299_vm2, %v17548_v52 }
 0x84b   : > { %10235 = vmatmul.mubr.msk.bf16.gmra.mrb[36].mxu1 %vm299_vm2, %v17549_v30 }
 0x84c   : > { %10238 = vmatprep.mubr.msk.bf16.mxu1 %vm299_vm2, %v15149_v3 }
 0x853   : > { %10239 = vmatmul.mubr.msk.bf16.gmra.mrb[40].mxu1 %vm299_vm2, %v17550_v50 }
 0x854   : > { %10242 = vmatprep.mubr.msk.bf16.mxu1 %vm299_vm2, %v17552_v25 }
 0x85b   : > { %10243 = vmatmul.mubr.msk.bf16.gmra.mrb[44].mxu1 %vm299_vm2, %v17555_v41  ;;  %v17565_v41 = vld [vmem:[#allocation16_spill] sm:$0xff] }
 0x8d6   : > { %v10200_v7 = vpop.f32.mrb[0].mxu1 }
 0x8d7   : > { %v15610_v53 = vpop.f32.mrb[1].mxu1  ;;  %v7918_v3 = vmul.f32 %v10200_v7, %v17556_v56 }
 0x8d8   : > { %v7916_v12 = vmul.f32 %v15610_v53, %v17557_v43  ;;  %v15615_v29 = vpop.f32.mrb[2].mxu1 }
 0x8d9   : > { %v15617_v39 = vpop.f32.mrb[3].mxu1  ;;  %v7919_v59 = vmul.f32 %v15615_v29, %v17558_v11  ;;  %v8068_v45 = vmul.f32 %v10200_v7, %v7918_v3  ;;  %v7967_v36 = vsel %vm299_vm2, %v7918_v3, 0.0  ;;  %v17566_v11 = vld [vmem:[#allocation17_spill] sm:$0xff] }
 0x8da   : > { %v8066_v54 = vmul.f32 %v7916_v12, %v15610_v53  ;;  %v7917_v61 = vmul.f32 %v15617_v39, %v17559_v5  ;;  %v7964_v31 = vsel %vm299_vm2, %v7916_v12, 0.0 }
 0x8db   : > { %v8069_v34 = vmul.f32 %v15615_v29, %v7919_v59  ;;  %v8117_v18 = vsel %vm299_vm2, %v8068_v45, 0.0  ;;  %v7969_v9 = vsel %vm299_vm2, %v7919_v59, 0.0  ;;  %v17567_v45 = vld [vmem:[#allocation21_spill] sm:$0xff] }
 0x8dc   : > { %v7965_v24 = vsel %vm299_vm2, %v7917_v61, 0.0  ;;  %v8067_v58 = vmul.f32 %v7917_v61, %v15617_v39  ;;  %v8114_v28 = vsel %vm299_vm2, %v8066_v54, 0.0 }
 0x8dd   : > { %v7966_v19 = vadd.f32 %v7965_v24, %v7964_v31  ;;  %v8119_v38 = vsel %vm299_vm2, %v8069_v34, 0.0 }
 0x8de   : > { %v8115_v20 = vsel %vm299_vm2, %v8067_v58, 0.0  ;;  %v15631_v51 = vpop.f32.mrb[4].mxu1 }
 0x8df   : > { %v7968_v40 = vadd.f32 %v7967_v36, %v7966_v19  ;;  %v8116_v15 = vadd.f32 %v8115_v20, %v8114_v28  ;;  %v15633_v13 = vpop.f32.mrb[5].mxu1  ;;  %v7922_v27 = vmul.f32 %v15631_v51, %v17561_v63 }
 0x8e0   : > { %v7920_v48 = vmul.f32 %v15633_v13, %v17560_v14  ;;  %v15639_v16 = vpop.f32.mrb[6].mxu1 }
 0x8e1   : > { %v8118_v32 = vadd.f32 %v8117_v18, %v8116_v15  ;;  %v7970_v26 = vadd.f32 %v7969_v9, %v7968_v40  ;;  %v7696_v44 = vpop.f32.mrb[7].mxu1  ;;  %v7923_v55 = vmul.f32 %v15639_v16, %v17563_v47  ;;  %v8072_v37 = vmul.f32 %v15631_v51, %v7922_v27 }
 0x8e2   : > { %v7971_v10 = vsel %vm299_vm2, %v7920_v48, 0.0  ;;  %v8070_v42 = vmul.f32 %v7920_v48, %v15633_v13  ;;  %v7921_v46 = vmul.f32 %v7696_v44, %v17562_v8  ;;  %v7975_v21 = vsel %vm299_vm2, %v7922_v27, 0.0  ;;  %v17568_v27 = vld [vmem:[#allocation20_spill] sm:$0xff] }
 0x8e3   : > { %v7972_v35 = vadd.f32 %v7971_v10, %v7970_v26  ;;  %v8120_v60 = vadd.f32 %v8119_v38, %v8118_v32  ;;  %v8073_v4 = vmul.f32 %v15639_v16, %v7923_v55  ;;  %v7977_v30 = vsel %vm299_vm2, %v7923_v55, 0.0  ;;  %v17569_v10 = vld [vmem:[#allocation22_spill] sm:$0xff]  ;;  %v17570_v55 = vld [vmem:[#allocation23_spill] sm:$0xff] }
 0x8e4   : > { %v8121_v49 = vsel %vm299_vm2, %v8070_v42, 0.0  ;;  %v7973_v0 = vsel %vm299_vm2, %v7921_v46, 0.0  ;;  %v8071_v1 = vmul.f32 %v7921_v46, %v7696_v44  ;;  %v8125_v33 = vsel %vm299_vm2, %v8072_v37, 0.0 }
 0x8e5   : > { %v8122_v57 = vadd.f32 %v8121_v49, %v8120_v60  ;;  %v7974_v17 = vadd.f32 %v7973_v0, %v7972_v35  ;;  %v8127_v5 = vsel %vm299_vm2, %v8073_v4, 0.0 }
 0x8e6   : > { %v15653_v62 = vpop.f32.mrb[8].mxu1  ;;  %v8123_v2 = vsel %vm299_vm2, %v8071_v1, 0.0 }
 0x8e7   : > { %v7976_v6 = vadd.f32 %v7975_v21, %v7974_v17  ;;  %v7709_v52 = vpop.f32.mrb[9].mxu1  ;;  %v8124_v50 = vadd.f32 %v8123_v2, %v8122_v57  ;;  %v7926_v7 = vmul.f32 %v15653_v62, %v17565_v41  ;;  %v17571_v57 = vld [vmem:[#allocation27_spill] sm:$0xff] }
 0x8e8   : > { %v7924_v25 = vmul.f32 %v7709_v52, %v17564_v23  ;;  %v10209_v22 = vpop.f32.mrb[10].mxu1 }
 0x8e9   : > { %v7978_v56 = vadd.f32 %v7977_v30, %v7976_v6  ;;  %v15662_v3 = vpop.f32.mrb[11].mxu1  ;;  %v8126_v43 = vadd.f32 %v8125_v33, %v8124_v50  ;;  %v7927_v31 = vmul.f32 %v10209_v22, %v17567_v45  ;;  %v8076_v28 = vmul.f32 %v15653_v62, %v7926_v7 }
 0x8ea   : > { %v7979_v12 = vsel %vm299_vm2, %v7924_v25, 0.0  ;;  %v8074_v54 = vmul.f32 %v7924_v25, %v7709_v52  ;;  %v7925_v59 = vmul.f32 %v15662_v3, %v17566_v11  ;;  %v7983_v20 = vsel %vm299_vm2, %v7926_v7, 0.0 }
 0x8eb   : > { %v7980_v61 = vadd.f32 %v7979_v12, %v7978_v56  ;;  %v8128_v24 = vadd.f32 %v8127_v5, %v8126_v43  ;;  %v8077_v9 = vmul.f32 %v10209_v22, %v7927_v31  ;;  %v7985_v32 = vsel %vm299_vm2, %v7927_v31, 0.0  ;;  %v17572_v43 = vld [vmem:[#allocation26_spill] sm:$0xff] }
 0x8ec   : > { %v8129_v58 = vsel %vm299_vm2, %v8074_v54, 0.0  ;;  %v7981_v19 = vsel %vm299_vm2, %v7925_v59, 0.0  ;;  %v8075_v36 = vmul.f32 %v7925_v59, %v15662_v3  ;;  %v8133_v38 = vsel %vm299_vm2, %v8076_v28, 0.0  ;;  %v17573_v59 = vld [vmem:[#allocation28_spill] sm:$0xff] }
 0x8ed   : > { %v7982_v34 = vadd.f32 %v7981_v19, %v7980_v61  ;;  %v8130_v40 = vadd.f32 %v8129_v58, %v8128_v24  ;;  %v8135_v0 = vsel %vm299_vm2, %v8077_v9, 0.0  ;;  %v17574_v19 = vld [vmem:[#allocation29_spill] sm:$0xff] }
 0x8ee   : > { %v8131_v15 = vsel %vm299_vm2, %v8075_v36, 0.0  ;;  %v10212_v18 = vpop.f32.mrb[12].mxu1 }
 0x8ef   : > { %v7984_v14 = vadd.f32 %v7983_v20, %v7982_v34  ;;  %v15675_v48 = vpop.f32.mrb[13].mxu1  ;;  %v8132_v63 = vadd.f32 %v8131_v15, %v8130_v40  ;;  %v7930_v42 = vmul.f32 %v10212_v18, %v17569_v10  ;;  %v17575_v20 = vld [vmem:[#allocation33_spill] sm:$0xff] }
 0x8f0   : > { %v7928_v26 = vmul.f32 %v15675_v48, %v17568_v27  ;;  %v15680_v44 = vpop.f32.mrb[14].mxu1 }
 0x8f1   : > { %v7986_v8 = vadd.f32 %v7985_v32, %v7984_v14  ;;  %v15684_v46 = vpop.f32.mrb[15].mxu1  ;;  %v8134_v35 = vadd.f32 %v8133_v38, %v8132_v63  ;;  %v7931_v17 = vmul.f32 %v15680_v44, %v17571_v57  ;;  %v8080_v2 = vmul.f32 %v10212_v18, %v7930_v42  ;;  %v17577_v57 = vld [vmem:[#allocation34_spill] sm:$0xff] }
 0x8f2   : > { %v7987_v60 = vsel %vm299_vm2, %v7928_v26, 0.0  ;;  %v8078_v47 = vmul.f32 %v7928_v26, %v15675_v48  ;;  %v7929_v49 = vmul.f32 %v15684_v46, %v17570_v55  ;;  %v7991_v30 = vsel %vm299_vm2, %v7930_v42, 0.0  ;;  %v17576_v55 = vld [vmem:[#allocation32_spill] sm:$0xff] }
 0x8f3   : > { %v7988_v37 = vadd.f32 %v7987_v60, %v7986_v8  ;;  %v8136_v1 = vadd.f32 %v8135_v0, %v8134_v35  ;;  %v8081_v22 = vmul.f32 %v15680_v44, %v7931_v17  ;;  %v7993_v7 = vsel %vm299_vm2, %v7931_v17, 0.0 }
 0x8f4   : > { %v8137_v21 = vsel %vm299_vm2, %v8078_v47, 0.0  ;;  %v7989_v4 = vsel %vm299_vm2, %v7929_v49, 0.0  ;;  %v8079_v6 = vmul.f32 %v7929_v49, %v15684_v46  ;;  %v8141_v11 = vsel %vm299_vm2, %v8080_v2, 0.0 }
 0x8f5   : > { %v7990_v52 = vadd.f32 %v7989_v4, %v7988_v37  ;;  %v8138_v50 = vadd.f32 %v8137_v21, %v8136_v1  ;;  %v8143_v28 = vsel %vm299_vm2, %v8081_v22, 0.0  ;;  %v17579_v22 = vld [vmem:[#allocation39_spill] sm:$0xff] }
 0x8f6   : > { %v8139_v23 = vsel %vm299_vm2, %v8079_v6, 0.0  ;;  %v15698_v25 = vpop.f32.mrb[16].mxu1 }
 0x8f7   : > { %v7992_v33 = vadd.f32 %v7991_v30, %v7990_v52  ;;  %v15701_v41 = vpop.f32.mrb[17].mxu1  ;;  %v8140_v56 = vadd.f32 %v8139_v23, %v8138_v50  ;;  %v7934_v5 = vmul.f32 %v15698_v25, %v17573_v59  ;;  %v17578_v52 = vld [vmem:[#allocation35_spill] sm:$0xff] }
 0x8f8   : > { %v7932_v12 = vmul.f32 %v15701_v41, %v17572_v43  ;;  %v15706_v54 = vpop.f32.mrb[18].mxu1 }
 0x8f9   : > { %v7994_v61 = vadd.f32 %v7993_v7, %v7992_v33  ;;  %v7744_v45 = vpop.f32.mrb[19].mxu1  ;;  %v8142_v31 = vadd.f32 %v8141_v11, %v8140_v56  ;;  %v7935_v40 = vmul.f32 %v15706_v54, %v17575_v20  ;;  %v8084_v32 = vmul.f32 %v15698_v25, %v7934_v5 }
 0x8fa   : > { %v7995_v24 = vsel %vm299_vm2, %v7932_v12, 0.0  ;;  %v8082_v58 = vmul.f32 %v7932_v12, %v15701_v41  ;;  %v7933_v36 = vmul.f32 %v7744_v45, %v17574_v19  ;;  %v7999_v27 = vsel %vm299_vm2, %v7934_v5, 0.0 }
 0x8fb   : > { %v7996_v34 = vadd.f32 %v7995_v24, %v7994_v61  ;;  %v8144_v15 = vadd.f32 %v8143_v28, %v8142_v31  ;;  %v8085_v42 = vmul.f32 %v15706_v54, %v7935_v40  ;;  %v8001_v60 = vsel %vm299_vm2, %v7935_v40, 0.0 }
 0x8fc   : > { %v8145_v18 = vsel %vm299_vm2, %v8082_v58, 0.0  ;;  %v7997_v9 = vsel %vm299_vm2, %v7933_v36, 0.0  ;;  %v8083_v14 = vmul.f32 %v7933_v36, %v7744_v45  ;;  %v8149_v37 = vsel %vm299_vm2, %v8084_v32, 0.0 }
 0x8fd   : > { %v7998_v63 = vadd.f32 %v7997_v9, %v7996_v34  ;;  %v8146_v26 = vadd.f32 %v8145_v18, %v8144_v15  ;;  %v8151_v50 = vsel %vm299_vm2, %v8085_v42, 0.0  ;;  %v17580_v34 = vld [vmem:[#allocation38_spill] sm:$0xff]  ;;  %v17581_v18 = vld [vmem:[#allocation40_spill] sm:$0xff] }
 0x8fe   : > { %v8147_v38 = vsel %vm299_vm2, %v8083_v14, 0.0  ;;  %v15722_v10 = vpop.f32.mrb[20].mxu1 }
 0x8ff   : > { %v8000_v8 = vadd.f32 %v7999_v27, %v7998_v63  ;;  %v7757_v35 = vpop.f32.mrb[21].mxu1  ;;  %v8148_v47 = vadd.f32 %v8147_v38, %v8146_v26  ;;  %v7938_v17 = vmul.f32 %v15722_v10, %v17577_v57  ;;  %v17582_v38 = vld [vmem:[#allocation41_spill] sm:$0xff] }
 0x900   : > { %v7936_v49 = vmul.f32 %v7757_v35, %v17576_v55  ;;  %v10221_v0 = vpop.f32.mrb[22].mxu1 }
 0x901   : > { %v8002_v1 = vadd.f32 %v8001_v60, %v8000_v8  ;;  %v15730_v21 = vpop.f32.mrb[23].mxu1  ;;  %v8150_v4 = vadd.f32 %v8149_v37, %v8148_v47  ;;  %v7939_v33 = vmul.f32 %v10221_v0, %v17579_v22  ;;  %v8088_v11 = vmul.f32 %v15722_v10, %v7938_v17  ;;  %v17583_v60 = vld [vmem:[#allocation45_spill] sm:$0xff] }
 0x902   : > { %v8003_v6 = vsel %vm299_vm2, %v7936_v49, 0.0  ;;  %v8086_v2 = vmul.f32 %v7936_v49, %v7757_v35  ;;  %v7937_v30 = vmul.f32 %v15730_v21, %v17578_v52  ;;  %v8007_v5 = vsel %vm299_vm2, %v7938_v17, 0.0 }
 0x903   : > { %v8004_v23 = vadd.f32 %v8003_v6, %v8002_v1  ;;  %v8152_v7 = vadd.f32 %v8151_v50, %v8150_v4  ;;  %v8089_v24 = vmul.f32 %v10221_v0, %v7939_v33  ;;  %v8009_v36 = vsel %vm299_vm2, %v7939_v33, 0.0  ;;  %v17584_v33 = vld [vmem:[#allocation44_spill] sm:$0xff] }
 0x904   : > { %v8153_v56 = vsel %vm299_vm2, %v8086_v2, 0.0  ;;  %v8005_v43 = vsel %vm299_vm2, %v7937_v30, 0.0  ;;  %v8087_v12 = vmul.f32 %v7937_v30, %v15730_v21  ;;  %v8157_v15 = vsel %vm299_vm2, %v8088_v11, 0.0 }
 0x905   : > { %v8006_v59 = vadd.f32 %v8005_v43, %v8004_v23  ;;  %v8154_v61 = vadd.f32 %v8153_v56, %v8152_v7  ;;  %v8159_v8 = vsel %vm299_vm2, %v8089_v24, 0.0  ;;  %v17586_v24 = vld [vmem:[#allocation47_spill] sm:$0xff] }
 0x906   : > { %v8155_v45 = vsel %vm299_vm2, %v8087_v12, 0.0  ;;  %v10224_v31 = vpop.f32.mrb[24].mxu1  ;;  %v17585_v12 = vld [vmem:[#allocation46_spill] sm:$0xff] }
 0x907   : > { %v8008_v58 = vadd.f32 %v8007_v5, %v8006_v59  ;;  %v15743_v19 = vpop.f32.mrb[25].mxu1  ;;  %v8156_v28 = vadd.f32 %v8155_v45, %v8154_v61  ;;  %v7942_v9 = vmul.f32 %v10224_v31, %v17581_v18 }
 0x908   : > { %v7940_v20 = vmul.f32 %v15743_v19, %v17580_v34  ;;  %v15748_v40 = vpop.f32.mrb[26].mxu1  ;;  %v17587_v34 = vld [vmem:[#allocation51_spill] sm:$0xff] }
 0x909   : > { %v8010_v14 = vadd.f32 %v8009_v36, %v8008_v58  ;;  %v15752_v32 = vpop.f32.mrb[27].mxu1  ;;  %v8158_v63 = vadd.f32 %v8157_v15, %v8156_v28  ;;  %v7943_v47 = vmul.f32 %v15748_v40, %v17583_v60  ;;  %v8092_v57 = vmul.f32 %v10224_v31, %v7942_v9 }
 0x90a   : > { %v8011_v27 = vsel %vm299_vm2, %v7940_v20, 0.0  ;;  %v8090_v26 = vmul.f32 %v7940_v20, %v15743_v19  ;;  %v7941_v42 = vmul.f32 %v15752_v32, %v17582_v38  ;;  %v8015_v1 = vsel %vm299_vm2, %v7942_v9, 0.0 }
 0x90b   : > { %v8012_v35 = vadd.f32 %v8011_v27, %v8010_v14  ;;  %v8160_v55 = vadd.f32 %v8159_v8, %v8158_v63  ;;  %v8093_v52 = vmul.f32 %v15748_v40, %v7943_v47  ;;  %v8017_v23 = vsel %vm299_vm2, %v7943_v47, 0.0 }
 0x90c   : > { %v8161_v49 = vsel %vm299_vm2, %v8090_v26, 0.0  ;;  %v8013_v0 = vsel %vm299_vm2, %v7941_v42, 0.0  ;;  %v8091_v37 = vmul.f32 %v7941_v42, %v15752_v32  ;;  %v8165_v43 = vsel %vm299_vm2, %v8092_v57, 0.0 }
 0x90d   : > { %v8014_v17 = vadd.f32 %v8013_v0, %v8012_v35  ;;  %v8162_v4 = vadd.f32 %v8161_v49, %v8160_v55  ;;  %v8167_v36 = vsel %vm299_vm2, %v8093_v52, 0.0  ;;  %v17588_v0 = vld [vmem:[#allocation50_spill] sm:$0xff] }
 0x90e   : > { %v8163_v6 = vsel %vm299_vm2, %v8091_v37, 0.0  ;;  %v15766_v2 = vpop.f32.mrb[28].mxu1 }
 0x90f   : > { %v8016_v30 = vadd.f32 %v8015_v1, %v8014_v17  ;;  %v15769_v50 = vpop.f32.mrb[29].mxu1  ;;  %v8164_v22 = vadd.f32 %v8163_v6, %v8162_v4  ;;  %v7946_v11 = vmul.f32 %v15766_v2, %v17585_v12  ;;  %v17589_v1 = vld [vmem:[#allocation52_spill] sm:$0xff] }
 0x910   : > { %v7944_v7 = vmul.f32 %v15769_v50, %v17584_v33  ;;  %v15774_v56 = vpop.f32.mrb[30].mxu1  ;;  %v17590_v33 = vld [vmem:[#allocation53_spill] sm:$0xff] }
 0x911   : > { %v8018_v59 = vadd.f32 %v8017_v23, %v8016_v30  ;;  %v7792_v5 = vpop.f32.mrb[31].mxu1  ;;  %v8166_v61 = vadd.f32 %v8165_v43, %v8164_v22  ;;  %v7947_v20 = vmul.f32 %v15774_v56, %v17587_v34  ;;  %v8096_v63 = vmul.f32 %v15766_v2, %v7946_v11 }
 0x912   : > { %v8019_v45 = vsel %vm299_vm2, %v7944_v7, 0.0  ;;  %v8094_v31 = vmul.f32 %v7944_v7, %v15769_v50  ;;  %v7945_v58 = vmul.f32 %v7792_v5, %v17586_v24  ;;  %v8023_v26 = vsel %vm299_vm2, %v7946_v11, 0.0  ;;  %v17591_v11 = vld [vmem:[#allocation57_spill] sm:$0xff] }
 0x913   : > { %v8020_v28 = vadd.f32 %v8019_v45, %v8018_v59  ;;  %v8168_v15 = vadd.f32 %v8167_v36, %v8166_v61  ;;  %v8097_v35 = vmul.f32 %v15774_v56, %v7947_v20  ;;  %v8025_v55 = vsel %vm299_vm2, %v7947_v20, 0.0 }
 0x914   : > { %v8169_v18 = vsel %vm299_vm2, %v8094_v31, 0.0  ;;  %v8021_v9 = vsel %vm299_vm2, %v7945_v58, 0.0  ;;  %v8095_v14 = vmul.f32 %v7945_v58, %v7792_v5  ;;  %v8173_v17 = vsel %vm299_vm2, %v8096_v63, 0.0 }
 0x915   : > { %v8022_v27 = vadd.f32 %v8021_v9, %v8020_v28  ;;  %v8170_v38 = vadd.f32 %v8169_v18, %v8168_v15  ;;  %v8175_v43 = vsel %vm299_vm2, %v8097_v35, 0.0  ;;  %v17593_v35 = vld [vmem:[#allocation58_spill] sm:$0xff] }
 0x916   : > { %v8171_v42 = vsel %vm299_vm2, %v8095_v14, 0.0  ;;  %v15790_v8 = vpop.f32.mrb[32].mxu1 }
 0x917   : > { %v8024_v60 = vadd.f32 %v8023_v26, %v8022_v27  ;;  %v7805_v47 = vpop.f32.mrb[33].mxu1  ;;  %v8172_v49 = vadd.f32 %v8171_v42, %v8170_v38  ;;  %v7950_v4 = vmul.f32 %v15790_v8, %v17589_v1  ;;  %v17592_v27 = vld [vmem:[#allocation56_spill] sm:$0xff] }
 0x918   : > { %v7948_v37 = vmul.f32 %v7805_v47, %v17588_v0  ;;  %v10233_v57 = vpop.f32.mrb[34].mxu1 }
 0x919   : > { %v8026_v6 = vadd.f32 %v8025_v55, %v8024_v60  ;;  %v15798_v52 = vpop.f32.mrb[35].mxu1  ;;  %v8174_v30 = vadd.f32 %v8173_v17, %v8172_v49  ;;  %v7951_v59 = vmul.f32 %v10233_v57, %v17591_v11  ;;  %v8100_v24 = vmul.f32 %v15790_v8, %v7950_v4 }
 0x91a   : > { %v8027_v23 = vsel %vm299_vm2, %v7948_v37, 0.0  ;;  %v8098_v22 = vmul.f32 %v7948_v37, %v7805_v47  ;;  %v7949_v7 = vmul.f32 %v15798_v52, %v17590_v33  ;;  %v8031_v36 = vsel %vm299_vm2, %v7950_v4, 0.0 }
 0x91b   : > { %v8028_v12 = vadd.f32 %v8027_v23, %v8026_v6  ;;  %v8176_v5 = vadd.f32 %v8175_v43, %v8174_v30  ;;  %v8101_v15 = vmul.f32 %v10233_v57, %v7951_v59  ;;  %v8033_v14 = vsel %vm299_vm2, %v7951_v59, 0.0  ;;  %v17594_v57 = vld [vmem:[#allocation59_spill] sm:$0xff]  ;;  %v17595_v6 = vld [vmem:[#allocation65_spill] sm:$0xff] }
 0x91c   : > { %v8177_v61 = vsel %vm299_vm2, %v8098_v22, 0.0  ;;  %v8029_v45 = vsel %vm299_vm2, %v7949_v7, 0.0  ;;  %v8099_v31 = vmul.f32 %v7949_v7, %v15798_v52  ;;  %v8181_v42 = vsel %vm299_vm2, %v8100_v24, 0.0 }
 0x91d   : > { %v8030_v58 = vadd.f32 %v8029_v45, %v8028_v12  ;;  %v8178_v28 = vadd.f32 %v8177_v61, %v8176_v5  ;;  %v8183_v1 = vsel %vm299_vm2, %v8101_v15, 0.0 }
 0x91e   : > { %v8179_v34 = vsel %vm299_vm2, %v8099_v31, 0.0  ;;  %v10236_v20 = vpop.f32.mrb[36].mxu1 }
 0x91f   : > { %v8032_v18 = vadd.f32 %v8031_v36, %v8030_v58  ;;  %v15811_v9 = vpop.f32.mrb[37].mxu1  ;;  %v8180_v63 = vadd.f32 %v8179_v34, %v8178_v28  ;;  %v7954_v60 = vmul.f32 %v10236_v20, %v17593_v35  ;;  %v17596_v28 = vld [vmem:[#allocation64_spill] sm:$0xff] }
 0x920   : > { %v7952_v26 = vmul.f32 %v15811_v9, %v17592_v27  ;;  %v15816_v38 = vpop.f32.mrb[38].mxu1 }
 0x921   : > { %v8034_v47 = vadd.f32 %v8033_v14, %v8032_v18  ;;  %v15820_v55 = vpop.f32.mrb[39].mxu1  ;;  %v8182_v49 = vadd.f32 %v8181_v42, %v8180_v63  ;;  %v7955_v30 = vmul.f32 %v15816_v38, %v17595_v6  ;;  %v8104_v43 = vmul.f32 %v10236_v20, %v7954_v60  ;;  %v17597_v18 = vld [vmem:[#allocation94_spill] sm:$0xff] }
 0x922   : > { %v8035_v0 = vsel %vm299_vm2, %v7952_v26, 0.0  ;;  %v8102_v37 = vmul.f32 %v7952_v26, %v15811_v9  ;;  %v7953_v17 = vmul.f32 %v15820_v55, %v17594_v57  ;;  %v8039_v11 = vsel %vm299_vm2, %v7954_v60, 0.0  ;;  %v17598_v60 = vld [vmem:[#allocation68_spill] sm:$0xff] }
 0x923   : > { %v8036_v4 = vadd.f32 %v8035_v0, %v8034_v47  ;;  %v8184_v23 = vadd.f32 %v8183_v1, %v8182_v49  ;;  %v8105_v45 = vmul.f32 %v15816_v38, %v7955_v30  ;;  %v8041_v58 = vsel %vm299_vm2, %v7955_v30, 0.0 }
 0x924   : > { %v8185_v22 = vsel %vm299_vm2, %v8102_v37, 0.0  ;;  %v8037_v33 = vsel %vm299_vm2, %v7953_v17, 0.0  ;;  %v8103_v7 = vmul.f32 %v7953_v17, %v15820_v55  ;;  %v8189_v15 = vsel %vm299_vm2, %v8104_v43, 0.0  ;;  %v17599_v37 = vld [vmem:[#allocation96_spill] sm:$0xff] }
 0x925   : > { %v8038_v12 = vadd.f32 %v8037_v33, %v8036_v4  ;;  %v8186_v59 = vadd.f32 %v8185_v22, %v8184_v23  ;;  %v8191_v49 = vsel %vm299_vm2, %v8105_v45, 0.0 }
 0x926   : > { %v8187_v5 = vsel %vm299_vm2, %v8103_v7, 0.0  ;;  %v15834_v61 = vpop.f32.mrb[40].mxu1 }
 0x927   : > { %v8040_v31 = vadd.f32 %v8039_v11, %v8038_v12  ;;  %v15837_v24 = vpop.f32.mrb[41].mxu1  ;;  %v8188_v36 = vadd.f32 %v8187_v5, %v8186_v59  ;;  %v7958_v14 = vmul.f32 %v15834_v61, %v17597_v18 }
 0x928   : > { %v7956_v34 = vmul.f32 %v15837_v24, %v17596_v28  ;;  %v15842_v20 = vpop.f32.mrb[42].mxu1 }
 0x929   : > { %v8042_v63 = vadd.f32 %v8041_v58, %v8040_v31  ;;  %v7840_v27 = vpop.f32.mrb[43].mxu1  ;;  %v8190_v26 = vadd.f32 %v8189_v15, %v8188_v36  ;;  %v7959_v57 = vmul.f32 %v15842_v20, %v17599_v37  ;;  %v8108_v30 = vmul.f32 %v15834_v61, %v7958_v14  ;;  %v17600_v31 = vld [vmem:[#allocation102_spill] sm:$0xff] }
 0x92a   : > { %v8043_v42 = vsel %vm299_vm2, %v7956_v34, 0.0  ;;  %v8106_v35 = vmul.f32 %v7956_v34, %v15837_v24  ;;  %v7957_v47 = vmul.f32 %v7840_v27, %v17598_v60  ;;  %v8047_v22 = vsel %vm299_vm2, %v7958_v14, 0.0  ;;  %v17601_v34 = vld [vmem:[#allocation106_spill] sm:$0xff] }
 0x92b   : > { %v8044_v0 = vadd.f32 %v8043_v42, %v8042_v63  ;;  %v8192_v17 = vadd.f32 %v8191_v49, %v8190_v26  ;;  %v8109_v12 = vmul.f32 %v15842_v20, %v7959_v57  ;;  %v8049_v5 = vsel %vm299_vm2, %v7959_v57, 0.0  ;;  %v17602_v42 = vld [vmem:[#allocation101_spill] sm:$0xff]  ;;  %v17603_v49 = vld [vmem:[#allocation108_spill] sm:$0xff] }
 0x92c   : > { %v8193_v1 = vsel %vm299_vm2, %v8106_v35, 0.0  ;;  %v8045_v4 = vsel %vm299_vm2, %v7957_v47, 0.0  ;;  %v8107_v6 = vmul.f32 %v7957_v47, %v7840_v27  ;;  %v8197_v28 = vsel %vm299_vm2, %v8108_v30, 0.0 }
 0x92d   : > { %v8046_v23 = vadd.f32 %v8045_v4, %v8044_v0  ;;  %v8194_v33 = vadd.f32 %v8193_v1, %v8192_v17  ;;  %v8199_v60 = vsel %vm299_vm2, %v8109_v12, 0.0 }
 0x92e   : > { %v8195_v7 = vsel %vm299_vm2, %v8107_v6, 0.0  ;;  %v15858_v43 = vpop.f32.mrb[44].mxu1 }
 0x92f   : > { %v8048_v11 = vadd.f32 %v8047_v22, %v8046_v23  ;;  %v7853_v59 = vpop.f32.mrb[45].mxu1  ;;  %v8196_v45 = vadd.f32 %v8195_v7, %v8194_v33  ;;  %v7962_v15 = vmul.f32 %v15858_v43, %v17601_v34 }
 0x930   : > { %v7960_v58 = vmul.f32 %v7853_v59, %v17600_v31  ;;  %v10245_v36 = vpop.f32.mrb[46].mxu1 }
 0x931   : > { %v8050_v18 = vadd.f32 %v8049_v5, %v8048_v11  ;;  %v15866_v14 = vpop.f32.mrb[47].mxu1  ;;  %v8198_v63 = vadd.f32 %v8197_v28, %v8196_v45  ;;  %v7963_v0 = vmul.f32 %v10245_v36, %v17603_v49  ;;  %v8112_v4 = vmul.f32 %v15858_v43, %v7962_v15 }
 0x932   : > { %v8051_v27 = vsel %vm299_vm2, %v7960_v58, 0.0  ;;  %v8110_v26 = vmul.f32 %v7960_v58, %v7853_v59  ;;  %v7961_v35 = vmul.f32 %v15866_v14, %v17602_v42  ;;  %v8055_v30 = vsel %vm299_vm2, %v7962_v15, 0.0 }
 0x933   : > { %v8052_v47 = vadd.f32 %v8051_v27, %v8050_v18  ;;  %v8200_v37 = vadd.f32 %v8199_v60, %v8198_v63  ;;  %v8113_v33 = vmul.f32 %v10245_v36, %v7963_v0  ;;  %v8057_v12 = vsel %vm299_vm2, %v7963_v0, 0.0 }
 0x934   : > { %v8201_v57 = vsel %vm299_vm2, %v8110_v26, 0.0  ;;  %v8053_v17 = vsel %vm299_vm2, %v7961_v35, 0.0  ;;  %v8111_v1 = vmul.f32 %v7961_v35, %v15866_v14  ;;  %v8205_v59 = vsel %vm299_vm2, %v8112_v4, 0.0 }
 0x935   : > { %v8054_v6 = vadd.f32 %v8053_v17, %v8052_v47  ;;  %v8202_v23 = vadd.f32 %v8201_v57, %v8200_v37  ;;  %v8207_v31 = vsel %vm299_vm2, %v8113_v33, 0.0 }
 0x936   : > { %v8203_v22 = vsel %vm299_vm2, %v8111_v1, 0.0 }
 0x937   : > { %v8056_v7 = vadd.f32 %v8055_v30, %v8054_v6  ;;  %v8204_v11 = vadd.f32 %v8203_v22, %v8202_v23 }
 0x939   : > { %v8058_v5 = vadd.f32 %v8057_v12, %v8056_v7  ;;  %v8206_v45 = vadd.f32 %v8205_v59, %v8204_v11 }
 0x93b   : > { %v8059_v58 = vrot.slane %v8058_v5, 4  ;;  %v8208_v28 = vadd.f32 %v8207_v31, %v8206_v45 }
 0x93d   : > { %v8060_v34 = vadd.f32 %v8059_v58, %v8058_v5  ;;  %v8209_v18 = vrot.slane %v8208_v28, 4 }
 0x93f   : > { %v8061_v63 = vrot.slane %v8060_v34, 2  ;;  %v8210_v15 = vadd.f32 %v8209_v18, %v8208_v28  ;;  %v8284_v18 = vld [vmem:[%s11141_s25] sm:$0xff] }
 0x941   : > { %v8062_v27 = vadd.f32 %v8061_v63, %v8060_v34  ;;  %v8211_v26 = vrot.slane %v8210_v15, 2  ;;  %v8285_v63 = vld [vmem:[%s11141_s25 + $0x8] sm:$0xff] }
 0x943   : > { %v8063_v42 = vrot.slane %v8062_v27, 1  ;;  %v8212_v36 = vadd.f32 %v8211_v26, %v8210_v15  ;;  %v8286_v15 = vld [vmem:[%s11141_s25 + $0x10] sm:$0xff] }
 0x945   : > { %v8064_v35 = vadd.f32 %v8063_v42, %v8062_v27  ;;  %v8213_v60 = vrot.slane %v8212_v36, 1  ;;  %v8287_v27 = vld [vmem:[%s11141_s25 + $0x18] sm:$0xff] }
 0x947   : > { %v15882_v47 = vmul.f32 0.00390625, %v8064_v35  ;;  %v8214_v49 = vadd.f32 %v8213_v60, %v8212_v36  ;;  %v8288_v60 = vld [vmem:[%s11141_s25 + $0x20] sm:$0xff] }
 0x949   : > { %v8216_v0 = vmul.f32 %v15882_v47, %v15882_v47  ;;  %v8218_v37 = vsub.f32 %v15610_v53, %v15882_v47  ;;  %v8219_v57 = vsub.f32 %v15617_v39, %v15882_v47  ;;  %v8220_v17 = vsub.f32 %v15615_v29, %v15882_v47 }
 0x94a   : > { %v8215_v1 = vmul.f32 0.00390625, %v8214_v49  ;;  %v8221_v4 = vsub.f32 %v15633_v13, %v15882_v47  ;;  %v8222_v6 = vsub.f32 %v15631_v51, %v15882_v47  ;;  %v8223_v30 = vsub.f32 %v15639_v16, %v15882_v47  ;;  %v8290_v49 = vld [vmem:[%s11141_s25 + $0x30] sm:$0xff] }
 0x94b   : > { %v8224_v23 = vsub.f32 %v15662_v3, %v15882_v47  ;;  %v8225_v53 = vsub.f32 %v15653_v62, %v15882_v47  ;;  %v8226_v39 = vsub.f32 %v15675_v48, %v15882_v47  ;;  %v8227_v29 = vsub.f32 %v15684_v46, %v15882_v47 }
 0x94c   : > { %v8217_v22 = vsub.f32 %v8215_v1, %v8216_v0  ;;  %v8228_v13 = vsub.f32 %v15680_v44, %v15882_v47  ;;  %v8229_v51 = vsub.f32 %v15701_v41, %v15882_v47  ;;  %v8230_v16 = vsub.f32 %v15698_v25, %v15882_v47  ;;  %v8291_v0 = vld [vmem:[%s11141_s25 + $0x38] sm:$0xff] }
 0x94d   : > { %v8231_v3 = vsub.f32 %v15706_v54, %v15882_v47  ;;  %v8232_v62 = vsub.f32 %v15730_v21, %v15882_v47  ;;  %v8233_v48 = vsub.f32 %v15722_v10, %v15882_v47  ;;  %v8234_v46 = vsub.f32 %v15743_v19, %v15882_v47 }
 0x94e   : > { %v8235_v44 = vsub.f32 %v15752_v32, %v15882_v47  ;;  %v8236_v41 = vsub.f32 %v15748_v40, %v15882_v47  ;;  %v8237_v25 = vsub.f32 %v15769_v50, %v15882_v47  ;;  %v8238_v54 = vsub.f32 %v15766_v2, %v15882_v47 }
 0x94f   : > { %v8239_v21 = vsub.f32 %v15774_v56, %v15882_v47  ;;  %v8240_v10 = vsub.f32 %v15798_v52, %v15882_v47  ;;  %v8241_v19 = vsub.f32 %v15790_v8, %v15882_v47  ;;  %v8242_v32 = vsub.f32 %v15811_v9, %v15882_v47 }
 0x950   : > { %v8243_v40 = vsub.f32 %v15820_v55, %v15882_v47  ;;  %v8244_v50 = vsub.f32 %v15816_v38, %v15882_v47  ;;  %v8245_v2 = vsub.f32 %v15837_v24, %v15882_v47  ;;  %v8246_v56 = vsub.f32 %v15834_v61, %v15882_v47 }
 0x951   : > { %v8247_v52 = vsub.f32 %v15842_v20, %v15882_v47  ;;  %v8248_v8 = vsub.f32 %v15866_v14, %v15882_v47  ;;  %v8249_v9 = vsub.f32 %v15858_v43, %v15882_v47  ;;  %v8250_v33 = vadd.f32 1e-05, %v8217_v22  ;;  %v8289_v47 = vld [vmem:[%s11141_s25 + $0x28] sm:$0xff]  ;;  %v8295_v22 = vld [vmem:[%s11141_s25 + $0x58] sm:$0xff] }
 0x953   : > { %11046 = vrsqrt.f32 %v8250_v33 }
 0x95d   : > { %v11047_v55 = vpop.eup %11046 }
 0x95e   : > { %v8252_v7 = vmul.f32 %v11047_v55, %v8218_v37  ;;  %v8253_v38 = vmul.f32 %v11047_v55, %v8219_v57  ;;  %v8254_v24 = vmul.f32 %v11047_v55, %v8220_v17  ;;  %v8255_v12 = vmul.f32 %v11047_v55, %v8221_v4  ;;  %v8292_v4 = vld [vmem:[%s11141_s25 + $0x40] sm:$0xff] }
 0x95f   : > { %v8256_v61 = vmul.f32 %v11047_v55, %v8222_v6  ;;  %v8257_v11 = vmul.f32 %v11047_v55, %v8223_v30  ;;  %v8258_v20 = vmul.f32 %v11047_v55, %v8224_v23  ;;  %v8259_v59 = vmul.f32 %v11047_v55, %v8225_v53  ;;  %v8293_v6 = vld [vmem:[%s11141_s25 + $0x48] sm:$0xff]  ;;  %v8294_v30 = vld [vmem:[%s11141_s25 + $0x50] sm:$0xff] }
 0x960   : > { %v8260_v5 = vmul.f32 %v11047_v55, %v8226_v39  ;;  %v8261_v14 = vmul.f32 %v11047_v55, %v8227_v29  ;;  %v8262_v43 = vmul.f32 %v11047_v55, %v8228_v13  ;;  %v8263_v45 = vmul.f32 %v11047_v55, %v8229_v51  ;;  %v8296_v13 = vld [vmem:[%s11141_s25 + $0x60] sm:$0xff]  ;;  %v8297_v51 = vld [vmem:[%s11141_s25 + $0x68] sm:$0xff] }
 0x961   : > { %v15950_v31 = vmul.f32 %v11047_v55, %v8230_v16  ;;  %v15952_v58 = vmul.f32 %v11047_v55, %v8231_v3  ;;  %v15954_v28 = vmul.f32 %v11047_v55, %v8232_v62  ;;  %v15956_v34 = vmul.f32 %v11047_v55, %v8233_v48 }
 0x962   : > { %v15962_v26 = vmul.f32 %v11047_v55, %v8234_v46  ;;  %v15964_v42 = vmul.f32 %v11047_v55, %v8235_v44  ;;  %v15966_v36 = vmul.f32 %v11047_v55, %v8236_v41  ;;  %v15968_v35 = vmul.f32 %v11047_v55, %v8237_v25  ;;  %v8298_v46 = vld [vmem:[%s11141_s25 + $0x70] sm:$0xff]  ;;  %v8299_v44 = vld [vmem:[%s11141_s25 + $0x78] sm:$0xff]  ;;  %v8300_v41 = vld [vmem:[%s11141_s25 + $0x80] sm:$0xff] }
 0x963   : > { %v15974_v37 = vmul.f32 %v11047_v55, %v8238_v54  ;;  %v15976_v57 = vmul.f32 %v11047_v55, %v8239_v21  ;;  %v15978_v17 = vmul.f32 %v11047_v55, %v8240_v10  ;;  %v15980_v1 = vmul.f32 %v11047_v55, %v8241_v19  ;;  %v8301_v25 = vld [vmem:[%s11141_s25 + $0x88] sm:$0xff]  ;;  %v8302_v54 = vld [vmem:[%s11141_s25 + $0x90] sm:$0xff]  ;;  %v8303_v21 = vld [vmem:[%s11141_s25 + $0x98] sm:$0xff] }
 0x964   : > { %v15985_v23 = vmul.f32 %v11047_v55, %v8242_v32  ;;  %v15987_v53 = vmul.f32 %v11047_v55, %v8243_v40  ;;  %v15989_v39 = vmul.f32 %v11047_v55, %v8244_v50  ;;  %v15991_v29 = vmul.f32 %v11047_v55, %v8245_v2  ;;  %v8304_v50 = vld [vmem:[%s11141_s25 + $0xa0] sm:$0xff]  ;;  %v8305_v2 = vld [vmem:[%s11141_s25 + $0xa8] sm:$0xff] }
 0x965   : > { %v16003_v16 = vmul.f32 %v11047_v55, %v8246_v56  ;;  %v16005_v3 = vmul.f32 %v11047_v55, %v8247_v52  ;;  %v16007_v62 = vmul.f32 %v11047_v55, %v8248_v8  ;;  %v16009_v48 = vmul.f32 %v11047_v55, %v8249_v9  ;;  %v8306_v56 = vld [vmem:[%s11141_s25 + $0xb0] sm:$0xff]  ;;  %v8307_v55 = vld [vmem:[%s11141_s25 + $0xb8] sm:$0xff] }
 0x966   : > { %v8316_v10 = vadd.f32 %v8284_v18, %v8252_v7  ;;  %v8317_v19 = vadd.f32 %v8285_v63, %v8253_v38  ;;  %v8318_v32 = vadd.f32 %v8286_v15, %v8254_v24  ;;  %v8319_v40 = vadd.f32 %v8287_v27, %v8255_v12  ;;  %v8309_v7 = vld [vmem:[%s11141_s25 + $0xc8] sm:$0xff] }
 0x967   : > { %17604 = vst [vmem:[#allocation137_spill] sm:$0xff] %v16009_v48  ;;  %v8320_v52 = vadd.f32 %v8288_v60, %v8256_v61  ;;  %v8321_v8 = vadd.f32 %v8289_v47, %v8257_v11  ;;  %v8322_v9 = vadd.f32 %v8290_v49, %v8258_v20  ;;  %v8323_v33 = vadd.f32 %v8291_v0, %v8259_v59  ;;  %v8308_v48 = vld [vmem:[%s11141_s25 + $0xc0] sm:$0xff]  ;;  %v8310_v61 = vld [vmem:[%s11141_s25 + $0xd0] sm:$0xff]  ;;  %v8311_v11 = vld [vmem:[%s11141_s25 + $0xd8] sm:$0xff] }
 0x968   : > { %v8324_v38 = vadd.f32 %v8292_v4, %v8260_v5  ;;  %v8325_v24 = vadd.f32 %v8293_v6, %v8261_v14  ;;  %v8326_v12 = vadd.f32 %v8294_v30, %v8262_v43  ;;  %v8327_v18 = vadd.f32 %v8295_v22, %v8263_v45  ;;  %8348 = vst.msk [vmem:[%s16001_s23] sm:$0xff] %vm299_vm2, %v8316_v10  ;;  %v8312_v20 = vld [vmem:[%s11141_s25 + $0xe0] sm:$0xff]  ;;  %v8313_v45 = vld [vmem:[%s11141_s25 + $0xe8] sm:$0xff] }
 0x969   : > { %8349 = vst.msk [vmem:[%s16001_s23 + $0x8] sm:$0xff] %vm299_vm2, %v8317_v19  ;;  %8350 = vst.msk [vmem:[%s16001_s23 + $0x10] sm:$0xff] %vm299_vm2, %v8318_v32  ;;  %v8328_v59 = vadd.f32 %v8296_v13, %v15950_v31  ;;  %v8329_v5 = vadd.f32 %v8297_v51, %v15952_v58  ;;  %v8330_v14 = vadd.f32 %v8298_v46, %v15954_v28  ;;  %v8314_v31 = vld [vmem:[%s11141_s25 + $0xf0] sm:$0xff]  ;;  %v8315_v58 = vld [vmem:[%s11141_s25 + $0xf8] sm:$0xff] }
 0x96a   : > { %8351 = vst.msk [vmem:[%s16001_s23 + $0x18] sm:$0xff] %vm299_vm2, %v8319_v40  ;;  %v8331_v43 = vadd.f32 %v8299_v44, %v15956_v34  ;;  %8352 = vst.msk [vmem:[%s16001_s23 + $0x20] sm:$0xff] %vm299_vm2, %v8320_v52  ;;  %v8332_v28 = vadd.f32 %v8300_v41, %v15962_v26  ;;  %v8333_v63 = vadd.f32 %v8301_v25, %v15964_v42 }
 0x96b   : > { %8353 = vst.msk [vmem:[%s16001_s23 + $0x28] sm:$0xff] %vm299_vm2, %v8321_v8  ;;  %8354 = vst.msk [vmem:[%s16001_s23 + $0x30] sm:$0xff] %vm299_vm2, %v8322_v9  ;;  %v8334_v34 = vadd.f32 %v8302_v54, %v15966_v36  ;;  %v8335_v15 = vadd.f32 %v8303_v21, %v15968_v35  ;;  %v8336_v27 = vadd.f32 %v8304_v50, %v15974_v37 }
 0x96c   : > { %8355 = vst.msk [vmem:[%s16001_s23 + $0x38] sm:$0xff] %vm299_vm2, %v8323_v33  ;;  %8356 = vst.msk [vmem:[%s16001_s23 + $0x40] sm:$0xff] %vm299_vm2, %v8324_v38  ;;  %v8337_v26 = vadd.f32 %v8305_v2, %v15976_v57  ;;  %v8338_v42 = vadd.f32 %v8306_v56, %v15978_v17  ;;  %v8339_v36 = vadd.f32 %v8307_v55, %v15980_v1 }
 0x96d   : > { %8357 = vst.msk [vmem:[%s16001_s23 + $0x48] sm:$0xff] %vm299_vm2, %v8325_v24  ;;  %8358 = vst.msk [vmem:[%s16001_s23 + $0x50] sm:$0xff] %vm299_vm2, %v8326_v12  ;;  %v8340_v35 = vadd.f32 %v8308_v48, %v15985_v23  ;;  %v8341_v60 = vadd.f32 %v8309_v7, %v15987_v53  ;;  %v8342_v47 = vadd.f32 %v8310_v61, %v15989_v39 }
 0x96e   : > { %8359 = vst.msk [vmem:[%s16001_s23 + $0x58] sm:$0xff] %vm299_vm2, %v8327_v18  ;;  %8360 = vst.msk [vmem:[%s16001_s23 + $0x60] sm:$0xff] %vm299_vm2, %v8328_v59  ;;  %v8343_v49 = vadd.f32 %v8311_v11, %v15991_v29  ;;  %v8344_v0 = vadd.f32 %v8312_v20, %v16003_v16  ;;  %v8345_v37 = vadd.f32 %v8313_v45, %v16005_v3  ;;  %v17605_v17 = vld [vmem:[#allocation137_spill] sm:$0xff] }
 0x96f   : > { %8361 = vst.msk [vmem:[%s16001_s23 + $0x68] sm:$0xff] %vm299_vm2, %v8329_v5  ;;  %8362 = vst.msk [vmem:[%s16001_s23 + $0x70] sm:$0xff] %vm299_vm2, %v8330_v14  ;;  %v8346_v57 = vadd.f32 %v8314_v31, %v16007_v62  ;;  %v8347_v1 = vadd.f32 %v8315_v58, %v17605_v17 }
 0x970   : > { %8363 = vst.msk [vmem:[%s16001_s23 + $0x78] sm:$0xff] %vm299_vm2, %v8331_v43  ;;  %8364 = vst.msk [vmem:[%s16001_s23 + $0x80] sm:$0xff] %vm299_vm2, %v8332_v28 }
 0x971   : > { %8365 = vst.msk [vmem:[%s16001_s23 + $0x88] sm:$0xff] %vm299_vm2, %v8333_v63  ;;  %8366 = vst.msk [vmem:[%s16001_s23 + $0x90] sm:$0xff] %vm299_vm2, %v8334_v34 }
 0x972   : > { %8367 = vst.msk [vmem:[%s16001_s23 + $0x98] sm:$0xff] %vm299_vm2, %v8335_v15  ;;  %8368 = vst.msk [vmem:[%s16001_s23 + $0xa0] sm:$0xff] %vm299_vm2, %v8336_v27 }
 0x973   : > { %8369 = vst.msk [vmem:[%s16001_s23 + $0xa8] sm:$0xff] %vm299_vm2, %v8337_v26  ;;  %8370 = vst.msk [vmem:[%s16001_s23 + $0xb0] sm:$0xff] %vm299_vm2, %v8338_v42 }
 0x974   : > { %8371 = vst.msk [vmem:[%s16001_s23 + $0xb8] sm:$0xff] %vm299_vm2, %v8339_v36  ;;  %8372 = vst.msk [vmem:[%s16001_s23 + $0xc0] sm:$0xff] %vm299_vm2, %v8340_v35 }
 0x975   : > { %8373 = vst.msk [vmem:[%s16001_s23 + $0xc8] sm:$0xff] %vm299_vm2, %v8341_v60  ;;  %8374 = vst.msk [vmem:[%s16001_s23 + $0xd0] sm:$0xff] %vm299_vm2, %v8342_v47 }
 0x976   : > { %8375 = vst.msk [vmem:[%s16001_s23 + $0xd8] sm:$0xff] %vm299_vm2, %v8343_v49  ;;  %8376 = vst.msk [vmem:[%s16001_s23 + $0xe0] sm:$0xff] %vm299_vm2, %v8344_v0 }
 0x977   : > { %8377 = vst.msk [vmem:[%s16001_s23 + $0xe8] sm:$0xff] %vm299_vm2, %v8345_v37  ;;  %8378 = vst.msk [vmem:[%s16001_s23 + $0xf0] sm:$0xff] %vm299_vm2, %v8346_v57 }
 0x978   : > { %8379 = vst.msk [vmem:[%s16001_s23 + $0xf8] sm:$0xff] %vm299_vm2, %v8347_v1 }
 0x979 PF: > { %s14_s15 = sadd.s32 1, %s11056_s15  }
 0x97a   : > { %p11_p4 = scmp.ge.s32.totalorder %s14_s15, 4  }
 0x97c   :  { %13 = sbr.rel (!%p11_p4) target bundleno = 1 (0x1), region = 86 }

</bundles_post_ra>
